<compile_context>
chip_gen: v7x
topology: tpu7x:2x2x1
jax: 0.10.0
libtpu: 0.0.40
codegen_flags: <defaults>
</compile_context>

<pallas_src>
import functools

import jax
import jax.numpy as jnp
from jax.experimental import pallas as pl
from jax.experimental.pallas import tpu as pltpu

BN_EPS = 1e-5


# ---------------------------------------------------------------------------
# Fused kernel: encoder (3x [3x3 conv + BN + ReLU + 2x2 maxpool]) + Classifier
# ---------------------------------------------------------------------------
def fused_forward_kernel(
        # --- inputs ---
        xcols_ref,                        # (N*H*W, 9*Cin)   bf16 (conv1 im2col)
        w1_ref,                           # (9*Cin, C1)      bf16
        w2_ref,                           # (9*C1, C2)       bf16
        w3_hbm, wc_hbm, whp_hbm, wp2_hbm,  # late-stage weights, left in HBM
        vec_ref,                          # (12, VW) f32: packed scales/biases
        # --- outputs ---
        y_ref, yp_ref,                    # (N, NC) f32 x2
        # --- scratch ---
        w3_buf, wc_buf, whp_buf, wp2_buf, dma_sem,
        pad2_ref, cols2_ref, pad3_ref, cols3_ref,
        *, N, H, W, C1, C2, C3, MLP, NCLS):
    f32 = jnp.float32
    bf16 = jnp.bfloat16

    # ---- kick off late-stage weight DMAs; they hide behind conv1/conv2 ----
    w3_cp = pltpu.make_async_copy(w3_hbm, w3_buf, dma_sem.at[0]); w3_cp.start()
    wc_cp = pltpu.make_async_copy(wc_hbm, wc_buf, dma_sem.at[1]); wc_cp.start()
    whp_cp = pltpu.make_async_copy(whp_hbm, whp_buf, dma_sem.at[2]); whp_cp.start()
    wp2_cp = pltpu.make_async_copy(wp2_hbm, wp2_buf, dma_sem.at[3]); wp2_cp.start()

    H2, W2 = H // 2, W // 2
    H3, W3 = H2 // 2, W2 // 2
    H4, W4 = H3 // 2, W3 // 2

    def vrow(r, c):                       # static slice of the packed vectors
        return vec_ref[r:r + 1, 0:c]

    def bn_relu(acc, s, b):               # folded eval-mode BN + ReLU (f32)
        return jnp.maximum(acc * s + b, 0.0)

    def pool2x2(y, n, h, w, c):
        # 2x2 / stride-2 max-pool; C stays the dense lane dim, both steps are
        # plain VPU maxima of statically indexed views.
        y = y.reshape(n * h * (w // 2), 2, c)
        y = jnp.maximum(y[:, 0, :], y[:, 1, :])
        y = y.reshape(n, h // 2, 2, w // 2, c)
        return jnp.maximum(y[:, :, 0], y[:, :, 1])

    def pad_store(pad_ref, x_bf16, n, h, w, c):
        # zero ONLY the 1-pixel halo, store the interior once (bf16)
        zrow = jnp.zeros((n, 1, w + 2, c), bf16)
        zcol = jnp.zeros((n, h + 2, 1, c), bf16)
        pad_ref[:, 0:1, :, :] = zrow
        pad_ref[:, h + 1:h + 2, :, :] = zrow
        pad_ref[:, :, 0:1, :] = zcol
        pad_ref[:, :, w + 1:w + 2, :] = zcol
        pad_ref[:, 1:h + 1, 1:w + 1, :] = x_bf16

    def im2col(pad_ref, cols_ref, h, w, c):
        # 9 static-slice copies: tap t=(kh*3+kw) -> lane band [t*c:(t+1)*c]
        for kh in range(3):
            for kw in range(3):
                t = kh * 3 + kw
                cols_ref[:, :, :, t * c:(t + 1) * c] = \
                    pad_ref[:, kh:kh + h, kw:kw + w, :]

    # ---- encoder block 1: ONE K=9*Cin matmul (im2col done in wrapper) ----
    a1 = jnp.dot(xcols_ref[...], w1_ref[...], preferred_element_type=f32)
    p1 = pool2x2(bn_relu(a1, vrow(0, C1), vrow(1, C1)), N, H, W, C1)

    # ---- encoder block 2: in-kernel bf16 im2col + ONE K=9*C1 matmul ----
    pad_store(pad2_ref, p1.astype(bf16), N, H2, W2, C1)
    im2col(pad2_ref, cols2_ref, H2, W2, C1)
    a2 = jnp.dot(cols2_ref[...].reshape(N * H2 * W2, 9 * C1), w2_ref[...],
                 preferred_element_type=f32)
    p2 = pool2x2(bn_relu(a2, vrow(2, C2), vrow(3, C2)), N, H2, W2, C2)

    # ---- encoder block 3: same, ONE K=9*C2 matmul ----
    pad_store(pad3_ref, p2.astype(bf16), N, H3, W3, C2)
    im2col(pad3_ref, cols3_ref, H3, W3, C2)
    w3_cp.wait()                                   # w3 needed only from here
    a3 = jnp.dot(cols3_ref[...].reshape(N * H3 * W3, 9 * C2), w3_buf[...],
                 preferred_element_type=f32)
    p3 = pool2x2(bn_relu(a3, vrow(4, C3), vrow(5, C3)), N, H3, W3, C3)

    # ---- Classifier: 1x1 conv + folded BN + ReLU + global average pool ----
    wc_cp.wait()
    feat = p3.reshape(N * H4 * W4, C3).astype(bf16)
    x1 = jnp.dot(feat, wc_buf[...], preferred_element_type=f32)
    x1 = jnp.maximum(x1 * vrow(6, C3) + vrow(7, C3), 0.0)
    pooled = jnp.mean(x1.reshape(N, H4 * W4, C3), axis=1)        # (N, C3)

    # ---- heads: merged [pseudo-Lin1 | head] matmul from `pooled`, split ----
    whp_cp.wait()
    z = jnp.dot(pooled.astype(bf16), whp_buf[...],
                preferred_element_type=f32) + vrow(10, MLP + NCLS)
    y_ref[...] = z[:, MLP:MLP + NCLS]                            # head
    h = jnp.maximum(z[:, 0:MLP], 0.0) * vrow(8, MLP) + vrow(9, MLP)  # ReLU->BN1d
    wp2_cp.wait()
    yp_ref[...] = jnp.dot(h.astype(bf16), wp2_buf[...],
                          preferred_element_type=f32) + vrow(11, NCLS)


# ---------------------------------------------------------------------------
# Wrapper
# ---------------------------------------------------------------------------
_VMEM = pl.BlockSpec(memory_space=pltpu.MemorySpace.VMEM)
_ANY = pl.BlockSpec(memory_space=pl.ANY)


def _im2col_3x3(x):
    """'same'-padded 3x3 im2col: (N,H,W,C) -> (N*H*W, 9*C), taps ordered (kh,kw,c)."""
    N, H, W, C = x.shape
    xp = jnp.pad(x, ((0, 0), (1, 1), (1, 1), (0, 0)))
    cols = [xp[:, kh:kh + H, kw:kw + W, :] for kh in range(3) for kw in range(3)]
    return jnp.concatenate(cols, axis=-1).reshape(N * H * W, 9 * C)


def network_forward(x, params, n_classes):
    """Whole forward (encoder + Classifier) as a single fused pallas_call."""
    N, H, W, Cin = x.shape
    (w1, s1, b1), (w2, s2, b2), (w3, s3, b3) = params['enc']
    wc, sc, bc = params['cls_conv']
    wh, bh = params['head']
    wp1, bp1 = params['p1']
    sp, bp = params['pbn']
    wp2, bp2 = params['p2']

    C1, C2, C3 = w1.shape[-1], w2.shape[-1], w3.shape[-1]
    MLP = wp1.shape[-1]
    H2, W2, H3, W3 = H // 2, W // 2, H // 4, W // 4

    # conv1 (Cin=4): one K=9*Cin matmul; the im2col (incl. zero pad) is a tiny
    # XLA gather on the ~4 KB input that fuses into the same jit executable.
    x_cols = _im2col_3x3(x).astype(jnp.bfloat16)
    # all conv weights pre-reshaped to (9*Cin, Cout), matching (kh,kw,c) order
    w1f = w1.reshape(9 * Cin, C1)
    w2f = w2.reshape(9 * C1, C2)
    w3f = w3.reshape(9 * C2, C3)

    # merge pseudo_head first linear + head into one lane-dense matmul
    whp = jnp.concatenate([wp1, wh], axis=1)            # (C3, MLP + n_classes)
    bhp = jnp.concatenate([bp1, bh], axis=0)

    # pack ALL per-channel scale/bias vectors into one (12, VW) f32 array
    VW = ((MLP + n_classes + 127) // 128) * 128
    def vrow(v):
        v = v.astype(jnp.float32).reshape(-1)
        return jnp.pad(v, (0, VW - v.shape[0]))
    vec = jnp.stack([vrow(s1), vrow(b1), vrow(s2), vrow(b2), vrow(s3), vrow(b3),
                     vrow(sc), vrow(bc), vrow(sp), vrow(bp), vrow(bhp), vrow(bp2)])

    kernel = functools.partial(fused_forward_kernel, N=N, H=H, W=W,
                               C1=C1, C2=C2, C3=C3, MLP=MLP, NCLS=n_classes)
    return pl.pallas_call(
        kernel,
        out_shape=(jax.ShapeDtypeStruct((N, n_classes), jnp.float32),
                   jax.ShapeDtypeStruct((N, n_classes), jnp.float32)),
        in_specs=[_VMEM, _VMEM, _VMEM,          # x_cols, w1f, w2f
                  _ANY, _ANY, _ANY, _ANY,        # w3f, wc, whp, wp2 (manual DMA)
                  _VMEM],                        # packed scale/bias vectors
        out_specs=(_VMEM, _VMEM),
        scratch_shapes=[
            pltpu.VMEM((9 * C2, C3), jnp.bfloat16),             # w3 buffer
            pltpu.VMEM((C3, C3), jnp.bfloat16),                 # wc buffer
            pltpu.VMEM((C3, MLP + n_classes), jnp.bfloat16),    # whp buffer
            pltpu.VMEM((MLP, n_classes), jnp.bfloat16),         # wp2 buffer
            pltpu.SemaphoreType.DMA((4,)),
            pltpu.VMEM((N, H2 + 2, W2 + 2, C1), jnp.bfloat16),  # pad2
            pltpu.VMEM((N, H2, W2, 9 * C1), jnp.bfloat16),      # im2col cols2
            pltpu.VMEM((N, H3 + 2, W3 + 2, C2), jnp.bfloat16),  # pad3
            pltpu.VMEM((N, H3, W3, 9 * C2), jnp.bfloat16),      # im2col cols3
        ],
        # ~1.6 MB total footprint; 32 MiB leaves headroom on v5e/v6e/v7x.
        compiler_params=pltpu.CompilerParams(vmem_limit_bytes=32 * 1024 * 1024),
        # grid=() -> single TensorCore.  At this size a grid only adds per-step
        # overhead and would duplicate weight DMA per core on v7x.
    )(x_cols, w1f, w2f, w3f, wc, whp, wp2, vec)


# ---------------------------------------------------------------------------
# Deterministic parameter init (synthetic).  Matmul weights stored in bf16
# (halves weight DMA); BN-folded scales/biases and linear biases stay f32.
# ---------------------------------------------------------------------------
def init_params(key, bands, n_classes, feature_dim):
    dim1 = 64
    keys = iter(jax.random.split(key, 32))

    def bn_affine(c):
        gamma = 1.0 + 0.1 * jax.random.normal(next(keys), (c,), jnp.float32)
        beta = 0.1 * jax.random.normal(next(keys), (c,), jnp.float32)
        mean = jnp.zeros((c,), jnp.float32)
        var = jnp.ones((c,), jnp.float32)
        return gamma, beta, mean, var

    def fold_bn(gamma, beta, mean, var, conv_bias):
        scale = gamma / jnp.sqrt(var + BN_EPS)
        bias = beta - scale * mean + scale * conv_bias
        return scale, bias

    def linear(cin, cout):
        w = (jax.random.normal(next(keys), (cin, cout), jnp.float32)
             / jnp.sqrt(float(cin))).astype(jnp.bfloat16)
        b = 0.1 * jax.random.normal(next(keys), (cout,), jnp.float32)
        return w, b

    params = {}
    enc = []
    for cin, cout in [(bands, dim1), (dim1, dim1 * 2), (dim1 * 2, dim1 * 4)]:
        w = (jax.random.normal(next(keys), (3, 3, cin, cout), jnp.float32)
             / jnp.sqrt(9.0 * cin)).astype(jnp.bfloat16)
        cb = 0.1 * jax.random.normal(next(keys), (cout,), jnp.float32)
        g, b, m, v = bn_affine(cout)
        s, bias = fold_bn(g, b, m, v, cb)
        enc.append((w, s, bias))
    params['enc'] = enc

    wc = (jax.random.normal(next(keys), (feature_dim, feature_dim), jnp.float32)
          / jnp.sqrt(float(feature_dim))).astype(jnp.bfloat16)
    cb = 0.1 * jax.random.normal(next(keys), (feature_dim,), jnp.float32)
    g, b, m, v = bn_affine(feature_dim)
    sc, bc = fold_bn(g, b, m, v, cb)
    params['cls_conv'] = (wc, sc, bc)

    params['head'] = linear(feature_dim, n_classes)
    mlp = 2 * feature_dim
    params['p1'] = linear(feature_dim, mlp)
    g, b, m, v = bn_affine(mlp)
    params['pbn'] = fold_bn(g, b, m, v, jnp.zeros((mlp,), jnp.float32))
    params['p2'] = linear(mlp, n_classes)
    return params


# ---------------------------------------------------------------------------
# Pure-JAX reference (f32, HIGHEST precision; weights upcast from bf16)
# ---------------------------------------------------------------------------
def reference_forward(x, params):
    hp = jax.lax.Precision.HIGHEST
    f32 = jnp.float32

    def block(x, w, scale, bias):
        N, H, W, _ = x.shape
        Cout = w.shape[-1]
        w = w.astype(f32)
        xp = jnp.pad(x, ((0, 0), (1, 1), (1, 1), (0, 0)))
        acc = jnp.zeros((N, H, W, Cout), f32)
        for kh in range(3):
            for kw in range(3):
                acc = acc + jnp.einsum('nhwc,cd->nhwd',
                                       xp[:, kh:kh + H, kw:kw + W, :], w[kh, kw],
                                       precision=hp)
        y = jnp.maximum(acc * scale + bias, 0.0)
        return y.reshape(N, H // 2, 2, W // 2, 2, Cout).max(axis=(2, 4))

    f = x
    for (w, s, b) in params['enc']:
        f = block(f, w, s, b)

    wc, sc, bc = params['cls_conv']
    x1 = jnp.maximum(jnp.einsum('nhwc,cd->nhwd', f, wc.astype(f32),
                                precision=hp) * sc + bc, 0.0)
    pooled = jnp.mean(x1, axis=(1, 2))

    wh, bh = params['head']
    y = jnp.dot(pooled, wh.astype(f32), precision=hp) + bh

    wp1, bp1 = params['p1']
    sp, bp = params['pbn']
    wp2, bp2 = params['p2']
    h = jnp.maximum(jnp.dot(pooled, wp1.astype(f32), precision=hp) + bp1, 0.0) * sp + bp
    yp = jnp.dot(h, wp2.astype(f32), precision=hp) + bp2
    return y, yp


# ---------------------------------------------------------------------------
if __name__ == "__main__":
    bands, n_classes, feature_dim = 4, 10, 256
    N, S = 2, 16                                    # batch=2, spatial=16x16

    key = jax.random.PRNGKey(0)
    kx, kp = jax.random.split(key)
    x = jax.random.normal(kx, (N, S, S, bands), jnp.float32)   # NHWC input
    params = init_params(kp, bands, n_classes, feature_dim)

    fwd = jax.jit(network_forward, static_argnames="n_classes")
    y, y_pseudo = fwd(x, params, n_classes=n_classes)
    jax.block_until_ready((y, y_pseudo))

    y_ref, yp_ref = reference_forward(x, params)
    assert y.shape == (N, n_classes) and y_pseudo.shape == (N, n_classes)
    # Tolerance 5e-2: kernel uses bf16 activations on the MXU (f32 accumulate);
    # reference is f32 HIGHEST with the same bf16 weights.
    assert jnp.allclose(y, y_ref, atol=5e-2, rtol=5e-2), "head mismatch"
    assert jnp.allclose(y_pseudo, yp_ref, atol=5e-2, rtol=5e-2), "pseudo head mismatch"

    print("KERNEL_OK")
</pallas_src>

<mosaic_0001>
module attributes {stable_mosaic.version = 11 : i64} {
  func.func @fused_forward_kernel(%arg0: memref<512x36xbf16, #tpu.memory_space<vmem>>, %arg1: memref<36x64xbf16, #tpu.memory_space<vmem>>, %arg2: memref<576x128xbf16, #tpu.memory_space<vmem>>, %arg3: memref<1152x256xbf16, #tpu.memory_space<any>>, %arg4: memref<256x256xbf16, #tpu.memory_space<any>>, %arg5: memref<256x522xbf16, #tpu.memory_space<any>>, %arg6: memref<512x10xbf16, #tpu.memory_space<any>>, %arg7: memref<12x640xf32, #tpu.memory_space<vmem>>, %arg8: memref<2x10xf32, #tpu.memory_space<vmem>>, %arg9: memref<2x10xf32, #tpu.memory_space<vmem>>, %arg10: memref<1152x256xbf16, #tpu.memory_space<vmem>>, %arg11: memref<256x256xbf16, #tpu.memory_space<vmem>>, %arg12: memref<256x522xbf16, #tpu.memory_space<vmem>>, %arg13: memref<512x10xbf16, #tpu.memory_space<vmem>>, %arg14: memref<4x!tpu.dma_semaphore, #tpu.memory_space<semaphore_mem>>, %arg15: memref<2x10x10x64xbf16, #tpu.memory_space<vmem>>, %arg16: memref<2x8x8x576xbf16, #tpu.memory_space<vmem>>, %arg17: memref<2x6x6x128xbf16, #tpu.memory_space<vmem>>, %arg18: memref<2x4x4x1152xbf16, #tpu.memory_space<vmem>>) attributes {dimension_semantics = [], scalar_prefetch = 0 : i64, scratch_operands = 9 : i64, tpu.core_type = #tpu.core_type<tc>} {
    %c0_i32 = arith.constant 0 : i32
    %0 = tpu.memref_slice %arg14[%c0_i32] : memref<4x!tpu.dma_semaphore, #tpu.memory_space<semaphore_mem>> -> memref<1x!tpu.dma_semaphore, #tpu.memory_space<semaphore_mem>>
    %1 = tpu.memref_squeeze %0 : memref<1x!tpu.dma_semaphore, #tpu.memory_space<semaphore_mem>> -> memref<!tpu.dma_semaphore, #tpu.memory_space<semaphore_mem>>
    tpu.enqueue_dma source(%arg3 : memref<1152x256xbf16, #tpu.memory_space<any>>) target(%arg10 : memref<1152x256xbf16, #tpu.memory_space<vmem>>) target_semaphore(%1 : memref<!tpu.dma_semaphore, #tpu.memory_space<semaphore_mem>>)
    %c1_i32 = arith.constant 1 : i32
    %2 = tpu.memref_slice %arg14[%c1_i32] : memref<4x!tpu.dma_semaphore, #tpu.memory_space<semaphore_mem>> -> memref<1x!tpu.dma_semaphore, #tpu.memory_space<semaphore_mem>>
    %3 = tpu.memref_squeeze %2 : memref<1x!tpu.dma_semaphore, #tpu.memory_space<semaphore_mem>> -> memref<!tpu.dma_semaphore, #tpu.memory_space<semaphore_mem>>
    tpu.enqueue_dma source(%arg4 : memref<256x256xbf16, #tpu.memory_space<any>>) target(%arg11 : memref<256x256xbf16, #tpu.memory_space<vmem>>) target_semaphore(%3 : memref<!tpu.dma_semaphore, #tpu.memory_space<semaphore_mem>>)
    %c2_i32 = arith.constant 2 : i32
    %4 = tpu.memref_slice %arg14[%c2_i32] : memref<4x!tpu.dma_semaphore, #tpu.memory_space<semaphore_mem>> -> memref<1x!tpu.dma_semaphore, #tpu.memory_space<semaphore_mem>>
    %5 = tpu.memref_squeeze %4 : memref<1x!tpu.dma_semaphore, #tpu.memory_space<semaphore_mem>> -> memref<!tpu.dma_semaphore, #tpu.memory_space<semaphore_mem>>
    tpu.enqueue_dma source(%arg5 : memref<256x522xbf16, #tpu.memory_space<any>>) target(%arg12 : memref<256x522xbf16, #tpu.memory_space<vmem>>) target_semaphore(%5 : memref<!tpu.dma_semaphore, #tpu.memory_space<semaphore_mem>>)
    %c3_i32 = arith.constant 3 : i32
    %6 = tpu.memref_slice %arg14[%c3_i32] : memref<4x!tpu.dma_semaphore, #tpu.memory_space<semaphore_mem>> -> memref<1x!tpu.dma_semaphore, #tpu.memory_space<semaphore_mem>>
    %7 = tpu.memref_squeeze %6 : memref<1x!tpu.dma_semaphore, #tpu.memory_space<semaphore_mem>> -> memref<!tpu.dma_semaphore, #tpu.memory_space<semaphore_mem>>
    tpu.enqueue_dma source(%arg6 : memref<512x10xbf16, #tpu.memory_space<any>>) target(%arg13 : memref<512x10xbf16, #tpu.memory_space<vmem>>) target_semaphore(%7 : memref<!tpu.dma_semaphore, #tpu.memory_space<semaphore_mem>>)
    %c0 = arith.constant 0 : index
    %c0_0 = arith.constant 0 : index
    %8 = vector.load %arg0[%c0, %c0_0] : memref<512x36xbf16, #tpu.memory_space<vmem>>, vector<512x36xbf16>
    %c0_1 = arith.constant 0 : index
    %c0_2 = arith.constant 0 : index
    %9 = vector.load %arg1[%c0_1, %c0_2] : memref<36x64xbf16, #tpu.memory_space<vmem>>, vector<36x64xbf16>
    %cst = arith.constant dense<0.000000e+00> : vector<512x64xf32>
    %10 = tpu.matmul %8, %9, %cst {dimension_numbers = #tpu.dot_dimension_numbers<[1], [0], [0], [1], [0, 0, 1, 1], [], []>} : vector<512x36xbf16>, vector<36x64xbf16>, vector<512x64xf32> -> vector<512x64xf32>
    %c0_3 = arith.constant 0 : index
    %c0_4 = arith.constant 0 : index
    %11 = vector.load %arg7[%c0_3, %c0_4] : memref<12x640xf32, #tpu.memory_space<vmem>>, vector<1x64xf32>
    %c1 = arith.constant 1 : index
    %c0_5 = arith.constant 0 : index
    %12 = vector.load %arg7[%c1, %c0_5] : memref<12x640xf32, #tpu.memory_space<vmem>>, vector<1x64xf32>
    %13 = vector.broadcast %11 : vector<1x64xf32> to vector<512x64xf32>
    %14 = arith.mulf %10, %13 : vector<512x64xf32>
    %15 = vector.broadcast %12 : vector<1x64xf32> to vector<512x64xf32>
    %16 = arith.addf %14, %15 : vector<512x64xf32>
    %cst_6 = arith.constant 0.000000e+00 : f32
    %17 = vector.broadcast %cst_6 : f32 to vector<512x64xf32>
    %18 = arith.maximumf %16, %17 : vector<512x64xf32>
    %19 = vector.shape_cast %18 : vector<512x64xf32> to vector<256x2x64xf32>
    %20 = vector.extract_strided_slice %19 {offsets = [0, 0, 0], sizes = [256, 1, 64], strides = [1, 1, 1]} : vector<256x2x64xf32> to vector<256x1x64xf32>
    %21 = vector.shape_cast %20 : vector<256x1x64xf32> to vector<256x64xf32>
    %22 = vector.extract_strided_slice %19 {offsets = [0, 1, 0], sizes = [256, 1, 64], strides = [1, 1, 1]} : vector<256x2x64xf32> to vector<256x1x64xf32>
    %23 = vector.shape_cast %22 : vector<256x1x64xf32> to vector<256x64xf32>
    %24 = arith.maximumf %21, %23 : vector<256x64xf32>
    %25 = vector.shape_cast %24 : vector<256x64xf32> to vector<2x8x2x8x64xf32>
    %26 = vector.extract_strided_slice %25 {offsets = [0, 0, 0, 0, 0], sizes = [2, 8, 1, 8, 64], strides = [1, 1, 1, 1, 1]} : vector<2x8x2x8x64xf32> to vector<2x8x1x8x64xf32>
    %27 = vector.shape_cast %26 : vector<2x8x1x8x64xf32> to vector<2x8x8x64xf32>
    %28 = vector.extract_strided_slice %25 {offsets = [0, 0, 1, 0, 0], sizes = [2, 8, 1, 8, 64], strides = [1, 1, 1, 1, 1]} : vector<2x8x2x8x64xf32> to vector<2x8x1x8x64xf32>
    %29 = vector.shape_cast %28 : vector<2x8x1x8x64xf32> to vector<2x8x8x64xf32>
    %30 = arith.maximumf %27, %29 : vector<2x8x8x64xf32>
    %31 = arith.truncf %30 : vector<2x8x8x64xf32> to vector<2x8x8x64xbf16>
    %cst_7 = arith.constant 0.000000e+00 : bf16
    %32 = vector.broadcast %cst_7 : bf16 to vector<2x1x10x64xbf16>
    %cst_8 = arith.constant 0.000000e+00 : bf16
    %33 = vector.broadcast %cst_8 : bf16 to vector<2x10x1x64xbf16>
    %c0_9 = arith.constant 0 : index
    %c0_10 = arith.constant 0 : index
    %c0_11 = arith.constant 0 : index
    %c0_12 = arith.constant 0 : index
    %34 = vector.load %arg15[%c0_9, %c0_10, %c0_11, %c0_12] : memref<2x10x10x64xbf16, #tpu.memory_space<vmem>>, vector<2x1x10x64xbf16>
    tpu.vector_store %arg15[%c0_9, %c0_10, %c0_11, %c0_12], %32 {strides = array<i32>} : memref<2x10x10x64xbf16, #tpu.memory_space<vmem>>, vector<2x1x10x64xbf16>,
    %c0_13 = arith.constant 0 : index
    %c9 = arith.constant 9 : index
    %c0_14 = arith.constant 0 : index
    %c0_15 = arith.constant 0 : index
    %35 = vector.load %arg15[%c0_13, %c9, %c0_14, %c0_15] : memref<2x10x10x64xbf16, #tpu.memory_space<vmem>>, vector<2x1x10x64xbf16>
    tpu.vector_store %arg15[%c0_13, %c9, %c0_14, %c0_15], %32 {strides = array<i32>} : memref<2x10x10x64xbf16, #tpu.memory_space<vmem>>, vector<2x1x10x64xbf16>,
    %c0_16 = arith.constant 0 : index
    %c0_17 = arith.constant 0 : index
    %c0_18 = arith.constant 0 : index
    %c0_19 = arith.constant 0 : index
    %36 = vector.load %arg15[%c0_16, %c0_17, %c0_18, %c0_19] : memref<2x10x10x64xbf16, #tpu.memory_space<vmem>>, vector<2x10x1x64xbf16>
    tpu.vector_store %arg15[%c0_16, %c0_17, %c0_18, %c0_19], %33 {strides = array<i32>} : memref<2x10x10x64xbf16, #tpu.memory_space<vmem>>, vector<2x10x1x64xbf16>,
    %c0_20 = arith.constant 0 : index
    %c0_21 = arith.constant 0 : index
    %c9_22 = arith.constant 9 : index
    %c0_23 = arith.constant 0 : index
    %37 = vector.load %arg15[%c0_20, %c0_21, %c9_22, %c0_23] : memref<2x10x10x64xbf16, #tpu.memory_space<vmem>>, vector<2x10x1x64xbf16>
    tpu.vector_store %arg15[%c0_20, %c0_21, %c9_22, %c0_23], %33 {strides = array<i32>} : memref<2x10x10x64xbf16, #tpu.memory_space<vmem>>, vector<2x10x1x64xbf16>,
    %c0_24 = arith.constant 0 : index
    %c1_25 = arith.constant 1 : index
    %c1_26 = arith.constant 1 : index
    %c0_27 = arith.constant 0 : index
    %38 = vector.load %arg15[%c0_24, %c1_25, %c1_26, %c0_27] : memref<2x10x10x64xbf16, #tpu.memory_space<vmem>>, vector<2x8x8x64xbf16>
    tpu.vector_store %arg15[%c0_24, %c1_25, %c1_26, %c0_27], %31 {strides = array<i32>} : memref<2x10x10x64xbf16, #tpu.memory_space<vmem>>, vector<2x8x8x64xbf16>,
    %c0_28 = arith.constant 0 : index
    %c0_29 = arith.constant 0 : index
    %c0_30 = arith.constant 0 : index
    %c0_31 = arith.constant 0 : index
    %39 = vector.load %arg15[%c0_28, %c0_29, %c0_30, %c0_31] : memref<2x10x10x64xbf16, #tpu.memory_space<vmem>>, vector<2x8x8x64xbf16>
    %c0_32 = arith.constant 0 : index
    %c0_33 = arith.constant 0 : index
    %c0_34 = arith.constant 0 : index
    %c0_35 = arith.constant 0 : index
    %40 = vector.load %arg16[%c0_32, %c0_33, %c0_34, %c0_35] : memref<2x8x8x576xbf16, #tpu.memory_space<vmem>>, vector<2x8x8x64xbf16>
    tpu.vector_store %arg16[%c0_32, %c0_33, %c0_34, %c0_35], %39 {strides = array<i32>} : memref<2x8x8x576xbf16, #tpu.memory_space<vmem>>, vector<2x8x8x64xbf16>,
    %c0_36 = arith.constant 0 : index
    %c0_37 = arith.constant 0 : index
    %c1_38 = arith.constant 1 : index
    %c0_39 = arith.constant 0 : index
    %41 = vector.load %arg15[%c0_36, %c0_37, %c1_38, %c0_39] : memref<2x10x10x64xbf16, #tpu.memory_space<vmem>>, vector<2x8x8x64xbf16>
    %c0_40 = arith.constant 0 : index
    %c0_41 = arith.constant 0 : index
    %c0_42 = arith.constant 0 : index
    %c64 = arith.constant 64 : index
    %42 = vector.load %arg16[%c0_40, %c0_41, %c0_42, %c64] : memref<2x8x8x576xbf16, #tpu.memory_space<vmem>>, vector<2x8x8x64xbf16>
    tpu.vector_store %arg16[%c0_40, %c0_41, %c0_42, %c64], %41 {strides = array<i32>} : memref<2x8x8x576xbf16, #tpu.memory_space<vmem>>, vector<2x8x8x64xbf16>,
    %c0_43 = arith.constant 0 : index
    %c0_44 = arith.constant 0 : index
    %c2 = arith.constant 2 : index
    %c0_45 = arith.constant 0 : index
    %43 = vector.load %arg15[%c0_43, %c0_44, %c2, %c0_45] : memref<2x10x10x64xbf16, #tpu.memory_space<vmem>>, vector<2x8x8x64xbf16>
    %c0_46 = arith.constant 0 : index
    %c0_47 = arith.constant 0 : index
    %c0_48 = arith.constant 0 : index
    %c128 = arith.constant 128 : index
    %44 = vector.load %arg16[%c0_46, %c0_47, %c0_48, %c128] : memref<2x8x8x576xbf16, #tpu.memory_space<vmem>>, vector<2x8x8x64xbf16>
    tpu.vector_store %arg16[%c0_46, %c0_47, %c0_48, %c128], %43 {strides = array<i32>} : memref<2x8x8x576xbf16, #tpu.memory_space<vmem>>, vector<2x8x8x64xbf16>,
    %c0_49 = arith.constant 0 : index
    %c1_50 = arith.constant 1 : index
    %c0_51 = arith.constant 0 : index
    %c0_52 = arith.constant 0 : index
    %45 = vector.load %arg15[%c0_49, %c1_50, %c0_51, %c0_52] : memref<2x10x10x64xbf16, #tpu.memory_space<vmem>>, vector<2x8x8x64xbf16>
    %c0_53 = arith.constant 0 : index
    %c0_54 = arith.constant 0 : index
    %c0_55 = arith.constant 0 : index
    %c192 = arith.constant 192 : index
    %46 = vector.load %arg16[%c0_53, %c0_54, %c0_55, %c192] : memref<2x8x8x576xbf16, #tpu.memory_space<vmem>>, vector<2x8x8x64xbf16>
    tpu.vector_store %arg16[%c0_53, %c0_54, %c0_55, %c192], %45 {strides = array<i32>} : memref<2x8x8x576xbf16, #tpu.memory_space<vmem>>, vector<2x8x8x64xbf16>,
    %c0_56 = arith.constant 0 : index
    %c1_57 = arith.constant 1 : index
    %c1_58 = arith.constant 1 : index
    %c0_59 = arith.constant 0 : index
    %47 = vector.load %arg15[%c0_56, %c1_57, %c1_58, %c0_59] : memref<2x10x10x64xbf16, #tpu.memory_space<vmem>>, vector<2x8x8x64xbf16>
    %c0_60 = arith.constant 0 : index
    %c0_61 = arith.constant 0 : index
    %c0_62 = arith.constant 0 : index
    %c256 = arith.constant 256 : index
    %48 = vector.load %arg16[%c0_60, %c0_61, %c0_62, %c256] : memref<2x8x8x576xbf16, #tpu.memory_space<vmem>>, vector<2x8x8x64xbf16>
    tpu.vector_store %arg16[%c0_60, %c0_61, %c0_62, %c256], %47 {strides = array<i32>} : memref<2x8x8x576xbf16, #tpu.memory_space<vmem>>, vector<2x8x8x64xbf16>,
    %c0_63 = arith.constant 0 : index
    %c1_64 = arith.constant 1 : index
    %c2_65 = arith.constant 2 : index
    %c0_66 = arith.constant 0 : index
    %49 = vector.load %arg15[%c0_63, %c1_64, %c2_65, %c0_66] : memref<2x10x10x64xbf16, #tpu.memory_space<vmem>>, vector<2x8x8x64xbf16>
    %c0_67 = arith.constant 0 : index
    %c0_68 = arith.constant 0 : index
    %c0_69 = arith.constant 0 : index
    %c320 = arith.constant 320 : index
    %50 = vector.load %arg16[%c0_67, %c0_68, %c0_69, %c320] : memref<2x8x8x576xbf16, #tpu.memory_space<vmem>>, vector<2x8x8x64xbf16>
    tpu.vector_store %arg16[%c0_67, %c0_68, %c0_69, %c320], %49 {strides = array<i32>} : memref<2x8x8x576xbf16, #tpu.memory_space<vmem>>, vector<2x8x8x64xbf16>,
    %c0_70 = arith.constant 0 : index
    %c2_71 = arith.constant 2 : index
    %c0_72 = arith.constant 0 : index
    %c0_73 = arith.constant 0 : index
    %51 = vector.load %arg15[%c0_70, %c2_71, %c0_72, %c0_73] : memref<2x10x10x64xbf16, #tpu.memory_space<vmem>>, vector<2x8x8x64xbf16>
    %c0_74 = arith.constant 0 : index
    %c0_75 = arith.constant 0 : index
    %c0_76 = arith.constant 0 : index
    %c384 = arith.constant 384 : index
    %52 = vector.load %arg16[%c0_74, %c0_75, %c0_76, %c384] : memref<2x8x8x576xbf16, #tpu.memory_space<vmem>>, vector<2x8x8x64xbf16>
    tpu.vector_store %arg16[%c0_74, %c0_75, %c0_76, %c384], %51 {strides = array<i32>} : memref<2x8x8x576xbf16, #tpu.memory_space<vmem>>, vector<2x8x8x64xbf16>,
    %c0_77 = arith.constant 0 : index
    %c2_78 = arith.constant 2 : index
    %c1_79 = arith.constant 1 : index
    %c0_80 = arith.constant 0 : index
    %53 = vector.load %arg15[%c0_77, %c2_78, %c1_79, %c0_80] : memref<2x10x10x64xbf16, #tpu.memory_space<vmem>>, vector<2x8x8x64xbf16>
    %c0_81 = arith.constant 0 : index
    %c0_82 = arith.constant 0 : index
    %c0_83 = arith.constant 0 : index
    %c448 = arith.constant 448 : index
    %54 = vector.load %arg16[%c0_81, %c0_82, %c0_83, %c448] : memref<2x8x8x576xbf16, #tpu.memory_space<vmem>>, vector<2x8x8x64xbf16>
    tpu.vector_store %arg16[%c0_81, %c0_82, %c0_83, %c448], %53 {strides = array<i32>} : memref<2x8x8x576xbf16, #tpu.memory_space<vmem>>, vector<2x8x8x64xbf16>,
    %c0_84 = arith.constant 0 : index
    %c2_85 = arith.constant 2 : index
    %c2_86 = arith.constant 2 : index
    %c0_87 = arith.constant 0 : index
    %55 = vector.load %arg15[%c0_84, %c2_85, %c2_86, %c0_87] : memref<2x10x10x64xbf16, #tpu.memory_space<vmem>>, vector<2x8x8x64xbf16>
    %c0_88 = arith.constant 0 : index
    %c0_89 = arith.constant 0 : index
    %c0_90 = arith.constant 0 : index
    %c512 = arith.constant 512 : index
    %56 = vector.load %arg16[%c0_88, %c0_89, %c0_90, %c512] : memref<2x8x8x576xbf16, #tpu.memory_space<vmem>>, vector<2x8x8x64xbf16>
    tpu.vector_store %arg16[%c0_88, %c0_89, %c0_90, %c512], %55 {strides = array<i32>} : memref<2x8x8x576xbf16, #tpu.memory_space<vmem>>, vector<2x8x8x64xbf16>,
    %c0_91 = arith.constant 0 : index
    %c0_92 = arith.constant 0 : index
    %c0_93 = arith.constant 0 : index
    %c0_94 = arith.constant 0 : index
    %57 = vector.load %arg16[%c0_91, %c0_92, %c0_93, %c0_94] : memref<2x8x8x576xbf16, #tpu.memory_space<vmem>>, vector<2x8x8x576xbf16>
    %58 = vector.shape_cast %57 : vector<2x8x8x576xbf16> to vector<128x576xbf16>
    %c0_95 = arith.constant 0 : index
    %c0_96 = arith.constant 0 : index
    %59 = vector.load %arg2[%c0_95, %c0_96] : memref<576x128xbf16, #tpu.memory_space<vmem>>, vector<576x128xbf16>
    %cst_97 = arith.constant dense<0.000000e+00> : vector<128x128xf32>
    %60 = tpu.matmul %58, %59, %cst_97 {dimension_numbers = #tpu.dot_dimension_numbers<[1], [0], [0], [1], [0, 0, 1, 1], [], []>} : vector<128x576xbf16>, vector<576x128xbf16>, vector<128x128xf32> -> vector<128x128xf32>
    %c2_98 = arith.constant 2 : index
    %c0_99 = arith.constant 0 : index
    %61 = vector.load %arg7[%c2_98, %c0_99] : memref<12x640xf32, #tpu.memory_space<vmem>>, vector<1x128xf32>
    %c3 = arith.constant 3 : index
    %c0_100 = arith.constant 0 : index
    %62 = vector.load %arg7[%c3, %c0_100] : memref<12x640xf32, #tpu.memory_space<vmem>>, vector<1x128xf32>
    %63 = vector.broadcast %61 : vector<1x128xf32> to vector<128x128xf32>
    %64 = arith.mulf %60, %63 : vector<128x128xf32>
    %65 = vector.broadcast %62 : vector<1x128xf32> to vector<128x128xf32>
    %66 = arith.addf %64, %65 : vector<128x128xf32>
    %cst_101 = arith.constant 0.000000e+00 : f32
    %67 = vector.broadcast %cst_101 : f32 to vector<128x128xf32>
    %68 = arith.maximumf %66, %67 : vector<128x128xf32>
    %69 = vector.shape_cast %68 : vector<128x128xf32> to vector<64x2x128xf32>
    %70 = vector.extract_strided_slice %69 {offsets = [0, 0, 0], sizes = [64, 1, 128], strides = [1, 1, 1]} : vector<64x2x128xf32> to vector<64x1x128xf32>
    %71 = vector.shape_cast %70 : vector<64x1x128xf32> to vector<64x128xf32>
    %72 = vector.extract_strided_slice %69 {offsets = [0, 1, 0], sizes = [64, 1, 128], strides = [1, 1, 1]} : vector<64x2x128xf32> to vector<64x1x128xf32>
    %73 = vector.shape_cast %72 : vector<64x1x128xf32> to vector<64x128xf32>
    %74 = arith.maximumf %71, %73 : vector<64x128xf32>
    %75 = vector.shape_cast %74 : vector<64x128xf32> to vector<2x4x2x4x128xf32>
    %76 = vector.extract_strided_slice %75 {offsets = [0, 0, 0, 0, 0], sizes = [2, 4, 1, 4, 128], strides = [1, 1, 1, 1, 1]} : vector<2x4x2x4x128xf32> to vector<2x4x1x4x128xf32>
    %77 = vector.shape_cast %76 : vector<2x4x1x4x128xf32> to vector<2x4x4x128xf32>
    %78 = vector.extract_strided_slice %75 {offsets = [0, 0, 1, 0, 0], sizes = [2, 4, 1, 4, 128], strides = [1, 1, 1, 1, 1]} : vector<2x4x2x4x128xf32> to vector<2x4x1x4x128xf32>
    %79 = vector.shape_cast %78 : vector<2x4x1x4x128xf32> to vector<2x4x4x128xf32>
    %80 = arith.maximumf %77, %79 : vector<2x4x4x128xf32>
    %81 = arith.truncf %80 : vector<2x4x4x128xf32> to vector<2x4x4x128xbf16>
    %cst_102 = arith.constant 0.000000e+00 : bf16
    %82 = vector.broadcast %cst_102 : bf16 to vector<2x1x6x128xbf16>
    %cst_103 = arith.constant 0.000000e+00 : bf16
    %83 = vector.broadcast %cst_103 : bf16 to vector<2x6x1x128xbf16>
    %c0_104 = arith.constant 0 : index
    %c0_105 = arith.constant 0 : index
    %c0_106 = arith.constant 0 : index
    %c0_107 = arith.constant 0 : index
    %84 = vector.load %arg17[%c0_104, %c0_105, %c0_106, %c0_107] : memref<2x6x6x128xbf16, #tpu.memory_space<vmem>>, vector<2x1x6x128xbf16>
    tpu.vector_store %arg17[%c0_104, %c0_105, %c0_106, %c0_107], %82 {strides = array<i32>} : memref<2x6x6x128xbf16, #tpu.memory_space<vmem>>, vector<2x1x6x128xbf16>,
    %c0_108 = arith.constant 0 : index
    %c5 = arith.constant 5 : index
    %c0_109 = arith.constant 0 : index
    %c0_110 = arith.constant 0 : index
    %85 = vector.load %arg17[%c0_108, %c5, %c0_109, %c0_110] : memref<2x6x6x128xbf16, #tpu.memory_space<vmem>>, vector<2x1x6x128xbf16>
    tpu.vector_store %arg17[%c0_108, %c5, %c0_109, %c0_110], %82 {strides = array<i32>} : memref<2x6x6x128xbf16, #tpu.memory_space<vmem>>, vector<2x1x6x128xbf16>,
    %c0_111 = arith.constant 0 : index
    %c0_112 = arith.constant 0 : index
    %c0_113 = arith.constant 0 : index
    %c0_114 = arith.constant 0 : index
    %86 = vector.load %arg17[%c0_111, %c0_112, %c0_113, %c0_114] : memref<2x6x6x128xbf16, #tpu.memory_space<vmem>>, vector<2x6x1x128xbf16>
    tpu.vector_store %arg17[%c0_111, %c0_112, %c0_113, %c0_114], %83 {strides = array<i32>} : memref<2x6x6x128xbf16, #tpu.memory_space<vmem>>, vector<2x6x1x128xbf16>,
    %c0_115 = arith.constant 0 : index
    %c0_116 = arith.constant 0 : index
    %c5_117 = arith.constant 5 : index
    %c0_118 = arith.constant 0 : index
    %87 = vector.load %arg17[%c0_115, %c0_116, %c5_117, %c0_118] : memref<2x6x6x128xbf16, #tpu.memory_space<vmem>>, vector<2x6x1x128xbf16>
    tpu.vector_store %arg17[%c0_115, %c0_116, %c5_117, %c0_118], %83 {strides = array<i32>} : memref<2x6x6x128xbf16, #tpu.memory_space<vmem>>, vector<2x6x1x128xbf16>,
    %c0_119 = arith.constant 0 : index
    %c1_120 = arith.constant 1 : index
    %c1_121 = arith.constant 1 : index
    %c0_122 = arith.constant 0 : index
    %88 = vector.load %arg17[%c0_119, %c1_120, %c1_121, %c0_122] : memref<2x6x6x128xbf16, #tpu.memory_space<vmem>>, vector<2x4x4x128xbf16>
    tpu.vector_store %arg17[%c0_119, %c1_120, %c1_121, %c0_122], %81 {strides = array<i32>} : memref<2x6x6x128xbf16, #tpu.memory_space<vmem>>, vector<2x4x4x128xbf16>,
    %c0_123 = arith.constant 0 : index
    %c0_124 = arith.constant 0 : index
    %c0_125 = arith.constant 0 : index
    %c0_126 = arith.constant 0 : index
    %89 = vector.load %arg17[%c0_123, %c0_124, %c0_125, %c0_126] : memref<2x6x6x128xbf16, #tpu.memory_space<vmem>>, vector<2x4x4x128xbf16>
    %c0_127 = arith.constant 0 : index
    %c0_128 = arith.constant 0 : index
    %c0_129 = arith.constant 0 : index
    %c0_130 = arith.constant 0 : index
    %90 = vector.load %arg18[%c0_127, %c0_128, %c0_129, %c0_130] : memref<2x4x4x1152xbf16, #tpu.memory_space<vmem>>, vector<2x4x4x128xbf16>
    tpu.vector_store %arg18[%c0_127, %c0_128, %c0_129, %c0_130], %89 {strides = array<i32>} : memref<2x4x4x1152xbf16, #tpu.memory_space<vmem>>, vector<2x4x4x128xbf16>,
    %c0_131 = arith.constant 0 : index
    %c0_132 = arith.constant 0 : index
    %c1_133 = arith.constant 1 : index
    %c0_134 = arith.constant 0 : index
    %91 = vector.load %arg17[%c0_131, %c0_132, %c1_133, %c0_134] : memref<2x6x6x128xbf16, #tpu.memory_space<vmem>>, vector<2x4x4x128xbf16>
    %c0_135 = arith.constant 0 : index
    %c0_136 = arith.constant 0 : index
    %c0_137 = arith.constant 0 : index
    %c128_138 = arith.constant 128 : index
    %92 = vector.load %arg18[%c0_135, %c0_136, %c0_137, %c128_138] : memref<2x4x4x1152xbf16, #tpu.memory_space<vmem>>, vector<2x4x4x128xbf16>
    tpu.vector_store %arg18[%c0_135, %c0_136, %c0_137, %c128_138], %91 {strides = array<i32>} : memref<2x4x4x1152xbf16, #tpu.memory_space<vmem>>, vector<2x4x4x128xbf16>,
    %c0_139 = arith.constant 0 : index
    %c0_140 = arith.constant 0 : index
    %c2_141 = arith.constant 2 : index
    %c0_142 = arith.constant 0 : index
    %93 = vector.load %arg17[%c0_139, %c0_140, %c2_141, %c0_142] : memref<2x6x6x128xbf16, #tpu.memory_space<vmem>>, vector<2x4x4x128xbf16>
    %c0_143 = arith.constant 0 : index
    %c0_144 = arith.constant 0 : index
    %c0_145 = arith.constant 0 : index
    %c256_146 = arith.constant 256 : index
    %94 = vector.load %arg18[%c0_143, %c0_144, %c0_145, %c256_146] : memref<2x4x4x1152xbf16, #tpu.memory_space<vmem>>, vector<2x4x4x128xbf16>
    tpu.vector_store %arg18[%c0_143, %c0_144, %c0_145, %c256_146], %93 {strides = array<i32>} : memref<2x4x4x1152xbf16, #tpu.memory_space<vmem>>, vector<2x4x4x128xbf16>,
    %c0_147 = arith.constant 0 : index
    %c1_148 = arith.constant 1 : index
    %c0_149 = arith.constant 0 : index
    %c0_150 = arith.constant 0 : index
    %95 = vector.load %arg17[%c0_147, %c1_148, %c0_149, %c0_150] : memref<2x6x6x128xbf16, #tpu.memory_space<vmem>>, vector<2x4x4x128xbf16>
    %c0_151 = arith.constant 0 : index
    %c0_152 = arith.constant 0 : index
    %c0_153 = arith.constant 0 : index
    %c384_154 = arith.constant 384 : index
    %96 = vector.load %arg18[%c0_151, %c0_152, %c0_153, %c384_154] : memref<2x4x4x1152xbf16, #tpu.memory_space<vmem>>, vector<2x4x4x128xbf16>
    tpu.vector_store %arg18[%c0_151, %c0_152, %c0_153, %c384_154], %95 {strides = array<i32>} : memref<2x4x4x1152xbf16, #tpu.memory_space<vmem>>, vector<2x4x4x128xbf16>,
    %c0_155 = arith.constant 0 : index
    %c1_156 = arith.constant 1 : index
    %c1_157 = arith.constant 1 : index
    %c0_158 = arith.constant 0 : index
    %97 = vector.load %arg17[%c0_155, %c1_156, %c1_157, %c0_158] : memref<2x6x6x128xbf16, #tpu.memory_space<vmem>>, vector<2x4x4x128xbf16>
    %c0_159 = arith.constant 0 : index
    %c0_160 = arith.constant 0 : index
    %c0_161 = arith.constant 0 : index
    %c512_162 = arith.constant 512 : index
    %98 = vector.load %arg18[%c0_159, %c0_160, %c0_161, %c512_162] : memref<2x4x4x1152xbf16, #tpu.memory_space<vmem>>, vector<2x4x4x128xbf16>
    tpu.vector_store %arg18[%c0_159, %c0_160, %c0_161, %c512_162], %97 {strides = array<i32>} : memref<2x4x4x1152xbf16, #tpu.memory_space<vmem>>, vector<2x4x4x128xbf16>,
    %c0_163 = arith.constant 0 : index
    %c1_164 = arith.constant 1 : index
    %c2_165 = arith.constant 2 : index
    %c0_166 = arith.constant 0 : index
    %99 = vector.load %arg17[%c0_163, %c1_164, %c2_165, %c0_166] : memref<2x6x6x128xbf16, #tpu.memory_space<vmem>>, vector<2x4x4x128xbf16>
    %c0_167 = arith.constant 0 : index
    %c0_168 = arith.constant 0 : index
    %c0_169 = arith.constant 0 : index
    %c640 = arith.constant 640 : index
    %100 = vector.load %arg18[%c0_167, %c0_168, %c0_169, %c640] : memref<2x4x4x1152xbf16, #tpu.memory_space<vmem>>, vector<2x4x4x128xbf16>
    tpu.vector_store %arg18[%c0_167, %c0_168, %c0_169, %c640], %99 {strides = array<i32>} : memref<2x4x4x1152xbf16, #tpu.memory_space<vmem>>, vector<2x4x4x128xbf16>,
    %c0_170 = arith.constant 0 : index
    %c2_171 = arith.constant 2 : index
    %c0_172 = arith.constant 0 : index
    %c0_173 = arith.constant 0 : index
    %101 = vector.load %arg17[%c0_170, %c2_171, %c0_172, %c0_173] : memref<2x6x6x128xbf16, #tpu.memory_space<vmem>>, vector<2x4x4x128xbf16>
    %c0_174 = arith.constant 0 : index
    %c0_175 = arith.constant 0 : index
    %c0_176 = arith.constant 0 : index
    %c768 = arith.constant 768 : index
    %102 = vector.load %arg18[%c0_174, %c0_175, %c0_176, %c768] : memref<2x4x4x1152xbf16, #tpu.memory_space<vmem>>, vector<2x4x4x128xbf16>
    tpu.vector_store %arg18[%c0_174, %c0_175, %c0_176, %c768], %101 {strides = array<i32>} : memref<2x4x4x1152xbf16, #tpu.memory_space<vmem>>, vector<2x4x4x128xbf16>,
    %c0_177 = arith.constant 0 : index
    %c2_178 = arith.constant 2 : index
    %c1_179 = arith.constant 1 : index
    %c0_180 = arith.constant 0 : index
    %103 = vector.load %arg17[%c0_177, %c2_178, %c1_179, %c0_180] : memref<2x6x6x128xbf16, #tpu.memory_space<vmem>>, vector<2x4x4x128xbf16>
    %c0_181 = arith.constant 0 : index
    %c0_182 = arith.constant 0 : index
    %c0_183 = arith.constant 0 : index
    %c896 = arith.constant 896 : index
    %104 = vector.load %arg18[%c0_181, %c0_182, %c0_183, %c896] : memref<2x4x4x1152xbf16, #tpu.memory_space<vmem>>, vector<2x4x4x128xbf16>
    tpu.vector_store %arg18[%c0_181, %c0_182, %c0_183, %c896], %103 {strides = array<i32>} : memref<2x4x4x1152xbf16, #tpu.memory_space<vmem>>, vector<2x4x4x128xbf16>,
    %c0_184 = arith.constant 0 : index
    %c2_185 = arith.constant 2 : index
    %c2_186 = arith.constant 2 : index
    %c0_187 = arith.constant 0 : index
    %105 = vector.load %arg17[%c0_184, %c2_185, %c2_186, %c0_187] : memref<2x6x6x128xbf16, #tpu.memory_space<vmem>>, vector<2x4x4x128xbf16>
    %c0_188 = arith.constant 0 : index
    %c0_189 = arith.constant 0 : index
    %c0_190 = arith.constant 0 : index
    %c1024 = arith.constant 1024 : index
    %106 = vector.load %arg18[%c0_188, %c0_189, %c0_190, %c1024] : memref<2x4x4x1152xbf16, #tpu.memory_space<vmem>>, vector<2x4x4x128xbf16>
    tpu.vector_store %arg18[%c0_188, %c0_189, %c0_190, %c1024], %105 {strides = array<i32>} : memref<2x4x4x1152xbf16, #tpu.memory_space<vmem>>, vector<2x4x4x128xbf16>,
    %c0_i32_191 = arith.constant 0 : i32
    %107 = tpu.memref_slice %arg14[%c0_i32_191] : memref<4x!tpu.dma_semaphore, #tpu.memory_space<semaphore_mem>> -> memref<1x!tpu.dma_semaphore, #tpu.memory_space<semaphore_mem>>
    %108 = tpu.memref_squeeze %107 : memref<1x!tpu.dma_semaphore, #tpu.memory_space<semaphore_mem>> -> memref<!tpu.dma_semaphore, #tpu.memory_space<semaphore_mem>>
    tpu.wait_dma2 semaphore(%108 : memref<!tpu.dma_semaphore, #tpu.memory_space<semaphore_mem>>) src(%arg3 : memref<1152x256xbf16, #tpu.memory_space<any>>) dst(%arg10 : memref<1152x256xbf16, #tpu.memory_space<vmem>>)
    %c0_192 = arith.constant 0 : index
    %c0_193 = arith.constant 0 : index
    %c0_194 = arith.constant 0 : index
    %c0_195 = arith.constant 0 : index
    %109 = vector.load %arg18[%c0_192, %c0_193, %c0_194, %c0_195] : memref<2x4x4x1152xbf16, #tpu.memory_space<vmem>>, vector<2x4x4x1152xbf16>
    %110 = vector.shape_cast %109 : vector<2x4x4x1152xbf16> to vector<32x1152xbf16>
    %c0_196 = arith.constant 0 : index
    %c0_197 = arith.constant 0 : index
    %111 = vector.load %arg10[%c0_196, %c0_197] : memref<1152x256xbf16, #tpu.memory_space<vmem>>, vector<1152x256xbf16>
    %cst_198 = arith.constant dense<0.000000e+00> : vector<32x256xf32>
    %112 = tpu.matmul %110, %111, %cst_198 {dimension_numbers = #tpu.dot_dimension_numbers<[1], [0], [0], [1], [0, 0, 1, 1], [], []>} : vector<32x1152xbf16>, vector<1152x256xbf16>, vector<32x256xf32> -> vector<32x256xf32>
    %c4 = arith.constant 4 : index
    %c0_199 = arith.constant 0 : index
    %113 = vector.load %arg7[%c4, %c0_199] : memref<12x640xf32, #tpu.memory_space<vmem>>, vector<1x256xf32>
    %c5_200 = arith.constant 5 : index
    %c0_201 = arith.constant 0 : index
    %114 = vector.load %arg7[%c5_200, %c0_201] : memref<12x640xf32, #tpu.memory_space<vmem>>, vector<1x256xf32>
    %115 = vector.broadcast %113 : vector<1x256xf32> to vector<32x256xf32>
    %116 = arith.mulf %112, %115 : vector<32x256xf32>
    %117 = vector.broadcast %114 : vector<1x256xf32> to vector<32x256xf32>
    %118 = arith.addf %116, %117 : vector<32x256xf32>
    %cst_202 = arith.constant 0.000000e+00 : f32
    %119 = vector.broadcast %cst_202 : f32 to vector<32x256xf32>
    %120 = arith.maximumf %118, %119 : vector<32x256xf32>
    %121 = vector.shape_cast %120 : vector<32x256xf32> to vector<16x2x256xf32>
    %122 = vector.extract_strided_slice %121 {offsets = [0, 0, 0], sizes = [16, 1, 256], strides = [1, 1, 1]} : vector<16x2x256xf32> to vector<16x1x256xf32>
    %123 = vector.shape_cast %122 : vector<16x1x256xf32> to vector<16x256xf32>
    %124 = vector.extract_strided_slice %121 {offsets = [0, 1, 0], sizes = [16, 1, 256], strides = [1, 1, 1]} : vector<16x2x256xf32> to vector<16x1x256xf32>
    %125 = vector.shape_cast %124 : vector<16x1x256xf32> to vector<16x256xf32>
    %126 = arith.maximumf %123, %125 : vector<16x256xf32>
    %127 = vector.shape_cast %126 : vector<16x256xf32> to vector<2x2x2x2x256xf32>
    %128 = vector.extract_strided_slice %127 {offsets = [0, 0, 0, 0, 0], sizes = [2, 2, 1, 2, 256], strides = [1, 1, 1, 1, 1]} : vector<2x2x2x2x256xf32> to vector<2x2x1x2x256xf32>
    %129 = vector.shape_cast %128 : vector<2x2x1x2x256xf32> to vector<2x2x2x256xf32>
    %130 = vector.extract_strided_slice %127 {offsets = [0, 0, 1, 0, 0], sizes = [2, 2, 1, 2, 256], strides = [1, 1, 1, 1, 1]} : vector<2x2x2x2x256xf32> to vector<2x2x1x2x256xf32>
    %131 = vector.shape_cast %130 : vector<2x2x1x2x256xf32> to vector<2x2x2x256xf32>
    %132 = arith.maximumf %129, %131 : vector<2x2x2x256xf32>
    %c1_i32_203 = arith.constant 1 : i32
    %133 = tpu.memref_slice %arg14[%c1_i32_203] : memref<4x!tpu.dma_semaphore, #tpu.memory_space<semaphore_mem>> -> memref<1x!tpu.dma_semaphore, #tpu.memory_space<semaphore_mem>>
    %134 = tpu.memref_squeeze %133 : memref<1x!tpu.dma_semaphore, #tpu.memory_space<semaphore_mem>> -> memref<!tpu.dma_semaphore, #tpu.memory_space<semaphore_mem>>
    tpu.wait_dma2 semaphore(%134 : memref<!tpu.dma_semaphore, #tpu.memory_space<semaphore_mem>>) src(%arg4 : memref<256x256xbf16, #tpu.memory_space<any>>) dst(%arg11 : memref<256x256xbf16, #tpu.memory_space<vmem>>)
    %135 = vector.shape_cast %132 : vector<2x2x2x256xf32> to vector<8x256xf32>
    %136 = arith.truncf %135 : vector<8x256xf32> to vector<8x256xbf16>
    %c0_204 = arith.constant 0 : index
    %c0_205 = arith.constant 0 : index
    %137 = vector.load %arg11[%c0_204, %c0_205] : memref<256x256xbf16, #tpu.memory_space<vmem>>, vector<256x256xbf16>
    %cst_206 = arith.constant dense<0.000000e+00> : vector<8x256xf32>
    %138 = tpu.matmul %136, %137, %cst_206 {dimension_numbers = #tpu.dot_dimension_numbers<[1], [0], [0], [1], [0, 0, 1, 1], [], []>} : vector<8x256xbf16>, vector<256x256xbf16>, vector<8x256xf32> -> vector<8x256xf32>
    %c6 = arith.constant 6 : index
    %c0_207 = arith.constant 0 : index
    %139 = vector.load %arg7[%c6, %c0_207] : memref<12x640xf32, #tpu.memory_space<vmem>>, vector<1x256xf32>
    %140 = vector.broadcast %139 : vector<1x256xf32> to vector<8x256xf32>
    %141 = arith.mulf %138, %140 : vector<8x256xf32>
    %c7 = arith.constant 7 : index
    %c0_208 = arith.constant 0 : index
    %142 = vector.load %arg7[%c7, %c0_208] : memref<12x640xf32, #tpu.memory_space<vmem>>, vector<1x256xf32>
    %143 = vector.broadcast %142 : vector<1x256xf32> to vector<8x256xf32>
    %144 = arith.addf %141, %143 : vector<8x256xf32>
    %cst_209 = arith.constant 0.000000e+00 : f32
    %145 = vector.broadcast %cst_209 : f32 to vector<8x256xf32>
    %146 = arith.maximumf %144, %145 : vector<8x256xf32>
    %147 = vector.shape_cast %146 : vector<8x256xf32> to vector<2x4x256xf32>
    %cst_210 = arith.constant dense<0.000000e+00> : vector<2x256xf32>
    %148 = vector.multi_reduction <add>, %147, %cst_210 [1] : vector<2x4x256xf32> to vector<2x256xf32>
    %cst_211 = arith.constant 4.000000e+00 : f32
    %149 = vector.broadcast %cst_211 : f32 to vector<2x256xf32>
    %150 = arith.divf %148, %149 : vector<2x256xf32>
    %c2_i32_212 = arith.constant 2 : i32
    %151 = tpu.memref_slice %arg14[%c2_i32_212] : memref<4x!tpu.dma_semaphore, #tpu.memory_space<semaphore_mem>> -> memref<1x!tpu.dma_semaphore, #tpu.memory_space<semaphore_mem>>
    %152 = tpu.memref_squeeze %151 : memref<1x!tpu.dma_semaphore, #tpu.memory_space<semaphore_mem>> -> memref<!tpu.dma_semaphore, #tpu.memory_space<semaphore_mem>>
    tpu.wait_dma2 semaphore(%152 : memref<!tpu.dma_semaphore, #tpu.memory_space<semaphore_mem>>) src(%arg5 : memref<256x522xbf16, #tpu.memory_space<any>>) dst(%arg12 : memref<256x522xbf16, #tpu.memory_space<vmem>>)
    %153 = arith.truncf %150 : vector<2x256xf32> to vector<2x256xbf16>
    %c0_213 = arith.constant 0 : index
    %c0_214 = arith.constant 0 : index
    %154 = vector.load %arg12[%c0_213, %c0_214] : memref<256x522xbf16, #tpu.memory_space<vmem>>, vector<256x522xbf16>
    %cst_215 = arith.constant dense<0.000000e+00> : vector<2x522xf32>
    %155 = tpu.matmul %153, %154, %cst_215 {dimension_numbers = #tpu.dot_dimension_numbers<[1], [0], [0], [1], [0, 0, 1, 1], [], []>} : vector<2x256xbf16>, vector<256x522xbf16>, vector<2x522xf32> -> vector<2x522xf32>
    %c10 = arith.constant 10 : index
    %c0_216 = arith.constant 0 : index
    %156 = vector.load %arg7[%c10, %c0_216] : memref<12x640xf32, #tpu.memory_space<vmem>>, vector<1x522xf32>
    %157 = vector.broadcast %156 : vector<1x522xf32> to vector<2x522xf32>
    %158 = arith.addf %155, %157 : vector<2x522xf32>
    %159 = vector.extract_strided_slice %158 {offsets = [0, 512], sizes = [2, 10], strides = [1, 1]} : vector<2x522xf32> to vector<2x10xf32>
    %c0_217 = arith.constant 0 : index
    %c0_218 = arith.constant 0 : index
    %160 = vector.load %arg8[%c0_217, %c0_218] : memref<2x10xf32, #tpu.memory_space<vmem>>, vector<2x10xf32>
    tpu.vector_store %arg8[%c0_217, %c0_218], %159 {strides = array<i32>} : memref<2x10xf32, #tpu.memory_space<vmem>>, vector<2x10xf32>,
    %161 = vector.extract_strided_slice %158 {offsets = [0, 0], sizes = [2, 512], strides = [1, 1]} : vector<2x522xf32> to vector<2x512xf32>
    %cst_219 = arith.constant 0.000000e+00 : f32
    %162 = vector.broadcast %cst_219 : f32 to vector<2x512xf32>
    %163 = arith.maximumf %161, %162 : vector<2x512xf32>
    %c8 = arith.constant 8 : index
    %c0_220 = arith.constant 0 : index
    %164 = vector.load %arg7[%c8, %c0_220] : memref<12x640xf32, #tpu.memory_space<vmem>>, vector<1x512xf32>
    %165 = vector.broadcast %164 : vector<1x512xf32> to vector<2x512xf32>
    %166 = arith.mulf %163, %165 : vector<2x512xf32>
    %c9_221 = arith.constant 9 : index
    %c0_222 = arith.constant 0 : index
    %167 = vector.load %arg7[%c9_221, %c0_222] : memref<12x640xf32, #tpu.memory_space<vmem>>, vector<1x512xf32>
    %168 = vector.broadcast %167 : vector<1x512xf32> to vector<2x512xf32>
    %169 = arith.addf %166, %168 : vector<2x512xf32>
    %c3_i32_223 = arith.constant 3 : i32
    %170 = tpu.memref_slice %arg14[%c3_i32_223] : memref<4x!tpu.dma_semaphore, #tpu.memory_space<semaphore_mem>> -> memref<1x!tpu.dma_semaphore, #tpu.memory_space<semaphore_mem>>
    %171 = tpu.memref_squeeze %170 : memref<1x!tpu.dma_semaphore, #tpu.memory_space<semaphore_mem>> -> memref<!tpu.dma_semaphore, #tpu.memory_space<semaphore_mem>>
    tpu.wait_dma2 semaphore(%171 : memref<!tpu.dma_semaphore, #tpu.memory_space<semaphore_mem>>) src(%arg6 : memref<512x10xbf16, #tpu.memory_space<any>>) dst(%arg13 : memref<512x10xbf16, #tpu.memory_space<vmem>>)
    %172 = arith.truncf %169 : vector<2x512xf32> to vector<2x512xbf16>
    %c0_224 = arith.constant 0 : index
    %c0_225 = arith.constant 0 : index
    %173 = vector.load %arg13[%c0_224, %c0_225] : memref<512x10xbf16, #tpu.memory_space<vmem>>, vector<512x10xbf16>
    %cst_226 = arith.constant dense<0.000000e+00> : vector<2x10xf32>
    %174 = tpu.matmul %172, %173, %cst_226 {dimension_numbers = #tpu.dot_dimension_numbers<[1], [0], [0], [1], [0, 0, 1, 1], [], []>} : vector<2x512xbf16>, vector<512x10xbf16>, vector<2x10xf32> -> vector<2x10xf32>
    %c11 = arith.constant 11 : index
    %c0_227 = arith.constant 0 : index
    %175 = vector.load %arg7[%c11, %c0_227] : memref<12x640xf32, #tpu.memory_space<vmem>>, vector<1x10xf32>
    %176 = vector.broadcast %175 : vector<1x10xf32> to vector<2x10xf32>
    %177 = arith.addf %174, %176 : vector<2x10xf32>
    %c0_228 = arith.constant 0 : index
    %c0_229 = arith.constant 0 : index
    %178 = vector.load %arg9[%c0_228, %c0_229] : memref<2x10xf32, #tpu.memory_space<vmem>>, vector<2x10xf32>
    tpu.vector_store %arg9[%c0_228, %c0_229], %177 {strides = array<i32>} : memref<2x10xf32, #tpu.memory_space<vmem>>, vector<2x10xf32>,
    return
  }
}

</mosaic_0001>

<bundles_post_ra>
// kernel: network_forward.1
= control target key start
LH: loop header
LB: loop body
LE: loop exit
PB: predicated region body
PF: predicated region fallthrough
CT: control target
= control target key end

     0   :  { %15 = vsyncpa [#allocation12], 0  ;;  %s18567_s0 = inlined_call_operand.vmem [shape: bf16[512,36], index: 0, kind: input, shape index: {}]   ;;  %s18568_s1 = inlined_call_operand.vmem [shape: bf16[36,64], index: 1, kind: input, shape index: {}]   ;;  %s18569_s2 = inlined_call_operand.vmem [shape: bf16[576,128], index: 2, kind: input, shape index: {}]   ;;  %s18570_s3 = inlined_call_operand.vmem [shape: bf16[1152,256], index: 3, kind: input, shape index: {}]   ;;  %s18571_s4 = inlined_call_operand.vmem [shape: bf16[256,256], index: 4, kind: input, shape index: {}]   ;;  %s18572_s5 = inlined_call_operand.vmem [shape: bf16[256,522], index: 5, kind: input, shape index: {}]   ;;  %s18573_s6 = inlined_call_operand.vmem [shape: bf16[512,10], index: 6, kind: input, shape index: {}]   ;;  %s18574_s7 = inlined_call_operand.vmem [shape: f32[12,640], index: 7, kind: input, shape index: {}]   ;;  %s18575_s8 = inlined_call_operand.hbm [shape: f32[2,10], index: 8, kind: output, shape index: {0}]   ;;  %s18576_s9 = inlined_call_operand.hbm [shape: f32[2,10], index: 9, kind: output, shape index: {1}]  }
   0x1   :  { %16 = vsyncpa [#allocation14], 0  ;;  %v43_v0 = vld [vmem:[%s18570_s3] sm:$0xf]  ;;  %v45_v1 = vld [vmem:[%s18570_s3 + $0x8] sm:$0xf] }
   0x2   :  { %44 = vst [vmem:[#allocation2] sm:$0xf] %v43_v0  ;;  %46 = vst [vmem:[#allocation2 + $0x4] sm:$0xf] %v45_v1  ;;  %v47_v2 = vld [vmem:[%s18570_s3 + $0x4] sm:$0xf] }
   0x3   :  { %v49_v3 = vld [vmem:[%s18570_s3 + $0xc] sm:$0xff]   ;;  %v53_v4 = vld [vmem:[%s18570_s3 + $0x18] sm:$0xf]  ;;  %48 = vst [vmem:[#allocation2 + $0x8] sm:$0xf] %v47_v2  ;;  %v57_v6 = vld [vmem:[%s18570_s3 + $0x1c] sm:$0xff]  }
   0x4   :  { %50 = vst [vmem:[#allocation2 + $0xc] sm:$0xff] %v49_v3   ;;  %54 = vst [vmem:[#allocation2 + $0x14] sm:$0xf] %v53_v4  ;;  %v55_v5 = vld [vmem:[%s18570_s3 + $0x14] sm:$0xf]  ;;  %v65_v9 = vld [vmem:[%s18570_s3 + $0x2c] sm:$0xff]  }
   0x5   :  { %v61_v7 = vld [vmem:[%s18570_s3 + $0x28] sm:$0xf]  ;;  %56 = vst [vmem:[#allocation2 + $0x18] sm:$0xf] %v55_v5  ;;  %58 = vst [vmem:[#allocation2 + $0x1c] sm:$0xff] %v57_v6   ;;  %v73_v12 = vld [vmem:[%s18570_s3 + $0x3c] sm:$0xff]  }
   0x6   :  { %62 = vst [vmem:[#allocation2 + $0x24] sm:$0xf] %v61_v7  ;;  %v63_v8 = vld [vmem:[%s18570_s3 + $0x24] sm:$0xf]  ;;  %v69_v10 = vld [vmem:[%s18570_s3 + $0x38] sm:$0xf] }
   0x7   :  { %64 = vst [vmem:[#allocation2 + $0x28] sm:$0xf] %v63_v8  ;;  %66 = vst [vmem:[#allocation2 + $0x2c] sm:$0xff] %v65_v9   ;;  %v71_v11 = vld [vmem:[%s18570_s3 + $0x34] sm:$0xf]  ;;  %v81_v15 = vld [vmem:[%s18570_s3 + $0x4c] sm:$0xff]  }
   0x8   :  { %70 = vst [vmem:[#allocation2 + $0x34] sm:$0xf] %v69_v10  ;;  %v77_v13 = vld [vmem:[%s18570_s3 + $0x48] sm:$0xf]  ;;  %72 = vst [vmem:[#allocation2 + $0x38] sm:$0xf] %v71_v11 }
   0x9   :  { %74 = vst [vmem:[#allocation2 + $0x3c] sm:$0xff] %v73_v12   ;;  %78 = vst [vmem:[#allocation2 + $0x44] sm:$0xf] %v77_v13  ;;  %v79_v14 = vld [vmem:[%s18570_s3 + $0x44] sm:$0xf]  ;;  %v89_v18 = vld [vmem:[%s18570_s3 + $0x5c] sm:$0xff]  }
   0xa   :  { %v85_v16 = vld [vmem:[%s18570_s3 + $0x58] sm:$0xf]  ;;  %80 = vst [vmem:[#allocation2 + $0x48] sm:$0xf] %v79_v14  ;;  %82 = vst [vmem:[#allocation2 + $0x4c] sm:$0xff] %v81_v15   ;;  %v97_v21 = vld [vmem:[%s18570_s3 + $0x6c] sm:$0xff]  }
   0xb   :  { %86 = vst [vmem:[#allocation2 + $0x54] sm:$0xf] %v85_v16  ;;  %v87_v17 = vld [vmem:[%s18570_s3 + $0x54] sm:$0xf]  ;;  %v93_v19 = vld [vmem:[%s18570_s3 + $0x68] sm:$0xf] }
   0xc   :  { %88 = vst [vmem:[#allocation2 + $0x58] sm:$0xf] %v87_v17  ;;  %90 = vst [vmem:[#allocation2 + $0x5c] sm:$0xff] %v89_v18   ;;  %v95_v20 = vld [vmem:[%s18570_s3 + $0x64] sm:$0xf]  ;;  %v105_v24 = vld [vmem:[%s18570_s3 + $0x7c] sm:$0xff]  }
   0xd   :  { %94 = vst [vmem:[#allocation2 + $0x64] sm:$0xf] %v93_v19  ;;  %v101_v22 = vld [vmem:[%s18570_s3 + $0x78] sm:$0xf]  ;;  %96 = vst [vmem:[#allocation2 + $0x68] sm:$0xf] %v95_v20 }
   0xe   :  { %98 = vst [vmem:[#allocation2 + $0x6c] sm:$0xff] %v97_v21   ;;  %102 = vst [vmem:[#allocation2 + $0x74] sm:$0xf] %v101_v22  ;;  %v103_v23 = vld [vmem:[%s18570_s3 + $0x74] sm:$0xf]  ;;  %v113_v27 = vld [vmem:[%s18570_s3 + $0x8c] sm:$0xff]  }
   0xf   :  { %v109_v25 = vld [vmem:[%s18570_s3 + $0x88] sm:$0xf]  ;;  %104 = vst [vmem:[#allocation2 + $0x78] sm:$0xf] %v103_v23  ;;  %106 = vst [vmem:[#allocation2 + $0x7c] sm:$0xff] %v105_v24   ;;  %v121_v30 = vld [vmem:[%s18570_s3 + $0x9c] sm:$0xff]  }
  0x10   :  { %110 = vst [vmem:[#allocation2 + $0x84] sm:$0xf] %v109_v25  ;;  %v111_v26 = vld [vmem:[%s18570_s3 + $0x84] sm:$0xf]  ;;  %v117_v28 = vld [vmem:[%s18570_s3 + $0x98] sm:$0xf] }
  0x11   :  { %112 = vst [vmem:[#allocation2 + $0x88] sm:$0xf] %v111_v26  ;;  %114 = vst [vmem:[#allocation2 + $0x8c] sm:$0xff] %v113_v27   ;;  %v119_v29 = vld [vmem:[%s18570_s3 + $0x94] sm:$0xf]  ;;  %v129_v33 = vld [vmem:[%s18570_s3 + $0xac] sm:$0xff]  }
  0x12   :  { %118 = vst [vmem:[#allocation2 + $0x94] sm:$0xf] %v117_v28  ;;  %v125_v31 = vld [vmem:[%s18570_s3 + $0xa8] sm:$0xf]  ;;  %120 = vst [vmem:[#allocation2 + $0x98] sm:$0xf] %v119_v29 }
  0x13   :  { %122 = vst [vmem:[#allocation2 + $0x9c] sm:$0xff] %v121_v30   ;;  %126 = vst [vmem:[#allocation2 + $0xa4] sm:$0xf] %v125_v31  ;;  %v127_v32 = vld [vmem:[%s18570_s3 + $0xa4] sm:$0xf]  ;;  %v137_v36 = vld [vmem:[%s18570_s3 + $0xbc] sm:$0xff]  }
  0x14   :  { %v133_v34 = vld [vmem:[%s18570_s3 + $0xb8] sm:$0xf]  ;;  %128 = vst [vmem:[#allocation2 + $0xa8] sm:$0xf] %v127_v32  ;;  %130 = vst [vmem:[#allocation2 + $0xac] sm:$0xff] %v129_v33   ;;  %v145_v39 = vld [vmem:[%s18570_s3 + $0xcc] sm:$0xff]  }
  0x15   :  { %134 = vst [vmem:[#allocation2 + $0xb4] sm:$0xf] %v133_v34  ;;  %v135_v35 = vld [vmem:[%s18570_s3 + $0xb4] sm:$0xf]  ;;  %v141_v37 = vld [vmem:[%s18570_s3 + $0xc8] sm:$0xf] }
  0x16   :  { %136 = vst [vmem:[#allocation2 + $0xb8] sm:$0xf] %v135_v35  ;;  %138 = vst [vmem:[#allocation2 + $0xbc] sm:$0xff] %v137_v36   ;;  %v143_v38 = vld [vmem:[%s18570_s3 + $0xc4] sm:$0xf]  ;;  %v153_v42 = vld [vmem:[%s18570_s3 + $0xdc] sm:$0xff]  }
  0x17   :  { %142 = vst [vmem:[#allocation2 + $0xc4] sm:$0xf] %v141_v37  ;;  %v149_v40 = vld [vmem:[%s18570_s3 + $0xd8] sm:$0xf]  ;;  %144 = vst [vmem:[#allocation2 + $0xc8] sm:$0xf] %v143_v38 }
  0x18   :  { %146 = vst [vmem:[#allocation2 + $0xcc] sm:$0xff] %v145_v39   ;;  %150 = vst [vmem:[#allocation2 + $0xd4] sm:$0xf] %v149_v40  ;;  %v151_v41 = vld [vmem:[%s18570_s3 + $0xd4] sm:$0xf]  ;;  %v161_v45 = vld [vmem:[%s18570_s3 + $0xec] sm:$0xff]  }
  0x19   :  { %v157_v43 = vld [vmem:[%s18570_s3 + $0xe8] sm:$0xf]  ;;  %152 = vst [vmem:[#allocation2 + $0xd8] sm:$0xf] %v151_v41  ;;  %154 = vst [vmem:[#allocation2 + $0xdc] sm:$0xff] %v153_v42   ;;  %v169_v48 = vld [vmem:[%s18570_s3 + $0xfc] sm:$0xff]  }
  0x1a   :  { %158 = vst [vmem:[#allocation2 + $0xe4] sm:$0xf] %v157_v43  ;;  %v159_v44 = vld [vmem:[%s18570_s3 + $0xe4] sm:$0xf]  ;;  %v165_v46 = vld [vmem:[%s18570_s3 + $0xf8] sm:$0xf] }
  0x1b   :  { %160 = vst [vmem:[#allocation2 + $0xe8] sm:$0xf] %v159_v44  ;;  %162 = vst [vmem:[#allocation2 + $0xec] sm:$0xff] %v161_v45   ;;  %v167_v47 = vld [vmem:[%s18570_s3 + $0xf4] sm:$0xf]  ;;  %v177_v51 = vld [vmem:[%s18570_s3 + $0x10c] sm:$0xff]  }
  0x1c   :  { %166 = vst [vmem:[#allocation2 + $0xf4] sm:$0xf] %v165_v46  ;;  %v173_v49 = vld [vmem:[%s18570_s3 + $0x108] sm:$0xf]  ;;  %168 = vst [vmem:[#allocation2 + $0xf8] sm:$0xf] %v167_v47 }
  0x1d   :  { %170 = vst [vmem:[#allocation2 + $0xfc] sm:$0xff] %v169_v48   ;;  %174 = vst [vmem:[#allocation2 + $0x104] sm:$0xf] %v173_v49  ;;  %v175_v50 = vld [vmem:[%s18570_s3 + $0x104] sm:$0xf]  ;;  %v185_v54 = vld [vmem:[%s18570_s3 + $0x11c] sm:$0xff]  }
  0x1e   :  { %v181_v52 = vld [vmem:[%s18570_s3 + $0x118] sm:$0xf]  ;;  %176 = vst [vmem:[#allocation2 + $0x108] sm:$0xf] %v175_v50  ;;  %178 = vst [vmem:[#allocation2 + $0x10c] sm:$0xff] %v177_v51   ;;  %v193_v57 = vld [vmem:[%s18570_s3 + $0x12c] sm:$0xff]  }
  0x1f   :  { %182 = vst [vmem:[#allocation2 + $0x114] sm:$0xf] %v181_v52  ;;  %v183_v53 = vld [vmem:[%s18570_s3 + $0x114] sm:$0xf]  ;;  %v189_v55 = vld [vmem:[%s18570_s3 + $0x128] sm:$0xf] }
  0x20   :  { %184 = vst [vmem:[#allocation2 + $0x118] sm:$0xf] %v183_v53  ;;  %186 = vst [vmem:[#allocation2 + $0x11c] sm:$0xff] %v185_v54   ;;  %v191_v56 = vld [vmem:[%s18570_s3 + $0x124] sm:$0xf]  ;;  %v201_v60 = vld [vmem:[%s18570_s3 + $0x13c] sm:$0xff]  }
  0x21   :  { %190 = vst [vmem:[#allocation2 + $0x124] sm:$0xf] %v189_v55  ;;  %v197_v58 = vld [vmem:[%s18570_s3 + $0x138] sm:$0xf]  ;;  %192 = vst [vmem:[#allocation2 + $0x128] sm:$0xf] %v191_v56 }
  0x22   :  { %194 = vst [vmem:[#allocation2 + $0x12c] sm:$0xff] %v193_v57   ;;  %198 = vst [vmem:[#allocation2 + $0x134] sm:$0xf] %v197_v58  ;;  %v199_v59 = vld [vmem:[%s18570_s3 + $0x134] sm:$0xf]  ;;  %v209_v63 = vld [vmem:[%s18570_s3 + $0x14c] sm:$0xff]  }
  0x23   :  { %v205_v61 = vld [vmem:[%s18570_s3 + $0x148] sm:$0xf]  ;;  %200 = vst [vmem:[#allocation2 + $0x138] sm:$0xf] %v199_v59  ;;  %202 = vst [vmem:[#allocation2 + $0x13c] sm:$0xff] %v201_v60   ;;  %v217_v2 = vld [vmem:[%s18570_s3 + $0x15c] sm:$0xff]  }
  0x24   :  { %206 = vst [vmem:[#allocation2 + $0x144] sm:$0xf] %v205_v61  ;;  %v207_v62 = vld [vmem:[%s18570_s3 + $0x144] sm:$0xf]  ;;  %v213_v0 = vld [vmem:[%s18570_s3 + $0x158] sm:$0xf] }
  0x25   :  { %208 = vst [vmem:[#allocation2 + $0x148] sm:$0xf] %v207_v62  ;;  %210 = vst [vmem:[#allocation2 + $0x14c] sm:$0xff] %v209_v63   ;;  %v215_v1 = vld [vmem:[%s18570_s3 + $0x154] sm:$0xf]  ;;  %v225_v5 = vld [vmem:[%s18570_s3 + $0x16c] sm:$0xff]  }
  0x26   :  { %214 = vst [vmem:[#allocation2 + $0x154] sm:$0xf] %v213_v0  ;;  %v221_v3 = vld [vmem:[%s18570_s3 + $0x168] sm:$0xf]  ;;  %216 = vst [vmem:[#allocation2 + $0x158] sm:$0xf] %v215_v1 }
  0x27   :  { %218 = vst [vmem:[#allocation2 + $0x15c] sm:$0xff] %v217_v2   ;;  %222 = vst [vmem:[#allocation2 + $0x164] sm:$0xf] %v221_v3  ;;  %v223_v4 = vld [vmem:[%s18570_s3 + $0x164] sm:$0xf]  ;;  %v233_v8 = vld [vmem:[%s18570_s3 + $0x17c] sm:$0xff]  }
  0x28   :  { %v229_v6 = vld [vmem:[%s18570_s3 + $0x178] sm:$0xf]  ;;  %224 = vst [vmem:[#allocation2 + $0x168] sm:$0xf] %v223_v4  ;;  %226 = vst [vmem:[#allocation2 + $0x16c] sm:$0xff] %v225_v5   ;;  %v241_v11 = vld [vmem:[%s18570_s3 + $0x18c] sm:$0xff]  }
  0x29   :  { %230 = vst [vmem:[#allocation2 + $0x174] sm:$0xf] %v229_v6  ;;  %v231_v7 = vld [vmem:[%s18570_s3 + $0x174] sm:$0xf]  ;;  %v237_v9 = vld [vmem:[%s18570_s3 + $0x188] sm:$0xf] }
  0x2a   :  { %232 = vst [vmem:[#allocation2 + $0x178] sm:$0xf] %v231_v7  ;;  %234 = vst [vmem:[#allocation2 + $0x17c] sm:$0xff] %v233_v8   ;;  %v239_v10 = vld [vmem:[%s18570_s3 + $0x184] sm:$0xf]  ;;  %v249_v14 = vld [vmem:[%s18570_s3 + $0x19c] sm:$0xff]  }
  0x2b   :  { %238 = vst [vmem:[#allocation2 + $0x184] sm:$0xf] %v237_v9  ;;  %v245_v12 = vld [vmem:[%s18570_s3 + $0x198] sm:$0xf]  ;;  %240 = vst [vmem:[#allocation2 + $0x188] sm:$0xf] %v239_v10 }
  0x2c   :  { %242 = vst [vmem:[#allocation2 + $0x18c] sm:$0xff] %v241_v11   ;;  %246 = vst [vmem:[#allocation2 + $0x194] sm:$0xf] %v245_v12  ;;  %v247_v13 = vld [vmem:[%s18570_s3 + $0x194] sm:$0xf]  ;;  %v257_v17 = vld [vmem:[%s18570_s3 + $0x1ac] sm:$0xff]  }
  0x2d   :  { %v253_v15 = vld [vmem:[%s18570_s3 + $0x1a8] sm:$0xf]  ;;  %248 = vst [vmem:[#allocation2 + $0x198] sm:$0xf] %v247_v13  ;;  %250 = vst [vmem:[#allocation2 + $0x19c] sm:$0xff] %v249_v14   ;;  %v265_v20 = vld [vmem:[%s18570_s3 + $0x1bc] sm:$0xff]  }
  0x2e   :  { %254 = vst [vmem:[#allocation2 + $0x1a4] sm:$0xf] %v253_v15  ;;  %v255_v16 = vld [vmem:[%s18570_s3 + $0x1a4] sm:$0xf]  ;;  %v261_v18 = vld [vmem:[%s18570_s3 + $0x1b8] sm:$0xf] }
  0x2f   :  { %256 = vst [vmem:[#allocation2 + $0x1a8] sm:$0xf] %v255_v16  ;;  %258 = vst [vmem:[#allocation2 + $0x1ac] sm:$0xff] %v257_v17   ;;  %v263_v19 = vld [vmem:[%s18570_s3 + $0x1b4] sm:$0xf]  ;;  %v273_v23 = vld [vmem:[%s18570_s3 + $0x1cc] sm:$0xff]  }
  0x30   :  { %262 = vst [vmem:[#allocation2 + $0x1b4] sm:$0xf] %v261_v18  ;;  %v269_v21 = vld [vmem:[%s18570_s3 + $0x1c8] sm:$0xf]  ;;  %264 = vst [vmem:[#allocation2 + $0x1b8] sm:$0xf] %v263_v19 }
  0x31   :  { %266 = vst [vmem:[#allocation2 + $0x1bc] sm:$0xff] %v265_v20   ;;  %270 = vst [vmem:[#allocation2 + $0x1c4] sm:$0xf] %v269_v21  ;;  %v271_v22 = vld [vmem:[%s18570_s3 + $0x1c4] sm:$0xf]  ;;  %v281_v26 = vld [vmem:[%s18570_s3 + $0x1dc] sm:$0xff]  }
  0x32   :  { %v277_v24 = vld [vmem:[%s18570_s3 + $0x1d8] sm:$0xf]  ;;  %272 = vst [vmem:[#allocation2 + $0x1c8] sm:$0xf] %v271_v22  ;;  %274 = vst [vmem:[#allocation2 + $0x1cc] sm:$0xff] %v273_v23   ;;  %v289_v29 = vld [vmem:[%s18570_s3 + $0x1ec] sm:$0xff]  }
  0x33   :  { %278 = vst [vmem:[#allocation2 + $0x1d4] sm:$0xf] %v277_v24  ;;  %v279_v25 = vld [vmem:[%s18570_s3 + $0x1d4] sm:$0xf]  ;;  %v285_v27 = vld [vmem:[%s18570_s3 + $0x1e8] sm:$0xf] }
  0x34   :  { %280 = vst [vmem:[#allocation2 + $0x1d8] sm:$0xf] %v279_v25  ;;  %282 = vst [vmem:[#allocation2 + $0x1dc] sm:$0xff] %v281_v26   ;;  %v287_v28 = vld [vmem:[%s18570_s3 + $0x1e4] sm:$0xf]  ;;  %v297_v32 = vld [vmem:[%s18570_s3 + $0x1fc] sm:$0xff]  }
  0x35   :  { %286 = vst [vmem:[#allocation2 + $0x1e4] sm:$0xf] %v285_v27  ;;  %v293_v30 = vld [vmem:[%s18570_s3 + $0x1f8] sm:$0xf]  ;;  %288 = vst [vmem:[#allocation2 + $0x1e8] sm:$0xf] %v287_v28 }
  0x36   :  { %290 = vst [vmem:[#allocation2 + $0x1ec] sm:$0xff] %v289_v29   ;;  %294 = vst [vmem:[#allocation2 + $0x1f4] sm:$0xf] %v293_v30  ;;  %v295_v31 = vld [vmem:[%s18570_s3 + $0x1f4] sm:$0xf]  ;;  %v305_v35 = vld [vmem:[%s18570_s3 + $0x20c] sm:$0xff]  }
  0x37   :  { %v301_v33 = vld [vmem:[%s18570_s3 + $0x208] sm:$0xf]  ;;  %296 = vst [vmem:[#allocation2 + $0x1f8] sm:$0xf] %v295_v31  ;;  %298 = vst [vmem:[#allocation2 + $0x1fc] sm:$0xff] %v297_v32   ;;  %v313_v38 = vld [vmem:[%s18570_s3 + $0x21c] sm:$0xff]  }
  0x38   :  { %302 = vst [vmem:[#allocation2 + $0x204] sm:$0xf] %v301_v33  ;;  %v303_v34 = vld [vmem:[%s18570_s3 + $0x204] sm:$0xf]  ;;  %v309_v36 = vld [vmem:[%s18570_s3 + $0x218] sm:$0xf] }
  0x39   :  { %304 = vst [vmem:[#allocation2 + $0x208] sm:$0xf] %v303_v34  ;;  %306 = vst [vmem:[#allocation2 + $0x20c] sm:$0xff] %v305_v35   ;;  %v311_v37 = vld [vmem:[%s18570_s3 + $0x214] sm:$0xf]  ;;  %v321_v41 = vld [vmem:[%s18570_s3 + $0x22c] sm:$0xff]  }
  0x3a   :  { %310 = vst [vmem:[#allocation2 + $0x214] sm:$0xf] %v309_v36  ;;  %v317_v39 = vld [vmem:[%s18570_s3 + $0x228] sm:$0xf]  ;;  %312 = vst [vmem:[#allocation2 + $0x218] sm:$0xf] %v311_v37 }
  0x3b   :  { %314 = vst [vmem:[#allocation2 + $0x21c] sm:$0xff] %v313_v38   ;;  %318 = vst [vmem:[#allocation2 + $0x224] sm:$0xf] %v317_v39  ;;  %v319_v40 = vld [vmem:[%s18570_s3 + $0x224] sm:$0xf]  ;;  %v329_v44 = vld [vmem:[%s18570_s3 + $0x23c] sm:$0xff]  }
  0x3c   :  { %v325_v42 = vld [vmem:[%s18570_s3 + $0x238] sm:$0xf]  ;;  %320 = vst [vmem:[#allocation2 + $0x228] sm:$0xf] %v319_v40  ;;  %322 = vst [vmem:[#allocation2 + $0x22c] sm:$0xff] %v321_v41   ;;  %v337_v47 = vld [vmem:[%s18570_s3 + $0x24c] sm:$0xff]  }
  0x3d   :  { %326 = vst [vmem:[#allocation2 + $0x234] sm:$0xf] %v325_v42  ;;  %v327_v43 = vld [vmem:[%s18570_s3 + $0x234] sm:$0xf]  ;;  %v333_v45 = vld [vmem:[%s18570_s3 + $0x248] sm:$0xf] }
  0x3e   :  { %328 = vst [vmem:[#allocation2 + $0x238] sm:$0xf] %v327_v43  ;;  %330 = vst [vmem:[#allocation2 + $0x23c] sm:$0xff] %v329_v44   ;;  %v335_v46 = vld [vmem:[%s18570_s3 + $0x244] sm:$0xf]  ;;  %v345_v50 = vld [vmem:[%s18570_s3 + $0x25c] sm:$0xff]  }
  0x3f   :  { %334 = vst [vmem:[#allocation2 + $0x244] sm:$0xf] %v333_v45  ;;  %v341_v48 = vld [vmem:[%s18570_s3 + $0x258] sm:$0xf]  ;;  %336 = vst [vmem:[#allocation2 + $0x248] sm:$0xf] %v335_v46 }
  0x40   :  { %338 = vst [vmem:[#allocation2 + $0x24c] sm:$0xff] %v337_v47   ;;  %342 = vst [vmem:[#allocation2 + $0x254] sm:$0xf] %v341_v48  ;;  %v343_v49 = vld [vmem:[%s18570_s3 + $0x254] sm:$0xf]  ;;  %v353_v53 = vld [vmem:[%s18570_s3 + $0x26c] sm:$0xff]  }
  0x41   :  { %v349_v51 = vld [vmem:[%s18570_s3 + $0x268] sm:$0xf]  ;;  %344 = vst [vmem:[#allocation2 + $0x258] sm:$0xf] %v343_v49  ;;  %346 = vst [vmem:[#allocation2 + $0x25c] sm:$0xff] %v345_v50   ;;  %v361_v56 = vld [vmem:[%s18570_s3 + $0x27c] sm:$0xff]  }
  0x42   :  { %350 = vst [vmem:[#allocation2 + $0x264] sm:$0xf] %v349_v51  ;;  %v351_v52 = vld [vmem:[%s18570_s3 + $0x264] sm:$0xf]  ;;  %v357_v54 = vld [vmem:[%s18570_s3 + $0x278] sm:$0xf] }
  0x43   :  { %352 = vst [vmem:[#allocation2 + $0x268] sm:$0xf] %v351_v52  ;;  %354 = vst [vmem:[#allocation2 + $0x26c] sm:$0xff] %v353_v53   ;;  %v359_v55 = vld [vmem:[%s18570_s3 + $0x274] sm:$0xf]  ;;  %v369_v59 = vld [vmem:[%s18570_s3 + $0x28c] sm:$0xff]  }
  0x44   :  { %358 = vst [vmem:[#allocation2 + $0x274] sm:$0xf] %v357_v54  ;;  %v365_v57 = vld [vmem:[%s18570_s3 + $0x288] sm:$0xf]  ;;  %360 = vst [vmem:[#allocation2 + $0x278] sm:$0xf] %v359_v55 }
  0x45   :  { %362 = vst [vmem:[#allocation2 + $0x27c] sm:$0xff] %v361_v56   ;;  %366 = vst [vmem:[#allocation2 + $0x284] sm:$0xf] %v365_v57  ;;  %v367_v58 = vld [vmem:[%s18570_s3 + $0x284] sm:$0xf]  ;;  %v377_v62 = vld [vmem:[%s18570_s3 + $0x29c] sm:$0xff]  }
  0x46   :  { %v373_v60 = vld [vmem:[%s18570_s3 + $0x298] sm:$0xf]  ;;  %368 = vst [vmem:[#allocation2 + $0x288] sm:$0xf] %v367_v58  ;;  %370 = vst [vmem:[#allocation2 + $0x28c] sm:$0xff] %v369_v59   ;;  %v385_v1 = vld [vmem:[%s18570_s3 + $0x2ac] sm:$0xff]  }
  0x47   :  { %374 = vst [vmem:[#allocation2 + $0x294] sm:$0xf] %v373_v60  ;;  %v375_v61 = vld [vmem:[%s18570_s3 + $0x294] sm:$0xf]  ;;  %v381_v63 = vld [vmem:[%s18570_s3 + $0x2a8] sm:$0xf] }
  0x48   :  { %376 = vst [vmem:[#allocation2 + $0x298] sm:$0xf] %v375_v61  ;;  %378 = vst [vmem:[#allocation2 + $0x29c] sm:$0xff] %v377_v62   ;;  %v383_v0 = vld [vmem:[%s18570_s3 + $0x2a4] sm:$0xf]  ;;  %v393_v4 = vld [vmem:[%s18570_s3 + $0x2bc] sm:$0xff]  }
  0x49   :  { %382 = vst [vmem:[#allocation2 + $0x2a4] sm:$0xf] %v381_v63  ;;  %v389_v2 = vld [vmem:[%s18570_s3 + $0x2b8] sm:$0xf]  ;;  %384 = vst [vmem:[#allocation2 + $0x2a8] sm:$0xf] %v383_v0 }
  0x4a   :  { %386 = vst [vmem:[#allocation2 + $0x2ac] sm:$0xff] %v385_v1   ;;  %390 = vst [vmem:[#allocation2 + $0x2b4] sm:$0xf] %v389_v2  ;;  %v391_v3 = vld [vmem:[%s18570_s3 + $0x2b4] sm:$0xf]  ;;  %v401_v7 = vld [vmem:[%s18570_s3 + $0x2cc] sm:$0xff]  }
  0x4b   :  { %v397_v5 = vld [vmem:[%s18570_s3 + $0x2c8] sm:$0xf]  ;;  %392 = vst [vmem:[#allocation2 + $0x2b8] sm:$0xf] %v391_v3  ;;  %394 = vst [vmem:[#allocation2 + $0x2bc] sm:$0xff] %v393_v4   ;;  %v409_v10 = vld [vmem:[%s18570_s3 + $0x2dc] sm:$0xff]  }
  0x4c   :  { %398 = vst [vmem:[#allocation2 + $0x2c4] sm:$0xf] %v397_v5  ;;  %v399_v6 = vld [vmem:[%s18570_s3 + $0x2c4] sm:$0xf]  ;;  %v405_v8 = vld [vmem:[%s18570_s3 + $0x2d8] sm:$0xf] }
  0x4d   :  { %400 = vst [vmem:[#allocation2 + $0x2c8] sm:$0xf] %v399_v6  ;;  %402 = vst [vmem:[#allocation2 + $0x2cc] sm:$0xff] %v401_v7   ;;  %v407_v9 = vld [vmem:[%s18570_s3 + $0x2d4] sm:$0xf]  ;;  %v417_v13 = vld [vmem:[%s18570_s3 + $0x2ec] sm:$0xff]  }
  0x4e   :  { %406 = vst [vmem:[#allocation2 + $0x2d4] sm:$0xf] %v405_v8  ;;  %v413_v11 = vld [vmem:[%s18570_s3 + $0x2e8] sm:$0xf]  ;;  %408 = vst [vmem:[#allocation2 + $0x2d8] sm:$0xf] %v407_v9 }
  0x4f   :  { %410 = vst [vmem:[#allocation2 + $0x2dc] sm:$0xff] %v409_v10   ;;  %414 = vst [vmem:[#allocation2 + $0x2e4] sm:$0xf] %v413_v11  ;;  %v415_v12 = vld [vmem:[%s18570_s3 + $0x2e4] sm:$0xf]  ;;  %v425_v16 = vld [vmem:[%s18570_s3 + $0x2fc] sm:$0xff]  }
  0x50   :  { %v421_v14 = vld [vmem:[%s18570_s3 + $0x2f8] sm:$0xf]  ;;  %416 = vst [vmem:[#allocation2 + $0x2e8] sm:$0xf] %v415_v12  ;;  %418 = vst [vmem:[#allocation2 + $0x2ec] sm:$0xff] %v417_v13   ;;  %v433_v19 = vld [vmem:[%s18570_s3 + $0x30c] sm:$0xff]  }
  0x51   :  { %422 = vst [vmem:[#allocation2 + $0x2f4] sm:$0xf] %v421_v14  ;;  %v423_v15 = vld [vmem:[%s18570_s3 + $0x2f4] sm:$0xf]  ;;  %v429_v17 = vld [vmem:[%s18570_s3 + $0x308] sm:$0xf] }
  0x52   :  { %424 = vst [vmem:[#allocation2 + $0x2f8] sm:$0xf] %v423_v15  ;;  %426 = vst [vmem:[#allocation2 + $0x2fc] sm:$0xff] %v425_v16   ;;  %v431_v18 = vld [vmem:[%s18570_s3 + $0x304] sm:$0xf]  ;;  %v441_v22 = vld [vmem:[%s18570_s3 + $0x31c] sm:$0xff]  }
  0x53   :  { %430 = vst [vmem:[#allocation2 + $0x304] sm:$0xf] %v429_v17  ;;  %v437_v20 = vld [vmem:[%s18570_s3 + $0x318] sm:$0xf]  ;;  %432 = vst [vmem:[#allocation2 + $0x308] sm:$0xf] %v431_v18 }
  0x54   :  { %434 = vst [vmem:[#allocation2 + $0x30c] sm:$0xff] %v433_v19   ;;  %438 = vst [vmem:[#allocation2 + $0x314] sm:$0xf] %v437_v20  ;;  %v439_v21 = vld [vmem:[%s18570_s3 + $0x314] sm:$0xf]  ;;  %v449_v25 = vld [vmem:[%s18570_s3 + $0x32c] sm:$0xff]  }
  0x55   :  { %v445_v23 = vld [vmem:[%s18570_s3 + $0x328] sm:$0xf]  ;;  %440 = vst [vmem:[#allocation2 + $0x318] sm:$0xf] %v439_v21  ;;  %442 = vst [vmem:[#allocation2 + $0x31c] sm:$0xff] %v441_v22   ;;  %v457_v28 = vld [vmem:[%s18570_s3 + $0x33c] sm:$0xff]  }
  0x56   :  { %446 = vst [vmem:[#allocation2 + $0x324] sm:$0xf] %v445_v23  ;;  %v447_v24 = vld [vmem:[%s18570_s3 + $0x324] sm:$0xf]  ;;  %v453_v26 = vld [vmem:[%s18570_s3 + $0x338] sm:$0xf] }
  0x57   :  { %448 = vst [vmem:[#allocation2 + $0x328] sm:$0xf] %v447_v24  ;;  %450 = vst [vmem:[#allocation2 + $0x32c] sm:$0xff] %v449_v25   ;;  %v455_v27 = vld [vmem:[%s18570_s3 + $0x334] sm:$0xf]  ;;  %v465_v31 = vld [vmem:[%s18570_s3 + $0x34c] sm:$0xff]  }
  0x58   :  { %454 = vst [vmem:[#allocation2 + $0x334] sm:$0xf] %v453_v26  ;;  %v461_v29 = vld [vmem:[%s18570_s3 + $0x348] sm:$0xf]  ;;  %456 = vst [vmem:[#allocation2 + $0x338] sm:$0xf] %v455_v27 }
  0x59   :  { %458 = vst [vmem:[#allocation2 + $0x33c] sm:$0xff] %v457_v28   ;;  %462 = vst [vmem:[#allocation2 + $0x344] sm:$0xf] %v461_v29  ;;  %v463_v30 = vld [vmem:[%s18570_s3 + $0x344] sm:$0xf]  ;;  %v473_v34 = vld [vmem:[%s18570_s3 + $0x35c] sm:$0xff]  }
  0x5a   :  { %v469_v32 = vld [vmem:[%s18570_s3 + $0x358] sm:$0xf]  ;;  %464 = vst [vmem:[#allocation2 + $0x348] sm:$0xf] %v463_v30  ;;  %466 = vst [vmem:[#allocation2 + $0x34c] sm:$0xff] %v465_v31   ;;  %v481_v37 = vld [vmem:[%s18570_s3 + $0x36c] sm:$0xff]  }
  0x5b   :  { %470 = vst [vmem:[#allocation2 + $0x354] sm:$0xf] %v469_v32  ;;  %v471_v33 = vld [vmem:[%s18570_s3 + $0x354] sm:$0xf]  ;;  %v477_v35 = vld [vmem:[%s18570_s3 + $0x368] sm:$0xf] }
  0x5c   :  { %472 = vst [vmem:[#allocation2 + $0x358] sm:$0xf] %v471_v33  ;;  %474 = vst [vmem:[#allocation2 + $0x35c] sm:$0xff] %v473_v34   ;;  %v479_v36 = vld [vmem:[%s18570_s3 + $0x364] sm:$0xf]  ;;  %v489_v40 = vld [vmem:[%s18570_s3 + $0x37c] sm:$0xff]  }
  0x5d   :  { %478 = vst [vmem:[#allocation2 + $0x364] sm:$0xf] %v477_v35  ;;  %v485_v38 = vld [vmem:[%s18570_s3 + $0x378] sm:$0xf]  ;;  %480 = vst [vmem:[#allocation2 + $0x368] sm:$0xf] %v479_v36 }
  0x5e   :  { %482 = vst [vmem:[#allocation2 + $0x36c] sm:$0xff] %v481_v37   ;;  %486 = vst [vmem:[#allocation2 + $0x374] sm:$0xf] %v485_v38  ;;  %v487_v39 = vld [vmem:[%s18570_s3 + $0x374] sm:$0xf]  ;;  %v497_v43 = vld [vmem:[%s18570_s3 + $0x38c] sm:$0xff]  }
  0x5f   :  { %v493_v41 = vld [vmem:[%s18570_s3 + $0x388] sm:$0xf]  ;;  %488 = vst [vmem:[#allocation2 + $0x378] sm:$0xf] %v487_v39  ;;  %490 = vst [vmem:[#allocation2 + $0x37c] sm:$0xff] %v489_v40   ;;  %v505_v46 = vld [vmem:[%s18570_s3 + $0x39c] sm:$0xff]  }
  0x60   :  { %494 = vst [vmem:[#allocation2 + $0x384] sm:$0xf] %v493_v41  ;;  %v495_v42 = vld [vmem:[%s18570_s3 + $0x384] sm:$0xf]  ;;  %v501_v44 = vld [vmem:[%s18570_s3 + $0x398] sm:$0xf] }
  0x61   :  { %496 = vst [vmem:[#allocation2 + $0x388] sm:$0xf] %v495_v42  ;;  %498 = vst [vmem:[#allocation2 + $0x38c] sm:$0xff] %v497_v43   ;;  %v503_v45 = vld [vmem:[%s18570_s3 + $0x394] sm:$0xf]  ;;  %v513_v49 = vld [vmem:[%s18570_s3 + $0x3ac] sm:$0xff]  }
  0x62   :  { %502 = vst [vmem:[#allocation2 + $0x394] sm:$0xf] %v501_v44  ;;  %v509_v47 = vld [vmem:[%s18570_s3 + $0x3a8] sm:$0xf]  ;;  %504 = vst [vmem:[#allocation2 + $0x398] sm:$0xf] %v503_v45 }
  0x63   :  { %506 = vst [vmem:[#allocation2 + $0x39c] sm:$0xff] %v505_v46   ;;  %510 = vst [vmem:[#allocation2 + $0x3a4] sm:$0xf] %v509_v47  ;;  %v511_v48 = vld [vmem:[%s18570_s3 + $0x3a4] sm:$0xf]  ;;  %v521_v52 = vld [vmem:[%s18570_s3 + $0x3bc] sm:$0xff]  }
  0x64   :  { %v517_v50 = vld [vmem:[%s18570_s3 + $0x3b8] sm:$0xf]  ;;  %512 = vst [vmem:[#allocation2 + $0x3a8] sm:$0xf] %v511_v48  ;;  %514 = vst [vmem:[#allocation2 + $0x3ac] sm:$0xff] %v513_v49   ;;  %v529_v55 = vld [vmem:[%s18570_s3 + $0x3cc] sm:$0xff]  }
  0x65   :  { %518 = vst [vmem:[#allocation2 + $0x3b4] sm:$0xf] %v517_v50  ;;  %v519_v51 = vld [vmem:[%s18570_s3 + $0x3b4] sm:$0xf]  ;;  %v525_v53 = vld [vmem:[%s18570_s3 + $0x3c8] sm:$0xf] }
  0x66   :  { %520 = vst [vmem:[#allocation2 + $0x3b8] sm:$0xf] %v519_v51  ;;  %522 = vst [vmem:[#allocation2 + $0x3bc] sm:$0xff] %v521_v52   ;;  %v527_v54 = vld [vmem:[%s18570_s3 + $0x3c4] sm:$0xf]  ;;  %v537_v58 = vld [vmem:[%s18570_s3 + $0x3dc] sm:$0xff]  }
  0x67   :  { %526 = vst [vmem:[#allocation2 + $0x3c4] sm:$0xf] %v525_v53  ;;  %v533_v56 = vld [vmem:[%s18570_s3 + $0x3d8] sm:$0xf]  ;;  %528 = vst [vmem:[#allocation2 + $0x3c8] sm:$0xf] %v527_v54 }
  0x68   :  { %530 = vst [vmem:[#allocation2 + $0x3cc] sm:$0xff] %v529_v55   ;;  %534 = vst [vmem:[#allocation2 + $0x3d4] sm:$0xf] %v533_v56  ;;  %v535_v57 = vld [vmem:[%s18570_s3 + $0x3d4] sm:$0xf]  ;;  %v545_v61 = vld [vmem:[%s18570_s3 + $0x3ec] sm:$0xff]  }
  0x69   :  { %v541_v59 = vld [vmem:[%s18570_s3 + $0x3e8] sm:$0xf]  ;;  %536 = vst [vmem:[#allocation2 + $0x3d8] sm:$0xf] %v535_v57  ;;  %538 = vst [vmem:[#allocation2 + $0x3dc] sm:$0xff] %v537_v58   ;;  %v553_v0 = vld [vmem:[%s18570_s3 + $0x3fc] sm:$0xff]  }
  0x6a   :  { %542 = vst [vmem:[#allocation2 + $0x3e4] sm:$0xf] %v541_v59  ;;  %v543_v60 = vld [vmem:[%s18570_s3 + $0x3e4] sm:$0xf]  ;;  %v549_v62 = vld [vmem:[%s18570_s3 + $0x3f8] sm:$0xf] }
  0x6b   :  { %544 = vst [vmem:[#allocation2 + $0x3e8] sm:$0xf] %v543_v60  ;;  %546 = vst [vmem:[#allocation2 + $0x3ec] sm:$0xff] %v545_v61   ;;  %v551_v63 = vld [vmem:[%s18570_s3 + $0x3f4] sm:$0xf]  ;;  %v561_v3 = vld [vmem:[%s18570_s3 + $0x40c] sm:$0xff]  }
  0x6c   :  { %550 = vst [vmem:[#allocation2 + $0x3f4] sm:$0xf] %v549_v62  ;;  %v557_v1 = vld [vmem:[%s18570_s3 + $0x408] sm:$0xf]  ;;  %552 = vst [vmem:[#allocation2 + $0x3f8] sm:$0xf] %v551_v63 }
  0x6d   :  { %554 = vst [vmem:[#allocation2 + $0x3fc] sm:$0xff] %v553_v0   ;;  %558 = vst [vmem:[#allocation2 + $0x404] sm:$0xf] %v557_v1  ;;  %v559_v2 = vld [vmem:[%s18570_s3 + $0x404] sm:$0xf]  ;;  %v569_v6 = vld [vmem:[%s18570_s3 + $0x41c] sm:$0xff]  }
  0x6e   :  { %v565_v4 = vld [vmem:[%s18570_s3 + $0x418] sm:$0xf]  ;;  %560 = vst [vmem:[#allocation2 + $0x408] sm:$0xf] %v559_v2  ;;  %562 = vst [vmem:[#allocation2 + $0x40c] sm:$0xff] %v561_v3   ;;  %v577_v9 = vld [vmem:[%s18570_s3 + $0x42c] sm:$0xff]  }
  0x6f   :  { %566 = vst [vmem:[#allocation2 + $0x414] sm:$0xf] %v565_v4  ;;  %v567_v5 = vld [vmem:[%s18570_s3 + $0x414] sm:$0xf]  ;;  %v573_v7 = vld [vmem:[%s18570_s3 + $0x428] sm:$0xf] }
  0x70   :  { %568 = vst [vmem:[#allocation2 + $0x418] sm:$0xf] %v567_v5  ;;  %570 = vst [vmem:[#allocation2 + $0x41c] sm:$0xff] %v569_v6   ;;  %v575_v8 = vld [vmem:[%s18570_s3 + $0x424] sm:$0xf]  ;;  %v585_v12 = vld [vmem:[%s18570_s3 + $0x43c] sm:$0xff]  }
  0x71   :  { %574 = vst [vmem:[#allocation2 + $0x424] sm:$0xf] %v573_v7  ;;  %v581_v10 = vld [vmem:[%s18570_s3 + $0x438] sm:$0xf]  ;;  %576 = vst [vmem:[#allocation2 + $0x428] sm:$0xf] %v575_v8 }
  0x72   :  { %578 = vst [vmem:[#allocation2 + $0x42c] sm:$0xff] %v577_v9   ;;  %582 = vst [vmem:[#allocation2 + $0x434] sm:$0xf] %v581_v10  ;;  %v583_v11 = vld [vmem:[%s18570_s3 + $0x434] sm:$0xf]  ;;  %v593_v15 = vld [vmem:[%s18570_s3 + $0x44c] sm:$0xff]  }
  0x73   :  { %v589_v13 = vld [vmem:[%s18570_s3 + $0x448] sm:$0xf]  ;;  %584 = vst [vmem:[#allocation2 + $0x438] sm:$0xf] %v583_v11  ;;  %586 = vst [vmem:[#allocation2 + $0x43c] sm:$0xff] %v585_v12   ;;  %v601_v18 = vld [vmem:[%s18570_s3 + $0x45c] sm:$0xff]  }
  0x74   :  { %590 = vst [vmem:[#allocation2 + $0x444] sm:$0xf] %v589_v13  ;;  %v591_v14 = vld [vmem:[%s18570_s3 + $0x444] sm:$0xf]  ;;  %v597_v16 = vld [vmem:[%s18570_s3 + $0x458] sm:$0xf] }
  0x75   :  { %592 = vst [vmem:[#allocation2 + $0x448] sm:$0xf] %v591_v14  ;;  %594 = vst [vmem:[#allocation2 + $0x44c] sm:$0xff] %v593_v15   ;;  %v599_v17 = vld [vmem:[%s18570_s3 + $0x454] sm:$0xf]  ;;  %v609_v21 = vld [vmem:[%s18570_s3 + $0x46c] sm:$0xff]  }
  0x76   :  { %598 = vst [vmem:[#allocation2 + $0x454] sm:$0xf] %v597_v16  ;;  %v605_v19 = vld [vmem:[%s18570_s3 + $0x468] sm:$0xf]  ;;  %600 = vst [vmem:[#allocation2 + $0x458] sm:$0xf] %v599_v17 }
  0x77   :  { %602 = vst [vmem:[#allocation2 + $0x45c] sm:$0xff] %v601_v18   ;;  %606 = vst [vmem:[#allocation2 + $0x464] sm:$0xf] %v605_v19  ;;  %v607_v20 = vld [vmem:[%s18570_s3 + $0x464] sm:$0xf] }
  0x78   :  { %v613_v22 = vld [vmem:[%s18570_s3 + $0x478] sm:$0xf]  ;;  %608 = vst [vmem:[#allocation2 + $0x468] sm:$0xf] %v607_v20  ;;  %610 = vst [vmem:[#allocation2 + $0x46c] sm:$0xff] %v609_v21  }
  0x79   :  { %614 = vst [vmem:[#allocation2 + $0x474] sm:$0xf] %v613_v22  ;;  %v615_v23 = vld [vmem:[%s18570_s3 + $0x474] sm:$0xf]  ;;  %v617_v24 = vld [vmem:[%s18570_s3 + $0x47c] sm:$0xf] }
  0x7a   :  { %616 = vst [vmem:[#allocation2 + $0x478] sm:$0xf] %v615_v23  ;;  %618 = vst [vmem:[#allocation2 + $0x47c] sm:$0xf] %v617_v24 }
  0x7b   :  { %1225 = vsyncadd [#allocation6], 18432  ;;  %v1244_v25 = vld [vmem:[%s18571_s4] sm:$0xf]  ;;  %v1246_v26 = vld [vmem:[%s18571_s4 + $0x8] sm:$0xf] }
  0x7c   :  { %1245 = vst [vmem:[#allocation3] sm:$0xf] %v1244_v25  ;;  %1247 = vst [vmem:[#allocation3 + $0x4] sm:$0xf] %v1246_v26  ;;  %v1248_v27 = vld [vmem:[%s18571_s4 + $0x4] sm:$0xf] }
  0x7d   :  { %v1250_v28 = vld [vmem:[%s18571_s4 + $0xc] sm:$0xff]   ;;  %v1254_v29 = vld [vmem:[%s18571_s4 + $0x18] sm:$0xf]  ;;  %1249 = vst [vmem:[#allocation3 + $0x8] sm:$0xf] %v1248_v27  ;;  %v1258_v31 = vld [vmem:[%s18571_s4 + $0x1c] sm:$0xff]  }
  0x7e   :  { %1251 = vst [vmem:[#allocation3 + $0xc] sm:$0xff] %v1250_v28   ;;  %1255 = vst [vmem:[#allocation3 + $0x14] sm:$0xf] %v1254_v29  ;;  %v1256_v30 = vld [vmem:[%s18571_s4 + $0x14] sm:$0xf]  ;;  %v1266_v34 = vld [vmem:[%s18571_s4 + $0x2c] sm:$0xff]  }
  0x7f   :  { %v1262_v32 = vld [vmem:[%s18571_s4 + $0x28] sm:$0xf]  ;;  %1257 = vst [vmem:[#allocation3 + $0x18] sm:$0xf] %v1256_v30  ;;  %1259 = vst [vmem:[#allocation3 + $0x1c] sm:$0xff] %v1258_v31   ;;  %v1274_v37 = vld [vmem:[%s18571_s4 + $0x3c] sm:$0xff]  }
  0x80   :  { %1263 = vst [vmem:[#allocation3 + $0x24] sm:$0xf] %v1262_v32  ;;  %v1264_v33 = vld [vmem:[%s18571_s4 + $0x24] sm:$0xf]  ;;  %v1270_v35 = vld [vmem:[%s18571_s4 + $0x38] sm:$0xf] }
  0x81   :  { %1265 = vst [vmem:[#allocation3 + $0x28] sm:$0xf] %v1264_v33  ;;  %1267 = vst [vmem:[#allocation3 + $0x2c] sm:$0xff] %v1266_v34   ;;  %v1272_v36 = vld [vmem:[%s18571_s4 + $0x34] sm:$0xf]  ;;  %v1282_v40 = vld [vmem:[%s18571_s4 + $0x4c] sm:$0xff]  }
  0x82   :  { %1271 = vst [vmem:[#allocation3 + $0x34] sm:$0xf] %v1270_v35  ;;  %v1278_v38 = vld [vmem:[%s18571_s4 + $0x48] sm:$0xf]  ;;  %1273 = vst [vmem:[#allocation3 + $0x38] sm:$0xf] %v1272_v36 }
  0x83   :  { %1275 = vst [vmem:[#allocation3 + $0x3c] sm:$0xff] %v1274_v37   ;;  %1279 = vst [vmem:[#allocation3 + $0x44] sm:$0xf] %v1278_v38  ;;  %v1280_v39 = vld [vmem:[%s18571_s4 + $0x44] sm:$0xf]  ;;  %v1290_v43 = vld [vmem:[%s18571_s4 + $0x5c] sm:$0xff]  }
  0x84   :  { %v1286_v41 = vld [vmem:[%s18571_s4 + $0x58] sm:$0xf]  ;;  %1281 = vst [vmem:[#allocation3 + $0x48] sm:$0xf] %v1280_v39  ;;  %1283 = vst [vmem:[#allocation3 + $0x4c] sm:$0xff] %v1282_v40   ;;  %v1298_v46 = vld [vmem:[%s18571_s4 + $0x6c] sm:$0xff]  }
  0x85   :  { %1287 = vst [vmem:[#allocation3 + $0x54] sm:$0xf] %v1286_v41  ;;  %v1288_v42 = vld [vmem:[%s18571_s4 + $0x54] sm:$0xf]  ;;  %v1294_v44 = vld [vmem:[%s18571_s4 + $0x68] sm:$0xf] }
  0x86   :  { %1289 = vst [vmem:[#allocation3 + $0x58] sm:$0xf] %v1288_v42  ;;  %1291 = vst [vmem:[#allocation3 + $0x5c] sm:$0xff] %v1290_v43   ;;  %v1296_v45 = vld [vmem:[%s18571_s4 + $0x64] sm:$0xf]  ;;  %v1306_v49 = vld [vmem:[%s18571_s4 + $0x7c] sm:$0xff]  }
  0x87   :  { %1295 = vst [vmem:[#allocation3 + $0x64] sm:$0xf] %v1294_v44  ;;  %v1302_v47 = vld [vmem:[%s18571_s4 + $0x78] sm:$0xf]  ;;  %1297 = vst [vmem:[#allocation3 + $0x68] sm:$0xf] %v1296_v45 }
  0x88   :  { %1299 = vst [vmem:[#allocation3 + $0x6c] sm:$0xff] %v1298_v46   ;;  %1303 = vst [vmem:[#allocation3 + $0x74] sm:$0xf] %v1302_v47  ;;  %v1304_v48 = vld [vmem:[%s18571_s4 + $0x74] sm:$0xf]  ;;  %v1314_v52 = vld [vmem:[%s18571_s4 + $0x8c] sm:$0xff]  }
  0x89   :  { %v1310_v50 = vld [vmem:[%s18571_s4 + $0x88] sm:$0xf]  ;;  %1305 = vst [vmem:[#allocation3 + $0x78] sm:$0xf] %v1304_v48  ;;  %1307 = vst [vmem:[#allocation3 + $0x7c] sm:$0xff] %v1306_v49   ;;  %v1322_v55 = vld [vmem:[%s18571_s4 + $0x9c] sm:$0xff]  }
  0x8a   :  { %1311 = vst [vmem:[#allocation3 + $0x84] sm:$0xf] %v1310_v50  ;;  %v1312_v51 = vld [vmem:[%s18571_s4 + $0x84] sm:$0xf]  ;;  %v1318_v53 = vld [vmem:[%s18571_s4 + $0x98] sm:$0xf] }
  0x8b   :  { %1313 = vst [vmem:[#allocation3 + $0x88] sm:$0xf] %v1312_v51  ;;  %1315 = vst [vmem:[#allocation3 + $0x8c] sm:$0xff] %v1314_v52   ;;  %v1320_v54 = vld [vmem:[%s18571_s4 + $0x94] sm:$0xf]  ;;  %v1330_v58 = vld [vmem:[%s18571_s4 + $0xac] sm:$0xff]  }
  0x8c   :  { %1319 = vst [vmem:[#allocation3 + $0x94] sm:$0xf] %v1318_v53  ;;  %v1326_v56 = vld [vmem:[%s18571_s4 + $0xa8] sm:$0xf]  ;;  %1321 = vst [vmem:[#allocation3 + $0x98] sm:$0xf] %v1320_v54 }
  0x8d   :  { %1323 = vst [vmem:[#allocation3 + $0x9c] sm:$0xff] %v1322_v55   ;;  %1327 = vst [vmem:[#allocation3 + $0xa4] sm:$0xf] %v1326_v56  ;;  %v1328_v57 = vld [vmem:[%s18571_s4 + $0xa4] sm:$0xf]  ;;  %v1338_v61 = vld [vmem:[%s18571_s4 + $0xbc] sm:$0xff]  }
  0x8e   :  { %v1334_v59 = vld [vmem:[%s18571_s4 + $0xb8] sm:$0xf]  ;;  %1329 = vst [vmem:[#allocation3 + $0xa8] sm:$0xf] %v1328_v57  ;;  %1331 = vst [vmem:[#allocation3 + $0xac] sm:$0xff] %v1330_v58   ;;  %v1346_v0 = vld [vmem:[%s18571_s4 + $0xcc] sm:$0xff]  }
  0x8f   :  { %1335 = vst [vmem:[#allocation3 + $0xb4] sm:$0xf] %v1334_v59  ;;  %v1336_v60 = vld [vmem:[%s18571_s4 + $0xb4] sm:$0xf]  ;;  %v1342_v62 = vld [vmem:[%s18571_s4 + $0xc8] sm:$0xf] }
  0x90   :  { %1337 = vst [vmem:[#allocation3 + $0xb8] sm:$0xf] %v1336_v60  ;;  %1339 = vst [vmem:[#allocation3 + $0xbc] sm:$0xff] %v1338_v61   ;;  %v1344_v63 = vld [vmem:[%s18571_s4 + $0xc4] sm:$0xf]  ;;  %v1354_v3 = vld [vmem:[%s18571_s4 + $0xdc] sm:$0xff]  }
  0x91   :  { %1343 = vst [vmem:[#allocation3 + $0xc4] sm:$0xf] %v1342_v62  ;;  %v1350_v1 = vld [vmem:[%s18571_s4 + $0xd8] sm:$0xf]  ;;  %1345 = vst [vmem:[#allocation3 + $0xc8] sm:$0xf] %v1344_v63 }
  0x92   :  { %1347 = vst [vmem:[#allocation3 + $0xcc] sm:$0xff] %v1346_v0   ;;  %1351 = vst [vmem:[#allocation3 + $0xd4] sm:$0xf] %v1350_v1  ;;  %v1352_v2 = vld [vmem:[%s18571_s4 + $0xd4] sm:$0xf]  ;;  %v1362_v6 = vld [vmem:[%s18571_s4 + $0xec] sm:$0xff]  }
  0x93   :  { %v1358_v4 = vld [vmem:[%s18571_s4 + $0xe8] sm:$0xf]  ;;  %1353 = vst [vmem:[#allocation3 + $0xd8] sm:$0xf] %v1352_v2  ;;  %1355 = vst [vmem:[#allocation3 + $0xdc] sm:$0xff] %v1354_v3  }
  0x94   :  { %1359 = vst [vmem:[#allocation3 + $0xe4] sm:$0xf] %v1358_v4  ;;  %v1360_v5 = vld [vmem:[%s18571_s4 + $0xe4] sm:$0xf]  ;;  %v1366_v7 = vld [vmem:[%s18571_s4 + $0xf8] sm:$0xf] }
  0x95   :  { %1361 = vst [vmem:[#allocation3 + $0xe8] sm:$0xf] %v1360_v5  ;;  %1363 = vst [vmem:[#allocation3 + $0xec] sm:$0xff] %v1362_v6   ;;  %v1368_v8 = vld [vmem:[%s18571_s4 + $0xf4] sm:$0xf] }
  0x96   :  { %1367 = vst [vmem:[#allocation3 + $0xf4] sm:$0xf] %v1366_v7  ;;  %v1370_v9 = vld [vmem:[%s18571_s4 + $0xfc] sm:$0xf]  ;;  %1369 = vst [vmem:[#allocation3 + $0xf8] sm:$0xf] %v1368_v8 }
  0x97   :  { %1371 = vst [vmem:[#allocation3 + $0xfc] sm:$0xf] %v1370_v9 }
  0x98   :  { %1530 = vsyncadd [#allocation6 + $0x1], 4096  ;;  %v1549_v10 = vld [vmem:[%s18572_s5] sm:$0xf]  ;;  %v1551_v11 = vld [vmem:[%s18572_s5 + $0x14] sm:$0xf] }
  0x99   :  { %1550 = vst [vmem:[#allocation4] sm:$0xf] %v1549_v10  ;;  %1552 = vst [vmem:[#allocation4 + $0x4] sm:$0xf] %v1551_v11  ;;  %v1553_v12 = vld [vmem:[%s18572_s5 + $0x4] sm:$0xf] }
  0x9a   :  { %v1555_v13 = vld [vmem:[%s18572_s5 + $0x18] sm:$0xf]  ;;  %v1557_v14 = vld [vmem:[%s18572_s5 + $0x8] sm:$0xf]  ;;  %1554 = vst [vmem:[#allocation4 + $0x8] sm:$0xf] %v1553_v12 }
  0x9b   :  { %1556 = vst [vmem:[#allocation4 + $0xc] sm:$0xf] %v1555_v13  ;;  %1558 = vst [vmem:[#allocation4 + $0x10] sm:$0xf] %v1557_v14  ;;  %v1559_v15 = vld [vmem:[%s18572_s5 + $0x1c] sm:$0xf] }
  0x9c   :  { %v1561_v16 = vld [vmem:[%s18572_s5 + $0xc] sm:$0xf]  ;;  %v1563_v17 = vld [vmem:[%s18572_s5 + $0x20] sm:$0xf]  ;;  %1560 = vst [vmem:[#allocation4 + $0x14] sm:$0xf] %v1559_v15 }
  0x9d   :  { %1562 = vst [vmem:[#allocation4 + $0x18] sm:$0xf] %v1561_v16  ;;  %1564 = vst [vmem:[#allocation4 + $0x1c] sm:$0xf] %v1563_v17  ;;  %v1565_v18 = vld [vmem:[%s18572_s5 + $0x10] sm:$0xf] }
  0x9e   :  { %v1567_v19 = vld [vmem:[%s18572_s5 + $0x24] sm:$0xff]   ;;  %v1571_v20 = vld [vmem:[%s18572_s5 + $0x3c] sm:$0xf]  ;;  %1566 = vst [vmem:[#allocation4 + $0x20] sm:$0xf] %v1565_v18  ;;  %v1587_v28 = vld [vmem:[%s18572_s5 + $0x4c] sm:$0xff]  }
  0x9f   :  { %1568 = vst [vmem:[#allocation4 + $0x24] sm:$0xff] %v1567_v19   ;;  %1572 = vst [vmem:[#allocation4 + $0x2c] sm:$0xf] %v1571_v20  ;;  %v1573_v21 = vld [vmem:[%s18572_s5 + $0x2c] sm:$0xf]  ;;  %v1607_v37 = vld [vmem:[%s18572_s5 + $0x74] sm:$0xff]  }
  0xa0   :  { %v1575_v22 = vld [vmem:[%s18572_s5 + $0x40] sm:$0xf]  ;;  %v1577_v23 = vld [vmem:[%s18572_s5 + $0x30] sm:$0xf]  ;;  %1574 = vst [vmem:[#allocation4 + $0x30] sm:$0xf] %v1573_v21 }
  0xa1   :  { %1576 = vst [vmem:[#allocation4 + $0x34] sm:$0xf] %v1575_v22  ;;  %1578 = vst [vmem:[#allocation4 + $0x38] sm:$0xf] %v1577_v23  ;;  %v1579_v24 = vld [vmem:[%s18572_s5 + $0x44] sm:$0xf] }
  0xa2   :  { %v1581_v25 = vld [vmem:[%s18572_s5 + $0x34] sm:$0xf]  ;;  %v1583_v26 = vld [vmem:[%s18572_s5 + $0x48] sm:$0xf]  ;;  %1580 = vst [vmem:[#allocation4 + $0x3c] sm:$0xf] %v1579_v24 }
  0xa3   :  { %1582 = vst [vmem:[#allocation4 + $0x40] sm:$0xf] %v1581_v25  ;;  %1584 = vst [vmem:[#allocation4 + $0x44] sm:$0xf] %v1583_v26  ;;  %v1585_v27 = vld [vmem:[%s18572_s5 + $0x38] sm:$0xf] }
  0xa4   :  { %v1591_v29 = vld [vmem:[%s18572_s5 + $0x64] sm:$0xf]  ;;  %1586 = vst [vmem:[#allocation4 + $0x48] sm:$0xf] %v1585_v27  ;;  %1588 = vst [vmem:[#allocation4 + $0x4c] sm:$0xff] %v1587_v28   ;;  %v1627_v46 = vld [vmem:[%s18572_s5 + $0x9c] sm:$0xff]  }
  0xa5   :  { %1592 = vst [vmem:[#allocation4 + $0x54] sm:$0xf] %v1591_v29  ;;  %v1593_v30 = vld [vmem:[%s18572_s5 + $0x54] sm:$0xf]  ;;  %v1595_v31 = vld [vmem:[%s18572_s5 + $0x68] sm:$0xf] }
  0xa6   :  { %v1597_v32 = vld [vmem:[%s18572_s5 + $0x58] sm:$0xf]  ;;  %1594 = vst [vmem:[#allocation4 + $0x58] sm:$0xf] %v1593_v30  ;;  %1596 = vst [vmem:[#allocation4 + $0x5c] sm:$0xf] %v1595_v31 }
  0xa7   :  { %1598 = vst [vmem:[#allocation4 + $0x60] sm:$0xf] %v1597_v32  ;;  %v1599_v33 = vld [vmem:[%s18572_s5 + $0x6c] sm:$0xf]  ;;  %v1601_v34 = vld [vmem:[%s18572_s5 + $0x5c] sm:$0xf] }
  0xa8   :  { %v1603_v35 = vld [vmem:[%s18572_s5 + $0x70] sm:$0xf]  ;;  %1600 = vst [vmem:[#allocation4 + $0x64] sm:$0xf] %v1599_v33  ;;  %1602 = vst [vmem:[#allocation4 + $0x68] sm:$0xf] %v1601_v34 }
  0xa9   :  { %1604 = vst [vmem:[#allocation4 + $0x6c] sm:$0xf] %v1603_v35  ;;  %v1605_v36 = vld [vmem:[%s18572_s5 + $0x60] sm:$0xf]  ;;  %v1611_v38 = vld [vmem:[%s18572_s5 + $0x8c] sm:$0xf] }
  0xaa   :  { %1606 = vst [vmem:[#allocation4 + $0x70] sm:$0xf] %v1605_v36  ;;  %1608 = vst [vmem:[#allocation4 + $0x74] sm:$0xff] %v1607_v37   ;;  %v1613_v39 = vld [vmem:[%s18572_s5 + $0x7c] sm:$0xf]  ;;  %v1647_v55 = vld [vmem:[%s18572_s5 + $0xc4] sm:$0xff]  }
  0xab   :  { %1612 = vst [vmem:[#allocation4 + $0x7c] sm:$0xf] %v1611_v38  ;;  %v1615_v40 = vld [vmem:[%s18572_s5 + $0x90] sm:$0xf]  ;;  %v1617_v41 = vld [vmem:[%s18572_s5 + $0x80] sm:$0xf] }
  0xac   :  { %1614 = vst [vmem:[#allocation4 + $0x80] sm:$0xf] %v1613_v39  ;;  %1616 = vst [vmem:[#allocation4 + $0x84] sm:$0xf] %v1615_v40  ;;  %v1619_v42 = vld [vmem:[%s18572_s5 + $0x94] sm:$0xf] }
  0xad   :  { %1618 = vst [vmem:[#allocation4 + $0x88] sm:$0xf] %v1617_v41  ;;  %v1621_v43 = vld [vmem:[%s18572_s5 + $0x84] sm:$0xf]  ;;  %v1623_v44 = vld [vmem:[%s18572_s5 + $0x98] sm:$0xf] }
  0xae   :  { %1620 = vst [vmem:[#allocation4 + $0x8c] sm:$0xf] %v1619_v42  ;;  %1622 = vst [vmem:[#allocation4 + $0x90] sm:$0xf] %v1621_v43  ;;  %v1625_v45 = vld [vmem:[%s18572_s5 + $0x88] sm:$0xf] }
  0xaf   :  { %1624 = vst [vmem:[#allocation4 + $0x94] sm:$0xf] %v1623_v44  ;;  %v1631_v47 = vld [vmem:[%s18572_s5 + $0xb4] sm:$0xf]  ;;  %1626 = vst [vmem:[#allocation4 + $0x98] sm:$0xf] %v1625_v45 }
  0xb0   :  { %1628 = vst [vmem:[#allocation4 + $0x9c] sm:$0xff] %v1627_v46   ;;  %1632 = vst [vmem:[#allocation4 + $0xa4] sm:$0xf] %v1631_v47  ;;  %v1633_v48 = vld [vmem:[%s18572_s5 + $0xa4] sm:$0xf]  ;;  %v1667_v0 = vld [vmem:[%s18572_s5 + $0xec] sm:$0xff]  }
  0xb1   :  { %v1635_v49 = vld [vmem:[%s18572_s5 + $0xb8] sm:$0xf]  ;;  %v1637_v50 = vld [vmem:[%s18572_s5 + $0xa8] sm:$0xf]  ;;  %1634 = vst [vmem:[#allocation4 + $0xa8] sm:$0xf] %v1633_v48 }
  0xb2   :  { %1636 = vst [vmem:[#allocation4 + $0xac] sm:$0xf] %v1635_v49  ;;  %1638 = vst [vmem:[#allocation4 + $0xb0] sm:$0xf] %v1637_v50  ;;  %v1639_v51 = vld [vmem:[%s18572_s5 + $0xbc] sm:$0xf] }
  0xb3   :  { %v1641_v52 = vld [vmem:[%s18572_s5 + $0xac] sm:$0xf]  ;;  %v1643_v53 = vld [vmem:[%s18572_s5 + $0xc0] sm:$0xf]  ;;  %1640 = vst [vmem:[#allocation4 + $0xb4] sm:$0xf] %v1639_v51 }
  0xb4   :  { %1642 = vst [vmem:[#allocation4 + $0xb8] sm:$0xf] %v1641_v52  ;;  %1644 = vst [vmem:[#allocation4 + $0xbc] sm:$0xf] %v1643_v53  ;;  %v1645_v54 = vld [vmem:[%s18572_s5 + $0xb0] sm:$0xf] }
  0xb5   :  { %v1651_v56 = vld [vmem:[%s18572_s5 + $0xdc] sm:$0xf]  ;;  %1646 = vst [vmem:[#allocation4 + $0xc0] sm:$0xf] %v1645_v54  ;;  %1648 = vst [vmem:[#allocation4 + $0xc4] sm:$0xff] %v1647_v55   ;;  %v1687_v9 = vld [vmem:[%s18572_s5 + $0x114] sm:$0xff]  }
  0xb6   :  { %1652 = vst [vmem:[#allocation4 + $0xcc] sm:$0xf] %v1651_v56  ;;  %v1653_v57 = vld [vmem:[%s18572_s5 + $0xcc] sm:$0xf]  ;;  %v1655_v58 = vld [vmem:[%s18572_s5 + $0xe0] sm:$0xf] }
  0xb7   :  { %v1657_v59 = vld [vmem:[%s18572_s5 + $0xd0] sm:$0xf]  ;;  %1654 = vst [vmem:[#allocation4 + $0xd0] sm:$0xf] %v1653_v57  ;;  %1656 = vst [vmem:[#allocation4 + $0xd4] sm:$0xf] %v1655_v58 }
  0xb8   :  { %1658 = vst [vmem:[#allocation4 + $0xd8] sm:$0xf] %v1657_v59  ;;  %v1659_v60 = vld [vmem:[%s18572_s5 + $0xe4] sm:$0xf]  ;;  %v1661_v61 = vld [vmem:[%s18572_s5 + $0xd4] sm:$0xf] }
  0xb9   :  { %v1663_v62 = vld [vmem:[%s18572_s5 + $0xe8] sm:$0xf]  ;;  %1660 = vst [vmem:[#allocation4 + $0xdc] sm:$0xf] %v1659_v60  ;;  %1662 = vst [vmem:[#allocation4 + $0xe0] sm:$0xf] %v1661_v61 }
  0xba   :  { %1664 = vst [vmem:[#allocation4 + $0xe4] sm:$0xf] %v1663_v62  ;;  %v1665_v63 = vld [vmem:[%s18572_s5 + $0xd8] sm:$0xf]  ;;  %v1671_v1 = vld [vmem:[%s18572_s5 + $0x104] sm:$0xf] }
  0xbb   :  { %1666 = vst [vmem:[#allocation4 + $0xe8] sm:$0xf] %v1665_v63  ;;  %1668 = vst [vmem:[#allocation4 + $0xec] sm:$0xff] %v1667_v0   ;;  %v1673_v2 = vld [vmem:[%s18572_s5 + $0xf4] sm:$0xf]  ;;  %v1707_v18 = vld [vmem:[%s18572_s5 + $0x13c] sm:$0xff]  }
  0xbc   :  { %1672 = vst [vmem:[#allocation4 + $0xf4] sm:$0xf] %v1671_v1  ;;  %v1675_v3 = vld [vmem:[%s18572_s5 + $0x108] sm:$0xf]  ;;  %v1677_v4 = vld [vmem:[%s18572_s5 + $0xf8] sm:$0xf] }
  0xbd   :  { %1674 = vst [vmem:[#allocation4 + $0xf8] sm:$0xf] %v1673_v2  ;;  %1676 = vst [vmem:[#allocation4 + $0xfc] sm:$0xf] %v1675_v3  ;;  %v1679_v5 = vld [vmem:[%s18572_s5 + $0x10c] sm:$0xf] }
  0xbe   :  { %1678 = vst [vmem:[#allocation4 + $0x100] sm:$0xf] %v1677_v4  ;;  %v1681_v6 = vld [vmem:[%s18572_s5 + $0xfc] sm:$0xf]  ;;  %v1683_v7 = vld [vmem:[%s18572_s5 + $0x110] sm:$0xf] }
  0xbf   :  { %1680 = vst [vmem:[#allocation4 + $0x104] sm:$0xf] %v1679_v5  ;;  %1682 = vst [vmem:[#allocation4 + $0x108] sm:$0xf] %v1681_v6  ;;  %v1685_v8 = vld [vmem:[%s18572_s5 + $0x100] sm:$0xf] }
  0xc0   :  { %1684 = vst [vmem:[#allocation4 + $0x10c] sm:$0xf] %v1683_v7  ;;  %v1691_v10 = vld [vmem:[%s18572_s5 + $0x12c] sm:$0xf]  ;;  %1686 = vst [vmem:[#allocation4 + $0x110] sm:$0xf] %v1685_v8 }
  0xc1   :  { %1688 = vst [vmem:[#allocation4 + $0x114] sm:$0xff] %v1687_v9   ;;  %1692 = vst [vmem:[#allocation4 + $0x11c] sm:$0xf] %v1691_v10  ;;  %v1693_v11 = vld [vmem:[%s18572_s5 + $0x11c] sm:$0xf]  ;;  %v1727_v27 = vld [vmem:[%s18572_s5 + $0x164] sm:$0xff]  }
  0xc2   :  { %v1695_v12 = vld [vmem:[%s18572_s5 + $0x130] sm:$0xf]  ;;  %v1697_v13 = vld [vmem:[%s18572_s5 + $0x120] sm:$0xf]  ;;  %1694 = vst [vmem:[#allocation4 + $0x120] sm:$0xf] %v1693_v11 }
  0xc3   :  { %1696 = vst [vmem:[#allocation4 + $0x124] sm:$0xf] %v1695_v12  ;;  %1698 = vst [vmem:[#allocation4 + $0x128] sm:$0xf] %v1697_v13  ;;  %v1699_v14 = vld [vmem:[%s18572_s5 + $0x134] sm:$0xf] }
  0xc4   :  { %v1701_v15 = vld [vmem:[%s18572_s5 + $0x124] sm:$0xf]  ;;  %v1703_v16 = vld [vmem:[%s18572_s5 + $0x138] sm:$0xf]  ;;  %1700 = vst [vmem:[#allocation4 + $0x12c] sm:$0xf] %v1699_v14 }
  0xc5   :  { %1702 = vst [vmem:[#allocation4 + $0x130] sm:$0xf] %v1701_v15  ;;  %1704 = vst [vmem:[#allocation4 + $0x134] sm:$0xf] %v1703_v16  ;;  %v1705_v17 = vld [vmem:[%s18572_s5 + $0x128] sm:$0xf] }
  0xc6   :  { %v1711_v19 = vld [vmem:[%s18572_s5 + $0x154] sm:$0xf]  ;;  %1706 = vst [vmem:[#allocation4 + $0x138] sm:$0xf] %v1705_v17  ;;  %1708 = vst [vmem:[#allocation4 + $0x13c] sm:$0xff] %v1707_v18   ;;  %v1747_v36 = vld [vmem:[%s18572_s5 + $0x18c] sm:$0xff]  }
  0xc7   :  { %1712 = vst [vmem:[#allocation4 + $0x144] sm:$0xf] %v1711_v19  ;;  %v1713_v20 = vld [vmem:[%s18572_s5 + $0x144] sm:$0xf]  ;;  %v1715_v21 = vld [vmem:[%s18572_s5 + $0x158] sm:$0xf] }
  0xc8   :  { %v1717_v22 = vld [vmem:[%s18572_s5 + $0x148] sm:$0xf]  ;;  %1714 = vst [vmem:[#allocation4 + $0x148] sm:$0xf] %v1713_v20  ;;  %1716 = vst [vmem:[#allocation4 + $0x14c] sm:$0xf] %v1715_v21 }
  0xc9   :  { %1718 = vst [vmem:[#allocation4 + $0x150] sm:$0xf] %v1717_v22  ;;  %v1719_v23 = vld [vmem:[%s18572_s5 + $0x15c] sm:$0xf]  ;;  %v1721_v24 = vld [vmem:[%s18572_s5 + $0x14c] sm:$0xf] }
  0xca   :  { %v1723_v25 = vld [vmem:[%s18572_s5 + $0x160] sm:$0xf]  ;;  %1720 = vst [vmem:[#allocation4 + $0x154] sm:$0xf] %v1719_v23  ;;  %1722 = vst [vmem:[#allocation4 + $0x158] sm:$0xf] %v1721_v24 }
  0xcb   :  { %1724 = vst [vmem:[#allocation4 + $0x15c] sm:$0xf] %v1723_v25  ;;  %v1725_v26 = vld [vmem:[%s18572_s5 + $0x150] sm:$0xf]  ;;  %v1731_v28 = vld [vmem:[%s18572_s5 + $0x17c] sm:$0xf] }
  0xcc   :  { %1726 = vst [vmem:[#allocation4 + $0x160] sm:$0xf] %v1725_v26  ;;  %1728 = vst [vmem:[#allocation4 + $0x164] sm:$0xff] %v1727_v27   ;;  %v1733_v29 = vld [vmem:[%s18572_s5 + $0x16c] sm:$0xf]  ;;  %v1767_v45 = vld [vmem:[%s18572_s5 + $0x1b4] sm:$0xff]  }
  0xcd   :  { %1732 = vst [vmem:[#allocation4 + $0x16c] sm:$0xf] %v1731_v28  ;;  %v1735_v30 = vld [vmem:[%s18572_s5 + $0x180] sm:$0xf]  ;;  %v1737_v31 = vld [vmem:[%s18572_s5 + $0x170] sm:$0xf] }
  0xce   :  { %1734 = vst [vmem:[#allocation4 + $0x170] sm:$0xf] %v1733_v29  ;;  %1736 = vst [vmem:[#allocation4 + $0x174] sm:$0xf] %v1735_v30  ;;  %v1739_v32 = vld [vmem:[%s18572_s5 + $0x184] sm:$0xf] }
  0xcf   :  { %1738 = vst [vmem:[#allocation4 + $0x178] sm:$0xf] %v1737_v31  ;;  %v1741_v33 = vld [vmem:[%s18572_s5 + $0x174] sm:$0xf]  ;;  %v1743_v34 = vld [vmem:[%s18572_s5 + $0x188] sm:$0xf] }
  0xd0   :  { %1740 = vst [vmem:[#allocation4 + $0x17c] sm:$0xf] %v1739_v32  ;;  %1742 = vst [vmem:[#allocation4 + $0x180] sm:$0xf] %v1741_v33  ;;  %v1745_v35 = vld [vmem:[%s18572_s5 + $0x178] sm:$0xf] }
  0xd1   :  { %1744 = vst [vmem:[#allocation4 + $0x184] sm:$0xf] %v1743_v34  ;;  %v1751_v37 = vld [vmem:[%s18572_s5 + $0x1a4] sm:$0xf]  ;;  %1746 = vst [vmem:[#allocation4 + $0x188] sm:$0xf] %v1745_v35 }
  0xd2   :  { %1748 = vst [vmem:[#allocation4 + $0x18c] sm:$0xff] %v1747_v36   ;;  %1752 = vst [vmem:[#allocation4 + $0x194] sm:$0xf] %v1751_v37  ;;  %v1753_v38 = vld [vmem:[%s18572_s5 + $0x194] sm:$0xf]  ;;  %v1787_v54 = vld [vmem:[%s18572_s5 + $0x1dc] sm:$0xff]  }
  0xd3   :  { %v1755_v39 = vld [vmem:[%s18572_s5 + $0x1a8] sm:$0xf]  ;;  %v1757_v40 = vld [vmem:[%s18572_s5 + $0x198] sm:$0xf]  ;;  %1754 = vst [vmem:[#allocation4 + $0x198] sm:$0xf] %v1753_v38 }
  0xd4   :  { %1756 = vst [vmem:[#allocation4 + $0x19c] sm:$0xf] %v1755_v39  ;;  %1758 = vst [vmem:[#allocation4 + $0x1a0] sm:$0xf] %v1757_v40  ;;  %v1759_v41 = vld [vmem:[%s18572_s5 + $0x1ac] sm:$0xf] }
  0xd5   :  { %v1761_v42 = vld [vmem:[%s18572_s5 + $0x19c] sm:$0xf]  ;;  %v1763_v43 = vld [vmem:[%s18572_s5 + $0x1b0] sm:$0xf]  ;;  %1760 = vst [vmem:[#allocation4 + $0x1a4] sm:$0xf] %v1759_v41 }
  0xd6   :  { %1762 = vst [vmem:[#allocation4 + $0x1a8] sm:$0xf] %v1761_v42  ;;  %1764 = vst [vmem:[#allocation4 + $0x1ac] sm:$0xf] %v1763_v43  ;;  %v1765_v44 = vld [vmem:[%s18572_s5 + $0x1a0] sm:$0xf] }
  0xd7   :  { %v1771_v46 = vld [vmem:[%s18572_s5 + $0x1cc] sm:$0xf]  ;;  %1766 = vst [vmem:[#allocation4 + $0x1b0] sm:$0xf] %v1765_v44  ;;  %1768 = vst [vmem:[#allocation4 + $0x1b4] sm:$0xff] %v1767_v45   ;;  %v1807_v63 = vld [vmem:[%s18572_s5 + $0x204] sm:$0xff]  }
  0xd8   :  { %1772 = vst [vmem:[#allocation4 + $0x1bc] sm:$0xf] %v1771_v46  ;;  %v1773_v47 = vld [vmem:[%s18572_s5 + $0x1bc] sm:$0xf]  ;;  %v1775_v48 = vld [vmem:[%s18572_s5 + $0x1d0] sm:$0xf] }
  0xd9   :  { %v1777_v49 = vld [vmem:[%s18572_s5 + $0x1c0] sm:$0xf]  ;;  %1774 = vst [vmem:[#allocation4 + $0x1c0] sm:$0xf] %v1773_v47  ;;  %1776 = vst [vmem:[#allocation4 + $0x1c4] sm:$0xf] %v1775_v48 }
  0xda   :  { %1778 = vst [vmem:[#allocation4 + $0x1c8] sm:$0xf] %v1777_v49  ;;  %v1779_v50 = vld [vmem:[%s18572_s5 + $0x1d4] sm:$0xf]  ;;  %v1781_v51 = vld [vmem:[%s18572_s5 + $0x1c4] sm:$0xf] }
  0xdb   :  { %v1783_v52 = vld [vmem:[%s18572_s5 + $0x1d8] sm:$0xf]  ;;  %1780 = vst [vmem:[#allocation4 + $0x1cc] sm:$0xf] %v1779_v50  ;;  %1782 = vst [vmem:[#allocation4 + $0x1d0] sm:$0xf] %v1781_v51 }
  0xdc   :  { %1784 = vst [vmem:[#allocation4 + $0x1d4] sm:$0xf] %v1783_v52  ;;  %v1785_v53 = vld [vmem:[%s18572_s5 + $0x1c8] sm:$0xf]  ;;  %v1791_v55 = vld [vmem:[%s18572_s5 + $0x1f4] sm:$0xf] }
  0xdd   :  { %1786 = vst [vmem:[#allocation4 + $0x1d8] sm:$0xf] %v1785_v53  ;;  %1788 = vst [vmem:[#allocation4 + $0x1dc] sm:$0xff] %v1787_v54   ;;  %v1793_v56 = vld [vmem:[%s18572_s5 + $0x1e4] sm:$0xf]  ;;  %v1827_v8 = vld [vmem:[%s18572_s5 + $0x22c] sm:$0xff]  }
  0xde   :  { %1792 = vst [vmem:[#allocation4 + $0x1e4] sm:$0xf] %v1791_v55  ;;  %v1795_v57 = vld [vmem:[%s18572_s5 + $0x1f8] sm:$0xf]  ;;  %v1797_v58 = vld [vmem:[%s18572_s5 + $0x1e8] sm:$0xf] }
  0xdf   :  { %1794 = vst [vmem:[#allocation4 + $0x1e8] sm:$0xf] %v1793_v56  ;;  %1796 = vst [vmem:[#allocation4 + $0x1ec] sm:$0xf] %v1795_v57  ;;  %v1799_v59 = vld [vmem:[%s18572_s5 + $0x1fc] sm:$0xf] }
  0xe0   :  { %1798 = vst [vmem:[#allocation4 + $0x1f0] sm:$0xf] %v1797_v58  ;;  %v1801_v60 = vld [vmem:[%s18572_s5 + $0x1ec] sm:$0xf]  ;;  %v1803_v61 = vld [vmem:[%s18572_s5 + $0x200] sm:$0xf] }
  0xe1   :  { %1800 = vst [vmem:[#allocation4 + $0x1f4] sm:$0xf] %v1799_v59  ;;  %1802 = vst [vmem:[#allocation4 + $0x1f8] sm:$0xf] %v1801_v60  ;;  %v1805_v62 = vld [vmem:[%s18572_s5 + $0x1f0] sm:$0xf] }
  0xe2   :  { %1804 = vst [vmem:[#allocation4 + $0x1fc] sm:$0xf] %v1803_v61  ;;  %v1811_v0 = vld [vmem:[%s18572_s5 + $0x21c] sm:$0xf]  ;;  %1806 = vst [vmem:[#allocation4 + $0x200] sm:$0xf] %v1805_v62 }
  0xe3   :  { %1808 = vst [vmem:[#allocation4 + $0x204] sm:$0xff] %v1807_v63   ;;  %1812 = vst [vmem:[#allocation4 + $0x20c] sm:$0xf] %v1811_v0  ;;  %v1813_v1 = vld [vmem:[%s18572_s5 + $0x20c] sm:$0xf]  ;;  %v1847_v17 = vld [vmem:[%s18572_s5 + $0x254] sm:$0xff]  }
  0xe4   :  { %v1815_v2 = vld [vmem:[%s18572_s5 + $0x220] sm:$0xf]  ;;  %v1817_v3 = vld [vmem:[%s18572_s5 + $0x210] sm:$0xf]  ;;  %1814 = vst [vmem:[#allocation4 + $0x210] sm:$0xf] %v1813_v1 }
  0xe5   :  { %1816 = vst [vmem:[#allocation4 + $0x214] sm:$0xf] %v1815_v2  ;;  %1818 = vst [vmem:[#allocation4 + $0x218] sm:$0xf] %v1817_v3  ;;  %v1819_v4 = vld [vmem:[%s18572_s5 + $0x224] sm:$0xf] }
  0xe6   :  { %v1821_v5 = vld [vmem:[%s18572_s5 + $0x214] sm:$0xf]  ;;  %v1823_v6 = vld [vmem:[%s18572_s5 + $0x228] sm:$0xf]  ;;  %1820 = vst [vmem:[#allocation4 + $0x21c] sm:$0xf] %v1819_v4 }
  0xe7   :  { %1822 = vst [vmem:[#allocation4 + $0x220] sm:$0xf] %v1821_v5  ;;  %1824 = vst [vmem:[#allocation4 + $0x224] sm:$0xf] %v1823_v6  ;;  %v1825_v7 = vld [vmem:[%s18572_s5 + $0x218] sm:$0xf] }
  0xe8   :  { %v1831_v9 = vld [vmem:[%s18572_s5 + $0x244] sm:$0xf]  ;;  %1826 = vst [vmem:[#allocation4 + $0x228] sm:$0xf] %v1825_v7  ;;  %1828 = vst [vmem:[#allocation4 + $0x22c] sm:$0xff] %v1827_v8  }
  0xe9   :  { %1832 = vst [vmem:[#allocation4 + $0x234] sm:$0xf] %v1831_v9  ;;  %v1833_v10 = vld [vmem:[%s18572_s5 + $0x234] sm:$0xf]  ;;  %v1835_v11 = vld [vmem:[%s18572_s5 + $0x248] sm:$0xf] }
  0xea   :  { %v1837_v12 = vld [vmem:[%s18572_s5 + $0x238] sm:$0xf]  ;;  %1834 = vst [vmem:[#allocation4 + $0x238] sm:$0xf] %v1833_v10  ;;  %1836 = vst [vmem:[#allocation4 + $0x23c] sm:$0xf] %v1835_v11 }
  0xeb   :  { %1838 = vst [vmem:[#allocation4 + $0x240] sm:$0xf] %v1837_v12  ;;  %v1839_v13 = vld [vmem:[%s18572_s5 + $0x24c] sm:$0xf]  ;;  %v1841_v14 = vld [vmem:[%s18572_s5 + $0x23c] sm:$0xf] }
  0xec   :  { %v1843_v15 = vld [vmem:[%s18572_s5 + $0x250] sm:$0xf]  ;;  %1840 = vst [vmem:[#allocation4 + $0x244] sm:$0xf] %v1839_v13  ;;  %1842 = vst [vmem:[#allocation4 + $0x248] sm:$0xf] %v1841_v14 }
  0xed   :  { %1844 = vst [vmem:[#allocation4 + $0x24c] sm:$0xf] %v1843_v15  ;;  %v1845_v16 = vld [vmem:[%s18572_s5 + $0x240] sm:$0xf]  ;;  %v1851_v18 = vld [vmem:[%s18572_s5 + $0x26c] sm:$0xf] }
  0xee   :  { %1846 = vst [vmem:[#allocation4 + $0x250] sm:$0xf] %v1845_v16  ;;  %1848 = vst [vmem:[#allocation4 + $0x254] sm:$0xff] %v1847_v17   ;;  %v1853_v19 = vld [vmem:[%s18572_s5 + $0x25c] sm:$0xf] }
  0xef   :  { %1852 = vst [vmem:[#allocation4 + $0x25c] sm:$0xf] %v1851_v18  ;;  %v1855_v20 = vld [vmem:[%s18572_s5 + $0x270] sm:$0xf]  ;;  %v1857_v21 = vld [vmem:[%s18572_s5 + $0x260] sm:$0xf] }
  0xf0   :  { %1854 = vst [vmem:[#allocation4 + $0x260] sm:$0xf] %v1853_v19  ;;  %1856 = vst [vmem:[#allocation4 + $0x264] sm:$0xf] %v1855_v20  ;;  %v1859_v22 = vld [vmem:[%s18572_s5 + $0x274] sm:$0xf] }
  0xf1   :  { %1858 = vst [vmem:[#allocation4 + $0x268] sm:$0xf] %v1857_v21  ;;  %v1861_v23 = vld [vmem:[%s18572_s5 + $0x264] sm:$0xf]  ;;  %v1863_v24 = vld [vmem:[%s18572_s5 + $0x278] sm:$0xf] }
  0xf2   :  { %1860 = vst [vmem:[#allocation4 + $0x26c] sm:$0xf] %v1859_v22  ;;  %1862 = vst [vmem:[#allocation4 + $0x270] sm:$0xf] %v1861_v23  ;;  %v1865_v25 = vld [vmem:[%s18572_s5 + $0x268] sm:$0xf] }
  0xf3   :  { %1864 = vst [vmem:[#allocation4 + $0x274] sm:$0xf] %v1863_v24  ;;  %v1867_v26 = vld [vmem:[%s18572_s5 + $0x27c] sm:$0xf]  ;;  %1866 = vst [vmem:[#allocation4 + $0x278] sm:$0xf] %v1865_v25 }
  0xf4   :  { %1868 = vst [vmem:[#allocation4 + $0x27c] sm:$0xf] %v1867_v26 }
  0xf5   :  { %2219 = vsyncadd [#allocation6 + $0x2], 10240  ;;  %v16014_v27 = vld [vmem:[%s18573_s6] sm:$0xff]  ;;  %v16019_v28 = vld [vmem:[%s18573_s6 + $0x8] sm:$0xff] }
  0xf6   :  { %18584 = vst [vmem:[#allocation25_spill] sm:$0xff] %v16014_v27  ;;  %18585 = vst [vmem:[#allocation26_spill] sm:$0xff] %v16019_v28  ;;  %v16024_v29 = vld [vmem:[%s18573_s6 + $0x10] sm:$0xff]  ;;  %v16029_v30 = vld [vmem:[%s18573_s6 + $0x18] sm:$0xff] }
  0xf7   :  { %18586 = vst [vmem:[#allocation27_spill] sm:$0xff] %v16024_v29  ;;  %18587 = vst [vmem:[#allocation28_spill] sm:$0xff] %v16029_v30  ;;  %v16034_v31 = vld [vmem:[%s18573_s6 + $0x20] sm:$0xff]  ;;  %v16039_v32 = vld [vmem:[%s18573_s6 + $0x28] sm:$0xff] }
  0xf8   :  { %18588 = vst [vmem:[#allocation29_spill] sm:$0xff] %v16034_v31  ;;  %18589 = vst [vmem:[#allocation30_spill] sm:$0xff] %v16039_v32  ;;  %v16044_v33 = vld [vmem:[%s18573_s6 + $0x30] sm:$0xff]  ;;  %v16049_v34 = vld [vmem:[%s18573_s6 + $0x38] sm:$0xff] }
  0xf9   :  { %18590 = vst [vmem:[#allocation31_spill] sm:$0xff] %v16044_v33  ;;  %18591 = vst [vmem:[#allocation32_spill] sm:$0xff] %v16049_v34  ;;  %v16054_v35 = vld [vmem:[%s18573_s6 + $0x40] sm:$0xff]  ;;  %v16059_v36 = vld [vmem:[%s18573_s6 + $0x48] sm:$0xff] }
  0xfa   :  { %18592 = vst [vmem:[#allocation33_spill] sm:$0xff] %v16054_v35  ;;  %18593 = vst [vmem:[#allocation34_spill] sm:$0xff] %v16059_v36  ;;  %v16064_v37 = vld [vmem:[%s18573_s6 + $0x50] sm:$0xff]  ;;  %v16069_v38 = vld [vmem:[%s18573_s6 + $0x58] sm:$0xff] }
  0xfb   :  { %18594 = vst [vmem:[#allocation35_spill] sm:$0xff] %v16064_v37  ;;  %18595 = vst [vmem:[#allocation36_spill] sm:$0xff] %v16069_v38  ;;  %v16074_v39 = vld [vmem:[%s18573_s6 + $0x60] sm:$0xff]  ;;  %v16079_v40 = vld [vmem:[%s18573_s6 + $0x68] sm:$0xff] }
  0xfc   :  { %18596 = vst [vmem:[#allocation37_spill] sm:$0xff] %v16074_v39  ;;  %18597 = vst [vmem:[#allocation38_spill] sm:$0xff] %v16079_v40  ;;  %v16084_v41 = vld [vmem:[%s18573_s6 + $0x70] sm:$0xff]  ;;  %v16089_v42 = vld [vmem:[%s18573_s6 + $0x78] sm:$0xff] }
  0xfd   :  { %18598 = vst [vmem:[#allocation39_spill] sm:$0xff] %v16084_v41  ;;  %18599 = vst [vmem:[#allocation40_spill] sm:$0xff] %v16089_v42  ;;  %v16094_v43 = vld [vmem:[%s18573_s6 + $0x80] sm:$0xff]  ;;  %v16099_v44 = vld [vmem:[%s18573_s6 + $0x88] sm:$0xff] }
  0xfe   :  { %18600 = vst [vmem:[#allocation41_spill] sm:$0xff] %v16094_v43  ;;  %18601 = vst [vmem:[#allocation42_spill] sm:$0xff] %v16099_v44  ;;  %v16104_v45 = vld [vmem:[%s18573_s6 + $0x90] sm:$0xff]  ;;  %v16109_v46 = vld [vmem:[%s18573_s6 + $0x98] sm:$0xff] }
  0xff   :  { %18602 = vst [vmem:[#allocation43_spill] sm:$0xff] %v16104_v45  ;;  %18603 = vst [vmem:[#allocation44_spill] sm:$0xff] %v16109_v46  ;;  %v16114_v47 = vld [vmem:[%s18573_s6 + $0xa0] sm:$0xff]  ;;  %v16119_v48 = vld [vmem:[%s18573_s6 + $0xa8] sm:$0xff] }
 0x100   :  { %18604 = vst [vmem:[#allocation45_spill] sm:$0xff] %v16114_v47  ;;  %18605 = vst [vmem:[#allocation46_spill] sm:$0xff] %v16119_v48  ;;  %v16124_v49 = vld [vmem:[%s18573_s6 + $0xb0] sm:$0xff]  ;;  %v16129_v50 = vld [vmem:[%s18573_s6 + $0xb8] sm:$0xff] }
 0x101   :  { %18606 = vst [vmem:[#allocation47_spill] sm:$0xff] %v16124_v49  ;;  %18607 = vst [vmem:[#allocation48_spill] sm:$0xff] %v16129_v50  ;;  %v16134_v51 = vld [vmem:[%s18573_s6 + $0xc0] sm:$0xff]  ;;  %v16139_v52 = vld [vmem:[%s18573_s6 + $0xc8] sm:$0xff] }
 0x102   :  { %18608 = vst [vmem:[#allocation49_spill] sm:$0xff] %v16134_v51  ;;  %18609 = vst [vmem:[#allocation50_spill] sm:$0xff] %v16139_v52  ;;  %v16144_v53 = vld [vmem:[%s18573_s6 + $0xd0] sm:$0xff]  ;;  %v16149_v54 = vld [vmem:[%s18573_s6 + $0xd8] sm:$0xff] }
 0x103   :  { %18610 = vst [vmem:[#allocation51_spill] sm:$0xff] %v16144_v53  ;;  %18611 = vst [vmem:[#allocation52_spill] sm:$0xff] %v16149_v54  ;;  %v16154_v55 = vld [vmem:[%s18573_s6 + $0xe0] sm:$0xff]  ;;  %v16159_v56 = vld [vmem:[%s18573_s6 + $0xe8] sm:$0xff] }
 0x104   :  { %18612 = vst [vmem:[#allocation53_spill] sm:$0xff] %v16154_v55  ;;  %18613 = vst [vmem:[#allocation54_spill] sm:$0xff] %v16159_v56  ;;  %v16164_v57 = vld [vmem:[%s18573_s6 + $0xf0] sm:$0xff]  ;;  %v16169_v58 = vld [vmem:[%s18573_s6 + $0xf8] sm:$0xff] }
 0x105   :  { %18614 = vst [vmem:[#allocation55_spill] sm:$0xff] %v16164_v57  ;;  %18615 = vst [vmem:[#allocation56_spill] sm:$0xff] %v16169_v58 }
 0x106   :  { %2324 = vsyncadd [#allocation6 + $0x3], 4096  ;;  %v14509_v59 = vld [vmem:[%s18568_s1] sm:$0xff]   ;;  %v14510_v60 = vld [vmem:[%s18568_s1 + $0x8] sm:$0xff]   ;;  %vm2569_vm0 = vcmask 293888   ;;  %vm2666_vm1 = vcmask 1041408  }
 0x107   :  { %14377 = vmatprep.subr.bf16.mxu0 %v14509_v59  ;;  %v14511_v61 = vld [vmem:[%s18568_s1 + $0x10] ss:$0 sps:$4 sm:$0x33]   ;;  %v14512_v62 = vld [vmem:[%s18567_s0] sm:$0xff]   ;;  %v14513_v0 = vld [vmem:[%s18567_s0 + $0x8] sm:$0xff]   ;;  %vm5843_vm2 = vcmask 516096  }
 0x108   :  { %14378 = vmatpush3.bf16.msra.mxu0 %v14509_v59  ;;  %14383 = vmatprep.mubr.msk.bf16.mxu0 %vm2569_vm0, %v14512_v62  ;;  %v2668_v63 = vsel %vm2666_vm1, %v14511_v61, 0  ;;  %v14514_v1 = vld [vmem:[%s18567_s0 + $0x10] sm:$0xff]   ;;  %v14515_v2 = vld [vmem:[%s18567_s0 + $0x18] sm:$0xff]   ;;  %v14516_v3 = vld [vmem:[%s18567_s0 + $0x20] sm:$0xff]   ;;  %vm5915_vm3 = vsmask.f32 7938 }
 0x109   :  { %14379 = vmatprep.subr.bf16.mxu0 %v14510_v60  ;;  %v14517_v4 = vld [vmem:[%s18567_s0 + $0x28] sm:$0xff]   ;;  %v14518_v5 = vld [vmem:[%s18567_s0 + $0x30] sm:$0xff]   ;;  %v14519_v6 = vld [vmem:[%s18567_s0 + $0x38] sm:$0xff]   ;;  %vm5853_vm5 = vsmask.f32 256  ;;  %vm5841_vm7 = vcmask 519168  }
 0x10a   :  { %v14520_v7 = vld [vmem:[%s18567_s0 + $0x40] sm:$0xff]   ;;  %v14521_v8 = vld [vmem:[%s18567_s0 + $0x48] sm:$0xff]   ;;  %v14522_v9 = vld [vmem:[%s18567_s0 + $0x50] sm:$0xff]   ;;  %vm6930_vm8 = vsmask.f32 3328  ;;  %vm6491_vm11 = vcmask 1042434  }
 0x10b   :  { %v14523_v10 = vld [vmem:[%s18567_s0 + $0x58] sm:$0xff]   ;;  %v14524_v11 = vld [vmem:[%s18567_s0 + $0x60] sm:$0xff]   ;;  %v14525_v12 = vld [vmem:[%s18567_s0 + $0x68] sm:$0xff]   ;;  %vm6931_vm9 = vsmask.f32 7440  ;;  %vm6494_vm12 = vcmask 1043459  }
 0x10c   :  { %14380 = vmatpush3.bf16.msra.mxu0 %v14510_v60  ;;  %v14526_v13 = vld [vmem:[%s18567_s0 + $0x70] sm:$0xff]   ;;  %v14527_v14 = vld [vmem:[%s18567_s0 + $0x78] sm:$0xff]   ;;  %v14528_v15 = vld [vmem:[%s18567_s0 + $0x80] sm:$0xff]   ;;  %vm6497_vm13 = vcmask 1044484   ;;  %vm6500_vm14 = vcmask 1045509   ;;  %vm6503_vm15 = vcmask 1046534  }
 0x10d   :  { %14503 = vmatprep.subr.msk.bf16.mxu0 %vm2666_vm1, %v14511_v61  ;;  %v14529_v16 = vld [vmem:[%s18567_s0 + $0x88] sm:$0xff]   ;;  %v14530_v17 = vld [vmem:[%s18567_s0 + $0x90] sm:$0xff]   ;;  %v14531_v18 = vld [vmem:[%s18567_s0 + $0x98] sm:$0xff]  }
 0x10e   :  { %v14532_v19 = vld [vmem:[%s18567_s0 + $0xa0] sm:$0xff]   ;;  %v14533_v20 = vld [vmem:[%s18567_s0 + $0xa8] sm:$0xff]   ;;  %v14534_v21 = vld [vmem:[%s18567_s0 + $0xb0] sm:$0xff]  }
 0x10f   :  { %v14535_v22 = vld [vmem:[%s18567_s0 + $0xb8] sm:$0xff]   ;;  %v14536_v23 = vld [vmem:[%s18567_s0 + $0xc0] sm:$0xff]   ;;  %v14537_v24 = vld [vmem:[%s18567_s0 + $0xc8] sm:$0xff]  }
 0x110   :  { %14382 = vmatpush3.bf16.msra.mxu0 %v2668_v63  ;;  %v14538_v25 = vld [vmem:[%s18567_s0 + $0xd0] sm:$0xff]   ;;  %v14539_v26 = vld [vmem:[%s18567_s0 + $0xd8] sm:$0xff]   ;;  %v14540_v59 = vld [vmem:[%s18567_s0 + $0xe0] sm:$0xff]  }
 0x111   :  { %v14541_v60 = vld [vmem:[%s18567_s0 + $0xe8] sm:$0xff]   ;;  %vm16301_vm4 = vmand %vm5843_vm2, %vm5915_vm3  ;;  %v14542_v63 = vld [vmem:[%s18567_s0 + $0xf0] sm:$0xff]  }
 0x112   :  { %v5920_v62 = vld [vmem:[#allocation7 + $0xc] sm:$0x1]  ;;  %vm16314_vm6 = vmand %vm5843_vm2, %vm5853_vm5  ;;  %v14585_v61 = vld [vmem:[%s18569_s2 + $0x80] sm:$0xff]  }
 0x113   :  { %14384 = vmatmul.mubr.msk.bf16.vlgmr.msra.gmra.mrb[0].mxu0 %vm2569_vm0, %v14513_v0  ;;  %v5921_v0 = vsel %vm16301_vm4, 0, %v5920_v62  ;;  %vm16360_vm10 = vmor %vm6930_vm8, %vm6931_vm9  ;;  %vm9010_vm9 = vcmask 523264  }
 0x114   :  { %14387 = vmatprep.mubr.msk.bf16.mxu0 %vm2569_vm0, %v14514_v1  ;;  %5922 = vst [vmem:[#allocation7 + $0xc] sm:$0x1] %v5921_v0  ;;  %v5858_v1 = vld [vmem:[#allocation7 + $0x8] sm:$0x1]  ;;  %vm16455_vm1 = vmand %vm5841_vm7, %vm5915_vm3  ;;  %vm7287_vm3 = vcmask 1046532  }
 0x11b   :  { %14388 = vmatmul.mubr.msk.bf16.gmra.mrb[4].mxu0 %vm2569_vm0, %v14515_v2  ;;  %v6773_v40 = vld [vmem:[#allocation7 + $0xc] sm:$0x1] }
 0x11c   :  { %14391 = vmatprep.mubr.msk.bf16.mxu0 %vm2569_vm0, %v14516_v3  ;;  %v5859_v3 = vsel %vm16314_vm6, 0, %v5858_v1 }
 0x11d   :  { %5860 = vst [vmem:[#allocation7 + $0x8] sm:$0x1] %v5859_v3  ;;  %v14724_v3 = vmov 1983009808  }
 0x123   :  { %14392 = vmatmul.mubr.msk.bf16.gmra.mrb[8].mxu0 %vm2569_vm0, %v14517_v4  ;;  %v14543_v4 = vld [vmem:[%s18567_s0 + $0xf8] sm:$0xff]   ;;  %s14725_s0 = smov 64  }
 0x124   :  { %14395 = vmatprep.mubr.msk.bf16.mxu0 %vm2569_vm0, %v14518_v5  ;;  %v5923_v5 = vld [vmem:[#allocation7 + $0x14] sm:$0x1] }
 0x12b   :  { %14396 = vmatmul.mubr.msk.bf16.gmra.mrb[12].mxu0 %vm2569_vm0, %v14519_v6  ;;  %v5924_v6 = vsel %vm16301_vm4, 0, %v5923_v5  ;;  %v3221_v5 = vlaneseq }
 0x12c   :  { %14399 = vmatprep.mubr.msk.bf16.mxu0 %vm2569_vm0, %v14520_v7  ;;  %5925 = vst [vmem:[#allocation7 + $0x14] sm:$0x1] %v5924_v6  ;;  %v5861_v7 = vld [vmem:[#allocation7 + $0x10] sm:$0x1] }
 0x133   :  { %14400 = vmatmul.mubr.msk.bf16.gmra.mrb[16].mxu0 %vm2569_vm0, %v14521_v8  ;;  %v5862_v8 = vsel %vm16314_vm6, 0, %v5861_v7  ;;  %v16370_v7 = vld [vmem:[%s18574_s7] ss:$0 sm:$0xff] }
 0x134   :  { %14403 = vmatprep.mubr.msk.bf16.mxu0 %vm2569_vm0, %v14522_v9  ;;  %5863 = vst [vmem:[#allocation7 + $0x10] sm:$0x1] %v5862_v8  ;;  %v5926_v9 = vld [vmem:[#allocation7 + $0x1c] sm:$0x1] }
 0x13b   :  { %14404 = vmatmul.mubr.msk.bf16.gmra.mrb[20].mxu0 %vm2569_vm0, %v14523_v10  ;;  %v5927_v10 = vsel %vm16301_vm4, 0, %v5926_v9  ;;  %v16372_v9 = vshrl.u32 %v3221_v5, 7 }
 0x13c   :  { %14407 = vmatprep.mubr.msk.bf16.mxu0 %vm2569_vm0, %v14524_v11  ;;  %5928 = vst [vmem:[#allocation7 + $0x1c] sm:$0x1] %v5927_v10  ;;  %v5864_v11 = vld [vmem:[#allocation7 + $0x18] sm:$0x1] }
 0x13d   :  { %18622 = vst [vmem:[#allocation57_spill] sm:$0xff] %v16372_v9 }
 0x143   :  { %14408 = vmatmul.mubr.msk.bf16.gmra.mrb[24].mxu0 %vm2569_vm0, %v14525_v12  ;;  %v5865_v12 = vsel %vm16314_vm6, 0, %v5864_v11  ;;  %v16377_v11 = vld [vmem:[%s18574_s7 + $0x1] ss:$0 sm:$0xff]  ;;  %v6785_v51 = vld [vmem:[#allocation7 + $0x1c] sm:$0x1] }
 0x144   :  { %14411 = vmatprep.mubr.msk.bf16.mxu0 %vm2569_vm0, %v14526_v13  ;;  %5866 = vst [vmem:[#allocation7 + $0x18] sm:$0x1] %v5865_v12  ;;  %v18577_v13 = vmov 0  }
 0x145   :  { %5842 = vst.msk [vmem:[#allocation7] sm:$0xf] %vm5841_vm7, %v18577_v13  ;;  %10048 = vst [vmem:[#allocation9] sm:$0x7] %v18577_v13 }
 0x146   :  { %5844 = vst.msk [vmem:[#allocation7 + $0x4] sm:$0x1] %vm5843_vm2, %v18577_v13  ;;  %10049 = vst [vmem:[#allocation9 + $0x18] sm:$0x7] %v18577_v13 }
 0x147   :  { %10051 = vst [vmem:[#allocation9 + $0x14] sm:$0x7] %v18577_v13  ;;  %10052 = vst [vmem:[#allocation9 + $0x2c] sm:$0x7] %v18577_v13 }
 0x148   :  { %5845 = vst.msk [vmem:[#allocation7 + $0x50] sm:$0xf] %vm5841_vm7, %v18577_v13  ;;  %5848 = vst.msk [vmem:[#allocation7 + $0x48] sm:$0xf] %vm5841_vm7, %v18577_v13 }
 0x149   :  { %5846 = vst.msk [vmem:[#allocation7 + $0x54] sm:$0x1] %vm5843_vm2, %v18577_v13  ;;  %5849 = vst.msk [vmem:[#allocation7 + $0x4c] sm:$0x1] %vm5843_vm2, %v18577_v13 }
 0x14a   :  { %5850 = vst.msk [vmem:[#allocation7 + $0x98] sm:$0xf] %vm5841_vm7, %v18577_v13 }
 0x14b   :  { %14412 = vmatmul.mubr.msk.bf16.gmra.mrb[28].mxu0 %vm2569_vm0, %v14527_v14  ;;  %5851 = vst.msk [vmem:[#allocation7 + $0x9c] sm:$0x1] %vm5843_vm2, %v18577_v13  ;;  %v5929_v14 = vld [vmem:[#allocation7 + $0x24] sm:$0x1]  ;;  %vm7286_vm2 = vcmask 1042432  }
 0x14c   :  { %14415 = vmatprep.mubr.msk.bf16.mxu0 %vm2569_vm0, %v14528_v15  ;;  %v5930_v15 = vsel %vm16301_vm4, 0, %v5929_v14  ;;  %vm16806_vm8 = vmor %vm7286_vm2, %vm7287_vm3  ;;  %vm7205_vm3 = vcmask 1043968  }
 0x14d   :  { %5931 = vst [vmem:[#allocation7 + $0x24] sm:$0x1] %v5930_v15  ;;  %v5932_v15 = vld [vmem:[#allocation7 + $0x2c] sm:$0x1] }
 0x153   :  { %14416 = vmatmul.mubr.msk.bf16.gmra.mrb[32].mxu0 %vm2569_vm0, %v14529_v16  ;;  %v5855_v16 = vld [vmem:[#allocation7] sm:$0x1] }
 0x154   :  { %14419 = vmatprep.mubr.msk.bf16.mxu0 %vm2569_vm0, %v14530_v17  ;;  %v5856_v17 = vsel %vm16314_vm6, 0, %v5855_v16 }
 0x155   :  { %5857 = vst [vmem:[#allocation7] sm:$0x1] %v5856_v17 }
 0x15b   :  { %14420 = vmatmul.mubr.msk.bf16.gmra.mrb[36].mxu0 %vm2569_vm0, %v14531_v18  ;;  %v5867_v18 = vld [vmem:[#allocation7 + $0x20] sm:$0x1] }
 0x15c   :  { %14423 = vmatprep.mubr.msk.bf16.mxu0 %vm2569_vm0, %v14532_v19  ;;  %v5868_v19 = vsel %vm16314_vm6, 0, %v5867_v18  ;;  %v5933_v18 = vsel %vm16301_vm4, 0, %v5932_v15 }
 0x15d   :  { %5869 = vst [vmem:[#allocation7 + $0x20] sm:$0x1] %v5868_v19  ;;  %5934 = vst [vmem:[#allocation7 + $0x2c] sm:$0x1] %v5933_v18 }
 0x163   :  { %14424 = vmatmul.mubr.msk.bf16.gmra.mrb[40].mxu0 %vm2569_vm0, %v14533_v20  ;;  %v5917_v20 = vld [vmem:[#allocation7 + $0x4] sm:$0x1] }
 0x164   :  { %14427 = vmatprep.mubr.msk.bf16.mxu0 %vm2569_vm0, %v14534_v21  ;;  %v5918_v21 = vsel %vm16301_vm4, 0, %v5917_v20 }
 0x165   :  { %5919 = vst [vmem:[#allocation7 + $0x4] sm:$0x1] %v5918_v21 }
 0x16b   :  { %14428 = vmatmul.mubr.msk.bf16.gmra.mrb[44].mxu0 %vm2569_vm0, %v14535_v22  ;;  %v6898_v22 = vld [vmem:[#allocation7] sm:$0xf] }
 0x16c   :  { %14431 = vmatprep.mubr.msk.bf16.mxu0 %vm2569_vm0, %v14536_v23  ;;  %v6934_v23 = vshrl.u32 %v6898_v22, 16 }
 0x173   :  { %14432 = vmatmul.mubr.msk.bf16.gmra.mrb[48].mxu0 %vm2569_vm0, %v14537_v24  ;;  %v6937_v24 = vshll.u32 %v6898_v22, 16 }
 0x174   :  { %14435 = vmatprep.mubr.msk.bf16.mxu0 %vm2569_vm0, %v14538_v25  ;;  %v6936_v25 = vrot.slane %v6934_v23, 4 }
 0x17b   :  { %14436 = vmatmul.mubr.msk.bf16.gmra.mrb[52].mxu0 %vm2569_vm0, %v14539_v26  ;;  %v6939_v26 = vrot.slane %v6937_v24, 5 }
 0x17c   :  { %14439 = vmatprep.mubr.msk.bf16.mxu0 %vm2569_vm0, %v14540_v59  ;;  %v6899_v59 = vld [vmem:[#allocation7 + $0x4] sm:$0x1] }
 0x17d   :  { %v6943_v62 = vshll.u32 %v6899_v59, 16 }
 0x17f   :  { %v6945_v0 = vrot.slane %v6943_v62, 5  ;;  %v5870_v62 = vld [vmem:[#allocation7 + $0x28] sm:$0x1] }
 0x183   :  { %14440 = vmatmul.mubr.msk.bf16.gmra.mrb[56].mxu0 %vm2569_vm0, %v14541_v60  ;;  %v6940_v60 = vor.u32 %v6939_v26, %v6936_v25 }
 0x184   :  { %14443 = vmatprep.mubr.msk.bf16.mxu0 %vm2569_vm0, %v14542_v63 }
 0x185   :  { %v6941_v63 = vrot.slane %v6940_v60, 4 }
 0x187   :  { %v6946_v6 = vsel %vm16360_vm10, %v6941_v63, %v6945_v0 }
 0x188   :  { %7157 = vrot.lane.b32.xlu0 %v6946_v6, %s14725_s0 }
 0x18b   :  { %14444 = vmatmul.mubr.msk.bf16.gmra.mrb[60].mxu0 %vm2569_vm0, %v14543_v4  ;;  %v3219_v4 = vunpack.c.l.s4 %v14724_v3  ;;  %vm18579_vm0 = vcmask 1047559  }
 0x18d   :  { %v3220_v8 = vunpack.c.0.s8 %v3219_v4  ;;  %v5871_v4 = vsel %vm16314_vm6, 0, %v5870_v62 }
 0x18e   :  { %5872 = vst [vmem:[#allocation7 + $0x28] sm:$0x1] %v5871_v4 }
 0x18f   :  { %v16385_v20 = vsub.s32 %v3220_v8, %v16372_v9 }
 0x1e6   :  { %v14385_v10 = vpop.f32.mrb[0].mxu0 }
 0x1e7   :  { %v2963_v12 = vmul.f32 %v14385_v10, %v16370_v7  ;;  %v2704_v14 = vpop.f32.mrb[1].mxu0 }
 0x1e8   :  { %v2961_v16 = vmul.f32 %v16370_v7, %v2704_v14  ;;  %v14386_v17 = vpop.f32.mrb[2].mxu0 }
 0x1e9   :  { %v3027_v19 = vadd.f32 %v2963_v12, %v16377_v11  ;;  %v2964_v21 = vmul.f32 %v14386_v17, %v16370_v7  ;;  %v2707_v22 = vpop.f32.mrb[3].mxu0 }
 0x1ea   :  { %v3025_v23 = vadd.f32 %v2961_v16, %v16377_v11  ;;  %v2962_v24 = vmul.f32 %v16370_v7, %v2707_v22 }
 0x1eb   :  { %v3091_v25 = vmax.f32 %v3027_v19, 0.0  ;;  %v3028_v26 = vadd.f32 %v2964_v21, %v16377_v11 }
 0x1ec   :  { %v3089_v59 = vmax.f32 %v3025_v23, 0.0  ;;  %v3026_v60 = vadd.f32 %v2962_v24, %v16377_v11 }
 0x1ed   :  { %v3251_v63 = vcombine.high %v3091_v25, %v3091_v25  ;;  %v3258_v0 = vrot.slane %v3091_v25, %v16385_v20  ;;  %v3092_v3 = vmax.f32 %v3028_v26, 0.0 }
 0x1ee   :  { %v3217_v5 = vcombine.high %v3089_v59, %v3089_v59  ;;  %v3224_v6 = vrot.slane %v3089_v59, %v16385_v20  ;;  %v16396_v8 = vmax.f32 %v3026_v60, 0.0  ;;  %v14389_v10 = vpop.f32.mrb[4].mxu0 }
 0x1ef   :  { %v3265_v12 = vrot.slane %v3251_v63, %v16385_v20  ;;  %v3266_v14 = vcombine.high %v3258_v0, %v3258_v0  ;;  %v13238_v15 = vrot.slane %v3258_v0, 9  ;;  %v3268_v16 = vcombine.high %v3092_v3, %v3092_v3  ;;  %v2720_v17 = vpop.f32.mrb[5].mxu0 }
 0x1f0   :  { %v3231_v18 = vrot.slane %v3217_v5, %v16385_v20  ;;  %v3232_v19 = vcombine.high %v3224_v6, %v3224_v6  ;;  %v13230_v21 = vrot.slane %v3224_v6, 9  ;;  %v3275_v22 = vrot.slane %v3092_v3, %v16385_v20  ;;  %v14390_v23 = vpop.f32.mrb[6].mxu0 }
 0x1f1   :  { %v3267_v24 = vcombine.high %v3265_v12, %v3265_v12  ;;  %v13239_v25 = vrot.slane %v3266_v14, 9  ;;  %v13240_v26 = vrot.slane %v3265_v12, 9  ;;  %v5337_v59 = vmax.f32 %v3258_v0, %v13238_v15  ;;  %v16401_v60 = vpop.f32.mrb[7].mxu0 }
 0x1f2   :  { %v3233_v62 = vcombine.high %v3231_v18, %v3231_v18  ;;  %v13231_v4 = vrot.slane %v3232_v19, 9  ;;  %v13232_v63 = vrot.slane %v3231_v18, 9  ;;  %v5329_v13 = vmax.f32 %v3224_v6, %v13230_v21 }
 0x1f3   :  { %v13241_v50 = vrot.slane %v3267_v24, 9  ;;  %v5338_v34 = vmax.f32 %v3266_v14, %v13239_v25  ;;  %v5339_v58 = vmax.f32 %v3265_v12, %v13240_v26  ;;  %v3282_v5 = vrot.slane %v3268_v16, %v16385_v20 }
 0x1f4   :  { %v13233_v42 = vrot.slane %v3233_v62, 9  ;;  %v5330_v49 = vmax.f32 %v3232_v19, %v13231_v4  ;;  %v5331_v3 = vmax.f32 %v3231_v18, %v13232_v63  ;;  %v5585_v33 = vmax.f32 %v5329_v13, %v5337_v59 }
 0x1f5   :  { %v5340_v57 = vmax.f32 %v3267_v24, %v13241_v50  ;;  %v3283_v41 = vcombine.high %v3275_v22, %v3275_v22  ;;  %v3284_v0 = vcombine.high %v3282_v5, %v3282_v5  ;;  %v13242_v15 = vrot.slane %v3275_v22, 9 }
 0x1f6   :  { %v5332_v48 = vmax.f32 %v3233_v62, %v13233_v42  ;;  %v5586_v32 = vmax.f32 %v5330_v49, %v5338_v34  ;;  %v5587_v56 = vmax.f32 %v5331_v3, %v5339_v58  ;;  %v13960_v6 = vpack.c.bf16 %v5585_v33, %v5585_v33  ;;  %v16404_v21 = vpop.f32.mrb[8].mxu0 }
 0x1f7   :  { %v13243_v12 = vrot.slane %v3283_v41, 9  ;;  %v13244_v14 = vrot.slane %v3282_v5, 9  ;;  %v13245_v25 = vrot.slane %v3284_v0, 9  ;;  %v5341_v16 = vmax.f32 %v3275_v22, %v13242_v15  ;;  %v16406_v26 = vpop.f32.mrb[9].mxu0 }
 0x1f8   :  { %v5588_v18 = vmax.f32 %v5332_v48, %v5340_v57  ;;  %v13961_v13 = vpack.c.bf16 %v5586_v32, %v5586_v32  ;;  %v13962_v19 = vpack.c.bf16 %v5587_v56, %v5587_v56  ;;  %v6361_v50 = vunpack.c.l.b16 %v13960_v6  ;;  %v16408_v24 = vpop.f32.mrb[10].mxu0 }
 0x1f9   :  { %v5342_v59 = vmax.f32 %v3283_v41, %v13243_v12  ;;  %v5343_v4 = vmax.f32 %v3282_v5, %v13244_v14  ;;  %v5344_v42 = vmax.f32 %v3284_v0, %v13245_v25  ;;  %v3234_v33 = vcombine.high %v16396_v8, %v16396_v8  ;;  %v16412_v34 = vpop.f32.mrb[11].mxu0 }
 0x1fa   :  { %v13963_v49 = vpack.c.bf16 %v5588_v18, %v5588_v18  ;;  %v6362_v58 = vunpack.c.l.b16 %v13961_v13  ;;  %v6363_v62 = vunpack.c.l.b16 %v13962_v19  ;;  %v6489_v22 = vrot.slane %v6361_v50, 7 }
 0x1fb   :  { %v3241_v48 = vrot.slane %v16396_v8, %v16385_v20  ;;  %v3248_v32 = vrot.slane %v3234_v33, %v16385_v20  ;;  %v2967_v56 = vmul.f32 %v14389_v10, %v16370_v7  ;;  %v2965_v41 = vmul.f32 %v16370_v7, %v2720_v17 }
 0x1fc   :  { %v6364_v57 = vunpack.c.l.b16 %v13963_v49  ;;  %v6490_v63 = vrot.slane %v6362_v58, 6  ;;  %v6493_v5 = vrot.slane %v6363_v62, 5  ;;  %v2968_v3 = vmul.f32 %v14390_v23, %v16370_v7 }
 0x1fd   :  { %v3249_v0 = vcombine.high %v3241_v48, %v3241_v48  ;;  %v3250_v15 = vcombine.high %v3248_v32, %v3248_v32  ;;  %v13234_v6 = vrot.slane %v3241_v48, 9  ;;  %v13236_v12 = vrot.slane %v3248_v32, 9 }
 0x1fe   :  { %v6492_v14 = vsel %vm6491_vm11, %v6490_v63, %v6489_v22  ;;  %v6496_v25 = vrot.slane %v6364_v57, 4  ;;  %v3031_v8 = vadd.f32 %v2967_v56, %v16377_v11  ;;  %v3029_v18 = vadd.f32 %v2965_v41, %v16377_v11  ;;  %v16423_v10 = vpop.f32.mrb[12].mxu0 }
 0x1ff   :  { %v6495_v17 = vsel %vm6494_vm12, %v6493_v5, %v6492_v14  ;;  %v13235_v13 = vrot.slane %v3249_v0, 9  ;;  %v13237_v19 = vrot.slane %v3250_v15, 9  ;;  %v5333_v50 = vmax.f32 %v3241_v48, %v13234_v6  ;;  %v16426_v23 = vpop.f32.mrb[13].mxu0 }
 0x200   :  { %v5335_v33 = vmax.f32 %v3248_v32, %v13236_v12  ;;  %v6498_v49 = vsel %vm6497_vm13, %v6496_v25, %v6495_v17  ;;  %v3095_v58 = vmax.f32 %v3031_v8, 0.0  ;;  %v3093_v62 = vmax.f32 %v3029_v18, 0.0  ;;  %v16429_v22 = vpop.f32.mrb[14].mxu0 }
 0x201   :  { %v5334_v56 = vmax.f32 %v3249_v0, %v13235_v13  ;;  %v5336_v57 = vmax.f32 %v3250_v15, %v13237_v19  ;;  %v5589_v41 = vmax.f32 %v5333_v50, %v5341_v16  ;;  %v3032_v63 = vadd.f32 %v2968_v3, %v16377_v11  ;;  %v16432_v5 = vpop.f32.mrb[15].mxu0 }
 0x202   :  { %v5591_v14 = vmax.f32 %v5335_v33, %v5343_v4  ;;  %v3319_v48 = vcombine.high %v3095_v58, %v3095_v58  ;;  %v3326_v6 = vrot.slane %v3095_v58, %v16385_v20  ;;  %v3285_v32 = vcombine.high %v3093_v62, %v3093_v62 }
 0x203   :  { %v5590_v12 = vmax.f32 %v5334_v56, %v5342_v59  ;;  %v5592_v25 = vmax.f32 %v5336_v57, %v5344_v42  ;;  %v13964_v17 = vpack.c.bf16 %v5589_v41, %v5589_v41  ;;  %v3292_v8 = vrot.slane %v3093_v62, %v16385_v20 }
 0x204   :  { %v13966_v18 = vpack.c.bf16 %v5591_v14, %v5591_v14  ;;  %v3333_v0 = vrot.slane %v3319_v48, %v16385_v20  ;;  %v3334_v16 = vcombine.high %v3326_v6, %v3326_v6  ;;  %v13254_v15 = vrot.slane %v3326_v6, 9 }
 0x205   :  { %v13965_v13 = vpack.c.bf16 %v5590_v12, %v5590_v12  ;;  %v6365_v3 = vunpack.c.l.b16 %v13964_v17  ;;  %v14088_v19 = vpack.c.bf16 %v5592_v25, %v5592_v25  ;;  %v3299_v4 = vrot.slane %v3285_v32, %v16385_v20 }
 0x206   :  { %v6367_v50 = vunpack.c.l.b16 %v13966_v18  ;;  %v3335_v33 = vcombine.high %v3333_v0, %v3333_v0  ;;  %v13255_v58 = vrot.slane %v3334_v16, 9  ;;  %v13256_v47 = vrot.slane %v3333_v0, 9  ;;  %v16438_v59 = vpop.f32.mrb[16].mxu0 }
 0x207   :  { %v6366_v42 = vunpack.c.l.b16 %v13965_v13  ;;  %v6499_v56 = vrot.slane %v6365_v3, 3  ;;  %v6774_v62 = vsel %vm16314_vm6, %v14088_v19, %v6773_v40  ;;  %v5353_v57 = vmax.f32 %v3326_v6, %v13254_v15  ;;  %v16442_v41 = vpop.f32.mrb[17].mxu0 }
 0x208   :  { %v6505_v14 = vrot.slane %v6367_v50, 1  ;;  %6775 = vst [vmem:[#allocation7 + $0xc] sm:$0x1] %v6774_v62  ;;  %v13257_v48 = vrot.slane %v3335_v33, 9  ;;  %v5354_v12 = vmax.f32 %v3334_v16, %v13255_v58  ;;  %v5355_v25 = vmax.f32 %v3333_v0, %v13256_v47  ;;  %v16444_v32 = vpop.f32.mrb[18].mxu0 }
 0x209   :  { %v6501_v17 = vsel %vm6500_vm14, %v6499_v56, %v6498_v49  ;;  %v6502_v18 = vrot.slane %v6366_v42, 2  ;;  %v3300_v31 = vcombine.high %v3292_v8, %v3292_v8  ;;  %v3301_v55 = vcombine.high %v3299_v4, %v3299_v4  ;;  %v16447_v13 = vpop.f32.mrb[19].mxu0  ;;  %v6770_v16 = vld [vmem:[#allocation7 + $0x8] sm:$0xf] }
 0x20a   :  { %v5356_v3 = vmax.f32 %v3335_v33, %v13257_v48  ;;  %v13246_v39 = vrot.slane %v3292_v8, 9  ;;  %v13248_v40 = vrot.slane %v3299_v4, 9  ;;  %v3096_v6 = vmax.f32 %v3032_v63, 0.0 }
 0x20b   :  { %v6504_v15 = vsel %vm6503_vm15, %v6502_v18, %v6501_v17  ;;  %v13247_v19 = vrot.slane %v3300_v31, 9  ;;  %v13249_v50 = vrot.slane %v3301_v55, 9  ;;  %v2966_v47 = vmul.f32 %v16370_v7, %v16401_v60 }
 0x20c   :  { %v6507_v0 = vsel %vm18579_vm0, %v6505_v14, %v6504_v15  ;;  %v5345_v33 = vmax.f32 %v3292_v8, %v13246_v39  ;;  %v5347_v58 = vmax.f32 %v3299_v4, %v13248_v40  ;;  %v3336_v42 = vcombine.high %v3096_v6, %v3096_v6 }
 0x20d   :  { %v6703_v63 = vpack.c.b16 %v6507_v0, %v6507_v0  ;;  %v5346_v56 = vmax.f32 %v3300_v31, %v13247_v19  ;;  %v5348_v62 = vmax.f32 %v3301_v55, %v13249_v50  ;;  %v3343_v48 = vrot.slane %v3096_v6, %v16385_v20 }
 0x20e   :  { %v5593_v17 = vmax.f32 %v5345_v33, %v5353_v57  ;;  %v5595_v18 = vmax.f32 %v5347_v58, %v5355_v25  ;;  %v3350_v60 = vrot.slane %v3336_v42, %v16385_v20  ;;  %v3030_v14 = vadd.f32 %v2966_v47, %v16377_v11  ;;  %v16462_v15 = vpop.f32.mrb[20].mxu0 }
 0x20f   :  { %v6771_v46 = vsel %vm16455_vm1, %v6703_v63, %v6770_v16  ;;  %v5594_v30 = vmax.f32 %v5346_v56, %v5354_v12  ;;  %v5596_v39 = vmax.f32 %v5348_v62, %v5356_v3  ;;  %v3351_v8 = vcombine.high %v3343_v48, %v3343_v48  ;;  %v16466_v4 = vpop.f32.mrb[21].mxu0 }
 0x210   :  { %6772 = vst [vmem:[#allocation7 + $0x8] sm:$0xf] %v6771_v46  ;;  %v13968_v31 = vpack.c.bf16 %v5593_v17, %v5593_v17  ;;  %v13970_v55 = vpack.c.bf16 %v5595_v18, %v5595_v18  ;;  %v3352_v40 = vcombine.high %v3350_v60, %v3350_v60  ;;  %v13258_v57 = vrot.slane %v3343_v48, 9  ;;  %v16468_v25 = vpop.f32.mrb[22].mxu0 }
 0x211   :  { %v13969_v6 = vpack.c.bf16 %v5594_v30, %v5594_v30  ;;  %v13971_v19 = vpack.c.bf16 %v5596_v39, %v5596_v39  ;;  %v13259_v50 = vrot.slane %v3351_v8, 9  ;;  %v13260_v47 = vrot.slane %v3350_v60, 9  ;;  %v16470_v0 = vpop.f32.mrb[23].mxu0 }
 0x212   :  { %v6369_v33 = vunpack.c.l.b16 %v13968_v31  ;;  %v6371_v16 = vunpack.c.l.b16 %v13970_v55  ;;  %v13261_v12 = vrot.slane %v3352_v40, 9  ;;  %v5357_v3 = vmax.f32 %v3343_v48, %v13258_v57 }
 0x213   :  { %v6370_v58 = vunpack.c.l.b16 %v13969_v6  ;;  %v6372_v42 = vunpack.c.l.b16 %v13971_v19  ;;  %v5358_v63 = vmax.f32 %v3351_v8, %v13259_v50  ;;  %v5359_v46 = vmax.f32 %v3350_v60, %v13260_v47 }
 0x214   :  { %v6508_v56 = vrot.slane %v6369_v33, 7  ;;  %v6511_v62 = vrot.slane %v6371_v16, 5  ;;  %v5360_v17 = vmax.f32 %v3352_v40, %v13261_v12  ;;  %v3094_v18 = vmax.f32 %v3030_v14, 0.0 }
 0x215   :  { %v6509_v54 = vrot.slane %v6370_v58, 6  ;;  %v6513_v38 = vrot.slane %v6372_v42, 4  ;;  %v2971_v30 = vmul.f32 %v16404_v21, %v16370_v7  ;;  %v2969_v39 = vmul.f32 %v16370_v7, %v16406_v26 }
 0x216   :  { %v3302_v31 = vcombine.high %v3094_v18, %v3094_v18  ;;  %v3309_v55 = vrot.slane %v3094_v18, %v16385_v20  ;;  %v2972_v48 = vmul.f32 %v16408_v24, %v16370_v7  ;;  %v16481_v60 = vmul.f32 %v16370_v7, %v16412_v34  ;;  %v16483_v8 = vpop.f32.mrb[24].mxu0 }
 0x217   :  { %v6510_v14 = vsel %vm6491_vm11, %v6509_v54, %v6508_v56  ;;  %v3035_v40 = vadd.f32 %v2971_v30, %v16377_v11  ;;  %v3033_v21 = vadd.f32 %v2969_v39, %v16377_v11  ;;  %v16490_v26 = vmul.f32 %v16423_v10, %v16370_v7  ;;  %v7385_v57 = vld [vmem:[#allocation7 + $0x8] sm:$0xf]  ;;  %v16492_v6 = vpop.f32.mrb[25].mxu0 }
 0x218   :  { %v6512_v24 = vsel %vm6494_vm12, %v6511_v62, %v6510_v14  ;;  %v3316_v34 = vrot.slane %v3302_v31, %v16385_v20  ;;  %v3317_v19 = vcombine.high %v3309_v55, %v3309_v55  ;;  %v13250_v50 = vrot.slane %v3309_v55, 9  ;;  %7417 = vrot.lane.b32.xlu1 %v7385_v57, %s14725_s0  ;;  %v16501_v39 = vpop.f32.mrb[26].mxu0 }
 0x219   :  { %v6514_v54 = vsel %vm6497_vm13, %v6513_v38, %v6512_v24  ;;  %v3099_v47 = vmax.f32 %v3035_v40, 0.0  ;;  %v3097_v33 = vmax.f32 %v3033_v21, 0.0  ;;  %v3036_v16 = vadd.f32 %v2972_v48, %v16377_v11  ;;  %v16503_v40 = vpop.f32.mrb[27].mxu0 }
 0x21a   :  { %v3318_v12 = vcombine.high %v3316_v34, %v3316_v34  ;;  %v13251_v10 = vrot.slane %v3317_v19, 9  ;;  %v13252_v58 = vrot.slane %v3316_v34, 9  ;;  %v5349_v42 = vmax.f32 %v3309_v55, %v13250_v50 }
 0x21b   :  { %v3387_v56 = vcombine.high %v3099_v47, %v3099_v47  ;;  %v3394_v18 = vrot.slane %v3099_v47, %v16385_v20  ;;  %v3353_v62 = vcombine.high %v3097_v33, %v3097_v33  ;;  %v3360_v30 = vrot.slane %v3097_v33, %v16385_v20 }
 0x21c   :  { %v13253_v31 = vrot.slane %v3318_v12, 9  ;;  %v5350_v14 = vmax.f32 %v3317_v19, %v13251_v10  ;;  %v5351_v57 = vmax.f32 %v3316_v34, %v13252_v58  ;;  %v5597_v38 = vmax.f32 %v5349_v42, %v5357_v3  ;;  %v6779_v10 = vld [vmem:[#allocation7 + $0x14] sm:$0x1] }
 0x21d   :  { %v3401_v48 = vrot.slane %v3387_v56, %v16385_v20  ;;  %v3402_v21 = vcombine.high %v3394_v18, %v3394_v18  ;;  %v13270_v24 = vrot.slane %v3394_v18, 9  ;;  %v3367_v55 = vrot.slane %v3353_v62, %v16385_v20 }
 0x21e   :  { %v5352_v50 = vmax.f32 %v3318_v12, %v13253_v31  ;;  %v5598_v45 = vmax.f32 %v5350_v14, %v5358_v63  ;;  %v5599_v47 = vmax.f32 %v5351_v57, %v5359_v46  ;;  %v13972_v29 = vpack.c.bf16 %v5597_v38, %v5597_v38  ;;  %v16507_v63 = vpop.f32.mrb[28].mxu0 }
 0x21f   :  { %v3403_v53 = vcombine.high %v3401_v48, %v3401_v48  ;;  %v13271_v33 = vrot.slane %v3402_v21, 9  ;;  %v13272_v37 = vrot.slane %v3401_v48, 9  ;;  %v5369_v44 = vmax.f32 %v3394_v18, %v13270_v24  ;;  %v16509_v18 = vpop.f32.mrb[29].mxu0 }
 0x220   :  { %v5600_v28 = vmax.f32 %v5352_v50, %v5360_v17  ;;  %v13973_v19 = vpack.c.bf16 %v5598_v45, %v5598_v45  ;;  %v13974_v34 = vpack.c.bf16 %v5599_v47, %v5599_v47  ;;  %v6373_v3 = vunpack.c.l.b16 %v13972_v29  ;;  %v16514_v38 = vpop.f32.mrb[30].mxu0 }
 0x221   :  { %v13273_v58 = vrot.slane %v3403_v53, 9  ;;  %v5370_v42 = vmax.f32 %v3402_v21, %v13271_v33  ;;  %v5371_v56 = vmax.f32 %v3401_v48, %v13272_v37  ;;  %v3368_v52 = vcombine.high %v3360_v30, %v3360_v30 }
 0x222   :  { %v6374_v36 = vunpack.c.l.b16 %v13973_v19  ;;  %v6375_v43 = vunpack.c.l.b16 %v13974_v34  ;;  %v6515_v62 = vrot.slane %v6373_v3, 3  ;;  %v14089_v12 = vpack.c.bf16 %v5600_v28, %v5600_v28  ;;  %v16522_v3 = vpop.f32.mrb[31].mxu0 }
 0x223   :  { %v5372_v46 = vmax.f32 %v3403_v53, %v13273_v58  ;;  %v3369_v31 = vcombine.high %v3367_v55, %v3367_v55  ;;  %v13262_v14 = vrot.slane %v3360_v30, 9  ;;  %v13263_v57 = vrot.slane %v3368_v52, 9 }
 0x224   :  { %v6516_v45 = vsel %vm6500_vm14, %v6515_v62, %v6514_v54  ;;  %v6517_v29 = vrot.slane %v6374_v36, 2  ;;  %v6519_v17 = vrot.slane %v6375_v43, 1  ;;  %v6780_v37 = vsel %vm16314_vm6, %v14089_v12, %v6779_v10  ;;  %v6776_v54 = vld [vmem:[#allocation7 + $0x10] sm:$0xf] }
 0x225   :  { %6781 = vst [vmem:[#allocation7 + $0x14] sm:$0x1] %v6780_v37  ;;  %v13264_v48 = vrot.slane %v3367_v55, 9  ;;  %v13265_v28 = vrot.slane %v3369_v31, 9  ;;  %v5361_v21 = vmax.f32 %v3360_v30, %v13262_v14  ;;  %v5362_v24 = vmax.f32 %v3368_v52, %v13263_v57 }
 0x226   :  { %v6518_v53 = vsel %vm6503_vm15, %v6517_v29, %v6516_v45  ;;  %v3100_v50 = vmax.f32 %v3036_v16, 0.0  ;;  %v3034_v47 = vadd.f32 %v16481_v60, %v16377_v11  ;;  %v3039_v36 = vadd.f32 %v16490_v26, %v16377_v11 }
 0x227   :  { %v6520_v43 = vsel %vm18579_vm0, %v6519_v17, %v6518_v53  ;;  %v5363_v33 = vmax.f32 %v3367_v55, %v13264_v48  ;;  %v5364_v19 = vmax.f32 %v3369_v31, %v13265_v28  ;;  %v5601_v34 = vmax.f32 %v5361_v21, %v5369_v44 }
 0x228   :  { %v6705_v10 = vpack.c.b16 %v6520_v43, %v6520_v43  ;;  %v5602_v30 = vmax.f32 %v5362_v24, %v5370_v42  ;;  %v3404_v52 = vcombine.high %v3100_v50, %v3100_v50  ;;  %v3411_v58 = vrot.slane %v3100_v50, %v16385_v20 }
 0x229   :  { %v5603_v16 = vmax.f32 %v5363_v33, %v5371_v56  ;;  %v5604_v62 = vmax.f32 %v5364_v19, %v5372_v46  ;;  %v13976_v12 = vpack.c.bf16 %v5601_v34, %v5601_v34  ;;  %v3098_v60 = vmax.f32 %v3034_v47, 0.0 }
 0x22a   :  { %v6777_v26 = vsel %vm16455_vm1, %v6705_v10, %v6776_v54  ;;  %v13977_v14 = vpack.c.bf16 %v5602_v30, %v5602_v30  ;;  %v3418_v57 = vrot.slane %v3404_v52, %v16385_v20  ;;  %v3419_v55 = vcombine.high %v3411_v58, %v3411_v58 }
 0x22b   :  { %6778 = vst [vmem:[#allocation7 + $0x10] sm:$0xf] %v6777_v26  ;;  %v13978_v44 = vpack.c.bf16 %v5603_v16, %v5603_v16  ;;  %v13979_v31 = vpack.c.bf16 %v5604_v62, %v5604_v62  ;;  %v6377_v45 = vunpack.c.l.b16 %v13976_v12  ;;  %v13274_v29 = vrot.slane %v3411_v58, 9 }
 0x22c   :  { %v6378_v42 = vunpack.c.l.b16 %v13977_v14  ;;  %v3420_v17 = vcombine.high %v3418_v57, %v3418_v57  ;;  %v13275_v37 = vrot.slane %v3419_v55, 9  ;;  %v13276_v48 = vrot.slane %v3418_v57, 9 }
 0x22d   :  { %v6379_v56 = vunpack.c.l.b16 %v13978_v44  ;;  %v6380_v46 = vunpack.c.l.b16 %v13979_v31  ;;  %v6521_v28 = vrot.slane %v6377_v45, 7  ;;  %v5373_v21 = vmax.f32 %v3411_v58, %v13274_v29 }
 0x22e   :  { %v6522_v24 = vrot.slane %v6378_v42, 6  ;;  %v13277_v53 = vrot.slane %v3420_v17, 9  ;;  %v5374_v50 = vmax.f32 %v3419_v55, %v13275_v37  ;;  %v5375_v47 = vmax.f32 %v3418_v57, %v13276_v48 }
 0x22f   :  { %v6524_v43 = vrot.slane %v6379_v56, 5  ;;  %v6526_v54 = vrot.slane %v6380_v46, 4  ;;  %v3370_v33 = vcombine.high %v3098_v60, %v3098_v60  ;;  %v3377_v19 = vrot.slane %v3098_v60, %v16385_v20 }
 0x230   :  { %v6523_v34 = vsel %vm6491_vm11, %v6522_v24, %v6521_v28  ;;  %v5376_v10 = vmax.f32 %v3420_v17, %v13277_v53  ;;  %v3103_v30 = vmax.f32 %v3039_v36, 0.0  ;;  %v2973_v52 = vmul.f32 %v16370_v7, %v16426_v23 }
 0x231   :  { %v6525_v16 = vsel %vm6494_vm12, %v6524_v43, %v6523_v34  ;;  %v3384_v58 = vrot.slane %v3370_v33, %v16385_v20  ;;  %v3385_v62 = vcombine.high %v3377_v19, %v3377_v19  ;;  %v13266_v12 = vrot.slane %v3377_v19, 9 }
 0x232   :  { %v6527_v26 = vsel %vm6497_vm13, %v6526_v54, %v6525_v16  ;;  %v3455_v14 = vcombine.high %v3103_v30, %v3103_v30  ;;  %v3462_v57 = vrot.slane %v3103_v30, %v16385_v20  ;;  %v3037_v60 = vadd.f32 %v2973_v52, %v16377_v11  ;;  %v7386_v55 = vld [vmem:[#allocation7 + $0x10] sm:$0xf] }
 0x233   :  { %v3386_v44 = vcombine.high %v3384_v58, %v3384_v58  ;;  %v13267_v31 = vrot.slane %v3385_v62, 9  ;;  %v13268_v36 = vrot.slane %v3384_v58, 9  ;;  %v5365_v45 = vmax.f32 %v3377_v19, %v13266_v12  ;;  %7419 = vrot.lane.b32.xlu1 %v7386_v55, %s14725_s0 }
 0x234   :  { %v3469_v23 = vrot.slane %v3455_v14, %v16385_v20  ;;  %v3470_v29 = vcombine.high %v3462_v57, %v3462_v57  ;;  %v13286_v42 = vrot.slane %v3462_v57, 9  ;;  %v3101_v17 = vmax.f32 %v3037_v60, 0.0 }
 0x235   :  { %v13269_v37 = vrot.slane %v3386_v44, 9  ;;  %v5366_v48 = vmax.f32 %v3385_v62, %v13267_v31  ;;  %v5367_v56 = vmax.f32 %v3384_v58, %v13268_v36  ;;  %v5605_v46 = vmax.f32 %v5365_v45, %v5373_v21 }
 0x236   :  { %v3471_v28 = vcombine.high %v3469_v23, %v3469_v23  ;;  %v13287_v24 = vrot.slane %v3470_v29, 9  ;;  %v13288_v53 = vrot.slane %v3469_v23, 9  ;;  %v5385_v43 = vmax.f32 %v3462_v57, %v13286_v42 }
 0x237   :  { %v5368_v54 = vmax.f32 %v3386_v44, %v13269_v37  ;;  %v5606_v33 = vmax.f32 %v5366_v48, %v5374_v50  ;;  %v5607_v34 = vmax.f32 %v5367_v56, %v5375_v47  ;;  %v13980_v30 = vpack.c.bf16 %v5605_v46, %v5605_v46 }
 0x238   :  { %v13289_v19 = vrot.slane %v3471_v28, 9  ;;  %v5386_v52 = vmax.f32 %v3470_v29, %v13287_v24  ;;  %v5387_v16 = vmax.f32 %v3469_v23, %v13288_v53  ;;  %v3421_v12 = vcombine.high %v3101_v17, %v3101_v17 }
 0x239   :  { %v5608_v14 = vmax.f32 %v5368_v54, %v5376_v10  ;;  %v13981_v55 = vpack.c.bf16 %v5606_v33, %v5606_v33  ;;  %v13982_v27 = vpack.c.bf16 %v5607_v34, %v5607_v34  ;;  %v6381_v60 = vunpack.c.l.b16 %v13980_v30  ;;  %v6782_v54 = vld [vmem:[#allocation7 + $0x18] sm:$0xf] }
 0x23a   :  { %v5388_v62 = vmax.f32 %v3471_v28, %v13289_v19  ;;  %v3428_v21 = vrot.slane %v3101_v17, %v16385_v20  ;;  %v3435_v58 = vrot.slane %v3421_v12, %v16385_v20  ;;  %v2976_v57 = vmul.f32 %v16429_v22, %v16370_v7 }
 0x23b   :  { %v6382_v50 = vunpack.c.l.b16 %v13981_v55  ;;  %v6383_v47 = vunpack.c.l.b16 %v13982_v27  ;;  %v6528_v44 = vrot.slane %v6381_v60, 3  ;;  %v14090_v31 = vpack.c.bf16 %v5608_v14, %v5608_v14 }
 0x23c   :  { %v3436_v36 = vcombine.high %v3428_v21, %v3428_v21  ;;  %v3437_v45 = vcombine.high %v3435_v58, %v3435_v58  ;;  %v13278_v23 = vrot.slane %v3428_v21, 9  ;;  %v13280_v10 = vrot.slane %v3435_v58, 9 }
 0x23d   :  { %v6529_v29 = vsel %vm6500_vm14, %v6528_v44, %v6527_v26  ;;  %v6530_v42 = vrot.slane %v6382_v50, 2  ;;  %v6532_v37 = vrot.slane %v6383_v47, 1  ;;  %v6786_v17 = vsel %vm16314_vm6, %v14090_v31, %v6785_v51 }
 0x23e   :  { %6787 = vst [vmem:[#allocation7 + $0x1c] sm:$0x1] %v6786_v17  ;;  %v13279_v48 = vrot.slane %v3436_v36, 9  ;;  %v13281_v56 = vrot.slane %v3437_v45, 9  ;;  %v5377_v46 = vmax.f32 %v3428_v21, %v13278_v23  ;;  %v5379_v22 = vmax.f32 %v3435_v58, %v13280_v10 }
 0x23f   :  { %v6531_v27 = vsel %vm6503_vm15, %v6530_v42, %v6529_v29  ;;  %v3040_v28 = vadd.f32 %v2976_v57, %v16377_v11  ;;  %v2974_v24 = vmul.f32 %v16370_v7, %v16432_v5  ;;  %v2979_v26 = vmul.f32 %v16438_v59, %v16370_v7 }
 0x240   :  { %v6533_v53 = vsel %vm18579_vm0, %v6532_v37, %v6531_v27  ;;  %v5378_v33 = vmax.f32 %v3436_v36, %v13279_v48  ;;  %v5380_v51 = vmax.f32 %v3437_v45, %v13281_v56  ;;  %v5609_v34 = vmax.f32 %v5377_v46, %v5385_v43  ;;  %v16559_v56 = vpop.f32.mrb[32].mxu0 }
 0x241   :  { %v6707_v30 = vpack.c.b16 %v6533_v53, %v6533_v53  ;;  %v5611_v19 = vmax.f32 %v5379_v22, %v5387_v16  ;;  %v3104_v12 = vmax.f32 %v3040_v28, 0.0  ;;  %v3038_v14 = vadd.f32 %v2974_v24, %v16377_v11  ;;  %v16562_v24 = vpop.f32.mrb[33].mxu0 }
 0x242   :  { %v5610_v55 = vmax.f32 %v5378_v33, %v5386_v52  ;;  %v5612_v60 = vmax.f32 %v5380_v51, %v5388_v62  ;;  %v13984_v21 = vpack.c.bf16 %v5609_v34, %v5609_v34  ;;  %v3043_v58 = vadd.f32 %v2979_v26, %v16377_v11 }
 0x243   :  { %v6783_v5 = vsel %vm16455_vm1, %v6707_v30, %v6782_v54  ;;  %v13986_v59 = vpack.c.bf16 %v5611_v19, %v5611_v19  ;;  %v3472_v57 = vcombine.high %v3104_v12, %v3104_v12  ;;  %v3479_v50 = vrot.slane %v3104_v12, %v16385_v20 }
 0x244   :  { %6784 = vst [vmem:[#allocation7 + $0x18] sm:$0xf] %v6783_v5  ;;  %v13985_v47 = vpack.c.bf16 %v5610_v55, %v5610_v55  ;;  %v13987_v43 = vpack.c.bf16 %v5612_v60, %v5612_v60  ;;  %v6385_v44 = vunpack.c.l.b16 %v13984_v21  ;;  %v3102_v16 = vmax.f32 %v3038_v14, 0.0 }
 0x245   :  { %v6387_v31 = vunpack.c.l.b16 %v13986_v59  ;;  %v3486_v36 = vrot.slane %v3472_v57, %v16385_v20  ;;  %v3487_v52 = vcombine.high %v3479_v50, %v3479_v50  ;;  %v13290_v62 = vrot.slane %v3479_v50, 9 }
 0x246   :  { %v6386_v45 = vunpack.c.l.b16 %v13985_v47  ;;  %v6388_v23 = vunpack.c.l.b16 %v13987_v43  ;;  %v6534_v10 = vrot.slane %v6385_v44, 7  ;;  %v3438_v29 = vcombine.high %v3102_v16, %v3102_v16 }
 0x247   :  { %v6537_v42 = vrot.slane %v6387_v31, 5  ;;  %v3488_v37 = vcombine.high %v3486_v36, %v3486_v36  ;;  %v13291_v17 = vrot.slane %v3487_v52, 9  ;;  %v13292_v48 = vrot.slane %v3486_v36, 9 }
 0x248   :  { %v6535_v46 = vrot.slane %v6386_v45, 6  ;;  %v6539_v22 = vrot.slane %v6388_v23, 4  ;;  %v5389_v27 = vmax.f32 %v3479_v50, %v13290_v62  ;;  %v3445_v28 = vrot.slane %v3102_v16, %v16385_v20 }
 0x249   :  { %v13293_v26 = vrot.slane %v3488_v37, 9  ;;  %v5390_v53 = vmax.f32 %v3487_v52, %v13291_v17  ;;  %v5391_v54 = vmax.f32 %v3486_v36, %v13292_v48  ;;  %v3452_v33 = vrot.slane %v3438_v29, %v16385_v20 }
 0x24a   :  { %v6536_v51 = vsel %vm6491_vm11, %v6535_v46, %v6534_v10  ;;  %v3453_v34 = vcombine.high %v3445_v28, %v3445_v28  ;;  %v13282_v30 = vrot.slane %v3445_v28, 9  ;;  %v3107_v19 = vmax.f32 %v3043_v58, 0.0 }
 0x24b   :  { %v6538_v12 = vsel %vm6494_vm12, %v6537_v42, %v6536_v51  ;;  %v5392_v14 = vmax.f32 %v3488_v37, %v13293_v26  ;;  %v3454_v55 = vcombine.high %v3452_v33, %v3452_v33  ;;  %v13284_v60 = vrot.slane %v3452_v33, 9  ;;  %v6791_v26 = vld [vmem:[#allocation7 + $0x24] sm:$0x1] }
 0x24c   :  { %v13283_v21 = vrot.slane %v3453_v34, 9  ;;  %v5381_v5 = vmax.f32 %v3445_v28, %v13282_v30  ;;  %v6540_v59 = vsel %vm6497_vm13, %v6539_v22, %v6538_v12  ;;  %v3523_v57 = vcombine.high %v3107_v19, %v3107_v19 }
 0x24d   :  { %v13285_v50 = vrot.slane %v3454_v55, 9  ;;  %v5383_v47 = vmax.f32 %v3452_v33, %v13284_v60  ;;  %v3530_v43 = vrot.slane %v3107_v19, %v16385_v20  ;;  %v2977_v44 = vmul.f32 %v16370_v7, %v16442_v41  ;;  %v16574_v41 = vpop.f32.mrb[34].mxu0 }
 0x24e   :  { %v5382_v16 = vmax.f32 %v3453_v34, %v13283_v21  ;;  %v5613_v31 = vmax.f32 %v5381_v5, %v5389_v27  ;;  %v3537_v58 = vrot.slane %v3523_v57, %v16385_v20  ;;  %v2980_v36 = vmul.f32 %v16444_v32, %v16370_v7  ;;  %v16576_v32 = vpop.f32.mrb[35].mxu0 }
 0x24f   :  { %v5384_v52 = vmax.f32 %v3454_v55, %v13285_v50  ;;  %v5615_v62 = vmax.f32 %v5383_v47, %v5391_v54  ;;  %v3538_v45 = vcombine.high %v3530_v43, %v3530_v43  ;;  %v13302_v23 = vrot.slane %v3530_v43, 9 }
 0x250   :  { %v5614_v10 = vmax.f32 %v5382_v16, %v5390_v53  ;;  %v13988_v29 = vpack.c.bf16 %v5613_v31, %v5613_v31  ;;  %v3539_v42 = vcombine.high %v3537_v58, %v3537_v58  ;;  %v13304_v37 = vrot.slane %v3537_v58, 9 }
 0x251   :  { %v5616_v17 = vmax.f32 %v5384_v52, %v5392_v14  ;;  %v13990_v48 = vpack.c.bf16 %v5615_v62, %v5615_v62  ;;  %v13303_v46 = vrot.slane %v3538_v45, 9  ;;  %v5401_v22 = vmax.f32 %v3530_v43, %v13302_v23  ;;  %v6788_v23 = vld [vmem:[#allocation7 + $0x20] sm:$0xf] }
 0x252   :  { %v13989_v27 = vpack.c.bf16 %v5614_v10, %v5614_v10  ;;  %v6389_v28 = vunpack.c.l.b16 %v13988_v29  ;;  %v13305_v33 = vrot.slane %v3539_v42, 9  ;;  %v5403_v51 = vmax.f32 %v3537_v58, %v13304_v37 }
 0x253   :  { %v6391_v54 = vunpack.c.l.b16 %v13990_v48  ;;  %v14091_v34 = vpack.c.bf16 %v5616_v17, %v5616_v17  ;;  %v5402_v30 = vmax.f32 %v3538_v45, %v13303_v46  ;;  %v3041_v53 = vadd.f32 %v2977_v44, %v16377_v11 }
 0x254   :  { %v6390_v19 = vunpack.c.l.b16 %v13989_v27  ;;  %v6541_v12 = vrot.slane %v6389_v28, 3  ;;  %v5404_v14 = vmax.f32 %v3539_v42, %v13305_v33  ;;  %v3044_v55 = vadd.f32 %v2980_v36, %v16377_v11 }
 0x255   :  { %v6545_v60 = vrot.slane %v6391_v54, 1  ;;  %v6792_v21 = vsel %vm16314_vm6, %v14091_v34, %v6791_v26  ;;  %v3105_v5 = vmax.f32 %v3041_v53, 0.0  ;;  %v2978_v57 = vmul.f32 %v16370_v7, %v16447_v13 }
 0x256   :  { %v6542_v50 = vsel %vm6500_vm14, %v6541_v12, %v6540_v59  ;;  %v6543_v47 = vrot.slane %v6390_v19, 2  ;;  %6793 = vst [vmem:[#allocation7 + $0x24] sm:$0x1] %v6792_v21  ;;  %v3108_v43 = vmax.f32 %v3044_v55, 0.0  ;;  %v2983_v44 = vmul.f32 %v16462_v15, %v16370_v7 }
 0x257   :  { %v3489_v16 = vcombine.high %v3105_v5, %v3105_v5  ;;  %v3496_v31 = vrot.slane %v3105_v5, %v16385_v20  ;;  %v3042_v58 = vadd.f32 %v2978_v57, %v16377_v11  ;;  %v2981_v36 = vmul.f32 %v16370_v7, %v16466_v4 }
 0x258   :  { %v6544_v52 = vsel %vm6503_vm15, %v6543_v47, %v6542_v50  ;;  %v3540_v62 = vcombine.high %v3108_v43, %v3108_v43  ;;  %v3547_v13 = vrot.slane %v3108_v43, %v16385_v20  ;;  %v3047_v59 = vadd.f32 %v2983_v44, %v16377_v11 }
 0x259   :  { %v6546_v45 = vsel %vm18579_vm0, %v6545_v60, %v6544_v52  ;;  %v3503_v15 = vrot.slane %v3489_v16, %v16385_v20  ;;  %v3504_v10 = vcombine.high %v3496_v31, %v3496_v31  ;;  %v13294_v29 = vrot.slane %v3496_v31, 9 }
 0x25a   :  { %v6709_v42 = vpack.c.b16 %v6546_v45, %v6546_v45  ;;  %v3554_v37 = vrot.slane %v3540_v62, %v16385_v20  ;;  %v3555_v17 = vcombine.high %v3547_v13, %v3547_v13  ;;  %v13306_v48 = vrot.slane %v3547_v13, 9 }
 0x25b   :  { %v3505_v7 = vcombine.high %v3503_v15, %v3503_v15  ;;  %v13295_v4 = vrot.slane %v3504_v10, 9  ;;  %v13296_v46 = vrot.slane %v3503_v15, 9  ;;  %v5393_v27 = vmax.f32 %v3496_v31, %v13294_v29  ;;  %v16602_v31 = vld [vmem:[%s18574_s7 + $0x1] ss:$0 sm:$0xff] }
 0x25c   :  { %v6789_v28 = vsel %vm16455_vm1, %v6709_v42, %v6788_v23  ;;  %v3556_v11 = vcombine.high %v3554_v37, %v3554_v37  ;;  %v13307_v26 = vrot.slane %v3555_v17, 9  ;;  %v13308_v33 = vrot.slane %v3554_v37, 9  ;;  %v14544_v42 = vld [vmem:[%s18569_s2 + $0x100] sm:$0xff]  }
 0x25d   :  { %6790 = vst [vmem:[#allocation7 + $0x20] sm:$0xf] %v6789_v28  ;;  %v13297_v54 = vrot.slane %v3505_v7, 9  ;;  %v5394_v34 = vmax.f32 %v3504_v10, %v13295_v4  ;;  %v5395_v53 = vmax.f32 %v3503_v15, %v13296_v46  ;;  %v5617_v19 = vmax.f32 %v5393_v27, %v5401_v22  ;;  %14447 = vmatprep.subr.bf16.mxu0 %v14544_v42  ;;  %v16613_v28 = vpop.f32.mrb[36].mxu0 }
 0x25e   :  { %v13309_v12 = vrot.slane %v3556_v11, 9  ;;  %v5405_v55 = vmax.f32 %v3547_v13, %v13306_v48  ;;  %v5406_v60 = vmax.f32 %v3555_v17, %v13307_v26  ;;  %v5407_v21 = vmax.f32 %v3554_v37, %v13308_v33  ;;  %14448 = vmatpush3.bf16.msra.mxu0 %v14544_v42  ;;  %v5873_v42 = vld [vmem:[#allocation7 + $0x30] sm:$0x1] }
 0x25f   :  { %v5396_v5 = vmax.f32 %v3505_v7, %v13297_v54  ;;  %v5618_v57 = vmax.f32 %v5394_v34, %v5402_v30  ;;  %v5619_v50 = vmax.f32 %v5395_v53, %v5403_v51  ;;  %v13992_v47 = vpack.c.bf16 %v5617_v19, %v5617_v19  ;;  %v16615_v34 = vpop.f32.mrb[37].mxu0 }
 0x260   :  { %v5408_v43 = vmax.f32 %v3556_v11, %v13309_v12  ;;  %v3106_v44 = vmax.f32 %v3042_v58, 0.0  ;;  %v3111_v16 = vmax.f32 %v3047_v59, 0.0  ;;  %v3045_v52 = vadd.f32 %v16602_v31, %v2981_v36 }
 0x261   :  { %v5620_v62 = vmax.f32 %v5396_v5, %v5404_v14  ;;  %v13993_v22 = vpack.c.bf16 %v5618_v57, %v5618_v57  ;;  %v13994_v45 = vpack.c.bf16 %v5619_v50, %v5619_v50  ;;  %v6393_v13 = vunpack.c.l.b16 %v13992_v47 }
 0x262   :  { %v3506_v23 = vcombine.high %v3106_v44, %v3106_v44  ;;  %v3513_v15 = vrot.slane %v3106_v44, %v16385_v20  ;;  %v3591_v30 = vcombine.high %v3111_v16, %v3111_v16  ;;  %v3598_v51 = vrot.slane %v3111_v16, %v16385_v20 }
 0x263   :  { %v13995_v10 = vpack.c.bf16 %v5620_v62, %v5620_v62  ;;  %v6394_v58 = vunpack.c.l.b16 %v13993_v22  ;;  %v6395_v59 = vunpack.c.l.b16 %v13994_v45  ;;  %v6547_v29 = vrot.slane %v6393_v13, 7 }
 0x264   :  { %v3520_v36 = vrot.slane %v3506_v23, %v16385_v20  ;;  %v3521_v14 = vcombine.high %v3513_v15, %v3513_v15  ;;  %v13298_v37 = vrot.slane %v3513_v15, 9  ;;  %v3605_v17 = vrot.slane %v3591_v30, %v16385_v20  ;;  %v7388_v48 = vld [vmem:[#allocation7 + $0x20] sm:$0xf] }
 0x265   :  { %v6396_v7 = vunpack.c.l.b16 %v13995_v10  ;;  %v6548_v4 = vrot.slane %v6394_v58, 6  ;;  %v6550_v46 = vrot.slane %v6395_v59, 5  ;;  %v3606_v27 = vcombine.high %v3598_v51, %v3598_v51  ;;  %7423 = vrot.lane.b32.xlu1 %v7388_v48, %s14725_s0 }
 0x266   :  { %v3522_v11 = vcombine.high %v3520_v36, %v3520_v36  ;;  %v13299_v26 = vrot.slane %v3521_v14, 9  ;;  %v13300_v33 = vrot.slane %v3520_v36, 9  ;;  %v5397_v54 = vmax.f32 %v3513_v15, %v13298_v37 }
 0x267   :  { %v6549_v53 = vsel %vm6491_vm11, %v6548_v4, %v6547_v29  ;;  %v6552_v19 = vrot.slane %v6396_v7, 4  ;;  %v3607_v12 = vcombine.high %v3605_v17, %v3605_v17  ;;  %v13318_v5 = vrot.slane %v3598_v51, 9 }
 0x268   :  { %v6551_v57 = vsel %vm6494_vm12, %v6550_v46, %v6549_v53  ;;  %v13301_v50 = vrot.slane %v3522_v11, 9  ;;  %v5398_v47 = vmax.f32 %v3521_v14, %v13299_v26  ;;  %v5399_v44 = vmax.f32 %v3520_v36, %v13300_v33  ;;  %v6797_v36 = vld [vmem:[#allocation7 + $0x2c] sm:$0x1]  ;;  %v16623_v46 = vld [vmem:[%s18574_s7] ss:$0 sm:$0xff] }
 0x269   :  { %v5621_v16 = vmax.f32 %v5397_v54, %v5405_v55  ;;  %v6553_v62 = vsel %vm6497_vm13, %v6552_v19, %v6551_v57  ;;  %v13319_v22 = vrot.slane %v3606_v27, 9  ;;  %v13320_v45 = vrot.slane %v3605_v17, 9  ;;  %v5935_v54 = vld [vmem:[#allocation7 + $0x34] sm:$0x1] }
 0x26a   :  { %v5400_v13 = vmax.f32 %v3522_v11, %v13301_v50  ;;  %v5622_v23 = vmax.f32 %v5398_v47, %v5406_v60  ;;  %v5623_v15 = vmax.f32 %v5399_v44, %v5407_v21  ;;  %v13321_v30 = vrot.slane %v3607_v12, 9 }
 0x26b   :  { %v13996_v10 = vpack.c.bf16 %v5621_v16, %v5621_v16  ;;  %v5417_v58 = vmax.f32 %v3598_v51, %v13318_v5  ;;  %v5418_v59 = vmax.f32 %v3606_v27, %v13319_v22  ;;  %v5419_v29 = vmax.f32 %v3605_v17, %v13320_v45 }
 0x26c   :  { %v5624_v37 = vmax.f32 %v5400_v13, %v5408_v43  ;;  %v13997_v48 = vpack.c.bf16 %v5622_v23, %v5622_v23  ;;  %v13998_v7 = vpack.c.bf16 %v5623_v15, %v5623_v15  ;;  %v5420_v4 = vmax.f32 %v3607_v12, %v13321_v30  ;;  %v6794_v13 = vld [vmem:[#allocation7 + $0x28] sm:$0xf] }
 0x26d   :  { %v6397_v14 = vunpack.c.l.b16 %v13996_v10  ;;  %v3109_v55 = vmax.f32 %v3045_v52, 0.0  ;;  %v2984_v60 = vmul.f32 %v16623_v46, %v16468_v25  ;;  %v2982_v21 = vmul.f32 %v16623_v46, %v16470_v0  ;;  %v14546_v10 = vld [vmem:[%s18569_s2 + $0x108] sm:$0xff]  }
 0x26e   :  { %v6398_v51 = vunpack.c.l.b16 %v13997_v48  ;;  %v6399_v17 = vunpack.c.l.b16 %v13998_v7  ;;  %v14092_v43 = vpack.c.bf16 %v5624_v37, %v5624_v37  ;;  %v5874_v27 = vsel %vm16314_vm6, 0, %v5873_v42  ;;  %14449 = vmatprep.subr.bf16.mxu0 %v14546_v10 }
 0x26f   :  { %v6554_v11 = vrot.slane %v6397_v14, 3  ;;  %v3557_v26 = vcombine.high %v3109_v55, %v3109_v55  ;;  %v3564_v52 = vrot.slane %v3109_v55, %v16385_v20  ;;  %v3048_v33 = vadd.f32 %v16602_v31, %v2984_v60  ;;  %5875 = vst [vmem:[#allocation7 + $0x30] sm:$0x1] %v5874_v27  ;;  %14450 = vmatpush3.bf16.msra.mxu0 %v14546_v10 }
 0x270   :  { %v6556_v53 = vrot.slane %v6398_v51, 2  ;;  %v6558_v19 = vrot.slane %v6399_v17, 1  ;;  %v6798_v25 = vsel %vm16314_vm6, %v14092_v43, %v6797_v36  ;;  %v3046_v0 = vadd.f32 %v16602_v31, %v2982_v21 }
 0x271   :  { %v6555_v12 = vsel %vm6500_vm14, %v6554_v11, %v6553_v62  ;;  %6799 = vst [vmem:[#allocation7 + $0x2c] sm:$0x1] %v6798_v25  ;;  %v3571_v5 = vrot.slane %v3557_v26, %v16385_v20  ;;  %v3572_v57 = vcombine.high %v3564_v52, %v3564_v52  ;;  %v13310_v50 = vrot.slane %v3564_v52, 9  ;;  %v16642_v62 = vpop.f32.mrb[38].mxu0 }
 0x272   :  { %v6557_v47 = vsel %vm6503_vm15, %v6556_v53, %v6555_v12  ;;  %v3112_v44 = vmax.f32 %v3048_v33, 0.0  ;;  %v3110_v16 = vmax.f32 %v3046_v0, 0.0  ;;  %v5936_v22 = vsel %vm16301_vm4, 0, %v5935_v54  ;;  %v16648_v14 = vpop.f32.mrb[39].mxu0 }
 0x273   :  { %v6559_v45 = vsel %vm18579_vm0, %v6558_v19, %v6557_v47  ;;  %v3573_v23 = vcombine.high %v3571_v5, %v3571_v5  ;;  %v13311_v15 = vrot.slane %v3572_v57, 9  ;;  %v13312_v30 = vrot.slane %v3571_v5, 9  ;;  %5937 = vst [vmem:[#allocation7 + $0x34] sm:$0x1] %v5936_v22 }
 0x274   :  { %v6711_v42 = vpack.c.b16 %v6559_v45, %v6559_v45  ;;  %v5409_v37 = vmax.f32 %v3564_v52, %v13310_v50  ;;  %v3608_v48 = vcombine.high %v3112_v44, %v3112_v44  ;;  %v3615_v7 = vrot.slane %v3112_v44, %v16385_v20 }
 0x275   :  { %v13313_v36 = vrot.slane %v3573_v23, 9  ;;  %v5410_v55 = vmax.f32 %v3572_v57, %v13311_v15  ;;  %v5411_v60 = vmax.f32 %v3571_v5, %v13312_v30  ;;  %v3574_v21 = vcombine.high %v3110_v16, %v3110_v16 }
 0x276   :  { %v6795_v51 = vsel %vm16455_vm1, %v6711_v42, %v6794_v13  ;;  %v5625_v17 = vmax.f32 %v5409_v37, %v5417_v58  ;;  %v3622_v43 = vrot.slane %v3608_v48, %v16385_v20  ;;  %v3623_v27 = vcombine.high %v3615_v7, %v3615_v7 }
 0x277   :  { %6796 = vst [vmem:[#allocation7 + $0x28] sm:$0xf] %v6795_v51  ;;  %v5412_v11 = vmax.f32 %v3573_v23, %v13313_v36  ;;  %v5626_v26 = vmax.f32 %v5410_v55, %v5418_v59  ;;  %v5627_v52 = vmax.f32 %v5411_v60, %v5419_v29  ;;  %v13322_v33 = vrot.slane %v3615_v7, 9 }
 0x278   :  { %v14000_v54 = vpack.c.bf16 %v5625_v17, %v5625_v17  ;;  %v3624_v53 = vcombine.high %v3622_v43, %v3622_v43  ;;  %v13323_v19 = vrot.slane %v3623_v27, 9  ;;  %v13324_v25 = vrot.slane %v3622_v43, 9 }
 0x279   :  { %v5628_v0 = vmax.f32 %v5412_v11, %v5420_v4  ;;  %v14001_v12 = vpack.c.bf16 %v5626_v26, %v5626_v26  ;;  %v14002_v5 = vpack.c.bf16 %v5627_v52, %v5627_v52  ;;  %v5421_v57 = vmax.f32 %v3615_v7, %v13322_v33 }
 0x27a   :  { %v6401_v50 = vunpack.c.l.b16 %v14000_v54  ;;  %v13325_v47 = vrot.slane %v3624_v53, 9  ;;  %v5422_v58 = vmax.f32 %v3623_v27, %v13323_v19  ;;  %v5423_v44 = vmax.f32 %v3622_v43, %v13324_v25 }
 0x27b   :  { %v14003_v22 = vpack.c.bf16 %v5628_v0, %v5628_v0  ;;  %v6402_v45 = vunpack.c.l.b16 %v14001_v12  ;;  %v6403_v13 = vunpack.c.l.b16 %v14002_v5  ;;  %v3581_v23 = vrot.slane %v3110_v16, %v16385_v20  ;;  %v16670_v12 = vpop.f32.mrb[40].mxu0 }
 0x27c   :  { %v6560_v59 = vrot.slane %v6401_v50, 7  ;;  %v5424_v29 = vmax.f32 %v3624_v53, %v13325_v47  ;;  %v3588_v15 = vrot.slane %v3574_v21, %v16385_v20  ;;  %v2987_v30 = vmul.f32 %v16623_v46, %v16483_v8  ;;  %v16661_v21 = vld [vmem:[#allocation7 + $0x8] sm:$0xf] }
 0x27d   :  { %v6404_v4 = vunpack.c.l.b16 %v14003_v22  ;;  %v6561_v10 = vrot.slane %v6402_v45, 6  ;;  %v6563_v42 = vrot.slane %v6403_v13, 5  ;;  %v3589_v37 = vcombine.high %v3581_v23, %v3581_v23  ;;  %v16673_v45 = vpop.f32.mrb[41].mxu0 }
 0x27e   :  { %v3590_v48 = vcombine.high %v3588_v15, %v3588_v15  ;;  %v13314_v7 = vrot.slane %v3581_v23, 9  ;;  %v13316_v36 = vrot.slane %v3588_v15, 9  ;;  %v3051_v55 = vadd.f32 %v16602_v31, %v2987_v30 }
 0x27f   :  { %v6562_v60 = vsel %vm6491_vm11, %v6561_v10, %v6560_v59  ;;  %v6565_v51 = vrot.slane %v6404_v4, 4  ;;  %v13315_v16 = vrot.slane %v3589_v37, 9  ;;  %v2985_v17 = vmul.f32 %v16623_v46, %v16492_v6  ;;  %v14547_v6 = vld [vmem:[%s18569_s2 + $0x110] sm:$0xff]  }
 0x280   :  { %v6564_v8 = vsel %vm6494_vm12, %v6563_v42, %v6562_v60  ;;  %v13317_v43 = vrot.slane %v3590_v48, 9  ;;  %v5413_v27 = vmax.f32 %v3581_v23, %v13314_v7  ;;  %v5415_v11 = vmax.f32 %v3588_v15, %v13316_v36  ;;  %14451 = vmatprep.subr.bf16.mxu0 %v14547_v6  ;;  %v6803_v15 = vld [vmem:[#allocation7 + $0x34] sm:$0x1] }
 0x281   :  { %v5414_v26 = vmax.f32 %v3589_v37, %v13315_v16  ;;  %v6566_v52 = vsel %vm6497_vm13, %v6565_v51, %v6564_v8  ;;  %v3115_v33 = vmax.f32 %v3051_v55, 0.0  ;;  %v3049_v54 = vadd.f32 %v16602_v31, %v2985_v17  ;;  %14452 = vmatpush3.bf16.msra.mxu0 %v14547_v6  ;;  %v6901_v8 = vld [vmem:[#allocation7 + $0xc] sm:$0x1] }
 0x282   :  { %v5416_v53 = vmax.f32 %v3590_v48, %v13317_v43  ;;  %v5629_v19 = vmax.f32 %v5413_v27, %v5421_v57  ;;  %v5631_v25 = vmax.f32 %v5415_v11, %v5423_v44  ;;  %v6948_v0 = vshrl.u32 %v16661_v21, 16  ;;  %v14548_v43 = vld [vmem:[%s18569_s2 + $0x118] sm:$0xff]  }
 0x283   :  { %v5630_v5 = vmax.f32 %v5414_v26, %v5422_v58  ;;  %v3659_v50 = vcombine.high %v3115_v33, %v3115_v33  ;;  %v3666_v47 = vrot.slane %v3115_v33, %v16385_v20  ;;  %v3113_v22 = vmax.f32 %v3049_v54, 0.0  ;;  %14453 = vmatprep.subr.bf16.mxu0 %v14548_v43 }
 0x284   :  { %v5632_v13 = vmax.f32 %v5416_v53, %v5424_v29  ;;  %v14004_v23 = vpack.c.bf16 %v5629_v19, %v5629_v19  ;;  %v14006_v59 = vpack.c.bf16 %v5631_v25, %v5631_v25  ;;  %v16675_v57 = vrot.slane %v6948_v0, 4 }
 0x285   :  { %v14005_v44 = vpack.c.bf16 %v5630_v5, %v5630_v5  ;;  %v3673_v30 = vrot.slane %v3659_v50, %v16385_v20  ;;  %v3674_v4 = vcombine.high %v3666_v47, %v3666_v47  ;;  %v13334_v10 = vrot.slane %v3666_v47, 9  ;;  %14454 = vmatpush3.bf16.msra.mxu0 %v14548_v43 }
 0x286   :  { %v6405_v58 = vunpack.c.l.b16 %v14004_v23  ;;  %v6407_v42 = vunpack.c.l.b16 %v14006_v59  ;;  %v14093_v37 = vpack.c.bf16 %v5632_v13, %v5632_v13  ;;  %v3625_v48 = vcombine.high %v3113_v22, %v3113_v22 }
 0x287   :  { %v6406_v7 = vunpack.c.l.b16 %v14005_v44  ;;  %v3675_v36 = vcombine.high %v3673_v30, %v3673_v30  ;;  %v13335_v55 = vrot.slane %v3674_v4, 9  ;;  %v13336_v29 = vrot.slane %v3673_v30, 9 }
 0x288   :  { %v6567_v60 = vrot.slane %v6405_v58, 3  ;;  %v6571_v51 = vrot.slane %v6407_v42, 1  ;;  %v6804_v16 = vsel %vm16314_vm6, %v14093_v37, %v6803_v15  ;;  %v5433_v17 = vmax.f32 %v3666_v47, %v13334_v10  ;;  %v16690_v47 = vpop.f32.mrb[42].mxu0  ;;  %v5876_v37 = vld [vmem:[#allocation7 + $0x38] sm:$0x1] }
 0x289   :  { %v6569_v27 = vrot.slane %v6406_v7, 2  ;;  %6805 = vst [vmem:[#allocation7 + $0x34] sm:$0x1] %v6804_v16  ;;  %v13337_v11 = vrot.slane %v3675_v36, 9  ;;  %v5434_v26 = vmax.f32 %v3674_v4, %v13335_v55  ;;  %v5435_v33 = vmax.f32 %v3673_v30, %v13336_v29  ;;  %v16693_v44 = vpop.f32.mrb[43].mxu0 }
 0x28a   :  { %v6568_v54 = vsel %vm6500_vm14, %v6567_v60, %v6566_v52  ;;  %v3632_v53 = vrot.slane %v3113_v22, %v16385_v20  ;;  %v3639_v19 = vrot.slane %v3625_v48, %v16385_v20  ;;  %v6951_v25 = vshll.u32 %v16661_v21, 16  ;;  %v6800_v52 = vld [vmem:[#allocation7 + $0x30] sm:$0xf] }
 0x28b   :  { %v6570_v0 = vsel %vm6503_vm15, %v6569_v27, %v6568_v54  ;;  %v5436_v6 = vmax.f32 %v3675_v36, %v13337_v11  ;;  %v6957_v5 = vshll.u32 %v6901_v8, 16  ;;  %v2988_v50 = vmul.f32 %v16623_v46, %v16501_v39 }
 0x28c   :  { %v6572_v13 = vsel %vm18579_vm0, %v6571_v51, %v6570_v0  ;;  %v3640_v23 = vcombine.high %v3632_v53, %v3632_v53  ;;  %v3641_v22 = vcombine.high %v3639_v19, %v3639_v19  ;;  %v13326_v59 = vrot.slane %v3632_v53, 9 }
 0x28d   :  { %v6713_v21 = vpack.c.b16 %v6572_v13, %v6572_v13  ;;  %v13328_v15 = vrot.slane %v3639_v19, 9  ;;  %v6953_v30 = vrot.slane %v6951_v25, 5  ;;  %v6959_v4 = vrot.slane %v6957_v5, 5 }
 0x28e   :  { %v13327_v10 = vrot.slane %v3640_v23, 9  ;;  %v13329_v58 = vrot.slane %v3641_v22, 9  ;;  %v5425_v42 = vmax.f32 %v3632_v53, %v13326_v59  ;;  %v3052_v39 = vadd.f32 %v16602_v31, %v2988_v50 }
 0x28f   :  { %v6801_v48 = vsel %vm16455_vm1, %v6713_v21, %v6800_v52  ;;  %v5427_v7 = vmax.f32 %v3639_v19, %v13328_v15  ;;  %v6954_v36 = vor.u32 %v6953_v30, %v16675_v57  ;;  %v2986_v55 = vmul.f32 %v16623_v46, %v16503_v40 }
 0x290   :  { %6802 = vst [vmem:[#allocation7 + $0x30] sm:$0xf] %v6801_v48  ;;  %v5426_v29 = vmax.f32 %v3640_v23, %v13327_v10  ;;  %v5428_v60 = vmax.f32 %v3641_v22, %v13329_v58  ;;  %v5633_v51 = vmax.f32 %v5425_v42, %v5433_v17  ;;  %v3116_v16 = vmax.f32 %v3052_v39, 0.0  ;;  %v7387_v22 = vld [vmem:[#allocation7 + $0x18] sm:$0xf] }
 0x291   :  { %v5635_v8 = vmax.f32 %v5427_v7, %v5435_v33  ;;  %v6955_v43 = vrot.slane %v6954_v36, 4  ;;  %v3050_v27 = vadd.f32 %v16602_v31, %v2986_v55  ;;  %v5877_v11 = vsel %vm16314_vm6, 0, %v5876_v37 }
 0x292   :  { %v5634_v54 = vmax.f32 %v5426_v29, %v5434_v26  ;;  %v5636_v53 = vmax.f32 %v5428_v60, %v5436_v6  ;;  %v14008_v19 = vpack.c.bf16 %v5633_v51, %v5633_v51  ;;  %v3676_v25 = vcombine.high %v3116_v16, %v3116_v16  ;;  %5878 = vst [vmem:[#allocation7 + $0x38] sm:$0x1] %v5877_v11 }
 0x293   :  { %v14010_v57 = vpack.c.bf16 %v5635_v8, %v5635_v8  ;;  %v6960_v40 = vsel %vm16360_vm10, %v6955_v43, %v6959_v4  ;;  %v3683_v0 = vrot.slane %v3116_v16, %v16385_v20  ;;  %v3114_v17 = vmax.f32 %v3050_v27, 0.0  ;;  %v5938_v4 = vld [vmem:[#allocation7 + $0x3c] sm:$0x1] }
 0x294   :  { %v14009_v5 = vpack.c.bf16 %v5634_v54, %v5634_v54  ;;  %v14011_v33 = vpack.c.bf16 %v5636_v53, %v5636_v53  ;;  %v6409_v50 = vunpack.c.l.b16 %v14008_v19  ;;  %7159 = vrot.lane.b32.xlu0 %v6960_v40, %s14725_s0  ;;  %v3690_v13 = vrot.slane %v3676_v25, %v16385_v20 }
 0x295   :  { %v6411_v52 = vunpack.c.l.b16 %v14010_v57  ;;  %v3691_v26 = vcombine.high %v3683_v0, %v3683_v0  ;;  %v13338_v6 = vrot.slane %v3683_v0, 9  ;;  %v3642_v23 = vcombine.high %v3114_v17, %v3114_v17 }
 0x296   :  { %v6410_v59 = vunpack.c.l.b16 %v14009_v5  ;;  %v6412_v21 = vunpack.c.l.b16 %v14011_v33  ;;  %v6573_v15 = vrot.slane %v6409_v50, 7  ;;  %v3692_v30 = vcombine.high %v3690_v13, %v3690_v13 }
 0x297   :  { %v6576_v10 = vrot.slane %v6411_v52, 5  ;;  %v13339_v58 = vrot.slane %v3691_v26, 9  ;;  %v13340_v42 = vrot.slane %v3690_v13, 9  ;;  %v5437_v39 = vmax.f32 %v3683_v0, %v13338_v6 }
 0x298   :  { %v6574_v37 = vrot.slane %v6410_v59, 6  ;;  %v6578_v48 = vrot.slane %v6412_v21, 4  ;;  %v13341_v7 = vrot.slane %v3692_v30, 9  ;;  %v3649_v36 = vrot.slane %v3114_v17, %v16385_v20  ;;  %7421 = vrot.lane.b32.xlu0 %v7387_v22, %s14725_s0 }
 0x299   :  { %v5438_v55 = vmax.f32 %v3691_v26, %v13339_v58  ;;  %v5439_v29 = vmax.f32 %v3690_v13, %v13340_v42  ;;  %v3656_v60 = vrot.slane %v3642_v23, %v16385_v20  ;;  %v5939_v51 = vsel %vm16301_vm4, 0, %v5938_v4  ;;  %v16729_v4 = vpop.f32.mrb[44].mxu0 }
 0x29a   :  { %v6575_v16 = vsel %vm6491_vm11, %v6574_v37, %v6573_v15  ;;  %v5440_v8 = vmax.f32 %v3692_v30, %v13341_v7  ;;  %v3657_v43 = vcombine.high %v3649_v36, %v3649_v36  ;;  %v13330_v27 = vrot.slane %v3649_v36, 9  ;;  %5940 = vst [vmem:[#allocation7 + $0x3c] sm:$0x1] %v5939_v51 }
 0x29b   :  { %v6577_v11 = vsel %vm6494_vm12, %v6576_v10, %v6575_v16  ;;  %v3658_v54 = vcombine.high %v3656_v60, %v3656_v60  ;;  %v13332_v53 = vrot.slane %v3656_v60, 9  ;;  %v2991_v19 = vmul.f32 %v16623_v46, %v16507_v63 }
 0x29c   :  { %v13331_v25 = vrot.slane %v3657_v43, 9  ;;  %v5429_v57 = vmax.f32 %v3649_v36, %v13330_v27  ;;  %v6579_v40 = vsel %vm6497_vm13, %v6578_v48, %v6577_v11  ;;  %v2989_v0 = vmul.f32 %v16623_v46, %v16509_v18 }
 0x29d   :  { %v13333_v17 = vrot.slane %v3658_v54, 9  ;;  %v5431_v5 = vmax.f32 %v3656_v60, %v13332_v53  ;;  %v3055_v33 = vadd.f32 %v16602_v31, %v2991_v19  ;;  %v2992_v50 = vmul.f32 %v16623_v46, %v16514_v38 }
 0x29e   :  { %v5430_v13 = vmax.f32 %v3657_v43, %v13331_v25  ;;  %v5637_v52 = vmax.f32 %v5429_v57, %v5437_v39  ;;  %v3053_v26 = vadd.f32 %v16602_v31, %v2989_v0  ;;  %v2990_v63 = vmul.f32 %v16623_v46, %v16522_v3  ;;  %v16732_v39 = vpop.f32.mrb[45].mxu0 }
 0x29f   :  { %v5432_v6 = vmax.f32 %v3658_v54, %v13333_v17  ;;  %v5639_v23 = vmax.f32 %v5431_v5, %v5439_v29  ;;  %v3119_v22 = vmax.f32 %v3055_v33, 0.0  ;;  %v3056_v59 = vadd.f32 %v16602_v31, %v2992_v50 }
 0x2a0   :  { %v5638_v18 = vmax.f32 %v5430_v13, %v5438_v55  ;;  %v14012_v21 = vpack.c.bf16 %v5637_v52, %v5637_v52  ;;  %v3117_v15 = vmax.f32 %v3053_v26, 0.0  ;;  %v3054_v30 = vadd.f32 %v16602_v31, %v2990_v63 }
 0x2a1   :  { %v5640_v38 = vmax.f32 %v5432_v6, %v5440_v8  ;;  %v14014_v10 = vpack.c.bf16 %v5639_v23, %v5639_v23  ;;  %v3727_v58 = vcombine.high %v3119_v22, %v3119_v22  ;;  %v3734_v42 = vrot.slane %v3119_v22, %v16385_v20  ;;  %v6809_v48 = vld [vmem:[#allocation7 + $0x3c] sm:$0x1]  ;;  %v5879_v23 = vld [vmem:[#allocation7 + $0x40] sm:$0x1] }
 0x2a2   :  { %v14013_v3 = vpack.c.bf16 %v5638_v18, %v5638_v18  ;;  %v6413_v37 = vunpack.c.l.b16 %v14012_v21  ;;  %v3693_v7 = vcombine.high %v3117_v15, %v3117_v15  ;;  %v3700_v36 = vrot.slane %v3117_v15, %v16385_v20  ;;  %v6806_v18 = vld [vmem:[#allocation7 + $0x38] sm:$0xf] }
 0x2a3   :  { %v6415_v55 = vunpack.c.l.b16 %v14014_v10  ;;  %v14094_v29 = vpack.c.bf16 %v5640_v38, %v5640_v38  ;;  %v3741_v60 = vrot.slane %v3727_v58, %v16385_v20  ;;  %v3742_v51 = vcombine.high %v3734_v42, %v3734_v42 }
 0x2a4   :  { %v6414_v16 = vunpack.c.l.b16 %v14013_v3  ;;  %v6580_v43 = vrot.slane %v6413_v37, 3  ;;  %v13350_v8 = vrot.slane %v3734_v42, 9  ;;  %v3707_v27 = vrot.slane %v3693_v7, %v16385_v20 }
 0x2a5   :  { %v6584_v11 = vrot.slane %v6415_v55, 1  ;;  %v6810_v54 = vsel %vm16314_vm6, %v14094_v29, %v6809_v48  ;;  %v3743_v53 = vcombine.high %v3741_v60, %v3741_v60  ;;  %v13351_v19 = vrot.slane %v3742_v51, 9 }
 0x2a6   :  { %v6581_v25 = vsel %vm6500_vm14, %v6580_v43, %v6579_v40  ;;  %v6582_v57 = vrot.slane %v6414_v16, 2  ;;  %6811 = vst [vmem:[#allocation7 + $0x3c] sm:$0x1] %v6810_v54  ;;  %v13352_v0 = vrot.slane %v3741_v60, 9  ;;  %v5449_v17 = vmax.f32 %v3734_v42, %v13350_v8 }
 0x2a7   :  { %v13353_v5 = vrot.slane %v3743_v53, 9  ;;  %v5450_v33 = vmax.f32 %v3742_v51, %v13351_v19  ;;  %v3708_v50 = vcombine.high %v3700_v36, %v3700_v36  ;;  %v3709_v13 = vcombine.high %v3707_v27, %v3707_v27 }
 0x2a8   :  { %v6583_v52 = vsel %vm6503_vm15, %v6582_v57, %v6581_v25  ;;  %v5451_v26 = vmax.f32 %v3741_v60, %v13352_v0  ;;  %v13342_v63 = vrot.slane %v3700_v36, 9  ;;  %v13344_v6 = vrot.slane %v3707_v27, 9 }
 0x2a9   :  { %v6585_v22 = vsel %vm18579_vm0, %v6584_v11, %v6583_v52  ;;  %v5452_v21 = vmax.f32 %v3743_v53, %v13353_v5  ;;  %v13343_v15 = vrot.slane %v3708_v50, 9  ;;  %v13345_v40 = vrot.slane %v3709_v13, 9 }
 0x2aa   :  { %v6715_v38 = vpack.c.b16 %v6585_v22, %v6585_v22  ;;  %v5441_v10 = vmax.f32 %v3700_v36, %v13342_v63  ;;  %v5443_v58 = vmax.f32 %v3707_v27, %v13344_v6  ;;  %v3120_v42 = vmax.f32 %v3056_v59, 0.0  ;;  %v16747_v59 = vpop.f32.mrb[46].mxu0  ;;  %v5941_v6 = vld [vmem:[#allocation7 + $0x44] sm:$0x1] }
 0x2ab   :  { %v5442_v3 = vmax.f32 %v3708_v50, %v13343_v15  ;;  %v5444_v37 = vmax.f32 %v3709_v13, %v13345_v40  ;;  %v3118_v48 = vmax.f32 %v3054_v30, 0.0  ;;  %v5880_v7 = vsel %vm16314_vm6, 0, %v5879_v23  ;;  %v16751_v53 = vpop.f32.mrb[47].mxu0  ;;  %v6902_v15 = vld [vmem:[#allocation7 + $0x10] sm:$0xf] }
 0x2ac   :  { %v6807_v55 = vsel %vm16455_vm1, %v6715_v38, %v6806_v18  ;;  %v5641_v29 = vmax.f32 %v5441_v10, %v5449_v17  ;;  %v5643_v60 = vmax.f32 %v5443_v58, %v5451_v26  ;;  %v3744_v51 = vcombine.high %v3120_v42, %v3120_v42  ;;  %5881 = vst [vmem:[#allocation7 + $0x40] sm:$0x1] %v5880_v7 }
 0x2ad   :  { %6808 = vst [vmem:[#allocation7 + $0x38] sm:$0xf] %v6807_v55  ;;  %v5642_v16 = vmax.f32 %v5442_v3, %v5450_v33  ;;  %v5644_v43 = vmax.f32 %v5444_v37, %v5452_v21  ;;  %v3751_v36 = vrot.slane %v3120_v42, %v16385_v20  ;;  %v3710_v8 = vcombine.high %v3118_v48, %v3118_v48 }
 0x2ae   :  { %v14016_v27 = vpack.c.bf16 %v5641_v29, %v5641_v29  ;;  %v14018_v30 = vpack.c.bf16 %v5643_v60, %v5643_v60  ;;  %v3758_v11 = vrot.slane %v3744_v51, %v16385_v20  ;;  %v3717_v54 = vrot.slane %v3118_v48, %v16385_v20  ;;  %v6903_v60 = vld [vmem:[#allocation7 + $0x14] sm:$0x1] }
 0x2af   :  { %v14017_v19 = vpack.c.bf16 %v5642_v16, %v5642_v16  ;;  %v14019_v25 = vpack.c.bf16 %v5644_v43, %v5644_v43  ;;  %v3759_v57 = vcombine.high %v3751_v36, %v3751_v36  ;;  %v13354_v0 = vrot.slane %v3751_v36, 9 }
 0x2b0   :  { %v6417_v17 = vunpack.c.l.b16 %v14016_v27  ;;  %v6419_v5 = vunpack.c.l.b16 %v14018_v30  ;;  %v3760_v33 = vcombine.high %v3758_v11, %v3758_v11  ;;  %v13356_v50 = vrot.slane %v3758_v11, 9 }
 0x2b1   :  { %v6418_v13 = vunpack.c.l.b16 %v14017_v19  ;;  %v6420_v52 = vunpack.c.l.b16 %v14019_v25  ;;  %v13355_v26 = vrot.slane %v3759_v57, 9  ;;  %v5453_v63 = vmax.f32 %v3751_v36, %v13354_v0 }
 0x2b2   :  { %v6586_v23 = vrot.slane %v6417_v17, 7  ;;  %v6589_v22 = vrot.slane %v6419_v5, 5  ;;  %v13357_v18 = vrot.slane %v3760_v33, 9  ;;  %v5455_v21 = vmax.f32 %v3758_v11, %v13356_v50 }
 0x2b3   :  { %v6587_v40 = vrot.slane %v6418_v13, 6  ;;  %v6591_v38 = vrot.slane %v6420_v52, 4  ;;  %v5454_v10 = vmax.f32 %v3759_v57, %v13355_v26  ;;  %v3724_v58 = vrot.slane %v3710_v8, %v16385_v20 }
 0x2b4   :  { %v5456_v42 = vmax.f32 %v3760_v33, %v13357_v18  ;;  %v3725_v3 = vcombine.high %v3717_v54, %v3717_v54  ;;  %v13346_v37 = vrot.slane %v3717_v54, 9  ;;  %v5942_v48 = vsel %vm16301_vm4, 0, %v5941_v6 }
 0x2b5   :  { %v6588_v7 = vsel %vm6491_vm11, %v6587_v40, %v6586_v23  ;;  %v3726_v55 = vcombine.high %v3724_v58, %v3724_v58  ;;  %v13348_v29 = vrot.slane %v3724_v58, 9  ;;  %5943 = vst [vmem:[#allocation7 + $0x44] sm:$0x1] %v5942_v48  ;;  %v6962_v51 = vshrl.u32 %v6902_v15, 16 }
 0x2b6   :  { %v6590_v16 = vsel %vm6494_vm12, %v6589_v22, %v6588_v7  ;;  %v13347_v43 = vrot.slane %v3725_v3, 9  ;;  %v5445_v36 = vmax.f32 %v3717_v54, %v13346_v37  ;;  %v6965_v27 = vshll.u32 %v6902_v15, 16 }
 0x2b7   :  { %v13349_v30 = vrot.slane %v3726_v55, 9  ;;  %v5447_v8 = vmax.f32 %v3724_v58, %v13348_v29  ;;  %v6592_v11 = vsel %vm6497_vm13, %v6591_v38, %v6590_v16  ;;  %v6964_v19 = vrot.slane %v6962_v51, 4  ;;  %v16767_v58 = vpop.f32.mrb[48].mxu0 }
 0x2b8   :  { %v5446_v25 = vmax.f32 %v3725_v3, %v13347_v43  ;;  %v5645_v57 = vmax.f32 %v5445_v36, %v5453_v63  ;;  %v6967_v0 = vrot.slane %v6965_v27, 5  ;;  %v6971_v17 = vshll.u32 %v6903_v60, 16  ;;  %v16772_v29 = vpop.f32.mrb[49].mxu0 }
 0x2b9   :  { %v5448_v5 = vmax.f32 %v3726_v55, %v13349_v30  ;;  %v5647_v33 = vmax.f32 %v5447_v8, %v5455_v21  ;;  %v2995_v50 = vmul.f32 %v16623_v46, %v16559_v56  ;;  %v2993_v13 = vmul.f32 %v16623_v46, %v16562_v24  ;;  %v7389_v8 = vld [vmem:[#allocation7 + $0x28] sm:$0xf] }
 0x2ba   :  { %v5646_v52 = vmax.f32 %v5446_v25, %v5454_v10  ;;  %v14020_v54 = vpack.c.bf16 %v5645_v57, %v5645_v57  ;;  %v6968_v26 = vor.u32 %v6967_v0, %v6964_v19  ;;  %v6973_v6 = vrot.slane %v6971_v17, 5 }
 0x2bb   :  { %v5648_v23 = vmax.f32 %v5448_v5, %v5456_v42  ;;  %v14022_v22 = vpack.c.bf16 %v5647_v33, %v5647_v33  ;;  %v3059_v18 = vadd.f32 %v16602_v31, %v2995_v50  ;;  %v3057_v63 = vadd.f32 %v16602_v31, %v2993_v13 }
 0x2bc   :  { %v14021_v15 = vpack.c.bf16 %v5646_v52, %v5646_v52  ;;  %v6421_v40 = vunpack.c.l.b16 %v14020_v54  ;;  %v6815_v38 = vld [vmem:[#allocation7 + $0x44] sm:$0x1]  ;;  %v6969_v21 = vrot.slane %v6968_v26, 4  ;;  %v2996_v56 = vmul.f32 %v16623_v46, %v16574_v41 }
 0x2bd   :  { %v6423_v24 = vunpack.c.l.b16 %v14022_v22  ;;  %v14095_v10 = vpack.c.bf16 %v5648_v23, %v5648_v23  ;;  %v3123_v3 = vmax.f32 %v3059_v18, 0.0  ;;  %v3121_v37 = vmax.f32 %v3057_v63, 0.0 }
 0x2be   :  { %v6422_v48 = vunpack.c.l.b16 %v14021_v15  ;;  %v6593_v42 = vrot.slane %v6421_v40, 3  ;;  %v6974_v7 = vsel %vm16360_vm10, %v6969_v21, %v6973_v6  ;;  %v3060_v55 = vadd.f32 %v16602_v31, %v2996_v56 }
 0x2bf   :  { %v6597_v60 = vrot.slane %v6423_v24, 1  ;;  %v6816_v51 = vsel %vm16314_vm6, %v14095_v10, %v6815_v38  ;;  %7161 = vrot.lane.b32.xlu0 %v6974_v7, %s14725_s0  ;;  %v3795_v41 = vcombine.high %v3123_v3, %v3123_v3  ;;  %v3802_v16 = vrot.slane %v3123_v3, %v16385_v20 }
 0x2c0   :  { %v6594_v43 = vsel %vm6500_vm14, %v6593_v42, %v6592_v11  ;;  %v6595_v36 = vrot.slane %v6422_v48, 2  ;;  %6817 = vst [vmem:[#allocation7 + $0x44] sm:$0x1] %v6816_v51  ;;  %v3761_v27 = vcombine.high %v3121_v37, %v3121_v37  ;;  %v3768_v30 = vrot.slane %v3121_v37, %v16385_v20  ;;  %v6812_v11 = vld [vmem:[#allocation7 + $0x40] sm:$0xf] }
 0x2c1   :  { %v3809_v19 = vrot.slane %v3795_v41, %v16385_v20  ;;  %v3810_v25 = vcombine.high %v3802_v16, %v3802_v16  ;;  %v13366_v57 = vrot.slane %v3802_v16, 9  ;;  %v3124_v0 = vmax.f32 %v3060_v55, 0.0  ;;  %v16790_v41 = vpop.f32.mrb[50].mxu0 }
 0x2c2   :  { %v6596_v17 = vsel %vm6503_vm15, %v6595_v36, %v6594_v43  ;;  %v3775_v5 = vrot.slane %v3761_v27, %v16385_v20  ;;  %v3776_v33 = vcombine.high %v3768_v30, %v3768_v30  ;;  %v13358_v50 = vrot.slane %v3768_v30, 9 }
 0x2c3   :  { %v6598_v13 = vsel %vm18579_vm0, %v6597_v60, %v6596_v17  ;;  %v3811_v52 = vcombine.high %v3809_v19, %v3809_v19  ;;  %v13367_v54 = vrot.slane %v3810_v25, 9  ;;  %v13368_v26 = vrot.slane %v3809_v19, 9  ;;  %7425 = vrot.lane.b32.xlu0 %v7389_v8, %s14725_s0 }
 0x2c4   :  { %v6717_v6 = vpack.c.b16 %v6598_v13, %v6598_v13  ;;  %v5465_v23 = vmax.f32 %v3802_v16, %v13366_v57  ;;  %v3777_v22 = vcombine.high %v3775_v5, %v3775_v5  ;;  %v13359_v18 = vrot.slane %v3776_v33, 9 }
 0x2c5   :  { %v13369_v63 = vrot.slane %v3811_v52, 9  ;;  %v5466_v15 = vmax.f32 %v3810_v25, %v13367_v54  ;;  %v5467_v40 = vmax.f32 %v3809_v19, %v13368_v26  ;;  %v13360_v38 = vrot.slane %v3775_v5, 9  ;;  %v5950_v54 = vld [vmem:[#allocation7 + $0x5c] sm:$0x1] }
 0x2c6   :  { %v6813_v21 = vsel %vm16455_vm1, %v6717_v6, %v6812_v11  ;;  %v13361_v56 = vrot.slane %v3777_v22, 9  ;;  %v5457_v24 = vmax.f32 %v3768_v30, %v13358_v50  ;;  %v5458_v10 = vmax.f32 %v3776_v33, %v13359_v18  ;;  %v16793_v30 = vpop.f32.mrb[51].mxu0  ;;  %v6905_v18 = vld [vmem:[#allocation7 + $0x1c] sm:$0x1] }
 0x2c7   :  { %6814 = vst [vmem:[#allocation7 + $0x40] sm:$0xf] %v6813_v21  ;;  %v5468_v3 = vmax.f32 %v3811_v52, %v13369_v63  ;;  %v5459_v37 = vmax.f32 %v3775_v5, %v13360_v38  ;;  %v3812_v48 = vcombine.high %v3124_v0, %v3124_v0  ;;  %v3819_v42 = vrot.slane %v3124_v0, %v16385_v20  ;;  %v5888_v52 = vld [vmem:[#allocation7 + $0x58] sm:$0x1] }
 0x2c8   :  { %v5460_v7 = vmax.f32 %v3777_v22, %v13361_v56  ;;  %v5649_v55 = vmax.f32 %v5457_v24, %v5465_v23  ;;  %v5650_v60 = vmax.f32 %v5458_v10, %v5466_v15  ;;  %v2994_v51 = vmul.f32 %v16623_v46, %v16576_v32 }
 0x2c9   :  { %v5651_v16 = vmax.f32 %v5459_v37, %v5467_v40  ;;  %v3826_v43 = vrot.slane %v3812_v48, %v16385_v20  ;;  %v3827_v36 = vcombine.high %v3819_v42, %v3819_v42  ;;  %v13370_v27 = vrot.slane %v3819_v42, 9 }
 0x2ca   :  { %v5652_v8 = vmax.f32 %v5460_v7, %v5468_v3  ;;  %v14024_v19 = vpack.c.bf16 %v5649_v55, %v5649_v55  ;;  %v14025_v25 = vpack.c.bf16 %v5650_v60, %v5650_v60  ;;  %v3058_v57 = vadd.f32 %v16602_v31, %v2994_v51  ;;  %v6904_v31 = vld [vmem:[#allocation7 + $0x18] sm:$0xf] }
 0x2cb   :  { %v14026_v0 = vpack.c.bf16 %v5651_v16, %v5651_v16  ;;  %v3828_v17 = vcombine.high %v3826_v43, %v3826_v43  ;;  %v13371_v5 = vrot.slane %v3827_v36, 9  ;;  %v13372_v33 = vrot.slane %v3826_v43, 9 }
 0x2cc   :  { %v14027_v50 = vpack.c.bf16 %v5652_v8, %v5652_v8  ;;  %v6425_v32 = vunpack.c.l.b16 %v14024_v19  ;;  %v6426_v13 = vunpack.c.l.b16 %v14025_v25  ;;  %v5469_v11 = vmax.f32 %v3819_v42, %v13370_v27  ;;  %v8314_v8 = vld [vmem:[#allocation7 + $0x10] sm:$0xe]  ;;  %v8315_v19 = vld [vmem:[#allocation7 + $0x14] sm:$0x1] }
 0x2cd   :  { %v6427_v26 = vunpack.c.l.b16 %v14026_v0  ;;  %v13373_v6 = vrot.slane %v3828_v17, 9  ;;  %v5470_v23 = vmax.f32 %v3827_v36, %v13371_v5  ;;  %v5471_v22 = vmax.f32 %v3826_v43, %v13372_v33 }
 0x2ce   :  { %v6428_v63 = vunpack.c.l.b16 %v14027_v50  ;;  %v6599_v15 = vrot.slane %v6425_v32, 7  ;;  %v6600_v40 = vrot.slane %v6426_v13, 6  ;;  %v3122_v38 = vmax.f32 %v3058_v57, 0.0  ;;  %v8316_v32 = vld [vmem:[#allocation7 + $0x18] sm:$0xe] }
 0x2cf   :  { %v6602_v21 = vrot.slane %v6427_v26, 5  ;;  %v5472_v56 = vmax.f32 %v3828_v17, %v13373_v6  ;;  %v5889_v24 = vsel %vm16314_vm6, 0, %v5888_v52  ;;  %v5951_v10 = vsel %vm16301_vm4, 0, %v5950_v54 }
 0x2d0   :  { %v6601_v3 = vsel %vm6491_vm11, %v6600_v40, %v6599_v15  ;;  %v6604_v37 = vrot.slane %v6428_v63, 4  ;;  %v3778_v48 = vcombine.high %v3122_v38, %v3122_v38  ;;  %v3785_v42 = vrot.slane %v3122_v38, %v16385_v20  ;;  %5890 = vst [vmem:[#allocation7 + $0x58] sm:$0x1] %v5889_v24  ;;  %5952 = vst [vmem:[#allocation7 + $0x5c] sm:$0x1] %v5951_v10 }
 0x2d1   :  { %v6603_v7 = vsel %vm6494_vm12, %v6602_v21, %v6601_v3  ;;  %v6976_v55 = vshrl.u32 %v6904_v31, 16  ;;  %v6979_v60 = vshll.u32 %v6904_v31, 16  ;;  %v6985_v51 = vshll.u32 %v6905_v18, 16  ;;  %v8317_v40 = vld [vmem:[#allocation7 + $0x1c] sm:$0x1] }
 0x2d2   :  { %v3792_v16 = vrot.slane %v3778_v48, %v16385_v20  ;;  %v3793_v43 = vcombine.high %v3785_v42, %v3785_v42  ;;  %v13362_v36 = vrot.slane %v3785_v42, 9  ;;  %v6605_v27 = vsel %vm6497_vm13, %v6604_v37, %v6603_v7  ;;  %v16820_v7 = vld [vmem:[%s18574_s7 + $0x1] ss:$0 sm:$0xff] }
 0x2d3   :  { %v6978_v25 = vrot.slane %v6976_v55, 4  ;;  %v6981_v57 = vrot.slane %v6979_v60, 5  ;;  %v6987_v0 = vrot.slane %v6985_v51, 5  ;;  %v13662_v52 = vrot.slane %v8314_v8, 9  ;;  %v7390_v8 = vld [vmem:[#allocation7 + $0x30] sm:$0xf] }
 0x2d4   :  { %v3794_v17 = vcombine.high %v3792_v16, %v3792_v16  ;;  %v13363_v5 = vrot.slane %v3793_v43, 9  ;;  %v13364_v33 = vrot.slane %v3792_v16, 9  ;;  %v5461_v50 = vmax.f32 %v3785_v42, %v13362_v36 }
 0x2d5   :  { %v6982_v13 = vor.u32 %v6981_v57, %v6978_v25  ;;  %v8380_v54 = vrot.slane %v8315_v19, 5  ;;  %v13663_v21 = vrot.slane %v8316_v32, 9  ;;  %v2999_v24 = vmul.f32 %v16623_v46, %v16613_v28  ;;  %v5891_v32 = vld [vmem:[#allocation7 + $0x60] sm:$0x1] }
 0x2d6   :  { %v13365_v26 = vrot.slane %v3794_v17, 9  ;;  %v5462_v6 = vmax.f32 %v3793_v43, %v13363_v5  ;;  %v5463_v18 = vmax.f32 %v3792_v16, %v13364_v33  ;;  %v5653_v63 = vmax.f32 %v5461_v50, %v5469_v11  ;;  %v16829_v43 = vld [vmem:[%s18574_s7] ss:$0 sm:$0xff] }
 0x2d7   :  { %v6983_v38 = vrot.slane %v6982_v13, 4  ;;  %v8381_v31 = vsel %vm16806_vm8, %v13662_v52, %v8380_v54  ;;  %v8384_v42 = vrot.slane %v8317_v40, 5  ;;  %v3063_v55 = vadd.f32 %v16820_v7, %v2999_v24  ;;  %v16839_v13 = vpop.f32.mrb[52].mxu0 }
 0x2d8   :  { %v5464_v10 = vmax.f32 %v3794_v17, %v13365_v26  ;;  %v5654_v3 = vmax.f32 %v5462_v6, %v5470_v23  ;;  %v5655_v37 = vmax.f32 %v5463_v18, %v5471_v22  ;;  %v14028_v48 = vpack.c.bf16 %v5653_v63, %v5653_v63  ;;  %8458 = vst.msk [vmem:[#allocation8 + $0x10] sm:$0xf] %vm5841_vm7, %v8381_v31  ;;  %v6821_v23 = vld [vmem:[#allocation7 + $0x5c] sm:$0x1] }
 0x2d9   :  { %v6988_v11 = vsel %vm16360_vm10, %v6983_v38, %v6987_v0  ;;  %v8385_v22 = vsel %vm16806_vm8, %v13663_v21, %v8384_v42  ;;  %v3127_v16 = vmax.f32 %v3063_v55, 0.0  ;;  %v2997_v36 = vmul.f32 %v16829_v43, %v16615_v34  ;;  %v16851_v21 = vpop.f32.mrb[53].mxu0 }
 0x2da   :  { %v5656_v60 = vmax.f32 %v5464_v10, %v5472_v56  ;;  %v14029_v51 = vpack.c.bf16 %v5654_v3, %v5654_v3  ;;  %v14030_v28 = vpack.c.bf16 %v5655_v37, %v5655_v37  ;;  %v6429_v46 = vunpack.c.l.b16 %v14028_v48  ;;  %7163 = vrot.lane.b32.xlu1 %v6988_v11, %s14725_s0  ;;  %8459 = vst.msk [vmem:[#allocation8 + $0x24] sm:$0xf] %vm5841_vm7, %v8385_v22  ;;  %v6818_v10 = vld [vmem:[#allocation7 + $0x58] sm:$0xf] }
 0x2db   :  { %v3000_v56 = vmul.f32 %v16829_v43, %v16642_v62  ;;  %v3863_v17 = vcombine.high %v3127_v16, %v3127_v16  ;;  %v3870_v5 = vrot.slane %v3127_v16, %v16385_v20  ;;  %v3061_v33 = vadd.f32 %v16820_v7, %v2997_v36 }
 0x2dc   :  { %v6430_v19 = vunpack.c.l.b16 %v14029_v51  ;;  %v6431_v25 = vunpack.c.l.b16 %v14030_v28  ;;  %v6606_v57 = vrot.slane %v6429_v46, 3  ;;  %v14096_v0 = vpack.c.bf16 %v5656_v60, %v5656_v60 }
 0x2dd   :  { %v3064_v50 = vadd.f32 %v16820_v7, %v3000_v56  ;;  %v3877_v26 = vrot.slane %v3863_v17, %v16385_v20  ;;  %v3878_v6 = vcombine.high %v3870_v5, %v3870_v5  ;;  %v13382_v18 = vrot.slane %v3870_v5, 9 }
 0x2de   :  { %v6607_v34 = vsel %vm6500_vm14, %v6606_v57, %v6605_v27  ;;  %v6608_v62 = vrot.slane %v6430_v19, 2  ;;  %v6610_v52 = vrot.slane %v6431_v25, 1  ;;  %v6822_v54 = vsel %vm16314_vm6, %v14096_v0, %v6821_v23  ;;  %7427 = vrot.lane.b32.xlu1 %v7390_v8, %s14725_s0 }
 0x2df   :  { %6823 = vst [vmem:[#allocation7 + $0x5c] sm:$0x1] %v6822_v54  ;;  %v3125_v63 = vmax.f32 %v3061_v33, 0.0  ;;  %v3128_v38 = vmax.f32 %v3064_v50, 0.0  ;;  %v2998_v31 = vmul.f32 %v16829_v43, %v16648_v14  ;;  %v5892_v27 = vsel %vm16314_vm6, 0, %v5891_v32 }
 0x2e0   :  { %v6609_v40 = vsel %vm6503_vm15, %v6608_v62, %v6607_v34  ;;  %v3879_v3 = vcombine.high %v3877_v26, %v3877_v26  ;;  %v13383_v37 = vrot.slane %v3878_v6, 9  ;;  %v13384_v48 = vrot.slane %v3877_v26, 9  ;;  %5893 = vst [vmem:[#allocation7 + $0x60] sm:$0x1] %v5892_v27 }
 0x2e1   :  { %v6611_v24 = vsel %vm18579_vm0, %v6610_v52, %v6609_v40  ;;  %v5481_v42 = vmax.f32 %v3870_v5, %v13382_v18  ;;  %v3829_v55 = vcombine.high %v3125_v63, %v3125_v63  ;;  %v3836_v60 = vrot.slane %v3125_v63, %v16385_v20  ;;  %v14545_v51 = vld [vmem:[#allocation8 + $0x10] ss:$20 sps:$4 sm:$0xff]  }
 0x2e2   :  { %v6719_v11 = vpack.c.b16 %v6611_v24, %v6611_v24  ;;  %v13385_v28 = vrot.slane %v3879_v3, 9  ;;  %v5482_v14 = vmax.f32 %v3878_v6, %v13383_v37  ;;  %v5483_v46 = vmax.f32 %v3877_v26, %v13384_v48  ;;  %14455 = vmatprep.mubr.msk.bf16.mxu0 %vm9010_vm9, %v14545_v51  ;;  %v5953_v18 = vld [vmem:[#allocation7 + $0x64] sm:$0x1]  ;;  %v6906_v37 = vld [vmem:[#allocation7 + $0x20] sm:$0xf] }
 0x2e3   :  { %v3880_v23 = vcombine.high %v3128_v38, %v3128_v38  ;;  %v3843_v16 = vrot.slane %v3829_v55, %v16385_v20  ;;  %v3844_v36 = vcombine.high %v3836_v60, %v3836_v60  ;;  %v13374_v56 = vrot.slane %v3836_v60, 9 }
 0x2e4   :  { %v6819_v22 = vsel %vm16455_vm1, %v6719_v11, %v6818_v10  ;;  %v5484_v8 = vmax.f32 %v3879_v3, %v13385_v28  ;;  %v3887_v19 = vrot.slane %v3128_v38, %v16385_v20  ;;  %v3062_v57 = vadd.f32 %v16820_v7, %v2998_v31 }
 0x2e5   :  { %6820 = vst [vmem:[#allocation7 + $0x58] sm:$0xf] %v6819_v22  ;;  %v3894_v25 = vrot.slane %v3880_v23, %v16385_v20  ;;  %v3845_v0 = vcombine.high %v3843_v16, %v3843_v16  ;;  %v13375_v17 = vrot.slane %v3844_v36, 9  ;;  %v13376_v5 = vrot.slane %v3843_v16, 9  ;;  %v16864_v22 = vpop.f32.mrb[54].mxu0 }
 0x2e6   :  { %v5473_v33 = vmax.f32 %v3836_v60, %v13374_v56  ;;  %v3895_v50 = vcombine.high %v3887_v19, %v3887_v19  ;;  %v13386_v34 = vrot.slane %v3887_v19, 9  ;;  %v3126_v55 = vmax.f32 %v3062_v57, 0.0  ;;  %v16867_v56 = vpop.f32.mrb[55].mxu0 }
 0x2e7   :  { %v3896_v32 = vcombine.high %v3894_v25, %v3894_v25  ;;  %v13388_v62 = vrot.slane %v3894_v25, 9  ;;  %v13377_v52 = vrot.slane %v3845_v0, 9  ;;  %v5474_v54 = vmax.f32 %v3844_v36, %v13375_v17 }
 0x2e8   :  { %v5475_v26 = vmax.f32 %v3843_v16, %v13376_v5  ;;  %v5657_v6 = vmax.f32 %v5473_v33, %v5481_v42  ;;  %v13387_v63 = vrot.slane %v3895_v50, 9  ;;  %v5485_v38 = vmax.f32 %v3887_v19, %v13386_v34  ;;  %v6907_v33 = vld [vmem:[#allocation7 + $0x24] sm:$0x1] }
 0x2e9   :  { %v13389_v40 = vrot.slane %v3896_v32, 9  ;;  %v5487_v27 = vmax.f32 %v3894_v25, %v13388_v62  ;;  %v5476_v24 = vmax.f32 %v3845_v0, %v13377_v52  ;;  %v5658_v10 = vmax.f32 %v5474_v54, %v5482_v14 }
 0x2ea   :  { %v5659_v31 = vmax.f32 %v5475_v26, %v5483_v46  ;;  %v14032_v3 = vpack.c.bf16 %v5657_v6, %v5657_v6  ;;  %v5486_v48 = vmax.f32 %v3895_v50, %v13387_v63  ;;  %v5954_v60 = vsel %vm16301_vm4, 0, %v5953_v18 }
 0x2eb   :  { %v5488_v11 = vmax.f32 %v3896_v32, %v13389_v40  ;;  %v5660_v51 = vmax.f32 %v5476_v24, %v5484_v8  ;;  %v14033_v28 = vpack.c.bf16 %v5658_v10, %v5658_v10  ;;  %5955 = vst [vmem:[#allocation7 + $0x64] sm:$0x1] %v5954_v60  ;;  %v3846_v16 = vcombine.high %v3126_v55, %v3126_v55 }
 0x2ec   :  { %v14034_v23 = vpack.c.bf16 %v5659_v31, %v5659_v31  ;;  %v6433_v42 = vunpack.c.l.b16 %v14032_v3  ;;  %v3853_v36 = vrot.slane %v3126_v55, %v16385_v20  ;;  %v6990_v14 = vshrl.u32 %v6906_v37, 16 }
 0x2ed   :  { %v6993_v46 = vshll.u32 %v6906_v37, 16  ;;  %v14035_v19 = vpack.c.bf16 %v5660_v51, %v5660_v51  ;;  %v6434_v25 = vunpack.c.l.b16 %v14033_v28  ;;  %v3860_v17 = vrot.slane %v3846_v16, %v16385_v20 }
 0x2ee   :  { %v6435_v57 = vunpack.c.l.b16 %v14034_v23  ;;  %v6612_v0 = vrot.slane %v6433_v42, 7  ;;  %v3861_v8 = vcombine.high %v3853_v36, %v3853_v36  ;;  %v13378_v5 = vrot.slane %v3853_v36, 9 }
 0x2ef   :  { %v6992_v50 = vrot.slane %v6990_v14, 4  ;;  %v6436_v32 = vunpack.c.l.b16 %v14035_v19  ;;  %v6613_v34 = vrot.slane %v6434_v25, 6  ;;  %v6995_v52 = vrot.slane %v6993_v46, 5 }
 0x2f0   :  { %v6615_v62 = vrot.slane %v6435_v57, 5  ;;  %v3862_v54 = vcombine.high %v3860_v17, %v3860_v17  ;;  %v13379_v26 = vrot.slane %v3861_v8, 9  ;;  %v13380_v6 = vrot.slane %v3860_v17, 9 }
 0x2f1   :  { %v5477_v18 = vmax.f32 %v3853_v36, %v13378_v5  ;;  %v6614_v63 = vsel %vm6491_vm11, %v6613_v34, %v6612_v0  ;;  %v6617_v40 = vrot.slane %v6436_v32, 4  ;;  %v6996_v24 = vor.u32 %v6995_v52, %v6992_v50  ;;  %v16887_v34 = vpop.f32.mrb[56].mxu0 }
 0x2f2   :  { %v6999_v10 = vshll.u32 %v6907_v33, 16  ;;  %v6616_v31 = vsel %vm6494_vm12, %v6615_v62, %v6614_v63  ;;  %v13381_v3 = vrot.slane %v3862_v54, 9  ;;  %v5478_v37 = vmax.f32 %v3861_v8, %v13379_v26  ;;  %v6827_v8 = vld [vmem:[#allocation7 + $0x64] sm:$0x1] }
 0x2f3   :  { %v5479_v55 = vmax.f32 %v3860_v17, %v13380_v6  ;;  %v5661_v60 = vmax.f32 %v5477_v18, %v5485_v38  ;;  %v6618_v51 = vsel %vm6497_vm13, %v6617_v40, %v6616_v31  ;;  %v6997_v28 = vrot.slane %v6996_v24, 4 }
 0x2f4   :  { %v7001_v23 = vrot.slane %v6999_v10, 5  ;;  %v5480_v42 = vmax.f32 %v3862_v54, %v13381_v3  ;;  %v5662_v16 = vmax.f32 %v5478_v37, %v5486_v48  ;;  %v3003_v36 = vmul.f32 %v16829_v43, %v16670_v12 }
 0x2f5   :  { %v5663_v14 = vmax.f32 %v5479_v55, %v5487_v27  ;;  %v14036_v46 = vpack.c.bf16 %v5661_v60, %v5661_v60  ;;  %v3001_v25 = vmul.f32 %v16829_v43, %v16673_v45  ;;  %v3004_v38 = vmul.f32 %v16829_v43, %v16690_v47  ;;  %v7391_v45 = vld [vmem:[#allocation7 + $0x38] sm:$0xf] }
 0x2f6   :  { %v7002_v19 = vsel %vm16360_vm10, %v6997_v28, %v7001_v23  ;;  %v5664_v57 = vmax.f32 %v5480_v42, %v5488_v11  ;;  %v14037_v0 = vpack.c.bf16 %v5662_v16, %v5662_v16  ;;  %v3067_v27 = vadd.f32 %v16820_v7, %v3003_v36  ;;  %v6824_v42 = vld [vmem:[#allocation7 + $0x60] sm:$0xf] }
 0x2f7   :  { %v14038_v17 = vpack.c.bf16 %v5663_v14, %v5663_v14  ;;  %7165 = vrot.lane.b32.xlu0 %v7002_v19, %s14725_s0  ;;  %v6437_v48 = vunpack.c.l.b16 %v14036_v46  ;;  %v3065_v12 = vadd.f32 %v16820_v7, %v3001_v25  ;;  %v3068_v5 = vadd.f32 %v16820_v7, %v3004_v38 }
 0x2f8   :  { %v3002_v33 = vmul.f32 %v16829_v43, %v16693_v44  ;;  %v6438_v50 = vunpack.c.l.b16 %v14037_v0  ;;  %v14097_v47 = vpack.c.bf16 %v5664_v57, %v5664_v57  ;;  %v3131_v11 = vmax.f32 %v3067_v27, 0.0  ;;  %v16895_v44 = vpop.f32.mrb[57].mxu0 }
 0x2f9   :  { %v6439_v32 = vunpack.c.l.b16 %v14038_v17  ;;  %v6619_v62 = vrot.slane %v6437_v48, 3  ;;  %v3129_v52 = vmax.f32 %v3065_v12, 0.0  ;;  %v3132_v54 = vmax.f32 %v3068_v5, 0.0 }
 0x2fa   :  { %v16890_v26 = vadd.f32 %v16820_v7, %v3002_v33  ;;  %v6621_v6 = vrot.slane %v6438_v50, 2  ;;  %v6828_v63 = vsel %vm16314_vm6, %v14097_v47, %v6827_v8  ;;  %v3931_v40 = vcombine.high %v3131_v11, %v3131_v11 }
 0x2fb   :  { %v6623_v18 = vrot.slane %v6439_v32, 1  ;;  %7429 = vrot.lane.b32.xlu0 %v7391_v45, %s14725_s0  ;;  %v6620_v24 = vsel %vm6500_vm14, %v6619_v62, %v6618_v51  ;;  %6829 = vst [vmem:[#allocation7 + $0x64] sm:$0x1] %v6828_v63  ;;  %v3938_v10 = vrot.slane %v3131_v11, %v16385_v20  ;;  %v3897_v31 = vcombine.high %v3129_v52, %v3129_v52  ;;  %v16907_v32 = vpop.f32.mrb[58].mxu0 }
 0x2fc   :  { %v3904_v3 = vrot.slane %v3129_v52, %v16385_v20  ;;  %v6622_v37 = vsel %vm6503_vm15, %v6621_v6, %v6620_v24  ;;  %v3945_v55 = vrot.slane %v3931_v40, %v16385_v20  ;;  %v3948_v60 = vcombine.high %v3132_v54, %v3132_v54 }
 0x2fd   :  { %v3955_v28 = vrot.slane %v3132_v54, %v16385_v20  ;;  %v6624_v23 = vsel %vm18579_vm0, %v6623_v18, %v6622_v37  ;;  %v3946_v16 = vcombine.high %v3938_v10, %v3938_v10  ;;  %v13398_v14 = vrot.slane %v3938_v10, 9  ;;  %v16910_v54 = vpop.f32.mrb[59].mxu0 }
 0x2fe   :  { %v3911_v51 = vrot.slane %v3897_v31, %v16385_v20  ;;  %v6721_v36 = vpack.c.b16 %v6624_v23, %v6624_v23  ;;  %v3947_v46 = vcombine.high %v3945_v55, %v3945_v55  ;;  %v13400_v19 = vrot.slane %v3945_v55, 9 }
 0x2ff   :  { %v3912_v25 = vcombine.high %v3904_v3, %v3904_v3  ;;  %v13399_v38 = vrot.slane %v3946_v16, 9  ;;  %v5497_v57 = vmax.f32 %v3938_v10, %v13398_v14  ;;  %v13390_v17 = vrot.slane %v3904_v3, 9  ;;  %v5956_v14 = vld [vmem:[#allocation7 + $0x6c] sm:$0x1] }
 0x300   :  { %v3913_v0 = vcombine.high %v3911_v51, %v3911_v51  ;;  %v6825_v27 = vsel %vm16455_vm1, %v6721_v36, %v6824_v42  ;;  %v13401_v48 = vrot.slane %v3947_v46, 9  ;;  %v5499_v8 = vmax.f32 %v3945_v55, %v13400_v19 }
 0x301   :  { %v13391_v12 = vrot.slane %v3912_v25, 9  ;;  %6826 = vst [vmem:[#allocation7 + $0x60] sm:$0xf] %v6825_v27  ;;  %v5498_v5 = vmax.f32 %v3946_v16, %v13399_v38  ;;  %v13392_v33 = vrot.slane %v3911_v51, 9  ;;  %v5489_v50 = vmax.f32 %v3904_v3, %v13390_v17  ;;  %v5894_v16 = vld [vmem:[#allocation7 + $0x68] sm:$0x1] }
 0x302   :  { %v13393_v45 = vrot.slane %v3913_v0, 9  ;;  %v5500_v47 = vmax.f32 %v3947_v46, %v13401_v48  ;;  %v3962_v62 = vrot.slane %v3948_v60, %v16385_v20  ;;  %v3963_v52 = vcombine.high %v3955_v28, %v3955_v28 }
 0x303   :  { %v5490_v11 = vmax.f32 %v3912_v25, %v13391_v12  ;;  %v5491_v6 = vmax.f32 %v3911_v51, %v13392_v33  ;;  %v5665_v63 = vmax.f32 %v5489_v50, %v5497_v57  ;;  %v13402_v40 = vrot.slane %v3955_v28, 9 }
 0x304   :  { %v5492_v18 = vmax.f32 %v3913_v0, %v13393_v45  ;;  %v3964_v10 = vcombine.high %v3962_v62, %v3962_v62  ;;  %v13403_v31 = vrot.slane %v3963_v52, 9  ;;  %v13404_v37 = vrot.slane %v3962_v62, 9  ;;  %v6908_v0 = vld [vmem:[#allocation7 + $0x28] sm:$0xf] }
 0x305   :  { %v5666_v24 = vmax.f32 %v5490_v11, %v5498_v5  ;;  %v5667_v55 = vmax.f32 %v5491_v6, %v5499_v8  ;;  %v14040_v3 = vpack.c.bf16 %v5665_v63, %v5665_v63  ;;  %v5501_v42 = vmax.f32 %v3955_v28, %v13402_v40  ;;  %v6909_v8 = vld [vmem:[#allocation7 + $0x2c] sm:$0x1] }
 0x306   :  { %v5668_v23 = vmax.f32 %v5492_v18, %v5500_v47  ;;  %v13405_v46 = vrot.slane %v3964_v10, 9  ;;  %v5502_v60 = vmax.f32 %v3963_v52, %v13403_v31  ;;  %v5503_v19 = vmax.f32 %v3962_v62, %v13404_v37  ;;  %v8318_v31 = vld [vmem:[#allocation7 + $0x20] sm:$0xe] }
 0x307   :  { %v14041_v36 = vpack.c.bf16 %v5666_v24, %v5666_v24  ;;  %v14042_v25 = vpack.c.bf16 %v5667_v55, %v5667_v55  ;;  %v6441_v51 = vunpack.c.l.b16 %v14040_v3  ;;  %v3130_v57 = vmax.f32 %v16890_v26, 0.0 }
 0x308   :  { %v14043_v38 = vpack.c.bf16 %v5668_v23, %v5668_v23  ;;  %v5504_v27 = vmax.f32 %v3964_v10, %v13405_v46  ;;  %v5895_v48 = vsel %vm16314_vm6, 0, %v5894_v16  ;;  %v5957_v28 = vsel %vm16301_vm4, 0, %v5956_v14  ;;  %v8319_v16 = vld [vmem:[#allocation7 + $0x24] sm:$0x1]  ;;  %v8320_v14 = vld [vmem:[#allocation7 + $0x28] sm:$0xe] }
 0x309   :  { %v6442_v17 = vunpack.c.l.b16 %v14041_v36  ;;  %v6443_v12 = vunpack.c.l.b16 %v14042_v25  ;;  %v6625_v33 = vrot.slane %v6441_v51, 7  ;;  %v3914_v45 = vcombine.high %v3130_v57, %v3130_v57  ;;  %5896 = vst [vmem:[#allocation7 + $0x68] sm:$0x1] %v5895_v48  ;;  %5958 = vst [vmem:[#allocation7 + $0x6c] sm:$0x1] %v5957_v28 }
 0x30a   :  { %v6444_v5 = vunpack.c.l.b16 %v14043_v38  ;;  %v3921_v47 = vrot.slane %v3130_v57, %v16385_v20  ;;  %v7004_v26 = vshrl.u32 %v6908_v0, 16  ;;  %v7007_v11 = vshll.u32 %v6908_v0, 16  ;;  %v8321_v51 = vld [vmem:[#allocation7 + $0x2c] sm:$0x1] }
 0x30b   :  { %v6626_v50 = vrot.slane %v6442_v17, 6  ;;  %v6628_v62 = vrot.slane %v6443_v12, 5  ;;  %v3928_v6 = vrot.slane %v3914_v45, %v16385_v20  ;;  %v7013_v18 = vshll.u32 %v6909_v8, 16 }
 0x30c   :  { %v6630_v52 = vrot.slane %v6444_v5, 4  ;;  %v3929_v40 = vcombine.high %v3921_v47, %v3921_v47  ;;  %v13394_v24 = vrot.slane %v3921_v47, 9  ;;  %v7006_v10 = vrot.slane %v7004_v26, 4 }
 0x30d   :  { %v6627_v63 = vsel %vm6491_vm11, %v6626_v50, %v6625_v33  ;;  %v3930_v55 = vcombine.high %v3928_v6, %v3928_v6  ;;  %v13396_v23 = vrot.slane %v3928_v6, 9  ;;  %v7009_v3 = vrot.slane %v7007_v11, 5 }
 0x30e   :  { %v6629_v37 = vsel %vm6494_vm12, %v6628_v62, %v6627_v63  ;;  %v13395_v36 = vrot.slane %v3929_v40, 9  ;;  %v5493_v46 = vmax.f32 %v3921_v47, %v13394_v24  ;;  %v7015_v38 = vrot.slane %v7013_v18, 5 }
 0x30f   :  { %v6631_v25 = vsel %vm6497_vm13, %v6630_v52, %v6629_v37  ;;  %v13397_v57 = vrot.slane %v3930_v55, 9  ;;  %v5495_v0 = vmax.f32 %v3928_v6, %v13396_v23  ;;  %v7010_v17 = vor.u32 %v7009_v3, %v7006_v10  ;;  %v16940_v23 = vpop.f32.mrb[60].mxu0 }
 0x310   :  { %v13664_v48 = vrot.slane %v8318_v31, 9  ;;  %v5494_v28 = vmax.f32 %v3929_v40, %v13395_v36  ;;  %v5669_v8 = vmax.f32 %v5493_v46, %v5501_v42  ;;  %v8388_v12 = vrot.slane %v8319_v16, 5  ;;  %v5897_v46 = vld [vmem:[#allocation7 + $0x70] sm:$0x1] }
 0x311   :  { %v13665_v5 = vrot.slane %v8320_v14, 9  ;;  %v5496_v33 = vmax.f32 %v3930_v55, %v13397_v57  ;;  %v5671_v45 = vmax.f32 %v5495_v0, %v5503_v19  ;;  %v7011_v50 = vrot.slane %v7010_v17, 4  ;;  %v7392_v55 = vld [vmem:[#allocation7 + $0x40] sm:$0xf] }
 0x312   :  { %v8392_v26 = vrot.slane %v8321_v51, 5  ;;  %v5670_v11 = vmax.f32 %v5494_v28, %v5502_v60  ;;  %v14044_v62 = vpack.c.bf16 %v5669_v8, %v5669_v8  ;;  %v8389_v47 = vsel %vm16806_vm8, %v13664_v48, %v8388_v12  ;;  %v6833_v60 = vld [vmem:[#allocation7 + $0x6c] sm:$0x1] }
 0x313   :  { %v3007_v52 = vmul.f32 %v16829_v43, %v16729_v4  ;;  %v5672_v18 = vmax.f32 %v5496_v33, %v5504_v27  ;;  %v14046_v6 = vpack.c.bf16 %v5671_v45, %v5671_v45  ;;  %v7016_v63 = vsel %vm16360_vm10, %v7011_v50, %v7015_v38  ;;  %8460 = vst.msk [vmem:[#allocation8 + $0x38] sm:$0xf] %vm5841_vm7, %v8389_v47  ;;  %v16943_v38 = vpop.f32.mrb[61].mxu0 }
 0x314   :  { %v8393_v42 = vsel %vm16806_vm8, %v13665_v5, %v8392_v26  ;;  %v14045_v19 = vpack.c.bf16 %v5670_v11, %v5670_v11  ;;  %v6445_v40 = vunpack.c.l.b16 %v14044_v62  ;;  %7167 = vrot.lane.b32.xlu1 %v7016_v63, %s14725_s0  ;;  %v3005_v4 = vmul.f32 %v16829_v43, %v16732_v39  ;;  %v6830_v11 = vld [vmem:[#allocation7 + $0x68] sm:$0xf] }
 0x315   :  { %8461 = vst.msk [vmem:[#allocation8 + $0x4c] sm:$0xf] %vm5841_vm7, %v8393_v42  ;;  %v3071_v24 = vadd.f32 %v16820_v7, %v3007_v52  ;;  %v6447_v27 = vunpack.c.l.b16 %v14046_v6  ;;  %v14098_v10 = vpack.c.bf16 %v5672_v18, %v5672_v18  ;;  %v3008_v31 = vmul.f32 %v16829_v43, %v16747_v59 }
 0x316   :  { %v3006_v37 = vmul.f32 %v16829_v43, %v16751_v53  ;;  %v6446_v3 = vunpack.c.l.b16 %v14045_v19  ;;  %v6632_v16 = vrot.slane %v6445_v40, 3  ;;  %v3069_v36 = vadd.f32 %v16820_v7, %v3005_v4 }
 0x317   :  { %v3135_v14 = vmax.f32 %v3071_v24, 0.0  ;;  %v6636_v39 = vrot.slane %v6447_v27, 1  ;;  %v6834_v51 = vsel %vm16314_vm6, %v14098_v10, %v6833_v60  ;;  %v3072_v59 = vadd.f32 %v16820_v7, %v3008_v31  ;;  %v16960_v27 = vpop.f32.mrb[62].mxu0 }
 0x318   :  { %v3070_v57 = vadd.f32 %v16820_v7, %v3006_v37  ;;  %v6633_v53 = vsel %vm6500_vm14, %v6632_v16, %v6631_v25  ;;  %v6634_v0 = vrot.slane %v6446_v3, 2  ;;  %6835 = vst [vmem:[#allocation7 + $0x6c] sm:$0x1] %v6834_v51  ;;  %7431 = vrot.lane.b32.xlu1 %v7392_v55, %s14725_s0  ;;  %v3133_v28 = vmax.f32 %v3069_v36, 0.0  ;;  %v16964_v3 = vpop.f32.mrb[63].mxu0 }
 0x319   :  { %v3999_v17 = vcombine.high %v3135_v14, %v3135_v14  ;;  %v4006_v48 = vrot.slane %v3135_v14, %v16385_v20  ;;  %v3136_v8 = vmax.f32 %v3072_v59, 0.0  ;;  %v5898_v5 = vsel %vm16314_vm6, 0, %v5897_v46 }
 0x31a   :  { %v3134_v12 = vmax.f32 %v3070_v57, 0.0  ;;  %v6635_v33 = vsel %vm6503_vm15, %v6634_v0, %v6633_v53  ;;  %5899 = vst [vmem:[#allocation7 + $0x70] sm:$0x1] %v5898_v5  ;;  %v3965_v47 = vcombine.high %v3133_v28, %v3133_v28  ;;  %v3972_v52 = vrot.slane %v3133_v28, %v16385_v20 }
 0x31b   :  { %v4013_v45 = vrot.slane %v3999_v17, %v16385_v20  ;;  %v4014_v50 = vcombine.high %v4006_v48, %v4006_v48  ;;  %v13414_v26 = vrot.slane %v4006_v48, 9  ;;  %v6637_v25 = vsel %vm18579_vm0, %v6636_v39, %v6635_v33 }
 0x31c   :  { %v14549_v62 = vld [vmem:[#allocation8 + $0x38] ss:$20 sps:$4 sm:$0xff]   ;;  %v4016_v18 = vcombine.high %v3136_v8, %v3136_v8  ;;  %v6723_v6 = vpack.c.b16 %v6637_v25, %v6637_v25  ;;  %v3979_v60 = vrot.slane %v3965_v47, %v16385_v20  ;;  %v3980_v24 = vcombine.high %v3972_v52, %v3972_v52 }
 0x31d   :  { %v4015_v63 = vcombine.high %v4013_v45, %v4013_v45  ;;  %v13415_v42 = vrot.slane %v4014_v50, 9  ;;  %v13416_v19 = vrot.slane %v4013_v45, 9  ;;  %14456 = vmatmul.mubr.msk.bf16.vlgmr.msra.gmra.mrb[64].mxu0 %vm9010_vm9, %v14549_v62  ;;  %v5513_v40 = vmax.f32 %v4006_v48, %v13414_v26 }
 0x31e   :  { %v13406_v4 = vrot.slane %v3972_v52, 9  ;;  %v6831_v10 = vsel %vm16455_vm1, %v6723_v6, %v6830_v11  ;;  %v3981_v16 = vcombine.high %v3979_v60, %v3979_v60  ;;  %v13407_v14 = vrot.slane %v3980_v24, 9 }
 0x31f   :  { %v13417_v31 = vrot.slane %v4015_v63, 9  ;;  %v5514_v37 = vmax.f32 %v4014_v50, %v13415_v42  ;;  %v5515_v55 = vmax.f32 %v4013_v45, %v13416_v19  ;;  %6832 = vst [vmem:[#allocation7 + $0x68] sm:$0xf] %v6831_v10  ;;  %v13408_v36 = vrot.slane %v3979_v60, 9 }
 0x320   :  { %v5505_v46 = vmax.f32 %v3972_v52, %v13406_v4  ;;  %v4023_v51 = vrot.slane %v3136_v8, %v16385_v20  ;;  %v4030_v59 = vrot.slane %v4016_v18, %v16385_v20  ;;  %v3982_v57 = vcombine.high %v3134_v12, %v3134_v12  ;;  %v5959_v4 = vld [vmem:[#allocation7 + $0x74] sm:$0x1] }
 0x321   :  { %v5516_v39 = vmax.f32 %v4015_v63, %v13417_v31  ;;  %v13409_v53 = vrot.slane %v3981_v16, 9  ;;  %v5506_v0 = vmax.f32 %v3980_v24, %v13407_v14  ;;  %v5507_v17 = vmax.f32 %v3979_v60, %v13408_v36 }
 0x322   :  { %v5673_v48 = vmax.f32 %v5505_v46, %v5513_v40  ;;  %v4031_v28 = vcombine.high %v4023_v51, %v4023_v51  ;;  %v4032_v5 = vcombine.high %v4030_v59, %v4030_v59  ;;  %v13418_v33 = vrot.slane %v4023_v51, 9 }
 0x323   :  { %v13420_v45 = vrot.slane %v4030_v59, 9  ;;  %v5508_v50 = vmax.f32 %v3981_v16, %v13409_v53  ;;  %v5674_v26 = vmax.f32 %v5506_v0, %v5514_v37  ;;  %v5675_v25 = vmax.f32 %v5507_v17, %v5515_v55 }
 0x324   :  { %v14048_v11 = vpack.c.bf16 %v5673_v48, %v5673_v48  ;;  %v13419_v62 = vrot.slane %v4031_v28, 9  ;;  %v13421_v47 = vrot.slane %v4032_v5, 9  ;;  %v5517_v52 = vmax.f32 %v4023_v51, %v13418_v33  ;;  %v6910_v51 = vld [vmem:[#allocation7 + $0x30] sm:$0xf]  ;;  %v6911_v33 = vld [vmem:[#allocation7 + $0x34] sm:$0x1] }
 0x325   :  { %v5519_v6 = vmax.f32 %v4030_v59, %v13420_v45  ;;  %v5676_v8 = vmax.f32 %v5508_v50, %v5516_v39  ;;  %v14049_v63 = vpack.c.bf16 %v5674_v26, %v5674_v26  ;;  %v14050_v18 = vpack.c.bf16 %v5675_v25, %v5675_v25 }
 0x326   :  { %v6449_v42 = vunpack.c.l.b16 %v14048_v11  ;;  %v5518_v19 = vmax.f32 %v4031_v28, %v13419_v62  ;;  %v5520_v24 = vmax.f32 %v4032_v5, %v13421_v47  ;;  %v3989_v40 = vrot.slane %v3134_v12, %v16385_v20 }
 0x327   :  { %v3996_v60 = vrot.slane %v3982_v57, %v16385_v20  ;;  %v14051_v10 = vpack.c.bf16 %v5676_v8, %v5676_v8  ;;  %v6450_v31 = vunpack.c.l.b16 %v14049_v63  ;;  %v6451_v37 = vunpack.c.l.b16 %v14050_v18 }
 0x328   :  { %v6638_v55 = vrot.slane %v6449_v42, 7  ;;  %v3997_v16 = vcombine.high %v3989_v40, %v3989_v40  ;;  %v13410_v36 = vrot.slane %v3989_v40, 9  ;;  %v5960_v0 = vsel %vm16301_vm4, 0, %v5959_v4 }
 0x329   :  { %v3998_v14 = vcombine.high %v3996_v60, %v3996_v60  ;;  %v13412_v46 = vrot.slane %v3996_v60, 9  ;;  %v6452_v39 = vunpack.c.l.b16 %v14051_v10  ;;  %v6639_v59 = vrot.slane %v6450_v31, 6  ;;  %5961 = vst [vmem:[#allocation7 + $0x74] sm:$0x1] %v5960_v0 }
 0x32a   :  { %v6641_v53 = vrot.slane %v6451_v37, 5  ;;  %v13411_v17 = vrot.slane %v3997_v16, 9  ;;  %v5509_v48 = vmax.f32 %v3989_v40, %v13410_v36  ;;  %v7018_v45 = vshrl.u32 %v6910_v51, 16 }
 0x32b   :  { %v13413_v12 = vrot.slane %v3998_v14, 9  ;;  %v5511_v57 = vmax.f32 %v3996_v60, %v13412_v46  ;;  %v6640_v28 = vsel %vm6491_vm11, %v6639_v59, %v6638_v55  ;;  %v6643_v5 = vrot.slane %v6452_v39, 4 }
 0x32c   :  { %v7021_v50 = vshll.u32 %v6910_v51, 16  ;;  %v6642_v26 = vsel %vm6494_vm12, %v6641_v53, %v6640_v28  ;;  %v5510_v25 = vmax.f32 %v3997_v16, %v13411_v17  ;;  %v5677_v62 = vmax.f32 %v5509_v48, %v5517_v52  ;;  %v5900_v48 = vld [vmem:[#allocation7 + $0x78] sm:$0x1] }
 0x32d   :  { %v5512_v11 = vmax.f32 %v3998_v14, %v13413_v12  ;;  %v5679_v47 = vmax.f32 %v5511_v57, %v5519_v6  ;;  %v6644_v8 = vsel %vm6497_vm13, %v6643_v5, %v6642_v26  ;;  %v7020_v63 = vrot.slane %v7018_v45, 4 }
 0x32e   :  { %v7023_v18 = vrot.slane %v7021_v50, 5  ;;  %v5678_v42 = vmax.f32 %v5510_v25, %v5518_v19  ;;  %v14052_v60 = vpack.c.bf16 %v5677_v62, %v5677_v62  ;;  %v7027_v4 = vshll.u32 %v6911_v33, 16 }
 0x32f   :  { %v5680_v40 = vmax.f32 %v5512_v11, %v5520_v24  ;;  %v14054_v10 = vpack.c.bf16 %v5679_v47, %v5679_v47  ;;  %v3011_v37 = vmul.f32 %v16829_v43, %v16767_v58  ;;  %v3009_v55 = vmul.f32 %v16829_v43, %v16772_v29  ;;  %v6836_v11 = vld [vmem:[#allocation7 + $0x70] sm:$0xf] }
 0x330   :  { %v7024_v31 = vor.u32 %v7023_v18, %v7020_v63  ;;  %v14053_v16 = vpack.c.bf16 %v5678_v42, %v5678_v42  ;;  %v6453_v14 = vunpack.c.l.b16 %v14052_v60  ;;  %v7029_v6 = vrot.slane %v7027_v4, 5  ;;  %v6839_v46 = vld [vmem:[#allocation7 + $0x74] sm:$0x1]  ;;  %v14553_v42 = vld [vmem:[%s18569_s2 + $0x40] sm:$0xff]  }
 0x331   :  { %v14099_v52 = vpack.c.bf16 %v5680_v40, %v5680_v40  ;;  %v6455_v36 = vunpack.c.l.b16 %v14054_v10  ;;  %v3075_v19 = vadd.f32 %v16820_v7, %v3011_v37  ;;  %v3073_v24 = vadd.f32 %v16820_v7, %v3009_v55  ;;  %v14554_v40 = vld [vmem:[%s18569_s2] sm:$0xff]   ;;  %14171 = vmatprep.subr.bf16.mxu1 %v14553_v42  ;;  %v6867_v42 = vld [vmem:[#allocation7 + $0x8] sm:$0xf] }
 0x332   :  { %v7025_v51 = vrot.slane %v7024_v31, 4  ;;  %v6454_v39 = vunpack.c.l.b16 %v14053_v16  ;;  %v6645_v59 = vrot.slane %v6453_v14, 3  ;;  %v3012_v58 = vmul.f32 %v16829_v43, %v16790_v41  ;;  %14172 = vmatpush3.bf16.msra.mxu1 %v14554_v40  ;;  %6883 = vst.msk [vmem:[#allocation8 + $0x14] sm:$0xf] %vm5841_vm7, %v6867_v42 }
 0x333   :  { %v6840_v53 = vsel %vm16314_vm6, %v14099_v52, %v6839_v46  ;;  %v6649_v29 = vrot.slane %v6455_v36, 1  ;;  %v3139_v17 = vmax.f32 %v3075_v19, 0.0  ;;  %v3137_v12 = vmax.f32 %v3073_v24, 0.0 }
 0x334   :  { %6841 = vst [vmem:[#allocation7 + $0x74] sm:$0x1] %v6840_v53  ;;  %v7030_v0 = vsel %vm16360_vm10, %v7025_v51, %v7029_v6  ;;  %v6646_v57 = vsel %vm6500_vm14, %v6645_v59, %v6644_v8  ;;  %v6647_v28 = vrot.slane %v6454_v39, 2  ;;  %v3076_v5 = vadd.f32 %v16820_v7, %v3012_v58  ;;  %v14556_v51 = vld [vmem:[%s18569_s2 + $0x8] sm:$0xff]  }
 0x335   :  { %7169 = vrot.lane.b32.xlu0 %v7030_v0, %s14725_s0  ;;  %v3010_v33 = vmul.f32 %v16829_v43, %v16793_v30  ;;  %v4067_v45 = vcombine.high %v3139_v17, %v3139_v17  ;;  %v4074_v41 = vrot.slane %v3139_v17, %v16385_v20  ;;  %v4033_v50 = vcombine.high %v3137_v12, %v3137_v12 }
 0x336   :  { %v4040_v26 = vrot.slane %v3137_v12, %v16385_v20  ;;  %v6648_v25 = vsel %vm6503_vm15, %v6647_v28, %v6646_v57  ;;  %v3140_v62 = vmax.f32 %v3076_v5, 0.0  ;;  %v5901_v8 = vsel %vm16314_vm6, 0, %v5900_v48  ;;  %v14558_v28 = vld [vmem:[%s18569_s2 + $0x50] sm:$0xff]   ;;  %v6866_v5 = vld [vmem:[#allocation7] sm:$0xf] }
 0x337   :  { %v3074_v47 = vadd.f32 %v16820_v7, %v3010_v33  ;;  %v6650_v63 = vsel %vm18579_vm0, %v6649_v29, %v6648_v25  ;;  %v4081_v18 = vrot.slane %v4067_v45, %v16385_v20  ;;  %v4082_v30 = vcombine.high %v4074_v41, %v4074_v41  ;;  %5902 = vst [vmem:[#allocation7 + $0x78] sm:$0x1] %v5901_v8  ;;  %v14555_v7 = vld [vmem:[%s18569_s2 + $0x48] sm:$0xff]   ;;  %v14560_v8 = vld [vmem:[%s18569_s2 + $0x58] sm:$0xff]  }
 0x338   :  { %v13430_v43 = vrot.slane %v4074_v41, 9  ;;  %v6725_v60 = vpack.c.b16 %v6650_v63, %v6650_v63  ;;  %v4047_v4 = vrot.slane %v4033_v50, %v16385_v20  ;;  %v4048_v10 = vcombine.high %v4040_v26, %v4040_v26  ;;  %14173 = vmatprep.subr.bf16.mxu1 %v14555_v7  ;;  %6882 = vst.msk [vmem:[#allocation8] sm:$0xf] %vm5841_vm7, %v6866_v5 }
 0x339   :  { %v13422_v31 = vrot.slane %v4040_v26, 9  ;;  %v4083_v37 = vcombine.high %v4081_v18, %v4081_v18  ;;  %v13431_v55 = vrot.slane %v4082_v30, 9  ;;  %v13432_v16 = vrot.slane %v4081_v18, 9  ;;  %14174 = vmatpush3.bf16.msra.mxu1 %v14556_v51  ;;  %v5885_v51 = vld [vmem:[#allocation7 + $0x50] sm:$0x1] }
 0x33a   :  { %v5529_v14 = vmax.f32 %v4074_v41, %v13430_v43  ;;  %v6837_v52 = vsel %vm16455_vm1, %v6725_v60, %v6836_v11  ;;  %v4049_v6 = vcombine.high %v4047_v4, %v4047_v4  ;;  %v13423_v36 = vrot.slane %v4048_v10, 9  ;;  %14175 = vmatprep.subr.bf16.mxu1 %v14558_v28 }
 0x33b   :  { %v13424_v46 = vrot.slane %v4047_v4, 9  ;;  %6838 = vst [vmem:[#allocation7 + $0x70] sm:$0xf] %v6837_v52  ;;  %v13433_v19 = vrot.slane %v4083_v37, 9  ;;  %v5530_v24 = vmax.f32 %v4082_v30, %v13431_v55  ;;  %v5531_v39 = vmax.f32 %v4081_v18, %v13432_v16  ;;  %v5962_v16 = vld [vmem:[#allocation7 + $0x7c] sm:$0x1] }
 0x33c   :  { %v5521_v59 = vmax.f32 %v4040_v26, %v13422_v31  ;;  %v13425_v53 = vrot.slane %v4049_v6, 9  ;;  %v5522_v58 = vmax.f32 %v4048_v10, %v13423_v36  ;;  %v4084_v0 = vcombine.high %v3140_v62, %v3140_v62  ;;  %v14559_v26 = vld [vmem:[%s18569_s2 + $0x10] sm:$0xff]  }
 0x33d   :  { %v5523_v29 = vmax.f32 %v4047_v4, %v13424_v46  ;;  %v5532_v17 = vmax.f32 %v4083_v37, %v13433_v19  ;;  %v4091_v48 = vrot.slane %v3140_v62, %v16385_v20  ;;  %v3138_v57 = vmax.f32 %v3074_v47, 0.0  ;;  %14176 = vmatpush3.bf16.msra.mxu1 %v14559_v26  ;;  %v5947_v19 = vld [vmem:[#allocation7 + $0x54] sm:$0x1] }
 0x33e   :  { %v5681_v12 = vmax.f32 %v5521_v59, %v5529_v14  ;;  %v5524_v33 = vmax.f32 %v4049_v6, %v13425_v53  ;;  %v5682_v45 = vmax.f32 %v5522_v58, %v5530_v24  ;;  %v4098_v50 = vrot.slane %v4084_v0, %v16385_v20  ;;  %v14561_v14 = vld [vmem:[%s18569_s2 + $0x18] sm:$0xff]   ;;  %14177 = vmatprep.subr.bf16.mxu1 %v14560_v8  ;;  %v14562_v24 = vld [vmem:[%s18569_s2 + $0x60] sm:$0xff]  }
 0x33f   :  { %v5683_v41 = vmax.f32 %v5523_v29, %v5531_v39  ;;  %v4099_v11 = vcombine.high %v4091_v48, %v4091_v48  ;;  %v13434_v62 = vrot.slane %v4091_v48, 9  ;;  %v4050_v47 = vcombine.high %v3138_v57, %v3138_v57 }
 0x340   :  { %v14056_v25 = vpack.c.bf16 %v5681_v12, %v5681_v12  ;;  %v5684_v63 = vmax.f32 %v5524_v33, %v5532_v17  ;;  %v14057_v18 = vpack.c.bf16 %v5682_v45, %v5682_v45  ;;  %v4100_v43 = vcombine.high %v4098_v50, %v4098_v50  ;;  %v6913_v45 = vld [vmem:[#allocation7 + $0x3c] sm:$0x1] }
 0x341   :  { %v14058_v30 = vpack.c.bf16 %v5683_v41, %v5683_v41  ;;  %v13435_v7 = vrot.slane %v4099_v11, 9  ;;  %v13436_v60 = vrot.slane %v4098_v50, 9  ;;  %v5533_v4 = vmax.f32 %v4091_v48, %v13434_v62  ;;  %v6912_v48 = vld [vmem:[#allocation7 + $0x38] sm:$0xf]  ;;  %14178 = vmatpush3.bf16.msra.mxu1 %v14561_v14  ;;  %v14563_v41 = vld [vmem:[%s18569_s2 + $0x20] sm:$0xff]  }
 0x342   :  { %v6457_v40 = vunpack.c.l.b16 %v14056_v25  ;;  %v14059_v10 = vpack.c.bf16 %v5684_v63, %v5684_v63  ;;  %v6458_v31 = vunpack.c.l.b16 %v14057_v18  ;;  %v13437_v55 = vrot.slane %v4100_v43, 9  ;;  %v8322_v62 = vld [vmem:[#allocation7 + $0x30] sm:$0xe]  ;;  %14179 = vmatprep.subr.bf16.mxu1 %v14562_v24  ;;  %v8325_v14 = vld [vmem:[#allocation7 + $0x3c] sm:$0x1] }
 0x343   :  { %v6459_v37 = vunpack.c.l.b16 %v14058_v30  ;;  %v5534_v6 = vmax.f32 %v4099_v11, %v13435_v7  ;;  %v5535_v36 = vmax.f32 %v4098_v50, %v13436_v60  ;;  %v4057_v46 = vrot.slane %v3138_v57, %v16385_v20 }
 0x344   :  { %v6651_v52 = vrot.slane %v6457_v40, 7  ;;  %v6460_v39 = vunpack.c.l.b16 %v14059_v10  ;;  %v6652_v59 = vrot.slane %v6458_v31, 6  ;;  %v5536_v58 = vmax.f32 %v4100_v43, %v13437_v55  ;;  %v8323_v43 = vld [vmem:[#allocation7 + $0x34] sm:$0x1]  ;;  %v8324_v10 = vld [vmem:[#allocation7 + $0x38] sm:$0xe] }
 0x345   :  { %v6654_v53 = vrot.slane %v6459_v37, 5  ;;  %v4064_v29 = vrot.slane %v4050_v47, %v16385_v20  ;;  %v4065_v0 = vcombine.high %v4057_v46, %v4057_v46  ;;  %v13426_v17 = vrot.slane %v4057_v46, 9  ;;  %v14564_v47 = vld [vmem:[%s18569_s2 + $0x68] sm:$0xff]   ;;  %v6868_v31 = vld [vmem:[#allocation7 + $0x10] sm:$0xf]  ;;  %14180 = vmatpush3.bf16.msra.mxu1 %v14563_v41 }
 0x346   :  { %v5963_v12 = vsel %vm16301_vm4, 0, %v5962_v16  ;;  %v6653_v57 = vsel %vm6491_vm11, %v6652_v59, %v6651_v52  ;;  %v6656_v28 = vrot.slane %v6460_v39, 4  ;;  %v5886_v5 = vsel %vm16314_vm6, 0, %v5885_v51  ;;  %6884 = vst.msk [vmem:[#allocation8 + $0x28] sm:$0xf] %vm5841_vm7, %v6868_v31  ;;  %14181 = vmatprep.subr.bf16.mxu1 %v14564_v47  ;;  %v14569_v47 = vld [vmem:[%s18569_s2 + $0x78] sm:$0xff]  }
 0x347   :  { %5964 = vst [vmem:[#allocation7 + $0x7c] sm:$0x1] %v5963_v12  ;;  %v5948_v33 = vsel %vm16301_vm4, 0, %v5947_v19  ;;  %v6655_v50 = vsel %vm6494_vm12, %v6654_v53, %v6653_v57  ;;  %v4066_v26 = vcombine.high %v4064_v29, %v4064_v29  ;;  %v13427_v25 = vrot.slane %v4065_v0, 9  ;;  %5887 = vst [vmem:[#allocation7 + $0x50] sm:$0x1] %v5886_v5 }
 0x348   :  { %v13428_v11 = vrot.slane %v4064_v29, 9  ;;  %5949 = vst [vmem:[#allocation7 + $0x54] sm:$0x1] %v5948_v33  ;;  %v5525_v8 = vmax.f32 %v4057_v46, %v13426_v17  ;;  %v6657_v63 = vsel %vm6497_vm13, %v6656_v28, %v6655_v50  ;;  %v7032_v18 = vshrl.u32 %v6912_v48, 16  ;;  %v14565_v46 = vld [vmem:[%s18569_s2 + $0x28] sm:$0xff]  }
 0x349   :  { %v7035_v30 = vshll.u32 %v6912_v48, 16  ;;  %v13429_v42 = vrot.slane %v4066_v26, 9  ;;  %v5526_v40 = vmax.f32 %v4065_v0, %v13427_v25  ;;  %v7041_v60 = vshll.u32 %v6913_v45, 16  ;;  %v17063_v41 = vld [vmem:[%s18574_s7] ss:$0 sm:$0xff]  ;;  %14182 = vmatpush3.bf16.msra.mxu1 %v14565_v46 }
 0x34a   :  { %v5527_v7 = vmax.f32 %v4064_v29, %v13428_v11  ;;  %v5685_v37 = vmax.f32 %v5525_v8, %v5533_v4  ;;  %v7034_v55 = vrot.slane %v7032_v18, 4  ;;  %v13666_v52 = vrot.slane %v8322_v62, 9  ;;  %v14567_v4 = vld [vmem:[%s18569_s2 + $0x70] sm:$0xff]  }
 0x34b   :  { %v7037_v16 = vrot.slane %v7035_v30, 5  ;;  %v5528_v51 = vmax.f32 %v4066_v26, %v13429_v42  ;;  %v5686_v19 = vmax.f32 %v5526_v40, %v5534_v6  ;;  %v7043_v39 = vrot.slane %v7041_v60, 5  ;;  %14183 = vmatprep.subr.bf16.mxu1 %v14567_v4  ;;  %v5944_v4 = vld [vmem:[#allocation7 + $0x4c] sm:$0x1] }
 0x34c   :  { %v5687_v24 = vmax.f32 %v5527_v7, %v5535_v36  ;;  %v14060_v59 = vpack.c.bf16 %v5685_v37, %v5685_v37  ;;  %v8396_v29 = vrot.slane %v8323_v43, 5  ;;  %v13667_v0 = vrot.slane %v8324_v10, 9  ;;  %v5903_v43 = vld [vmem:[#allocation7 + $0x80] sm:$0x1] }
 0x34d   :  { %v7038_v53 = vor.u32 %v7037_v16, %v7034_v55  ;;  %v5688_v17 = vmax.f32 %v5528_v51, %v5536_v58  ;;  %v14061_v12 = vpack.c.bf16 %v5686_v19, %v5686_v19  ;;  %v8400_v28 = vrot.slane %v8325_v14, 5  ;;  %v14568_v58 = vld [vmem:[%s18569_s2 + $0x30] sm:$0xff]   ;;  %v7394_v10 = vld [vmem:[#allocation7 + $0x60] sm:$0xf]  ;;  %v14570_v14 = vld [vmem:[%s18569_s2 + $0x38] sm:$0xff]  }
 0x34e   :  { %v14062_v48 = vpack.c.bf16 %v5687_v24, %v5687_v24  ;;  %v6845_v57 = vld [vmem:[#allocation7 + $0x7c] sm:$0x1]  ;;  %v6461_v5 = vunpack.c.l.b16 %v14060_v59  ;;  %v6914_v33 = vld [vmem:[#allocation7 + $0x50] sm:$0xf]  ;;  %v8397_v36 = vsel %vm16806_vm8, %v13666_v52, %v8396_v29  ;;  %v3015_v50 = vmul.f32 %v17063_v41, %v16839_v13  ;;  %14184 = vmatpush3.bf16.msra.mxu1 %v14568_v58  ;;  %v6869_v52 = vld [vmem:[#allocation7 + $0x18] sm:$0xf] }
 0x34f   :  { %v6915_v45 = vld [vmem:[#allocation7 + $0x54] sm:$0x1]  ;;  %v7039_v6 = vrot.slane %v7038_v53, 4  ;;  %v6462_v26 = vunpack.c.l.b16 %v14061_v12  ;;  %v14100_v11 = vpack.c.bf16 %v5688_v17, %v5688_v17  ;;  %v7046_v62 = vshrl.u32 %v6914_v33, 16  ;;  %8462 = vst.msk [vmem:[#allocation8 + $0x60] sm:$0xf] %vm5841_vm7, %v8397_v36  ;;  %14185 = vmatprep.subr.bf16.mxu1 %v14569_v47 }
 0x350   :  { %v6463_v25 = vunpack.c.l.b16 %v14062_v48  ;;  %v6658_v8 = vrot.slane %v6461_v5, 3  ;;  %v7049_v18 = vshll.u32 %v6914_v33, 16  ;;  %v7055_v30 = vshll.u32 %v6915_v45, 16  ;;  %6885 = vst.msk [vmem:[#allocation8 + $0x3c] sm:$0xf] %vm5841_vm7, %v6869_v52 }
 0x351   :  { %v7044_v13 = vsel %vm16360_vm10, %v7039_v6, %v7043_v39  ;;  %v6660_v42 = vrot.slane %v6462_v26, 2  ;;  %v6846_v7 = vsel %vm16314_vm6, %v14100_v11, %v6845_v57  ;;  %v7048_v60 = vrot.slane %v7046_v62, 4  ;;  %v5965_v39 = vld [vmem:[#allocation7 + $0x84] sm:$0x1]  ;;  %v6842_v53 = vld [vmem:[#allocation7 + $0x78] sm:$0xf] }
 0x352   :  { %v6662_v40 = vrot.slane %v6463_v25, 1  ;;  %7171 = vrot.lane.b32.xlu1 %v7044_v13, %s14725_s0  ;;  %v6659_v31 = vsel %vm6500_vm14, %v6658_v8, %v6657_v63  ;;  %6847 = vst [vmem:[#allocation7 + $0x7c] sm:$0x1] %v6846_v7  ;;  %v7051_v37 = vrot.slane %v7049_v18, 5  ;;  %v7057_v55 = vrot.slane %v7055_v30, 5  ;;  %14186 = vmatpush3.bf16.msra.mxu1 %v14570_v14 }
 0x353   :  { %v8401_v16 = vsel %vm16806_vm8, %v13667_v0, %v8400_v28  ;;  %v6661_v46 = vsel %vm6503_vm15, %v6660_v42, %v6659_v31  ;;  %v17090_v63 = vld [vmem:[%s18574_s7 + $0x1] ss:$0 sm:$0xff]  ;;  %v3013_v19 = vmul.f32 %v17063_v41, %v16851_v21  ;;  %v3016_v24 = vmul.f32 %v17063_v41, %v16864_v22  ;;  %v7393_v13 = vld [vmem:[#allocation7 + $0x58] sm:$0xf] }
 0x354   :  { %8463 = vst.msk [vmem:[#allocation8 + $0x74] sm:$0xf] %vm5841_vm7, %v8401_v16  ;;  %v3079_v51 = vadd.f32 %v17090_v63, %v3015_v50  ;;  %v6663_v59 = vsel %vm18579_vm0, %v6662_v40, %v6661_v46  ;;  %v7052_v29 = vor.u32 %v7051_v37, %v7048_v60  ;;  %v3014_v0 = vmul.f32 %v17063_v41, %v16867_v56  ;;  %v17105_v57 = vld [vmem:[#allocation7 + $0x40] sm:$0xe] }
 0x355   :  { %v5904_v17 = vsel %vm16314_vm6, 0, %v5903_v43  ;;  %v6727_v12 = vpack.c.b16 %v6663_v59, %v6663_v59  ;;  %v3077_v48 = vadd.f32 %v17090_v63, %v3013_v19  ;;  %v3080_v22 = vadd.f32 %v17090_v63, %v3016_v24 }
 0x356   :  { %v3143_v21 = vmax.f32 %v3079_v51, 0.0  ;;  %5905 = vst [vmem:[#allocation7 + $0x80] sm:$0x1] %v5904_v17  ;;  %7435 = vrot.lane.b32.xlu1 %v7394_v10, %s14725_s0  ;;  %v7053_v28 = vrot.slane %v7052_v29, 4  ;;  %v3078_v5 = vadd.f32 %v17090_v63, %v3014_v0  ;;  %v5966_v56 = vsel %vm16301_vm4, 0, %v5965_v39 }
 0x357   :  { %v5945_v33 = vsel %vm16301_vm4, 0, %v5944_v4  ;;  %v6843_v45 = vsel %vm16455_vm1, %v6727_v12, %v6842_v53  ;;  %v3141_v50 = vmax.f32 %v3077_v48, 0.0  ;;  %5967 = vst [vmem:[#allocation7 + $0x84] sm:$0x1] %v5966_v56  ;;  %v3144_v26 = vmax.f32 %v3080_v22, 0.0 }
 0x358   :  { %v4135_v6 = vcombine.high %v3143_v21, %v3143_v21  ;;  %v4142_v36 = vrot.slane %v3143_v21, %v16385_v20  ;;  %5946 = vst [vmem:[#allocation7 + $0x4c] sm:$0x1] %v5945_v33  ;;  %6844 = vst [vmem:[#allocation7 + $0x78] sm:$0xf] %v6843_v45  ;;  %v7058_v58 = vsel %vm16360_vm10, %v7053_v28, %v7057_v55  ;;  %v3142_v25 = vmax.f32 %v3078_v5, 0.0 }
 0x359   :  { %v13668_v11 = vrot.slane %v17105_v57, 9  ;;  %7173 = vrot.lane.b32.xlu0 %v7058_v58, %s14725_s0  ;;  %v4101_v18 = vcombine.high %v3141_v50, %v3141_v50  ;;  %v4108_v43 = vrot.slane %v3141_v50, %v16385_v20  ;;  %v4152_v42 = vcombine.high %v3144_v26, %v3144_v26  ;;  %v7395_v29 = vld [vmem:[#allocation7 + $0x68] sm:$0xf] }
 0x35a   :  { %v4149_v62 = vrot.slane %v4135_v6, %v16385_v20  ;;  %v4150_v47 = vcombine.high %v4142_v36, %v4142_v36  ;;  %v13446_v8 = vrot.slane %v4142_v36, 9  ;;  %v4159_v40 = vrot.slane %v3144_v26, %v16385_v20 }
 0x35b   :  { %v14550_v30 = vld [vmem:[#allocation8 + $0x60] ss:$20 sps:$4 sm:$0xff]   ;;  %v4118_v7 = vcombine.high %v3142_v25, %v3142_v25  ;;  %v4115_v55 = vrot.slane %v4101_v18, %v16385_v20  ;;  %v4116_v16 = vcombine.high %v4108_v43, %v4108_v43  ;;  %v13438_v14 = vrot.slane %v4108_v43, 9 }
 0x35c   :  { %v4151_v60 = vcombine.high %v4149_v62, %v4149_v62  ;;  %v13447_v10 = vrot.slane %v4150_v47, 9  ;;  %v13448_v31 = vrot.slane %v4149_v62, 9  ;;  %v5545_v37 = vmax.f32 %v4142_v36, %v13446_v8  ;;  %14459 = vmatprep.mubr.msk.bf16.mxu0 %vm9010_vm9, %v14550_v30 }
 0x35d   :  { %v4166_v52 = vrot.slane %v4152_v42, %v16385_v20  ;;  %7433 = vrot.lane.b32.xlu0 %v7393_v13, %s14725_s0  ;;  %v4167_v24 = vcombine.high %v4159_v40, %v4159_v40  ;;  %v4117_v39 = vcombine.high %v4115_v55, %v4115_v55  ;;  %v13439_v4 = vrot.slane %v4116_v16, 9 }
 0x35e   :  { %v13449_v46 = vrot.slane %v4151_v60, 9  ;;  %v5546_v51 = vmax.f32 %v4150_v47, %v13447_v10  ;;  %v5547_v19 = vmax.f32 %v4149_v62, %v13448_v31  ;;  %v13440_v59 = vrot.slane %v4115_v55, 9  ;;  %v6851_v57 = vld [vmem:[#allocation7 + $0x84] sm:$0x1] }
 0x35f   :  { %v5537_v53 = vmax.f32 %v4108_v43, %v13438_v14  ;;  %v4168_v17 = vcombine.high %v4166_v52, %v4166_v52  ;;  %v13450_v12 = vrot.slane %v4159_v40, 9  ;;  %v13451_v21 = vrot.slane %v4167_v24, 9 }
 0x360   :  { %v5548_v0 = vmax.f32 %v4151_v60, %v13449_v46  ;;  %v13441_v48 = vrot.slane %v4117_v39, 9  ;;  %v5538_v22 = vmax.f32 %v4116_v16, %v13439_v4  ;;  %v5539_v28 = vmax.f32 %v4115_v55, %v13440_v59  ;;  %v6870_v60 = vld [vmem:[#allocation7 + $0x20] sm:$0xf]  ;;  %v8327_v55 = vld [vmem:[#allocation7 + $0x44] sm:$0x1] }
 0x361   :  { %v5689_v5 = vmax.f32 %v5537_v53, %v5545_v37  ;;  %v13452_v56 = vrot.slane %v4166_v52, 9  ;;  %v13453_v33 = vrot.slane %v4168_v17, 9  ;;  %v5549_v45 = vmax.f32 %v4159_v40, %v13450_v12  ;;  %7437 = vrot.lane.b32.xlu0 %v7395_v29, %s14725_s0  ;;  %6886 = vst.msk [vmem:[#allocation8 + $0x50] sm:$0xf] %vm5841_vm7, %v6870_v60 }
 0x362   :  { %v5550_v6 = vmax.f32 %v4167_v24, %v13451_v21  ;;  %v5540_v36 = vmax.f32 %v4117_v39, %v13441_v48  ;;  %v5690_v50 = vmax.f32 %v5538_v22, %v5546_v51  ;;  %v5691_v58 = vmax.f32 %v5539_v28, %v5547_v19  ;;  %v8328_v24 = vld [vmem:[#allocation7 + $0x48] sm:$0xe]  ;;  %v8329_v21 = vld [vmem:[#allocation7 + $0x4c] sm:$0x1] }
 0x363   :  { %v14064_v26 = vpack.c.bf16 %v5689_v5, %v5689_v5  ;;  %v5551_v62 = vmax.f32 %v4166_v52, %v13452_v56  ;;  %v5552_v47 = vmax.f32 %v4168_v17, %v13453_v33  ;;  %v4125_v8 = vrot.slane %v3142_v25, %v16385_v20  ;;  %v6871_v48 = vld [vmem:[#allocation7 + $0x28] sm:$0xf]  ;;  %v6872_v33 = vld [vmem:[#allocation7 + $0x30] sm:$0xf] }
 0x364   :  { %v4132_v18 = vrot.slane %v4118_v7, %v16385_v20  ;;  %v5692_v30 = vmax.f32 %v5540_v36, %v5548_v0  ;;  %v14065_v13 = vpack.c.bf16 %v5690_v50, %v5690_v50  ;;  %v14066_v43 = vpack.c.bf16 %v5691_v58, %v5691_v58  ;;  %6887 = vst.msk [vmem:[#allocation8 + $0x64] sm:$0xf] %vm5841_vm7, %v6871_v48 }
 0x365   :  { %v6465_v42 = vunpack.c.l.b16 %v14064_v26  ;;  %v4133_v10 = vcombine.high %v4125_v8, %v4125_v8  ;;  %v13442_v31 = vrot.slane %v4125_v8, 9  ;;  %v8404_v53 = vrot.slane %v8327_v55, 5  ;;  %6888 = vst.msk [vmem:[#allocation8 + $0x78] sm:$0xf] %vm5841_vm7, %v6872_v33 }
 0x366   :  { %v4134_v40 = vcombine.high %v4132_v18, %v4132_v18  ;;  %v13444_v37 = vrot.slane %v4132_v18, 9  ;;  %v14067_v16 = vpack.c.bf16 %v5692_v30, %v5692_v30  ;;  %v6466_v14 = vunpack.c.l.b16 %v14065_v13 }
 0x367   :  { %v6467_v52 = vunpack.c.l.b16 %v14066_v43  ;;  %v6664_v46 = vrot.slane %v6465_v42, 7  ;;  %v13443_v51 = vrot.slane %v4133_v10, 9  ;;  %v5541_v19 = vmax.f32 %v4125_v8, %v13442_v31 }
 0x368   :  { %v13445_v25 = vrot.slane %v4134_v40, 9  ;;  %v5543_v7 = vmax.f32 %v4132_v18, %v13444_v37  ;;  %v6468_v39 = vunpack.c.l.b16 %v14067_v16  ;;  %v6665_v4 = vrot.slane %v6466_v14, 6 }
 0x369   :  { %v6667_v59 = vrot.slane %v6467_v52, 5  ;;  %v5542_v29 = vmax.f32 %v4133_v10, %v13443_v51  ;;  %v5693_v17 = vmax.f32 %v5541_v19, %v5549_v45  ;;  %v8405_v5 = vsel %vm16806_vm8, %v13668_v11, %v8404_v53  ;;  %v5906_v10 = vld [vmem:[#allocation7 + $0x88] sm:$0x1]  ;;  %v5968_v52 = vld [vmem:[#allocation7 + $0x8c] sm:$0x1] }
 0x36a   :  { %v5544_v0 = vmax.f32 %v4134_v40, %v13445_v25  ;;  %v5695_v12 = vmax.f32 %v5543_v7, %v5551_v62  ;;  %v6666_v22 = vsel %vm6491_vm11, %v6665_v4, %v6664_v46  ;;  %v6669_v28 = vrot.slane %v6468_v39, 4  ;;  %8464 = vst.msk [vmem:[#allocation8 + $0x88] sm:$0xf] %vm5841_vm7, %v8405_v5  ;;  %v6873_v4 = vld [vmem:[#allocation7 + $0x38] sm:$0xf] }
 0x36b   :  { %v13669_v56 = vrot.slane %v8328_v24, 9  ;;  %v6668_v36 = vsel %vm6494_vm12, %v6667_v59, %v6666_v22  ;;  %v5694_v50 = vmax.f32 %v5542_v29, %v5550_v6  ;;  %v14068_v45 = vpack.c.bf16 %v5693_v17, %v5693_v17  ;;  %6889 = vst.msk [vmem:[#allocation8 + $0x8c] sm:$0xf] %vm5841_vm7, %v6873_v4  ;;  %v6848_v17 = vld [vmem:[#allocation7 + $0x80] sm:$0xf] }
 0x36c   :  { %v5696_v58 = vmax.f32 %v5544_v0, %v5552_v47  ;;  %v14070_v26 = vpack.c.bf16 %v5695_v12, %v5695_v12  ;;  %v6670_v62 = vsel %vm6497_vm13, %v6669_v28, %v6668_v36  ;;  %v8408_v8 = vrot.slane %v8329_v21, 5 }
 0x36d   :  { %v3019_v11 = vmul.f32 %v17063_v41, %v16887_v34  ;;  %v14069_v18 = vpack.c.bf16 %v5694_v50, %v5694_v50  ;;  %v6469_v30 = vunpack.c.l.b16 %v14068_v45  ;;  %v3017_v6 = vmul.f32 %v17063_v41, %v16895_v44 }
 0x36e   :  { %v14101_v13 = vpack.c.bf16 %v5696_v58, %v5696_v58  ;;  %v6471_v47 = vunpack.c.l.b16 %v14070_v26  ;;  %v8409_v43 = vsel %vm16806_vm8, %v13669_v56, %v8408_v8  ;;  %v3020_v60 = vmul.f32 %v17063_v41, %v16907_v32 }
 0x36f   :  { %v3083_v42 = vadd.f32 %v17090_v63, %v3019_v11  ;;  %v6470_v40 = vunpack.c.l.b16 %v14069_v18  ;;  %v6671_v31 = vrot.slane %v6469_v30, 3  ;;  %8465 = vst.msk [vmem:[#allocation8 + $0x9c] sm:$0xf] %vm5841_vm7, %v8409_v43  ;;  %v3081_v37 = vadd.f32 %v17090_v63, %v3017_v6 }
 0x370   :  { %v6852_v34 = vsel %vm16314_vm6, %v14101_v13, %v6851_v57  ;;  %v6675_v44 = vrot.slane %v6471_v47, 1  ;;  %v3084_v16 = vadd.f32 %v17090_v63, %v3020_v60  ;;  %v3018_v14 = vmul.f32 %v17063_v41, %v16910_v54 }
 0x371   :  { %6853 = vst [vmem:[#allocation7 + $0x84] sm:$0x1] %v6852_v34  ;;  %v3147_v55 = vmax.f32 %v3083_v42, 0.0  ;;  %v6672_v32 = vsel %vm6500_vm14, %v6671_v31, %v6670_v62  ;;  %v6673_v46 = vrot.slane %v6470_v40, 2  ;;  %v3145_v51 = vmax.f32 %v3081_v37, 0.0 }
 0x372   :  { %v5907_v25 = vsel %vm16314_vm6, 0, %v5906_v10  ;;  %v3148_v24 = vmax.f32 %v3084_v16, 0.0  ;;  %v3082_v39 = vadd.f32 %v17090_v63, %v3018_v14  ;;  %v5969_v29 = vsel %vm16301_vm4, 0, %v5968_v52  ;;  %v6874_v16 = vld [vmem:[#allocation7 + $0x50] sm:$0xf] }
 0x373   :  { %v4203_v19 = vcombine.high %v3147_v55, %v3147_v55  ;;  %v4210_v7 = vrot.slane %v3147_v55, %v16385_v20  ;;  %5908 = vst [vmem:[#allocation7 + $0x88] sm:$0x1] %v5907_v25  ;;  %v6674_v59 = vsel %vm6503_vm15, %v6673_v46, %v6672_v32  ;;  %v4169_v53 = vcombine.high %v3145_v51, %v3145_v51 }
 0x374   :  { %v4176_v54 = vrot.slane %v3145_v51, %v16385_v20  ;;  %v6676_v0 = vsel %vm18579_vm0, %v6675_v44, %v6674_v59  ;;  %5970 = vst [vmem:[#allocation7 + $0x8c] sm:$0x1] %v5969_v29  ;;  %v4220_v42 = vcombine.high %v3148_v24, %v3148_v24  ;;  %v4227_v40 = vrot.slane %v3148_v24, %v16385_v20 }
 0x375   :  { %v4217_v12 = vrot.slane %v4203_v19, %v16385_v20  ;;  %v4218_v21 = vcombine.high %v4210_v7, %v4210_v7  ;;  %v13462_v48 = vrot.slane %v4210_v7, 9  ;;  %v6729_v22 = vpack.c.b16 %v6676_v0, %v6676_v0  ;;  %6890 = vst.msk [vmem:[#allocation8 + $0xa0] sm:$0xf] %vm5841_vm7, %v6874_v16 }
 0x376   :  { %v4183_v28 = vrot.slane %v4169_v53, %v16385_v20  ;;  %v4184_v5 = vcombine.high %v4176_v54, %v4176_v54  ;;  %v13454_v56 = vrot.slane %v4176_v54, 9  ;;  %v14551_v33 = vld [vmem:[#allocation8 + $0x88] ss:$20 sps:$4 sm:$0xff]   ;;  %v3146_v31 = vmax.f32 %v3082_v39, 0.0 }
 0x377   :  { %v4219_v36 = vcombine.high %v4217_v12, %v4217_v12  ;;  %v13463_v50 = vrot.slane %v4218_v21, 9  ;;  %v13464_v58 = vrot.slane %v4217_v12, 9  ;;  %v5561_v45 = vmax.f32 %v4210_v7, %v13462_v48  ;;  %14460 = vmatmul.mubr.msk.bf16.gmra.mrb[68].mxu0 %vm9010_vm9, %v14551_v33 }
 0x378   :  { %v6849_v26 = vsel %vm16455_vm1, %v6729_v22, %v6848_v17  ;;  %v4185_v62 = vcombine.high %v4183_v28, %v4183_v28  ;;  %v13455_v57 = vrot.slane %v4184_v5, 9  ;;  %v13456_v8 = vrot.slane %v4183_v28, 9  ;;  %v6916_v17 = vld [vmem:[#allocation7 + $0x58] sm:$0xf] }
 0x379   :  { %6850 = vst [vmem:[#allocation7 + $0x80] sm:$0xf] %v6849_v26  ;;  %v13465_v11 = vrot.slane %v4219_v36, 9  ;;  %v5562_v18 = vmax.f32 %v4218_v21, %v13463_v50  ;;  %v5563_v30 = vmax.f32 %v4217_v12, %v13464_v58  ;;  %v5553_v13 = vmax.f32 %v4176_v54, %v13454_v56 }
 0x37a   :  { %v13457_v6 = vrot.slane %v4185_v62, 9  ;;  %v5554_v47 = vmax.f32 %v4184_v5, %v13455_v57  ;;  %v5555_v43 = vmax.f32 %v4183_v28, %v13456_v8  ;;  %v4234_v55 = vrot.slane %v4220_v42, %v16385_v20  ;;  %v6917_v28 = vld [vmem:[#allocation7 + $0x5c] sm:$0x1] }
 0x37b   :  { %v5564_v60 = vmax.f32 %v4219_v36, %v13465_v11  ;;  %v5697_v10 = vmax.f32 %v5553_v13, %v5561_v45  ;;  %v4235_v52 = vcombine.high %v4227_v40, %v4227_v40  ;;  %v13466_v32 = vrot.slane %v4227_v40, 9 }
 0x37c   :  { %v5556_v34 = vmax.f32 %v4185_v62, %v13457_v6  ;;  %v5698_v37 = vmax.f32 %v5554_v47, %v5562_v18  ;;  %v5699_v44 = vmax.f32 %v5555_v43, %v5563_v30  ;;  %v4186_v46 = vcombine.high %v3146_v31, %v3146_v31  ;;  %v6875_v18 = vld [vmem:[#allocation7 + $0x58] sm:$0xf] }
 0x37d   :  { %v14072_v14 = vpack.c.bf16 %v5697_v10, %v5697_v10  ;;  %v4236_v7 = vcombine.high %v4234_v55, %v4234_v55  ;;  %v13467_v59 = vrot.slane %v4235_v52, 9  ;;  %v13468_v24 = vrot.slane %v4234_v55, 9  ;;  %6891 = vst.msk [vmem:[#allocation8 + $0xb4] sm:$0xf] %vm5841_vm7, %v6875_v18 }
 0x37e   :  { %v5700_v51 = vmax.f32 %v5556_v34, %v5564_v60  ;;  %v14073_v25 = vpack.c.bf16 %v5698_v37, %v5698_v37  ;;  %v14074_v19 = vpack.c.bf16 %v5699_v44, %v5699_v44  ;;  %v5565_v39 = vmax.f32 %v4227_v40, %v13466_v32 }
 0x37f   :  { %v6473_v4 = vunpack.c.l.b16 %v14072_v14  ;;  %v13469_v0 = vrot.slane %v4236_v7, 9  ;;  %v5566_v21 = vmax.f32 %v4235_v52, %v13467_v59  ;;  %v5567_v48 = vmax.f32 %v4234_v55, %v13468_v24  ;;  %v7962_v52 = vld [vmem:[#allocation7 + $0x10] sm:$0xf] }
 0x380   :  { %v14075_v53 = vpack.c.bf16 %v5700_v51, %v5700_v51  ;;  %v6474_v54 = vunpack.c.l.b16 %v14073_v25  ;;  %v6475_v29 = vunpack.c.l.b16 %v14074_v19  ;;  %v4193_v22 = vrot.slane %v3146_v31, %v16385_v20  ;;  %v6876_v19 = vld [vmem:[#allocation7 + $0x60] sm:$0xf]  ;;  %7978 = vst.msk [vmem:[#allocation8 + $0xc] sm:$0xf] %vm5841_vm7, %v7962_v52 }
 0x381   :  { %v6677_v12 = vrot.slane %v6473_v4, 7  ;;  %v5568_v36 = vmax.f32 %v4236_v7, %v13469_v0  ;;  %v4200_v50 = vrot.slane %v4186_v46, %v16385_v20  ;;  %v7060_v26 = vshrl.u32 %v6916_v17, 16  ;;  %6892 = vst.msk [vmem:[#allocation8 + $0xc8] sm:$0xf] %vm5841_vm7, %v6876_v19 }
 0x382   :  { %v6476_v5 = vunpack.c.l.b16 %v14075_v53  ;;  %v6678_v56 = vrot.slane %v6474_v54, 6  ;;  %v6680_v33 = vrot.slane %v6475_v29, 5  ;;  %v4201_v58 = vcombine.high %v4193_v22, %v4193_v22  ;;  %v6857_v29 = vld [vmem:[#allocation7 + $0x8c] sm:$0x1] }
 0x383   :  { %v13458_v45 = vrot.slane %v4193_v22, 9  ;;  %v7063_v8 = vshll.u32 %v6916_v17, 16  ;;  %v7069_v11 = vshll.u32 %v6917_v28, 16  ;;  %v4202_v13 = vcombine.high %v4200_v50, %v4200_v50 }
 0x384   :  { %v6679_v62 = vsel %vm6491_vm11, %v6678_v56, %v6677_v12  ;;  %v6682_v57 = vrot.slane %v6476_v5, 4  ;;  %v13459_v6 = vrot.slane %v4201_v58, 9  ;;  %v13460_v47 = vrot.slane %v4200_v50, 9  ;;  %v14584_v12 = vld [vmem:[%s18569_s2 + $0xc0] sm:$0xff]  }
 0x385   :  { %v6681_v30 = vsel %vm6494_vm12, %v6680_v33, %v6679_v62  ;;  %v5557_v43 = vmax.f32 %v4193_v22, %v13458_v45  ;;  %v7062_v60 = vrot.slane %v7060_v26, 4  ;;  %v7065_v10 = vrot.slane %v7063_v8, 5  ;;  %14235 = vmatprep.subr.bf16.mxu1 %v14584_v12 }
 0x386   :  { %v6683_v42 = vsel %vm6497_vm13, %v6682_v57, %v6681_v30  ;;  %v13461_v40 = vrot.slane %v4202_v13, 9  ;;  %v5558_v31 = vmax.f32 %v4201_v58, %v13459_v6  ;;  %v5559_v34 = vmax.f32 %v4200_v50, %v13460_v47  ;;  %v7396_v50 = vld [vmem:[#allocation7 + $0x70] sm:$0xf]  ;;  %v17200_v58 = vpop.permute.xlu0 %7157 }
 0x387   :  { %v7071_v37 = vrot.slane %v7069_v11, 5  ;;  %v5701_v44 = vmax.f32 %v5557_v43, %v5565_v39  ;;  %v7066_v55 = vor.u32 %v7065_v10, %v7062_v60  ;;  %v3023_v16 = vmul.f32 %v17063_v41, %v16940_v23  ;;  %v6877_v10 = vld [vmem:[#allocation7 + $0x68] sm:$0xf]  ;;  %7206 = vst.msk [vmem:[#allocation8] sm:$0xf] %vm7205_vm3, %v17200_v58 }
 0x388   :  { %v3021_v14 = vmul.f32 %v17063_v41, %v16943_v38  ;;  %v5560_v32 = vmax.f32 %v4202_v13, %v13461_v40  ;;  %v5702_v46 = vmax.f32 %v5558_v31, %v5566_v21  ;;  %v5703_v51 = vmax.f32 %v5559_v34, %v5567_v48  ;;  %v7963_v13 = vld [vmem:[#allocation7 + $0x18] sm:$0xf]  ;;  %6893 = vst.msk [vmem:[#allocation8 + $0xdc] sm:$0xf] %vm5841_vm7, %v6877_v10 }
 0x389   :  { %v3024_v25 = vmul.f32 %v17063_v41, %v16960_v27  ;;  %v14076_v7 = vpack.c.bf16 %v5701_v44, %v5701_v44  ;;  %v7067_v4 = vrot.slane %v7066_v55, 4  ;;  %v3087_v59 = vadd.f32 %v17090_v63, %v3023_v16  ;;  %7979 = vst.msk [vmem:[#allocation8 + $0x20] sm:$0xf] %vm5841_vm7, %v7963_v13 }
 0x38a   :  { %v3085_v24 = vadd.f32 %v17090_v63, %v3021_v14  ;;  %v5704_v23 = vmax.f32 %v5560_v32, %v5568_v36  ;;  %v14077_v38 = vpack.c.bf16 %v5702_v46, %v5702_v46  ;;  %v14078_v39 = vpack.c.bf16 %v5703_v51, %v5703_v51  ;;  %v17212_v44 = vpop.permute.xlu0 %7159 }
 0x38b   :  { %v3088_v53 = vadd.f32 %v17090_v63, %v3024_v25  ;;  %v6477_v54 = vunpack.c.l.b16 %v14076_v7  ;;  %v7072_v27 = vsel %vm16360_vm10, %v7067_v4, %v7071_v37  ;;  %v3151_v0 = vmax.f32 %v3087_v59, 0.0  ;;  %7207 = vst.msk [vmem:[#allocation8 + $0x14] sm:$0xf] %vm7205_vm3, %v17212_v44  ;;  %v17301_v44 = vld [vmem:[#allocation7 + $0xc] sm:$0x1] }
 0x38c   :  { %v3149_v17 = vmax.f32 %v3085_v24, 0.0  ;;  %v6478_v21 = vunpack.c.l.b16 %v14077_v38  ;;  %v6479_v48 = vunpack.c.l.b16 %v14078_v39  ;;  %v14102_v22 = vpack.c.bf16 %v5704_v23, %v5704_v23  ;;  %7175 = vrot.lane.b32.xlu1 %v7072_v27, %s14725_s0 }
 0x38d   :  { %v3152_v28 = vmax.f32 %v3088_v53, 0.0  ;;  %v6684_v5 = vrot.slane %v6477_v54, 3  ;;  %v4271_v56 = vcombine.high %v3151_v0, %v3151_v0  ;;  %v4278_v33 = vrot.slane %v3151_v0, %v16385_v20 }
 0x38e   :  { %v4237_v36 = vcombine.high %v3149_v17, %v3149_v17  ;;  %v6686_v45 = vrot.slane %v6478_v21, 2  ;;  %v6688_v26 = vrot.slane %v6479_v48, 1  ;;  %v6858_v62 = vsel %vm16314_vm6, %v14102_v22, %v6857_v29  ;;  %v17218_v53 = vpop.permute.xlu0 %7421  ;;  %v17223_v22 = vpop.permute.xlu1 %7417 }
 0x38f   :  { %v4244_v57 = vrot.slane %v3149_v17, %v16385_v20  ;;  %v6685_v8 = vsel %vm6500_vm14, %v6684_v5, %v6683_v42  ;;  %6859 = vst [vmem:[#allocation7 + $0x8c] sm:$0x1] %v6858_v62  ;;  %v4285_v11 = vrot.slane %v4271_v56, %v16385_v20  ;;  %v4286_v18 = vcombine.high %v4278_v33, %v4278_v33  ;;  %v6854_v42 = vld [vmem:[#allocation7 + $0x88] sm:$0xf]  ;;  %v7964_v5 = vld [vmem:[#allocation7 + $0x20] sm:$0xf] }
 0x390   :  { %v13478_v30 = vrot.slane %v4278_v33, 9  ;;  %v6687_v6 = vsel %vm6503_vm15, %v6686_v45, %v6685_v8  ;;  %v4251_v47 = vrot.slane %v4237_v36, %v16385_v20  ;;  %7439 = vrot.lane.b32.xlu1 %v7396_v50, %s14725_s0  ;;  %v4288_v38 = vcombine.high %v3152_v28, %v3152_v28  ;;  %v6878_v50 = vld [vmem:[#allocation7 + $0x70] sm:$0xf]  ;;  %7980 = vst.msk [vmem:[#allocation8 + $0x34] sm:$0xf] %vm5841_vm7, %v7964_v5 }
 0x391   :  { %v4252_v43 = vcombine.high %v4244_v57, %v4244_v57  ;;  %v13470_v60 = vrot.slane %v4244_v57, 9  ;;  %v6689_v40 = vsel %vm18579_vm0, %v6688_v26, %v6687_v6  ;;  %v4287_v31 = vcombine.high %v4285_v11, %v4285_v11  ;;  %6894 = vst.msk [vmem:[#allocation8 + $0xf0] sm:$0xf] %vm5841_vm7, %v6878_v50 }
 0x392   :  { %v13479_v34 = vrot.slane %v4286_v18, 9  ;;  %v13480_v37 = vrot.slane %v4285_v11, 9  ;;  %v6731_v55 = vpack.c.b16 %v6689_v40, %v6689_v40  ;;  %v5577_v16 = vmax.f32 %v4278_v33, %v13478_v30 }
 0x393   :  { %v4253_v14 = vcombine.high %v4251_v47, %v4251_v47  ;;  %v13471_v52 = vrot.slane %v4252_v43, 9  ;;  %v13481_v32 = vrot.slane %v4287_v31, 9  ;;  %v13472_v25 = vrot.slane %v4251_v47, 9 }
 0x394   :  { %v5578_v46 = vmax.f32 %v4286_v18, %v13479_v34  ;;  %v5579_v51 = vmax.f32 %v4285_v11, %v13480_v37  ;;  %v6855_v19 = vsel %vm16455_vm1, %v6731_v55, %v6854_v42  ;;  %v5569_v4 = vmax.f32 %v4244_v57, %v13470_v60  ;;  %v5909_v11 = vld [vmem:[#allocation7 + $0x90] sm:$0x1]  ;;  %v5971_v18 = vld [vmem:[#allocation7 + $0x94] sm:$0x1] }
 0x395   :  { %v13473_v7 = vrot.slane %v4253_v14, 9  ;;  %v5570_v59 = vmax.f32 %v4252_v43, %v13471_v52  ;;  %6856 = vst [vmem:[#allocation7 + $0x88] sm:$0xf] %v6855_v19  ;;  %v5580_v24 = vmax.f32 %v4287_v31, %v13481_v32  ;;  %v5571_v23 = vmax.f32 %v4251_v47, %v13472_v25  ;;  %v17228_v43 = vpop.permute.xlu1 %7419  ;;  %v6918_v31 = vld [vmem:[#allocation7 + $0x60] sm:$0xf] }
 0x396   :  { %v4295_v39 = vrot.slane %v3152_v28, %v16385_v20  ;;  %v5705_v29 = vmax.f32 %v5569_v4, %v5577_v16  ;;  %v3022_v0 = vmul.f32 %v17063_v41, %v16964_v3  ;;  %v4302_v12 = vrot.slane %v4288_v38, %v16385_v20  ;;  %v6920_v25 = vld [vmem:[#allocation7 + $0x68] sm:$0xf] }
 0x397   :  { %v5572_v54 = vmax.f32 %v4253_v14, %v13473_v7  ;;  %v5706_v27 = vmax.f32 %v5570_v59, %v5578_v46  ;;  %v5707_v17 = vmax.f32 %v5571_v23, %v5579_v51  ;;  %v5910_v55 = vsel %vm16314_vm6, 0, %v5909_v11  ;;  %v6919_v51 = vld [vmem:[#allocation7 + $0x64] sm:$0x1]  ;;  %v8330_v11 = vld [vmem:[#allocation7 + $0x60] sm:$0xe] }
 0x398   :  { %v4303_v21 = vcombine.high %v4295_v39, %v4295_v39  ;;  %v13482_v48 = vrot.slane %v4295_v39, 9  ;;  %v14080_v33 = vpack.c.bf16 %v5705_v29, %v5705_v29  ;;  %v3086_v28 = vadd.f32 %v17090_v63, %v3022_v0  ;;  %v17230_v63 = vpop.permute.xlu0 %7161  ;;  %5911 = vst [vmem:[#allocation7 + $0x90] sm:$0x1] %v5910_v55  ;;  %v6879_v0 = vld [vmem:[#allocation7 + $0x78] sm:$0xf] }
 0x399   :  { %v5708_v56 = vmax.f32 %v5572_v54, %v5580_v24  ;;  %v14081_v36 = vpack.c.bf16 %v5706_v27, %v5706_v27  ;;  %v14082_v45 = vpack.c.bf16 %v5707_v17, %v5707_v17  ;;  %v4304_v26 = vcombine.high %v4302_v12, %v4302_v12  ;;  %v17239_v24 = vpop.permute.xlu1 %7423  ;;  %v6921_v27 = vld [vmem:[#allocation7 + $0x6c] sm:$0x1]  ;;  %6895 = vst.msk [vmem:[#allocation8 + $0x104] sm:$0xf] %vm5841_vm7, %v6879_v0  ;;  %v8331_v55 = vld [vmem:[#allocation7 + $0x64] sm:$0x1] }
 0x39a   :  { %v13483_v62 = vrot.slane %v4303_v21, 9  ;;  %v13484_v3 = vrot.slane %v4302_v12, 9  ;;  %v6481_v57 = vunpack.c.l.b16 %v14080_v33  ;;  %v5581_v6 = vmax.f32 %v4295_v39, %v13482_v48  ;;  %7208 = vst.msk [vmem:[#allocation8 + $0x28] sm:$0xf] %vm7205_vm3, %v17230_v63  ;;  %v7225_v63 = vld [vmem:[#allocation7 + $0xc] sm:$0x1] }
 0x39b   :  { %v14083_v41 = vpack.c.bf16 %v5708_v56, %v5708_v56  ;;  %v6482_v8 = vunpack.c.l.b16 %v14081_v36  ;;  %v6483_v30 = vunpack.c.l.b16 %v14082_v45  ;;  %v13485_v13 = vrot.slane %v4304_v26, 9 }
 0x39c   :  { %v5582_v47 = vmax.f32 %v4303_v21, %v13483_v62  ;;  %v6690_v10 = vrot.slane %v6481_v57, 7  ;;  %v3150_v42 = vmax.f32 %v3086_v28, 0.0  ;;  %v5583_v37 = vmax.f32 %v4302_v12, %v13484_v3  ;;  %v17241_v23 = vpop.permute.xlu0 %7425  ;;  %v7965_v28 = vld [vmem:[#allocation7 + $0x28] sm:$0xf] }
 0x39d   :  { %v6484_v60 = vunpack.c.l.b16 %v14083_v41  ;;  %v6691_v40 = vrot.slane %v6482_v8, 6  ;;  %v6693_v34 = vrot.slane %v6483_v30, 5  ;;  %v5972_v16 = vsel %vm16301_vm4, 0, %v5971_v18  ;;  %7981 = vst.msk [vmem:[#allocation8 + $0x48] sm:$0xf] %vm5841_vm7, %v7965_v28 }
 0x39e   :  { %v4254_v32 = vcombine.high %v3150_v42, %v3150_v42  ;;  %v4261_v46 = vrot.slane %v3150_v42, %v16385_v20  ;;  %5973 = vst [vmem:[#allocation7 + $0x94] sm:$0x1] %v5972_v16  ;;  %v5584_v7 = vmax.f32 %v4304_v26, %v13485_v13  ;;  %v7074_v4 = vshrl.u32 %v6918_v31, 16  ;;  %v8332_v16 = vld [vmem:[#allocation7 + $0x68] sm:$0xe] }
 0x39f   :  { %v6692_v14 = vsel %vm6491_vm11, %v6691_v40, %v6690_v10  ;;  %v6695_v52 = vrot.slane %v6484_v60, 4  ;;  %v7077_v59 = vshll.u32 %v6918_v31, 16  ;;  %v7083_v21 = vshll.u32 %v6919_v51, 16  ;;  %v17249_v60 = vpop.permute.xlu1 %7163  ;;  %v7966_v51 = vld [vmem:[#allocation7 + $0x30] sm:$0xf] }
 0x3a0   :  { %v6694_v19 = vsel %vm6494_vm12, %v6693_v34, %v6692_v14  ;;  %v4268_v38 = vrot.slane %v4254_v32, %v16385_v20  ;;  %v4269_v39 = vcombine.high %v4261_v46, %v4261_v46  ;;  %v13474_v54 = vrot.slane %v4261_v46, 9  ;;  %v17251_v10 = vpop.permute.xlu0 %7165  ;;  %v8333_v14 = vld [vmem:[#allocation7 + $0x6c] sm:$0x1]  ;;  %7982 = vst.msk [vmem:[#allocation8 + $0x5c] sm:$0xf] %vm5841_vm7, %v7966_v51 }
 0x3a1   :  { %v17245_v29 = vsel %vm6497_vm13, %v6695_v52, %v6694_v19  ;;  %v7076_v17 = vrot.slane %v7074_v4, 4  ;;  %v7079_v12 = vrot.slane %v7077_v59, 5  ;;  %v7088_v48 = vshrl.u32 %v6920_v25, 16  ;;  %7209 = vst.msk [vmem:[#allocation8 + $0x3c] sm:$0xf] %vm7205_vm3, %v17249_v60 }
 0x3a2   :  { %v4270_v5 = vcombine.high %v4268_v38, %v4268_v38  ;;  %v13475_v56 = vrot.slane %v4269_v39, 9  ;;  %v13476_v33 = vrot.slane %v4268_v38, 9  ;;  %v5573_v36 = vmax.f32 %v4261_v46, %v13474_v54  ;;  %7210 = vst.msk [vmem:[#allocation8 + $0x50] sm:$0xf] %vm7205_vm3, %v17251_v10  ;;  %v6927_v10 = vld [vmem:[#allocation7 + $0x84] sm:$0x1] }
 0x3a3   :  { %v7080_v50 = vor.u32 %v7079_v12, %v7076_v17  ;;  %v7090_v45 = vrot.slane %v7088_v48, 4  ;;  %v7091_v26 = vshll.u32 %v6920_v25, 16  ;;  %v7097_v62 = vshll.u32 %v6921_v27, 16  ;;  %v17257_v12 = vpop.permute.xlu1 %7427 }
 0x3a4   :  { %v13477_v3 = vrot.slane %v4270_v5, 9  ;;  %v5574_v41 = vmax.f32 %v4269_v39, %v13475_v56  ;;  %v5575_v57 = vmax.f32 %v4268_v38, %v13476_v33  ;;  %v5709_v8 = vmax.f32 %v5573_v36, %v5581_v6  ;;  %v7397_v38 = vld [vmem:[#allocation7 + $0x78] sm:$0xf]  ;;  %v6923_v33 = vld [vmem:[#allocation7 + $0x74] sm:$0x1] }
 0x3a5   :  { %v7081_v18 = vrot.slane %v7080_v50, 4  ;;  %v7085_v30 = vrot.slane %v7083_v21, 5  ;;  %v7093_v13 = vrot.slane %v7091_v26, 5  ;;  %v7099_v6 = vrot.slane %v7097_v62, 5  ;;  %v6863_v39 = vld [vmem:[#allocation7 + $0x94] sm:$0x1]  ;;  %v17259_v21 = vpop.permute.xlu0 %7429 }
 0x3a6   :  { %v5576_v40 = vmax.f32 %v4270_v5, %v13477_v3  ;;  %v5710_v42 = vmax.f32 %v5574_v41, %v5582_v47  ;;  %v5711_v31 = vmax.f32 %v5575_v57, %v5583_v37  ;;  %v14084_v34 = vpack.c.bf16 %v5709_v8, %v5709_v8  ;;  %v6922_v47 = vld [vmem:[#allocation7 + $0x70] sm:$0xf]  ;;  %v6880_v37 = vld [vmem:[#allocation7 + $0x80] sm:$0xf]  ;;  %v6924_v36 = vld [vmem:[#allocation7 + $0x78] sm:$0xf] }
 0x3a7   :  { %v7086_v52 = vsel %vm16360_vm10, %v7081_v18, %v7085_v30  ;;  %v7094_v32 = vor.u32 %v7093_v13, %v7090_v45  ;;  %v13670_v46 = vrot.slane %v8330_v11, 9  ;;  %v8412_v27 = vrot.slane %v8331_v55, 5  ;;  %6896 = vst.msk [vmem:[#allocation8 + $0x118] sm:$0xf] %vm5841_vm7, %v6880_v37  ;;  %v6925_v62 = vld [vmem:[#allocation7 + $0x7c] sm:$0x1] }
 0x3a8   :  { %v5712_v25 = vmax.f32 %v5576_v40, %v5584_v7  ;;  %v14085_v19 = vpack.c.bf16 %v5710_v42, %v5710_v42  ;;  %v14086_v4 = vpack.c.bf16 %v5711_v31, %v5711_v31  ;;  %v6485_v59 = vunpack.c.l.b16 %v14084_v34  ;;  %7177 = vrot.lane.b32.xlu0 %v7086_v52, %s14725_s0  ;;  %v8334_v3 = vld [vmem:[#allocation7 + $0x70] sm:$0xe]  ;;  %v8335_v18 = vld [vmem:[#allocation7 + $0x74] sm:$0x1]  ;;  %v8337_v30 = vld [vmem:[#allocation7 + $0x7c] sm:$0x1] }
 0x3a9   :  { %v7095_v54 = vrot.slane %v7094_v32, 4  ;;  %v13671_v0 = vrot.slane %v8332_v16, 9  ;;  %v8416_v17 = vrot.slane %v8333_v14, 5  ;;  %v8413_v50 = vsel %vm16806_vm8, %v13670_v46, %v8412_v27  ;;  %v7222_v34 = vld [vmem:[#allocation7] sm:$0xe] }
 0x3aa   :  { %v6486_v7 = vunpack.c.l.b16 %v14085_v19  ;;  %v6487_v48 = vunpack.c.l.b16 %v14086_v4  ;;  %v6697_v5 = vrot.slane %v6485_v59, 3  ;;  %v14103_v56 = vpack.c.bf16 %v5712_v25, %v5712_v25  ;;  %8466 = vst.msk [vmem:[#allocation8 + $0xb0] sm:$0xf] %vm5841_vm7, %v8413_v50  ;;  %v8336_v52 = vld [vmem:[#allocation7 + $0x78] sm:$0xe]  ;;  %v7168_v59 = vpop.permute.xlu1 %7167 }
 0x3ab   :  { %v7100_v28 = vsel %vm16360_vm10, %v7095_v54, %v7099_v6  ;;  %v8417_v45 = vsel %vm16806_vm8, %v13671_v0, %v8416_v17  ;;  %v7102_v26 = vshrl.u32 %v6922_v47, 16  ;;  %v7105_v40 = vshll.u32 %v6922_v47, 16  ;;  %v6860_v46 = vld [vmem:[#allocation7 + $0x90] sm:$0xf]  ;;  %v7223_v4 = vld [vmem:[#allocation7 + $0x4] sm:$0x1] }
 0x3ac   :  { %v6698_v41 = vsel %vm6500_vm14, %v6697_v5, %v17245_v29  ;;  %v6699_v57 = vrot.slane %v6486_v7, 2  ;;  %v6701_v8 = vrot.slane %v6487_v48, 1  ;;  %v6864_v11 = vsel %vm16314_vm6, %v14103_v56, %v6863_v39  ;;  %7179 = vrot.lane.b32.xlu1 %v7100_v28, %s14725_s0  ;;  %8467 = vst.msk [vmem:[#allocation8 + $0xc4] sm:$0xf] %vm5841_vm7, %v8417_v45  ;;  %7441 = vrot.lane.b32.xlu0 %v7397_v38, %s14725_s0  ;;  %v7398_v29 = vld [vmem:[#allocation7 + $0x80] sm:$0xf]  ;;  %v7170_v38 = vpop.permute.xlu0 %7169 }
 0x3ad   :  { %6865 = vst [vmem:[#allocation7 + $0x94] sm:$0x1] %v6864_v11  ;;  %v7104_v13 = vrot.slane %v7102_v26, 4  ;;  %v7111_v42 = vshll.u32 %v6923_v33, 16  ;;  %v7116_v31 = vshrl.u32 %v6924_v36, 16  ;;  %v7119_v16 = vshll.u32 %v6924_v36, 16 }
 0x3ae   :  { %v6700_v55 = vsel %vm6503_vm15, %v6699_v57, %v6698_v41  ;;  %v7125_v14 = vshll.u32 %v6925_v62, 16  ;;  %v13672_v32 = vrot.slane %v8334_v3, 9  ;;  %v7107_v51 = vrot.slane %v7105_v40, 5  ;;  %v7967_v27 = vld [vmem:[#allocation7 + $0x38] sm:$0xf] }
 0x3af   :  { %v6702_v6 = vsel %vm18579_vm0, %v6701_v8, %v6700_v55  ;;  %v7113_v25 = vrot.slane %v7111_v42, 5  ;;  %v7118_v19 = vrot.slane %v7116_v31, 4  ;;  %v7121_v37 = vrot.slane %v7119_v16, 5  ;;  %v6926_v48 = vld [vmem:[#allocation7 + $0x80] sm:$0xf] }
 0x3b0   :  { %v6733_v47 = vpack.c.b16 %v6702_v6, %v6702_v6  ;;  %7443 = vrot.lane.b32.xlu1 %v7398_v29, %s14725_s0  ;;  %v7127_v39 = vrot.slane %v7125_v14, 5  ;;  %v8420_v54 = vrot.slane %v8335_v18, 5  ;;  %v7108_v0 = vor.u32 %v7107_v51, %v7104_v13  ;;  %7983 = vst.msk [vmem:[#allocation8 + $0x70] sm:$0xf] %vm5841_vm7, %v7967_v27  ;;  %v17286_v28 = vld [vmem:[#allocation7 + $0x8] sm:$0xe] }
 0x3b1   :  { %v13673_v17 = vrot.slane %v8336_v52, 9  ;;  %v8424_v7 = vrot.slane %v8337_v30, 5  ;;  %v7122_v56 = vor.u32 %v7121_v37, %v7118_v19  ;;  %v13630_v36 = vrot.slane %v7222_v34, 9  ;;  %v7224_v50 = vld [vmem:[#allocation7 + $0x8] sm:$0xe] }
 0x3b2   :  { %v6861_v5 = vsel %vm16455_vm1, %v6733_v47, %v6860_v46  ;;  %v8421_v33 = vsel %vm16806_vm8, %v13672_v32, %v8420_v54  ;;  %7211 = vst.msk [vmem:[#allocation8 + $0x64] sm:$0xf] %vm7205_vm3, %v7168_v59  ;;  %7212 = vst.msk [vmem:[#allocation8 + $0x78] sm:$0xf] %vm7205_vm3, %v7170_v38  ;;  %v7109_v45 = vrot.slane %v7108_v0, 4  ;;  %v7291_v60 = vrot.slane %v7223_v4, 5 }
 0x3b3   :  { %6862 = vst [vmem:[#allocation7 + $0x90] sm:$0xf] %v6861_v5  ;;  %v14552_v49 = vld [vmem:[#allocation8 + $0xb0] ss:$20 sps:$4 sm:$0xff]   ;;  %v8425_v58 = vsel %vm16806_vm8, %v13673_v17, %v8424_v7  ;;  %8468 = vst.msk [vmem:[#allocation8 + $0xd8] sm:$0xf] %vm5841_vm7, %v8421_v33 }
 0x3b4   :  { %v7123_v26 = vrot.slane %v7122_v56, 4  ;;  %8469 = vst.msk [vmem:[#allocation8 + $0xec] sm:$0xf] %vm5841_vm7, %v8425_v58  ;;  %v7130_v62 = vshrl.u32 %v6926_v48, 16  ;;  %14463 = vmatprep.mubr.msk.bf16.mxu0 %vm9010_vm9, %v14552_v49  ;;  %v7133_v3 = vshll.u32 %v6926_v48, 16  ;;  %v7114_v8 = vsel %vm16360_vm10, %v7109_v45, %v7113_v25 }
 0x3b5   :  { %v7994_v41 = vld [vmem:[#allocation7 + $0x10] sm:$0xf]  ;;  %v17305_v57 = vld [vmem:[#allocation7 + $0x14] sm:$0x1]  ;;  %v7292_v18 = vsel %vm16806_vm8, %v13630_v36, %v7291_v60  ;;  %v6928_v13 = vld [vmem:[#allocation7 + $0x88] sm:$0xf]  ;;  %7181 = vrot.lane.b32.xlu0 %v7114_v8, %s14725_s0 }
 0x3b6   :  { %v7128_v11 = vsel %vm16360_vm10, %v7123_v26, %v7127_v39  ;;  %v7132_v30 = vrot.slane %v7130_v62, 4  ;;  %v6929_v40 = vld [vmem:[#allocation7 + $0x8c] sm:$0x1]  ;;  %v7399_v42 = vld [vmem:[#allocation7 + $0x88] sm:$0xf]  ;;  %v7135_v29 = vrot.slane %v7133_v3, 5  ;;  %v17336_v26 = vpop.permute.xlu1 %7431 }
 0x3b7   :  { %7183 = vrot.lane.b32.xlu1 %v7128_v11, %s14725_s0  ;;  %7369 = vst.msk [vmem:[#allocation8 + $0x4] sm:$0xf] %vm5841_vm7, %v7292_v18  ;;  %v7139_v31 = vshll.u32 %v6927_v10, 16  ;;  %v13646_v34 = vrot.slane %v17286_v28, 9  ;;  %v13631_v55 = vrot.slane %v7224_v50, 9  ;;  %v7835_v16 = vrot.slane %v17301_v44, 5 }
 0x3b8   :  { %7465 = vst.msk [vmem:[#allocation8 + $0x4] sm:$0xf] %vm7205_vm3, %v17223_v22  ;;  %v7295_v14 = vrot.slane %v7225_v63, 5  ;;  %v8027_v52 = vshrl.u32 %v7994_v41, 16  ;;  %v8030_v32 = vshll.u32 %v7994_v41, 16  ;;  %v7136_v25 = vor.u32 %v7135_v29, %v7132_v30 }
 0x3b9   :  { %v8338_v6 = vld [vmem:[#allocation7 + $0x80] sm:$0xe]  ;;  %v8339_v46 = vld [vmem:[#allocation7 + $0x84] sm:$0x1]  ;;  %v8340_v51 = vld [vmem:[#allocation7 + $0x88] sm:$0xe]  ;;  %7445 = vrot.lane.b32.xlu0 %v7399_v42, %s14725_s0  ;;  %v7836_v60 = vsel %vm16806_vm8, %v13646_v34, %v7835_v16 }
 0x3ba   :  { %v8036_v19 = vshll.u32 %v17305_v57, 16  ;;  %v7144_v4 = vshrl.u32 %v6928_v13, 16  ;;  %v7147_v59 = vshll.u32 %v6928_v13, 16  ;;  %v8341_v38 = vld [vmem:[#allocation7 + $0x8c] sm:$0x1]  ;;  %v7296_v39 = vsel %vm16806_vm8, %v13631_v55, %v7295_v14 }
 0x3bb   :  { %v7968_v47 = vld [vmem:[#allocation7 + $0x40] sm:$0xf]  ;;  %v7400_v37 = vld [vmem:[#allocation7 + $0x90] sm:$0xf]  ;;  %v8029_v22 = vrot.slane %v8027_v52, 4  ;;  %v8032_v54 = vrot.slane %v8030_v32, 5 }
 0x3bc   :  { %7984 = vst.msk [vmem:[#allocation8 + $0x84] sm:$0xf] %vm5841_vm7, %v7968_v47  ;;  %v14557_v27 = vld [vmem:[#allocation8 + $0xd8] ss:$20 sps:$4 sm:$0xff]   ;;  %v7137_v0 = vrot.slane %v7136_v25, 4  ;;  %7447 = vrot.lane.b32.xlu1 %v7400_v37, %s14725_s0  ;;  %v7153_v17 = vshll.u32 %v6929_v40, 16 }
 0x3bd   :  { %7370 = vst.msk [vmem:[#allocation8 + $0x18] sm:$0xf] %vm5841_vm7, %v7296_v39  ;;  %v7226_v7 = vld [vmem:[#allocation7 + $0x10] sm:$0xe]  ;;  %v7141_v48 = vrot.slane %v7139_v31, 5  ;;  %v8033_v5 = vor.u32 %v8032_v54, %v8029_v22  ;;  %v7146_v56 = vrot.slane %v7144_v4, 4  ;;  %14464 = vmatmul.mubr.msk.bf16.gmra.mrb[72].mxu0 %vm9010_vm9, %v14557_v27 }
 0x3be   :  { %7466 = vst.msk [vmem:[#allocation8 + $0x18] sm:$0xf] %vm7205_vm3, %v17228_v43  ;;  %v7149_v33 = vrot.slane %v7147_v59, 5  ;;  %v17329_v36 = vld [vmem:[#allocation7 + $0x18] sm:$0xe]  ;;  %v13674_v58 = vrot.slane %v8338_v6, 9 }
 0x3bf   :  { %v17331_v28 = vld [vmem:[#allocation7 + $0x1c] sm:$0x1]  ;;  %v17333_v50 = vld [vmem:[#allocation7 + $0x10] sm:$0xe]  ;;  %v7227_v49 = vld [vmem:[#allocation7 + $0x14] sm:$0x1]  ;;  %v7142_v43 = vsel %vm16360_vm10, %v7137_v0, %v7141_v48 }
 0x3c0   :  { %v8428_v44 = vrot.slane %v8339_v46, 5  ;;  %v13675_v63 = vrot.slane %v8340_v51, 9  ;;  %v7998_v45 = vld [vmem:[#allocation7 + $0x20] sm:$0xf]  ;;  %v7150_v10 = vor.u32 %v7149_v33, %v7146_v56  ;;  %v8432_v62 = vrot.slane %v8341_v38, 5  ;;  %7185 = vrot.lane.b32.xlu0 %v7142_v43, %s14725_s0 }
 0x3c1   :  { %v7999_v3 = vld [vmem:[#allocation7 + $0x24] sm:$0x1]  ;;  %v7996_v41 = vld [vmem:[#allocation7 + $0x18] sm:$0xf]  ;;  %v7997_v57 = vld [vmem:[#allocation7 + $0x1c] sm:$0x1] }
 0x3c2   :  { %v8034_v8 = vrot.slane %v8033_v5, 4  ;;  %v8038_v11 = vrot.slane %v8036_v19, 5  ;;  %v7155_v18 = vrot.slane %v7153_v17, 5  ;;  %v8429_v30 = vsel %vm16806_vm8, %v13674_v58, %v8428_v44  ;;  %v7772_v13 = vld [vmem:[#allocation7 + $0x14] sm:$0x1] }
 0x3c3   :  { %v6881_v40 = vld [vmem:[#allocation7 + $0x88] sm:$0xf]  ;;  %v7151_v42 = vrot.slane %v7150_v10, 4  ;;  %v8433_v29 = vsel %vm16806_vm8, %v13675_v63, %v8432_v62  ;;  %8470 = vst.msk [vmem:[#allocation8 + $0x100] sm:$0xf] %vm5841_vm7, %v8429_v30  ;;  %v13648_v31 = vrot.slane %v17329_v36, 9 }
 0x3c4   :  { %v13632_v34 = vrot.slane %v7226_v7, 9  ;;  %v5974_v55 = vld [vmem:[#allocation7 + $0x9c] sm:$0x1]  ;;  %6897 = vst.msk [vmem:[#allocation8 + $0x12c] sm:$0xf] %vm5841_vm7, %v6881_v40  ;;  %v7843_v16 = vrot.slane %v17331_v28, 5  ;;  %7897 = vrot.lane.b32.xlu0 %v7836_v60, %s14725_s0  ;;  %v7172_v17 = vpop.permute.xlu1 %7171  ;;  %v8039_v58 = vsel %vm16360_vm10, %v8034_v8, %v8038_v11 }
 0x3c5   :  { %8471 = vst.msk [vmem:[#allocation8 + $0x114] sm:$0xf] %vm5841_vm7, %v8433_v29  ;;  %v13647_v14 = vrot.slane %v17333_v50, 9  ;;  %v7299_v52 = vrot.slane %v7227_v49, 5  ;;  %v8055_v32 = vshrl.u32 %v7998_v45, 16  ;;  %v7156_v46 = vsel %vm16360_vm10, %v7151_v42, %v7155_v18  ;;  %v14590_v36 = vld [vmem:[%s18569_s2 + $0x88] sm:$0xff]  }
 0x3c6   :  { %v8343_v6 = vld [vmem:[#allocation7 + $0x94] sm:$0x1]  ;;  %v8058_v51 = vshll.u32 %v7998_v45, 16  ;;  %v8064_v25 = vshll.u32 %v7999_v3, 16  ;;  %v8041_v19 = vshrl.u32 %v7996_v41, 16  ;;  %7187 = vrot.lane.b32.xlu1 %v7156_v46, %s14725_s0  ;;  %v8044_v39 = vshll.u32 %v7996_v41, 16 }
 0x3c7   :  { %v8342_v4 = vld [vmem:[#allocation7 + $0x90] sm:$0xe]  ;;  %v17355_v59 = vld [vmem:[#allocation7 + $0x98] sm:$0xe]  ;;  %v17357_v38 = vld [vmem:[#allocation7 + $0x28] sm:$0xe]  ;;  %v7300_v47 = vsel %vm16806_vm8, %v13632_v34, %v7299_v52  ;;  %v7844_v29 = vsel %vm16806_vm8, %v13648_v31, %v7843_v16 }
 0x3c8   :  { %v8057_v37 = vrot.slane %v8055_v32, 4  ;;  %v8050_v22 = vshll.u32 %v7997_v57, 16  ;;  %v14572_v54 = vld [vmem:[#allocation8] ss:$20 sps:$4 sm:$0xff]   ;;  %v17363_v27 = vld [vmem:[#allocation7 + $0x2c] sm:$0x1]  ;;  %8250 = vrot.lane.b32.xlu0 %v8039_v58, %s14725_s0 }
 0x3c9   :  { %v7228_v0 = vld [vmem:[#allocation7 + $0x18] sm:$0xe]  ;;  %v7839_v7 = vrot.slane %v7772_v13, 5  ;;  %7371 = vst.msk [vmem:[#allocation8 + $0x2c] sm:$0xf] %vm5841_vm7, %v7300_v47  ;;  %v8060_v48 = vrot.slane %v8058_v51, 5 }
 0x3ca   :  { %v8043_v5 = vrot.slane %v8041_v19, 4  ;;  %v5975_v56 = vsel %vm16301_vm4, 0, %v5974_v55  ;;  %v14574_v33 = vld [vmem:[#allocation8 + $0x4] ss:$20 sps:$4 sm:$0xff]   ;;  %v17368_v28 = vld [vmem:[#allocation7 + $0x20] sm:$0xe] }
 0x3cb   :  { %v7229_v50 = vld [vmem:[#allocation7 + $0x1c] sm:$0x1]  ;;  %v8002_v49 = vld [vmem:[#allocation7 + $0x30] sm:$0xf]  ;;  %7213 = vst.msk [vmem:[#allocation8 + $0x8c] sm:$0xf] %vm7205_vm3, %v7172_v17  ;;  %v7840_v60 = vsel %vm16806_vm8, %v13647_v14, %v7839_v7  ;;  %v8061_v10 = vor.u32 %v8060_v48, %v8057_v37  ;;  %9067 = vmatprep.mubr.bf16.mxu1 %v14574_v33 }
 0x3cc   :  { %7467 = vst.msk [vmem:[#allocation8 + $0x2c] sm:$0xf] %vm7205_vm3, %v17218_v53  ;;  %v8046_v44 = vrot.slane %v8044_v39, 5  ;;  %5976 = vst [vmem:[#allocation7 + $0x9c] sm:$0x1] %v5975_v56  ;;  %v13676_v63 = vrot.slane %v8342_v4, 9  ;;  %7899 = vrot.lane.b32.xlu1 %v7840_v60, %s14725_s0  ;;  %9068 = vmatmul.mubr.bf16.vlgmr.msra.gmra.mrb[0].mxu1 %v14572_v54 }
 0x3cd   :  { %v8436_v45 = vrot.slane %v8343_v6, 5  ;;  %v17375_v43 = vld [vmem:[#allocation7 + $0x34] sm:$0x1]  ;;  %v17382_v62 = vrot.slane %v8064_v25, 5  ;;  %v8052_v3 = vrot.slane %v8050_v22, 5  ;;  %v14588_v53 = vld [vmem:[%s18569_s2 + $0xc8] sm:$0xff]   ;;  %14236 = vmatpush3.bf16.msra.mxu1 %v14585_v61  ;;  %7901 = vrot.lane.b32.xlu0 %v7844_v29, %s14725_s0  ;;  %v7174_v22 = vpop.permute.xlu0 %7173 }
 0x3ce   :  { %v8000_v41 = vld [vmem:[#allocation7 + $0x28] sm:$0xf]  ;;  %v8047_v57 = vor.u32 %v8046_v44, %v8043_v5  ;;  %v13677_v11 = vrot.slane %v17355_v59, 9  ;;  %v13650_v18 = vrot.slane %v17357_v38, 9  ;;  %v7776_v30 = vld [vmem:[#allocation7 + $0x24] sm:$0x1]  ;;  %14237 = vmatprep.subr.bf16.mxu1 %v14588_v53 }
 0x3cf   :  { %v8437_v8 = vsel %vm16806_vm8, %v13676_v63, %v8436_v45  ;;  %v17393_v13 = vld [vmem:[#allocation7 + $0x2c] sm:$0x1]  ;;  %v7970_v40 = vld [vmem:[#allocation7 + $0x60] sm:$0xf]  ;;  %v7851_v34 = vrot.slane %v17363_v27, 5  ;;  %v13633_v55 = vrot.slane %v7228_v0, 9 }
 0x3d0   :  { %v14566_v42 = vld [vmem:[#allocation8 + $0x100] ss:$20 sps:$4 sm:$0xff]   ;;  %8472 = vst.msk [vmem:[#allocation8 + $0x128] sm:$0xf] %vm5841_vm7, %v8437_v8  ;;  %7986 = vst.msk [vmem:[#allocation8 + $0xac] sm:$0xf] %vm5841_vm7, %v7970_v40 }
 0x3d1   :  { %v8048_v14 = vrot.slane %v8047_v57, 4  ;;  %v13649_v52 = vrot.slane %v17368_v28, 9  ;;  %v7303_v32 = vrot.slane %v7229_v50, 5  ;;  %v8083_v6 = vshrl.u32 %v8002_v49, 16  ;;  %14467 = vmatprep.mubr.msk.bf16.mxu0 %vm9010_vm9, %v14566_v42  ;;  %v14591_v25 = vld [vmem:[%s18569_s2 + $0xd0] sm:$0xff]   ;;  %14238 = vmatpush3.bf16.msra.mxu1 %v14590_v36  ;;  %v14595_v61 = vld [vmem:[%s18569_s2 + $0xd8] sm:$0xff]  }
 0x3d2   :  { %v8062_v31 = vrot.slane %v8061_v10, 4  ;;  %v8086_v16 = vshll.u32 %v8002_v49, 16  ;;  %v8092_v46 = vshll.u32 %v17375_v43, 16  ;;  %v8069_v51 = vshrl.u32 %v8000_v41, 16  ;;  %v17416_v47 = vld [vmem:[#allocation7 + $0x38] sm:$0xe]  ;;  %14239 = vmatprep.subr.bf16.mxu1 %v14591_v25 }
 0x3d3   :  { %v8053_v19 = vsel %vm16360_vm10, %v8048_v14, %v8052_v3  ;;  %v7304_v4 = vsel %vm16806_vm8, %v13633_v55, %v7303_v32  ;;  %v8085_v59 = vrot.slane %v8083_v6, 4  ;;  %v8072_v38 = vshll.u32 %v8000_v41, 16  ;;  %v7230_v37 = vld [vmem:[#allocation7 + $0x20] sm:$0xe]  ;;  %v7231_v39 = vld [vmem:[#allocation7 + $0x24] sm:$0x1] }
 0x3d4   :  { %8252 = vrot.lane.b32.xlu1 %v8053_v19, %s14725_s0  ;;  %v8345_v54 = vld [vmem:[#allocation7 + $0x9c] sm:$0x1]  ;;  %v7847_v27 = vrot.slane %v7776_v30, 5  ;;  %7372 = vst.msk [vmem:[#allocation8 + $0x40] sm:$0xf] %vm5841_vm7, %v7304_v4  ;;  %v8088_v0 = vrot.slane %v8086_v16, 5  ;;  %v7852_v5 = vsel %vm16806_vm8, %v13650_v18, %v7851_v34  ;;  %v8067_v49 = vsel %vm16360_vm10, %v8062_v31, %v17382_v62 }
 0x3d5   :  { %v8071_v17 = vrot.slane %v8069_v51, 4  ;;  %v8078_v7 = vshll.u32 %v17393_v13, 16  ;;  %7214 = vst.msk [vmem:[#allocation8 + $0xa0] sm:$0xf] %vm7205_vm3, %v7174_v22  ;;  %v8440_v48 = vrot.slane %v8345_v54, 5  ;;  %v8074_v56 = vrot.slane %v8072_v38, 5  ;;  %8254 = vrot.lane.b32.xlu0 %v8067_v49, %s14725_s0 }
 0x3d6   :  { %7468 = vst.msk [vmem:[#allocation8 + $0x40] sm:$0xf] %vm7205_vm3, %v17239_v24  ;;  %v17426_v33 = vld [vmem:[#allocation7 + $0x3c] sm:$0x1]  ;;  %v8006_v28 = vld [vmem:[#allocation7 + $0x40] sm:$0xf]  ;;  %v7848_v58 = vsel %vm16806_vm8, %v13649_v52, %v7847_v27  ;;  %v8089_v44 = vor.u32 %v8088_v0, %v8085_v59 }
 0x3d7   :  { %v14592_v50 = vld [vmem:[%s18569_s2 + $0x90] sm:$0xff]   ;;  %v17436_v63 = vrot.slane %v8092_v46, 5  ;;  %v8007_v45 = vld [vmem:[#allocation7 + $0x44] sm:$0x1]  ;;  %v8004_v43 = vld [vmem:[#allocation7 + $0x38] sm:$0xf]  ;;  %v8441_v60 = vsel %vm16806_vm8, %v13677_v11, %v8440_v48  ;;  %v8075_v10 = vor.u32 %v8074_v56, %v8071_v17 }
 0x3d8   :  { %v17438_v24 = vld [vmem:[#allocation7 + $0x30] sm:$0xe]  ;;  %v13652_v62 = vrot.slane %v17416_v47, 9  ;;  %v17447_v3 = vld [vmem:[#allocation7 + $0x34] sm:$0x1]  ;;  %v13634_v41 = vrot.slane %v7230_v37, 9  ;;  %7903 = vrot.lane.b32.xlu1 %v7848_v58, %s14725_s0  ;;  %14240 = vmatpush3.bf16.msra.mxu1 %v14592_v50 }
 0x3d9   :  { %v17449_v53 = vld [vmem:[#allocation7 + $0x3c] sm:$0x1]  ;;  %8473 = vst.msk [vmem:[#allocation8 + $0x13c] sm:$0xf] %vm5841_vm7, %v8441_v60  ;;  %v8090_v57 = vrot.slane %v8089_v44, 4  ;;  %v8080_v8 = vrot.slane %v8078_v7, 5  ;;  %14241 = vmatprep.subr.bf16.mxu1 %v14595_v61  ;;  %7905 = vrot.lane.b32.xlu0 %v7852_v5, %s14725_s0 }
 0x3da   :  { %v7307_v18 = vrot.slane %v7231_v39, 5  ;;  %v8111_v30 = vshrl.u32 %v8006_v28, 16  ;;  %v17453_v13 = vld [vmem:[#allocation7 + $0x58] sm:$0xe]  ;;  %v17455_v40 = vld [vmem:[#allocation7 + $0x5c] sm:$0x1] }
 0x3db   :  { %v7971_v11 = vld [vmem:[#allocation7 + $0x68] sm:$0xf]  ;;  %v8076_v42 = vrot.slane %v8075_v10, 4  ;;  %v8114_v29 = vshll.u32 %v8006_v28, 16  ;;  %v8120_v34 = vshll.u32 %v8007_v45, 16  ;;  %v8097_v55 = vshrl.u32 %v8004_v43, 16 }
 0x3dc   :  { %v17457_v14 = vld [vmem:[#allocation7 + $0x40] sm:$0xe]  ;;  %v17459_v52 = vld [vmem:[#allocation7 + $0x44] sm:$0x1]  ;;  %v17461_v32 = vld [vmem:[#allocation7 + $0x28] sm:$0xe]  ;;  %v7308_v31 = vsel %vm16806_vm8, %v13634_v41, %v7307_v18  ;;  %v8095_v5 = vsel %vm16360_vm10, %v8090_v57, %v17436_v63 }
 0x3dd   :  { %v14597_v6 = vld [vmem:[%s18569_s2 + $0x98] sm:$0xff]   ;;  %7987 = vst.msk [vmem:[#allocation8 + $0xc0] sm:$0xf] %vm5841_vm7, %v7971_v11  ;;  %v7859_v36 = vrot.slane %v17426_v33, 5  ;;  %v8113_v16 = vrot.slane %v8111_v30, 4  ;;  %v8100_v46 = vshll.u32 %v8004_v43, 16  ;;  %v8081_v19 = vsel %vm16360_vm10, %v8076_v42, %v8080_v8  ;;  %8258 = vrot.lane.b32.xlu0 %v8095_v5, %s14725_s0 }
 0x3de   :  { %v7233_v51 = vld [vmem:[#allocation7 + $0x2c] sm:$0x1]  ;;  %v14598_v25 = vld [vmem:[%s18569_s2 + $0xe0] sm:$0xff]   ;;  %v13651_v4 = vrot.slane %v17438_v24, 9  ;;  %7373 = vst.msk [vmem:[#allocation8 + $0x54] sm:$0xf] %vm5841_vm7, %v7308_v31  ;;  %8256 = vrot.lane.b32.xlu1 %v8081_v19, %s14725_s0  ;;  %14242 = vmatpush3.bf16.msra.mxu1 %v14597_v6 }
 0x3df   :  { %v8116_v59 = vrot.slane %v8114_v29, 5  ;;  %v8099_v38 = vrot.slane %v8097_v55, 4  ;;  %v8010_v37 = vld [vmem:[#allocation7 + $0x60] sm:$0xf]  ;;  %v17478_v39 = vld [vmem:[#allocation7 + $0x64] sm:$0x1]  ;;  %14243 = vmatprep.subr.bf16.mxu1 %v14598_v25  ;;  %v7860_v61 = vsel %vm16806_vm8, %v13652_v62, %v7859_v36 }
 0x3e0   :  { %v7855_v22 = vrot.slane %v17447_v3, 5  ;;  %7469 = vst.msk [vmem:[#allocation8 + $0x54] sm:$0xf] %vm7205_vm3, %v17241_v23  ;;  %v17484_v54 = vrot.slane %v8120_v34, 5  ;;  %v8102_v27 = vrot.slane %v8100_v46, 5  ;;  %v8106_v0 = vshll.u32 %v17449_v53, 16 }
 0x3e1   :  { %v5882_v17 = vld [vmem:[#allocation7 + $0x48] sm:$0x1]  ;;  %v17487_v7 = vld [vmem:[#allocation7 + $0x4c] sm:$0x1]  ;;  %v14599_v48 = vld [vmem:[%s18569_s2 + $0xa0] sm:$0xff]   ;;  %v8117_v56 = vor.u32 %v8116_v59, %v8113_v16  ;;  %v13654_v33 = vrot.slane %v17453_v13, 9  ;;  %7909 = vrot.lane.b32.xlu0 %v7860_v61, %s14725_s0 }
 0x3e2   :  { %v7867_v23 = vrot.slane %v17455_v40, 5  ;;  %v14575_v28 = vld [vmem:[#allocation8 + $0x2c] ss:$20 sps:$4 sm:$0xff]   ;;  %v14577_v50 = vld [vmem:[#allocation8 + $0x28] ss:$20 sps:$4 sm:$0xff]   ;;  %v8103_v49 = vor.u32 %v8102_v27, %v8099_v38  ;;  %v13653_v58 = vrot.slane %v17457_v14, 9  ;;  %v7856_v60 = vsel %vm16806_vm8, %v13651_v4, %v7855_v22  ;;  %14244 = vmatpush3.bf16.msra.mxu1 %v14599_v48 }
 0x3e3   :  { %v7863_v44 = vrot.slane %v17459_v52, 5  ;;  %v13635_v24 = vrot.slane %v17461_v32, 9  ;;  %v17500_v45 = vld [vmem:[#allocation7 + $0x68] sm:$0xe]  ;;  %v8118_v10 = vrot.slane %v8117_v56, 4  ;;  %9075 = vmatprep.mubr.bf16.mxu1 %v14575_v28  ;;  %v7311_v3 = vrot.slane %v7233_v51, 5  ;;  %7907 = vrot.lane.b32.xlu1 %v7856_v60, %s14725_s0 }
 0x3e4   :  { %v14602_v63 = vld [vmem:[%s18569_s2 + $0xe8] sm:$0xff]   ;;  %v17512_v41 = vld [vmem:[#allocation7 + $0x60] sm:$0xe]  ;;  %v7234_v53 = vld [vmem:[#allocation7 + $0x30] sm:$0xe]  ;;  %v8104_v8 = vrot.slane %v8103_v49, 4  ;;  %9076 = vmatmul.mubr.bf16.gmra.mrb[4].mxu1 %v14577_v50  ;;  %v17528_v32 = vsel %vm16806_vm8, %v13654_v33, %v7867_v23 }
 0x3e5   :  { %v14571_v43 = vld [vmem:[#allocation8 + $0x128] ss:$20 sps:$4 sm:$0xff]   ;;  %v7235_v57 = vld [vmem:[#allocation7 + $0x34] sm:$0x1]  ;;  %v8139_v18 = vshrl.u32 %v8010_v37, 16  ;;  %v8142_v30 = vshll.u32 %v8010_v37, 16  ;;  %v7312_v11 = vsel %vm16806_vm8, %v13635_v24, %v7311_v3  ;;  %v7864_v6 = vsel %vm16806_vm8, %v13653_v58, %v7863_v44  ;;  %14245 = vmatprep.subr.bf16.mxu1 %v14602_v63 }
 0x3e6   :  { %v8148_v47 = vshll.u32 %v17478_v39, 16  ;;  %v8014_v13 = vld [vmem:[#allocation7 + $0x70] sm:$0xf]  ;;  %14468 = vmatmul.mubr.msk.bf16.gmra.mrb[76].mxu0 %vm9010_vm9, %v14571_v43  ;;  %v8108_v40 = vrot.slane %v8106_v0, 5  ;;  %v5883_v42 = vsel %vm16314_vm6, 0, %v5882_v17  ;;  %v8134_v29 = vshll.u32 %v17487_v7, 16 }
 0x3e7   :  { %v7972_v62 = vld [vmem:[#allocation7 + $0x70] sm:$0xf]  ;;  %v7790_v34 = vld [vmem:[#allocation7 + $0x6c] sm:$0x1]  ;;  %v7788_v55 = vld [vmem:[#allocation7 + $0x64] sm:$0x1]  ;;  %v8123_v51 = vsel %vm16360_vm10, %v8118_v10, %v17484_v54 }
 0x3e8   :  { %v8015_v14 = vld [vmem:[#allocation7 + $0x74] sm:$0x1]  ;;  %v14604_v52 = vld [vmem:[%s18569_s2 + $0xa8] sm:$0xff]   ;;  %7988 = vst.msk [vmem:[#allocation8 + $0xd4] sm:$0xf] %vm5841_vm7, %v7972_v62  ;;  %v8141_v36 = vrot.slane %v8139_v18, 4  ;;  %v8109_v25 = vsel %vm16360_vm10, %v8104_v8, %v8108_v40  ;;  %8262 = vrot.lane.b32.xlu0 %v8123_v51, %s14725_s0 }
 0x3e9   :  { %7374 = vst.msk [vmem:[#allocation8 + $0x68] sm:$0xf] %vm5841_vm7, %v7312_v11  ;;  %v8144_v31 = vrot.slane %v8142_v30, 5  ;;  %5884 = vst [vmem:[#allocation7 + $0x48] sm:$0x1] %v5883_v42  ;;  %v14605_v46 = vld [vmem:[%s18569_s2 + $0xf0] sm:$0xff]   ;;  %8260 = vrot.lane.b32.xlu1 %v8109_v25, %s14725_s0  ;;  %14246 = vmatpush3.bf16.msra.mxu1 %v14604_v52 }
 0x3ea   :  { %v8012_v16 = vld [vmem:[#allocation7 + $0x68] sm:$0xf]  ;;  %7470 = vst.msk [vmem:[#allocation8 + $0x68] sm:$0xf] %vm7205_vm3, %v17257_v12  ;;  %v17544_v19 = vrot.slane %v8148_v47, 5  ;;  %v13656_v4 = vrot.slane %v17500_v45, 9  ;;  %14247 = vmatprep.subr.bf16.mxu1 %v14605_v46 }
 0x3eb   :  { %v8013_v59 = vld [vmem:[#allocation7 + $0x6c] sm:$0x1]  ;;  %v8145_v38 = vor.u32 %v8144_v31, %v8141_v36  ;;  %v13655_v37 = vrot.slane %v17512_v41, 9  ;;  %v13636_v39 = vrot.slane %v7234_v53, 9  ;;  %v7315_v22 = vrot.slane %v7235_v57, 5  ;;  %v14606_v48 = vld [vmem:[%s18569_s2 + $0xb0] sm:$0xff]  }
 0x3ec   :  { %v17549_v27 = vld [vmem:[#allocation7 + $0x78] sm:$0xe]  ;;  %v17551_v54 = vrot.slane %v8134_v29, 5  ;;  %v8167_v0 = vshrl.u32 %v8014_v13, 16  ;;  %v8170_v17 = vshll.u32 %v8014_v13, 16  ;;  %v8176_v7 = vshll.u32 %v8015_v14, 16  ;;  %7913 = vrot.lane.b32.xlu0 %v17528_v32, %s14725_s0 }
 0x3ed   :  { %v17553_v12 = vld [vmem:[#allocation7 + $0x7c] sm:$0x1]  ;;  %v7875_v5 = vrot.slane %v7790_v34, 5  ;;  %v7871_v56 = vrot.slane %v7788_v55, 5  ;;  %v7316_v33 = vsel %vm16806_vm8, %v13636_v39, %v7315_v22  ;;  %v8153_v23 = vshrl.u32 %v8012_v16, 16  ;;  %7911 = vrot.lane.b32.xlu1 %v7864_v6, %s14725_s0  ;;  %14248 = vmatpush3.bf16.msra.mxu1 %v14606_v48 }
 0x3ee   :  { %v17560_v28 = vld [vmem:[#allocation7 + $0x70] sm:$0xe]  ;;  %v7236_v50 = vld [vmem:[#allocation7 + $0x38] sm:$0xe]  ;;  %v8146_v58 = vrot.slane %v8145_v38, 4  ;;  %v8169_v44 = vrot.slane %v8167_v0, 4 }
 0x3ef   :  { %v14609_v49 = vld [vmem:[%s18569_s2 + $0xf8] sm:$0xff]   ;;  %7375 = vst.msk [vmem:[#allocation8 + $0x7c] sm:$0xf] %vm5841_vm7, %v7316_v33  ;;  %v8172_v24 = vrot.slane %v8170_v17, 5  ;;  %v8156_v45 = vshll.u32 %v8012_v16, 16  ;;  %v17572_v61 = vsel %vm16806_vm8, %v13656_v4, %v7875_v5  ;;  %v17576_v60 = vsel %vm16806_vm8, %v13655_v37, %v7871_v56 }
 0x3f0   :  { %v17567_v63 = vld [vmem:[#allocation7 + $0x74] sm:$0x1]  ;;  %v7237_v43 = vld [vmem:[#allocation7 + $0x3c] sm:$0x1]  ;;  %7471 = vst.msk [vmem:[#allocation8 + $0x7c] sm:$0xf] %vm7205_vm3, %v17259_v21  ;;  %14249 = vmatprep.subr.bf16.mxu1 %v14609_v49  ;;  %v8151_v34 = vsel %vm16360_vm10, %v8146_v58, %v17544_v19 }
 0x3f1   :  { %v8155_v10 = vrot.slane %v8153_v23, 4  ;;  %v8162_v3 = vshll.u32 %v8013_v59, 16  ;;  %v8018_v41 = vld [vmem:[#allocation7 + $0x80] sm:$0xf]  ;;  %v7973_v53 = vld [vmem:[#allocation7 + $0x78] sm:$0xf]  ;;  %v8173_v8 = vor.u32 %v8172_v24, %v8169_v44  ;;  %8266 = vrot.lane.b32.xlu0 %v8151_v34, %s14725_s0 }
 0x3f2   :  { %v8008_v57 = vld [vmem:[#allocation7 + $0x48] sm:$0xf]  ;;  %v17580_v18 = vrot.slane %v8176_v7, 5  ;;  %v8158_v30 = vrot.slane %v8156_v45, 5  ;;  %v13658_v47 = vrot.slane %v17549_v27, 9  ;;  %v14610_v40 = vld [vmem:[%s18569_s2 + $0xb8] sm:$0xff]  }
 0x3f3   :  { %v8019_v13 = vld [vmem:[#allocation7 + $0x84] sm:$0x1]  ;;  %v8016_v62 = vld [vmem:[#allocation7 + $0x78] sm:$0xf]  ;;  %7989 = vst.msk [vmem:[#allocation8 + $0xe8] sm:$0xf] %vm5841_vm7, %v7973_v53  ;;  %14250 = vmatpush3.bf16.msra.mxu1 %v14610_v40 }
 0x3f4   :  { %v8125_v21 = vshrl.u32 %v8008_v57, 16  ;;  %v8128_v11 = vshll.u32 %v8008_v57, 16  ;;  %v7883_v42 = vrot.slane %v17553_v12, 5  ;;  %v13657_v29 = vrot.slane %v17560_v28, 9  ;;  %v14578_v52 = vld [vmem:[#allocation8 + $0x54] ss:$20 sps:$4 sm:$0xff]  }
 0x3f5   :  { %v8159_v55 = vor.u32 %v8158_v30, %v8155_v10  ;;  %v17594_v14 = vrot.slane %v8162_v3, 5  ;;  %v14580_v6 = vld [vmem:[#allocation8 + $0x50] ss:$20 sps:$4 sm:$0xff]   ;;  %v13637_v36 = vrot.slane %v7236_v50, 9  ;;  %v7879_v46 = vrot.slane %v17567_v63, 5  ;;  %9083 = vmatprep.mubr.bf16.mxu1 %v14578_v52  ;;  %7917 = vrot.lane.b32.xlu0 %v17572_v61, %s14725_s0 }
 0x3f6   :  { %v8127_v31 = vrot.slane %v8125_v21, 4  ;;  %v8130_v16 = vrot.slane %v8128_v11, 5  ;;  %v7319_v51 = vrot.slane %v7237_v43, 5  ;;  %v7969_v25 = vld [vmem:[#allocation7 + $0x48] sm:$0xf]  ;;  %v17597_v4 = vrot.slane %v8173_v8, 4  ;;  %9084 = vmatmul.mubr.bf16.gmra.mrb[8].mxu1 %v14580_v6 }
 0x3f7   :  { %v17599_v59 = vrot.slane %v8159_v55, 4  ;;  %v8195_v32 = vshrl.u32 %v8018_v41, 16  ;;  %v8198_v38 = vshll.u32 %v8018_v41, 16  ;;  %v8017_v19 = vld [vmem:[#allocation7 + $0x7c] sm:$0x1]  ;;  %v8204_v22 = vshll.u32 %v8019_v13, 16 }
 0x3f8   :  { %7985 = vst.msk [vmem:[#allocation8 + $0x98] sm:$0xf] %vm5841_vm7, %v7969_v25  ;;  %v8131_v37 = vor.u32 %v8130_v16, %v8127_v31  ;;  %v7320_v39 = vsel %vm16806_vm8, %v13637_v36, %v7319_v51  ;;  %v8181_v27 = vshrl.u32 %v8016_v62, 16  ;;  %v17604_v0 = vld [vmem:[#allocation7 + $0x88] sm:$0xe]  ;;  %v17609_v48 = vsel %vm16806_vm8, %v13658_v47, %v7883_v42  ;;  %v7434_v36 = vpop.permute.xlu0 %7433 }
 0x3f9   :  { %v7798_v17 = vld [vmem:[#allocation7 + $0x8c] sm:$0x1]  ;;  %v7795_v7 = vld [vmem:[#allocation7 + $0x80] sm:$0xe]  ;;  %v7238_v12 = vld [vmem:[#allocation7 + $0x50] sm:$0xe]  ;;  %v17614_v50 = vsel %vm16806_vm8, %v13657_v29, %v7879_v46  ;;  %v8179_v45 = vsel %vm16360_vm10, %v17597_v4, %v17580_v18  ;;  %v8165_v63 = vsel %vm16360_vm10, %v17599_v59, %v17594_v14 }
 0x3fa   :  { %7376 = vst.msk [vmem:[#allocation8 + $0x90] sm:$0xf] %vm5841_vm7, %v7320_v39  ;;  %v8197_v5 = vrot.slane %v8195_v32, 4  ;;  %v8200_v56 = vrot.slane %v8198_v38, 5  ;;  %v8184_v33 = vshll.u32 %v8016_v62, 16  ;;  %v8132_v28 = vrot.slane %v8131_v37, 4  ;;  %8270 = vrot.lane.b32.xlu0 %v8179_v45, %s14725_s0 }
 0x3fb   :  { %v7974_v23 = vld [vmem:[#allocation7 + $0x80] sm:$0xf]  ;;  %7472 = vst.msk [vmem:[#allocation8 + $0x90] sm:$0xf] %vm7205_vm3, %v17336_v26  ;;  %v8183_v49 = vrot.slane %v8181_v27, 4  ;;  %v8190_v58 = vshll.u32 %v8017_v19, 16 }
 0x3fc   :  { %v7796_v44 = vld [vmem:[#allocation7 + $0x84] sm:$0x1]  ;;  %v7239_v24 = vld [vmem:[#allocation7 + $0x54] sm:$0x1]  ;;  %7990 = vst.msk [vmem:[#allocation8 + $0xfc] sm:$0xf] %vm5841_vm7, %v7974_v23  ;;  %v8201_v43 = vor.u32 %v8200_v56, %v8197_v5  ;;  %v8137_v41 = vsel %vm16360_vm10, %v8132_v28, %v17551_v54 }
 0x3fd   :  { %v8186_v10 = vrot.slane %v8184_v33, 5  ;;  %v8020_v3 = vld [vmem:[#allocation7 + $0x88] sm:$0xf]  ;;  %v8021_v26 = vld [vmem:[#allocation7 + $0x8c] sm:$0x1]  ;;  %v17630_v53 = vrot.slane %v8204_v22, 5  ;;  %8264 = vrot.lane.b32.xlu1 %v8137_v41, %s14725_s0 }
 0x3fe   :  { %v13660_v57 = vrot.slane %v17604_v0, 9  ;;  %v7891_v8 = vrot.slane %v7798_v17, 5  ;;  %v8022_v30 = vld [vmem:[#allocation7 + $0x90] sm:$0xf]  ;;  %v17636_v18 = vrot.slane %v8201_v43, 4  ;;  %v13659_v13 = vrot.slane %v7795_v7, 9  ;;  %7921 = vrot.lane.b32.xlu0 %v17609_v48, %s14725_s0 }
 0x3ff   :  { %v8187_v47 = vor.u32 %v8186_v10, %v8183_v49  ;;  %v13638_v62 = vrot.slane %v7238_v12, 9  ;;  %v17638_v40 = vrot.slane %v8190_v58, 5  ;;  %v7323_v21 = vrot.slane %v7239_v24, 5  ;;  %v17640_v42 = vld [vmem:[#allocation7 + $0x94] sm:$0x1] }
 0x400   :  { %v8209_v54 = vshrl.u32 %v8020_v3, 16  ;;  %v8212_v11 = vshll.u32 %v8020_v3, 16  ;;  %v7240_v29 = vld [vmem:[#allocation7 + $0x58] sm:$0xe]  ;;  %v7241_v34 = vld [vmem:[#allocation7 + $0x5c] sm:$0x1]  ;;  %v8207_v39 = vsel %vm16360_vm10, %v17636_v18, %v17630_v53  ;;  %v17661_v22 = vsel %vm16806_vm8, %v13660_v57, %v7891_v8 }
 0x401   :  { %v5912_v55 = vld [vmem:[#allocation7 + $0x98] sm:$0x1]  ;;  %v17642_v52 = vrot.slane %v8187_v47, 4  ;;  %v7887_v6 = vrot.slane %v7796_v44, 5  ;;  %v8218_v61 = vshll.u32 %v8021_v26, 16  ;;  %v8223_v31 = vshrl.u32 %v8022_v30, 16  ;;  %7915 = vrot.lane.b32.xlu1 %v17576_v60, %s14725_s0  ;;  %v7436_v47 = vpop.permute.xlu1 %7435 }
 0x402   :  { %v17644_v16 = vld [vmem:[#allocation7 + $0x94] sm:$0x1]  ;;  %v7324_v46 = vsel %vm16806_vm8, %v13638_v62, %v7323_v21  ;;  %v8211_v51 = vrot.slane %v8209_v54, 4  ;;  %v8214_v25 = vrot.slane %v8212_v11, 5  ;;  %v8226_v4 = vshll.u32 %v8022_v30, 16  ;;  %v17678_v44 = vpop.f32.mrb[64].mxu0  ;;  %8274 = vrot.lane.b32.xlu0 %v8207_v39, %s14725_s0 }
 0x403   :  { %v17648_v32 = vld [vmem:[#allocation7 + $0x90] sm:$0xe]  ;;  %v7242_v38 = vld [vmem:[#allocation7 + $0x60] sm:$0xe]  ;;  %v7243_v19 = vld [vmem:[#allocation7 + $0x64] sm:$0x1]  ;;  %v17665_v27 = vsel %vm16806_vm8, %v13659_v13, %v7887_v6  ;;  %v8193_v12 = vsel %vm16360_vm10, %v17642_v52, %v17638_v40 }
 0x404   :  { %v17650_v37 = vld [vmem:[#allocation7 + $0x68] sm:$0xe]  ;;  %7377 = vst.msk [vmem:[#allocation8 + $0xa4] sm:$0xf] %vm5841_vm7, %v7324_v46  ;;  %v8225_v0 = vrot.slane %v8223_v31, 4  ;;  %v8215_v5 = vor.u32 %v8214_v25, %v8211_v51  ;;  %v8228_v56 = vrot.slane %v8226_v4, 5 }
 0x405   :  { %v14581_v17 = vld [vmem:[#allocation8 + $0x7c] ss:$20 sps:$4 sm:$0xff]   ;;  %v7245_v7 = vld [vmem:[#allocation7 + $0x6c] sm:$0x1]  ;;  %7473 = vst.msk [vmem:[#allocation8 + $0xa4] sm:$0xf] %vm7205_vm3, %v7434_v36  ;;  %8268 = vrot.lane.b32.xlu1 %v8165_v63, %s14725_s0  ;;  %v7438_v63 = vpop.permute.xlu0 %7437 }
 0x406   :  { %v17668_v60 = vld [vmem:[#allocation7 + $0x9c] sm:$0x1]  ;;  %v8232_v33 = vshll.u32 %v17640_v42, 16  ;;  %v14583_v23 = vld [vmem:[#allocation8 + $0x78] ss:$20 sps:$4 sm:$0xff]   ;;  %v17680_v24 = vrot.slane %v8218_v61, 5  ;;  %9091 = vmatprep.mubr.bf16.mxu1 %v14581_v17  ;;  %v8229_v57 = vor.u32 %v8228_v56, %v8225_v0  ;;  %7925 = vrot.lane.b32.xlu0 %v17661_v22, %s14725_s0  ;;  %v7176_v22 = vpop.permute.xlu1 %7175 }
 0x407   :  { %v7246_v28 = vld [vmem:[#allocation7 + $0x70] sm:$0xe]  ;;  %v7247_v49 = vld [vmem:[#allocation7 + $0x74] sm:$0x1]  ;;  %v17676_v58 = vld [vmem:[#allocation7 + $0x78] sm:$0xe]  ;;  %9092 = vmatmul.mubr.bf16.gmra.mrb[12].mxu1 %v14583_v23 }
 0x408   :  { %v13639_v45 = vrot.slane %v7240_v29, 9  ;;  %v7327_v43 = vrot.slane %v7241_v34, 5  ;;  %v5913_v10 = vsel %vm16314_vm6, 0, %v5912_v55  ;;  %v7249_v3 = vld [vmem:[#allocation7 + $0x7c] sm:$0x1]  ;;  %v17684_v26 = vpop.f32.mrb[65].mxu0 }
 0x409   :  { %v17686_v41 = vrot.slane %v8215_v5, 4  ;;  %v13661_v8 = vrot.slane %v17648_v32, 9  ;;  %v7895_v30 = vrot.slane %v17644_v16, 5  ;;  %5914 = vst [vmem:[#allocation7 + $0x98] sm:$0x1] %v5913_v10  ;;  %v17690_v54 = vpop.f32.mrb[66].mxu0  ;;  %7919 = vrot.lane.b32.xlu1 %v17614_v50, %s14725_s0 }
 0x40a   :  { %v7250_v13 = vld [vmem:[#allocation7 + $0x80] sm:$0xe]  ;;  %v7251_v62 = vld [vmem:[#allocation7 + $0x84] sm:$0x1]  ;;  %v7481_v21 = vld [vmem:[#allocation7 + $0x8] sm:$0xf]  ;;  %v7328_v2 = vsel %vm16806_vm8, %v13639_v45, %v7327_v43 }
 0x40b   :  { %v13640_v11 = vrot.slane %v7242_v38, 9  ;;  %v7331_v42 = vrot.slane %v7243_v19, 5  ;;  %v13641_v29 = vrot.slane %v17650_v37, 9  ;;  %v17703_v34 = vld [vmem:[#allocation7 + $0xc] sm:$0x1]  ;;  %v17705_v55 = vpop.f32.mrb[67].mxu0  ;;  %v8221_v14 = vsel %vm16360_vm10, %v17686_v41, %v17680_v24 }
 0x40c   :  { %v7975_v6 = vld [vmem:[#allocation7 + $0x88] sm:$0xf]  ;;  %v17711_v59 = vrot.slane %v8232_v33, 5  ;;  %7378 = vst.msk [vmem:[#allocation8 + $0xb8] sm:$0xf] %vm5841_vm7, %v7328_v2  ;;  %v8246_v48 = vshll.u32 %v17668_v60, 16 }
 0x40d   :  { %v7335_v36 = vrot.slane %v7245_v7, 5  ;;  %v7252_v61 = vld [vmem:[#allocation7 + $0x88] sm:$0xe]  ;;  %v7485_v31 = vld [vmem:[#allocation7 + $0x18] sm:$0xf]  ;;  %v7332_v46 = vsel %vm16806_vm8, %v13640_v11, %v7331_v42  ;;  %v13642_v51 = vrot.slane %v7246_v28, 9  ;;  %8272 = vrot.lane.b32.xlu1 %v8193_v12, %s14725_s0 }
 0x40e   :  { %7991 = vst.msk [vmem:[#allocation8 + $0x110] sm:$0xf] %vm5841_vm7, %v7975_v6  ;;  %v7339_v25 = vrot.slane %v7247_v49, 5  ;;  %v13643_v4 = vrot.slane %v17676_v58, 9  ;;  %v7253_v38 = vld [vmem:[#allocation7 + $0x8c] sm:$0x1] }
 0x40f   :  { %7474 = vst.msk [vmem:[#allocation8 + $0xb8] sm:$0xf] %vm7205_vm3, %v7436_v47  ;;  %v8230_v19 = vrot.slane %v8229_v57, 4  ;;  %v7336_v37 = vsel %vm16806_vm8, %v13641_v29, %v7335_v36  ;;  %v7343_v0 = vrot.slane %v7249_v3, 5  ;;  %v13644_v17 = vrot.slane %v7250_v13, 9 }
 0x410   :  { %7379 = vst.msk [vmem:[#allocation8 + $0xcc] sm:$0xf] %vm5841_vm7, %v7332_v46  ;;  %v7976_v7 = vld [vmem:[#allocation7 + $0x90] sm:$0xf]  ;;  %7380 = vst.msk [vmem:[#allocation8 + $0xe0] sm:$0xf] %vm5841_vm7, %v7336_v37  ;;  %v7340_v5 = vsel %vm16806_vm8, %v13642_v51, %v7339_v25 }
 0x411   :  { %7475 = vst.msk [vmem:[#allocation8 + $0xcc] sm:$0xf] %vm7205_vm3, %v7438_v63  ;;  %v7347_v56 = vrot.slane %v7251_v62, 5  ;;  %v7514_v33 = vshrl.u32 %v7481_v21, 16  ;;  %v7517_v23 = vshll.u32 %v7481_v21, 16  ;;  %v7344_v50 = vsel %vm16806_vm8, %v13643_v4, %v7343_v0  ;;  %7923 = vrot.lane.b32.xlu1 %v17665_v27, %s14725_s0 }
 0x412   :  { %v7486_v28 = vld [vmem:[#allocation7 + $0x1c] sm:$0x1]  ;;  %7992 = vst.msk [vmem:[#allocation8 + $0x124] sm:$0xf] %vm5841_vm7, %v7976_v7  ;;  %7381 = vst.msk [vmem:[#allocation8 + $0xf4] sm:$0xf] %vm5841_vm7, %v7340_v5  ;;  %v8235_v57 = vsel %vm16360_vm10, %v8230_v19, %v17711_v59 }
 0x413   :  { %v7523_v53 = vshll.u32 %v17703_v34, 16  ;;  %v13645_v18 = vrot.slane %v7252_v61, 9  ;;  %v7351_v39 = vrot.slane %v7253_v38, 5  ;;  %v7483_v49 = vld [vmem:[#allocation7 + $0x10] sm:$0xf]  ;;  %v7348_v45 = vsel %vm16806_vm8, %v13644_v17, %v7347_v56  ;;  %8278 = vrot.lane.b32.xlu0 %v8235_v57, %s14725_s0 }
 0x414   :  { %v8024_v58 = vld [vmem:[#allocation7 + $0x98] sm:$0xf]  ;;  %7382 = vst.msk [vmem:[#allocation8 + $0x108] sm:$0xf] %vm5841_vm7, %v7344_v50  ;;  %v7516_v43 = vrot.slane %v7514_v33, 4  ;;  %v7519_v10 = vrot.slane %v7517_v23, 5 }
 0x415   :  { %v7542_v3 = vshrl.u32 %v7485_v31, 16  ;;  %v8237_v47 = vshrl.u32 %v8024_v58, 16  ;;  %v8240_v13 = vshll.u32 %v8024_v58, 16  ;;  %7383 = vst.msk [vmem:[#allocation8 + $0x11c] sm:$0xf] %vm5841_vm7, %v7348_v45  ;;  %v7352_v62 = vsel %vm16806_vm8, %v13645_v18, %v7351_v39  ;;  %8276 = vrot.lane.b32.xlu1 %v8221_v14, %s14725_s0 }
 0x416   :  { %v7484_v21 = vld [vmem:[#allocation7 + $0x14] sm:$0x1]  ;;  %v7977_v2 = vld [vmem:[#allocation7 + $0x98] sm:$0xf]  ;;  %v7520_v11 = vor.u32 %v7519_v10, %v7516_v43  ;;  %7384 = vst.msk [vmem:[#allocation8 + $0x130] sm:$0xf] %vm5841_vm7, %v7352_v62 }
 0x417   :  { %v7544_v42 = vrot.slane %v7542_v3, 4  ;;  %v7545_v29 = vshll.u32 %v7485_v31, 16  ;;  %v7551_v34 = vshll.u32 %v7486_v28, 16  ;;  %v7489_v6 = vld [vmem:[#allocation7 + $0x28] sm:$0xf]  ;;  %v8239_v59 = vrot.slane %v8237_v47, 4 }
 0x418   :  { %7993 = vst.msk [vmem:[#allocation8 + $0x138] sm:$0xf] %vm5841_vm7, %v7977_v2  ;;  %v8242_v63 = vrot.slane %v8240_v13, 5  ;;  %v7528_v36 = vshrl.u32 %v7483_v49, 16  ;;  %v7531_v61 = vshll.u32 %v7483_v49, 16  ;;  %v7521_v46 = vrot.slane %v7520_v11, 4  ;;  %v7440_v49 = vpop.permute.xlu1 %7439 }
 0x419   :  { %v7525_v51 = vrot.slane %v7523_v53, 5  ;;  %v7547_v40 = vrot.slane %v7545_v29, 5  ;;  %v7537_v52 = vshll.u32 %v7484_v21, 16  ;;  %v7490_v12 = vld [vmem:[#allocation7 + $0x2c] sm:$0x1]  ;;  %v7570_v19 = vshrl.u32 %v7489_v6, 16 }
 0x41a   :  { %v8243_v25 = vor.u32 %v8242_v63, %v8239_v59  ;;  %v7530_v4 = vrot.slane %v7528_v36, 4  ;;  %v7533_v38 = vrot.slane %v7531_v61, 5  ;;  %v7487_v37 = vld [vmem:[#allocation7 + $0x20] sm:$0xf]  ;;  %v17764_v31 = vrot.slane %v8246_v48, 5 }
 0x41b   :  { %7215 = vst.msk [vmem:[#allocation8 + $0xb4] sm:$0xf] %vm7205_vm3, %v7176_v22  ;;  %v7526_v0 = vsel %vm16360_vm10, %v7521_v46, %v7525_v51  ;;  %v7548_v17 = vor.u32 %v7547_v40, %v7544_v42  ;;  %v7573_v7 = vshll.u32 %v7489_v6, 16  ;;  %v7488_v5 = vld [vmem:[#allocation7 + $0x24] sm:$0x1]  ;;  %v7553_v56 = vrot.slane %v7551_v34, 5 }
 0x41c   :  { %7753 = vst.msk [vmem:[#allocation8 + $0x8] sm:$0xf] %vm5841_vm7, %v7526_v0  ;;  %v7534_v33 = vor.u32 %v7533_v38, %v7530_v4  ;;  %v7572_v23 = vrot.slane %v7570_v19, 4  ;;  %v7579_v27 = vshll.u32 %v7490_v12, 16  ;;  %v7494_v28 = vld [vmem:[#allocation7 + $0x3c] sm:$0x1]  ;;  %v7896_v59 = vsel %vm16806_vm8, %v13661_v8, %v7895_v30 }
 0x41d   :  { %v7549_v50 = vrot.slane %v7548_v17, 4  ;;  %v7575_v53 = vrot.slane %v7573_v7, 5  ;;  %v7556_v60 = vshrl.u32 %v7487_v37, 16  ;;  %v7559_v48 = vshll.u32 %v7487_v37, 16  ;;  %v7493_v18 = vld [vmem:[#allocation7 + $0x38] sm:$0xf]  ;;  %7927 = vrot.lane.b32.xlu1 %v7896_v59, %s14725_s0 }
 0x41e   :  { %v8244_v39 = vrot.slane %v8243_v25, 4  ;;  %v7535_v58 = vrot.slane %v7534_v33, 4  ;;  %v7539_v45 = vrot.slane %v7537_v52, 5  ;;  %v7565_v43 = vshll.u32 %v7488_v5, 16  ;;  %v7491_v10 = vld [vmem:[#allocation7 + $0x30] sm:$0xf] }
 0x41f   :  { %7476 = vst.msk [vmem:[#allocation8 + $0xe0] sm:$0xf] %vm7205_vm3, %v7440_v49  ;;  %v7554_v3 = vsel %vm16360_vm10, %v7549_v50, %v7553_v56  ;;  %v7576_v57 = vor.u32 %v7575_v53, %v7572_v23  ;;  %v7558_v47 = vrot.slane %v7556_v60, 4  ;;  %v7561_v13 = vrot.slane %v7559_v48, 5  ;;  %v7492_v62 = vld [vmem:[#allocation7 + $0x34] sm:$0x1] }
 0x420   :  { %7755 = vst.msk [vmem:[#allocation8 + $0x30] sm:$0xf] %vm5841_vm7, %v7554_v3  ;;  %v7540_v21 = vsel %vm16360_vm10, %v7535_v58, %v7539_v45  ;;  %v7581_v2 = vrot.slane %v7579_v27, 5  ;;  %v7598_v11 = vshrl.u32 %v7493_v18, 16  ;;  %v7601_v42 = vshll.u32 %v7493_v18, 16 }
 0x421   :  { %v7497_v29 = vld [vmem:[#allocation7 + $0x58] sm:$0xf]  ;;  %7754 = vst.msk [vmem:[#allocation8 + $0x1c] sm:$0xf] %vm5841_vm7, %v7540_v21  ;;  %v7577_v24 = vrot.slane %v7576_v57, 4  ;;  %v7562_v41 = vor.u32 %v7561_v13, %v7558_v47  ;;  %v7607_v14 = vshll.u32 %v7494_v28, 16  ;;  %v8249_v63 = vsel %vm16360_vm10, %v8244_v39, %v17764_v31 }
 0x422   :  { %v7584_v34 = vshrl.u32 %v7491_v10, 16  ;;  %v7498_v6 = vld [vmem:[#allocation7 + $0x5c] sm:$0x1]  ;;  %v14586_v36 = vld [vmem:[#allocation8 + $0xa4] ss:$20 sps:$4 sm:$0xff]   ;;  %v7600_v46 = vrot.slane %v7598_v11, 4  ;;  %8280 = vrot.lane.b32.xlu1 %v8249_v63, %s14725_s0 }
 0x423   :  { %v14589_v61 = vld [vmem:[#allocation8 + $0xa0] ss:$20 sps:$4 sm:$0xff]   ;;  %v7582_v51 = vsel %vm16360_vm10, %v7577_v24, %v7581_v2  ;;  %v7563_v40 = vrot.slane %v7562_v41, 4  ;;  %v7567_v52 = vrot.slane %v7565_v43, 5  ;;  %v7603_v16 = vrot.slane %v7601_v42, 5  ;;  %9099 = vmatprep.mubr.bf16.mxu1 %v14586_v36 }
 0x424   :  { %v7495_v12 = vld [vmem:[#allocation7 + $0x40] sm:$0xf]  ;;  %7757 = vst.msk [vmem:[#allocation8 + $0x58] sm:$0xf] %vm5841_vm7, %v7582_v51  ;;  %v7586_v15 = vrot.slane %v7584_v34, 4  ;;  %v7587_v32 = vshll.u32 %v7491_v10, 16  ;;  %9100 = vmatmul.mubr.bf16.gmra.mrb[16].mxu1 %v14589_v61 }
 0x425   :  { %v7593_v8 = vshll.u32 %v7492_v62, 16  ;;  %v7626_v30 = vshrl.u32 %v7497_v29, 16  ;;  %v7568_v25 = vsel %vm16360_vm10, %v7563_v40, %v7567_v52  ;;  %v7604_v22 = vor.u32 %v7603_v16, %v7600_v46  ;;  %v7496_v19 = vld [vmem:[#allocation7 + $0x44] sm:$0x1]  ;;  %v7501_v37 = vld [vmem:[#allocation7 + $0x68] sm:$0xf] }
 0x426   :  { %v7609_v4 = vrot.slane %v7607_v14, 5  ;;  %v7629_v38 = vshll.u32 %v7497_v29, 16  ;;  %7756 = vst.msk [vmem:[#allocation8 + $0x44] sm:$0xf] %vm5841_vm7, %v7568_v25  ;;  %v7589_v31 = vrot.slane %v7587_v32, 5  ;;  %v7635_v17 = vshll.u32 %v7498_v6, 16 }
 0x427   :  { %v7628_v0 = vrot.slane %v7626_v30, 4  ;;  %v7612_v7 = vshrl.u32 %v7495_v12, 16  ;;  %v7605_v5 = vrot.slane %v7604_v22, 4  ;;  %v7595_v56 = vrot.slane %v7593_v8, 5  ;;  %v7502_v27 = vld [vmem:[#allocation7 + $0x6c] sm:$0x1] }
 0x428   :  { %v7631_v33 = vrot.slane %v7629_v38, 5  ;;  %v7615_v23 = vshll.u32 %v7495_v12, 16  ;;  %v7590_v28 = vor.u32 %v7589_v31, %v7586_v15  ;;  %v7621_v53 = vshll.u32 %v7496_v19, 16  ;;  %v7499_v48 = vld [vmem:[#allocation7 + $0x60] sm:$0xf] }
 0x429   :  { %v7614_v50 = vrot.slane %v7612_v7, 4  ;;  %v7654_v60 = vshrl.u32 %v7501_v37, 16  ;;  %v7610_v18 = vsel %vm16360_vm10, %v7605_v5, %v7609_v4  ;;  %v7657_v58 = vshll.u32 %v7501_v37, 16  ;;  %v7500_v45 = vld [vmem:[#allocation7 + $0x64] sm:$0x1] }
 0x42a   :  { %v7632_v39 = vor.u32 %v7631_v33, %v7628_v0  ;;  %v7617_v49 = vrot.slane %v7615_v23, 5  ;;  %7759 = vst.msk [vmem:[#allocation8 + $0x80] sm:$0xf] %vm5841_vm7, %v7610_v18  ;;  %v7591_v43 = vrot.slane %v7590_v28, 4  ;;  %v7637_v10 = vrot.slane %v7635_v17, 5 }
 0x42b   :  { %v7656_v3 = vrot.slane %v7654_v60, 4  ;;  %v7663_v57 = vshll.u32 %v7502_v27, 16  ;;  %v7506_v47 = vld [vmem:[#allocation7 + $0x7c] sm:$0x1]  ;;  %v7659_v21 = vrot.slane %v7657_v58, 5  ;;  %v7640_v2 = vshrl.u32 %v7499_v48, 16 }
 0x42c   :  { %v7633_v13 = vrot.slane %v7632_v39, 4  ;;  %v7618_v62 = vor.u32 %v7617_v49, %v7614_v50  ;;  %v7505_v11 = vld [vmem:[#allocation7 + $0x78] sm:$0xf]  ;;  %v7596_v42 = vsel %vm16360_vm10, %v7591_v43, %v7595_v56  ;;  %v7623_v29 = vrot.slane %v7621_v53, 5  ;;  %v7503_v14 = vld [vmem:[#allocation7 + $0x70] sm:$0xf]  ;;  %v7178_v43 = vpop.permute.xlu0 %7177 }
 0x42d   :  { %v7643_v24 = vshll.u32 %v7499_v48, 16  ;;  %v7649_v41 = vshll.u32 %v7500_v45, 16  ;;  %7758 = vst.msk [vmem:[#allocation8 + $0x6c] sm:$0xf] %vm5841_vm7, %v7596_v42  ;;  %v7660_v59 = vor.u32 %v7659_v21, %v7656_v3  ;;  %v7642_v63 = vrot.slane %v7640_v2, 4 }
 0x42e   :  { %v7638_v34 = vsel %vm16360_vm10, %v7633_v13, %v7637_v10  ;;  %v7619_v6 = vrot.slane %v7618_v62, 4  ;;  %v7504_v36 = vld [vmem:[#allocation7 + $0x74] sm:$0x1]  ;;  %v7665_v61 = vrot.slane %v7663_v57, 5  ;;  %v7682_v51 = vshrl.u32 %v7505_v11, 16 }
 0x42f   :  { %7761 = vst.msk [vmem:[#allocation8 + $0xa8] sm:$0xf] %vm5841_vm7, %v7638_v34  ;;  %v7645_v46 = vrot.slane %v7643_v24, 5  ;;  %v7685_v40 = vshll.u32 %v7505_v11, 16  ;;  %v7510_v52 = vld [vmem:[#allocation7 + $0x8c] sm:$0x1] }
 0x430   :  { %v7624_v16 = vsel %vm16360_vm10, %v7619_v6, %v7623_v29  ;;  %v7661_v12 = vrot.slane %v7660_v59, 4  ;;  %v7691_v15 = vshll.u32 %v7506_v47, 16  ;;  %v7668_v32 = vshrl.u32 %v7503_v14, 16  ;;  %v7509_v8 = vld [vmem:[#allocation7 + $0x88] sm:$0xf]  ;;  %v7180_v59 = vpop.permute.xlu1 %7179 }
 0x431   :  { %7760 = vst.msk [vmem:[#allocation8 + $0x94] sm:$0xf] %vm5841_vm7, %v7624_v16  ;;  %v7646_v30 = vor.u32 %v7645_v46, %v7642_v63  ;;  %v7684_v25 = vrot.slane %v7682_v51, 4  ;;  %v7687_v22 = vrot.slane %v7685_v40, 5  ;;  %v7671_v4 = vshll.u32 %v7503_v14, 16  ;;  %v7442_v63 = vpop.permute.xlu0 %7441 }
 0x432   :  { %v7507_v38 = vld [vmem:[#allocation7 + $0x80] sm:$0xf]  ;;  %v7666_v19 = vsel %vm16360_vm10, %v7661_v12, %v7665_v61  ;;  %v7651_v37 = vrot.slane %v7649_v41, 5  ;;  %v7670_v31 = vrot.slane %v7668_v32, 4  ;;  %v7677_v0 = vshll.u32 %v7504_v36, 16 }
 0x433   :  { %7763 = vst.msk [vmem:[#allocation8 + $0xd0] sm:$0xf] %vm5841_vm7, %v7666_v19  ;;  %v7647_v17 = vrot.slane %v7646_v30, 4  ;;  %v7688_v7 = vor.u32 %v7687_v22, %v7684_v25  ;;  %v7673_v5 = vrot.slane %v7671_v4, 5  ;;  %v7710_v56 = vshrl.u32 %v7509_v8, 16 }
 0x434   :  { %v7693_v33 = vrot.slane %v7691_v15, 5  ;;  %v7713_v23 = vshll.u32 %v7509_v8, 16  ;;  %v7719_v27 = vshll.u32 %v7510_v52, 16  ;;  %v7696_v28 = vshrl.u32 %v7507_v38, 16  ;;  %v7511_v50 = vld [vmem:[#allocation7 + $0x90] sm:$0xf]  ;;  %v7444_v12 = vpop.permute.xlu1 %7443 }
 0x435   :  { %v7652_v53 = vsel %vm16360_vm10, %v7647_v17, %v7651_v37  ;;  %v7689_v60 = vrot.slane %v7688_v7, 4  ;;  %v7674_v48 = vor.u32 %v7673_v5, %v7670_v31  ;;  %v7712_v18 = vrot.slane %v7710_v56, 4  ;;  %v7508_v39 = vld [vmem:[#allocation7 + $0x84] sm:$0x1]  ;;  %v7512_v13 = vld [vmem:[#allocation7 + $0x94] sm:$0x1]  ;;  %v7182_v30 = vpop.permute.xlu0 %7181 }
 0x436   :  { %7762 = vst.msk [vmem:[#allocation8 + $0xbc] sm:$0xf] %vm5841_vm7, %v7652_v53  ;;  %v7715_v49 = vrot.slane %v7713_v23, 5  ;;  %v7698_v58 = vrot.slane %v7696_v28, 4  ;;  %v7699_v45 = vshll.u32 %v7507_v38, 16  ;;  %v7679_v57 = vrot.slane %v7677_v0, 5 }
 0x437   :  { %v7694_v10 = vsel %vm16360_vm10, %v7689_v60, %v7693_v33  ;;  %v7675_v3 = vrot.slane %v7674_v48, 4  ;;  %v7724_v47 = vshrl.u32 %v7511_v50, 16  ;;  %7216 = vst.msk [vmem:[#allocation8 + $0xc8] sm:$0xf] %vm7205_vm3, %v7178_v43  ;;  %v7705_v2 = vshll.u32 %v7508_v39, 16 }
 0x438   :  { %7765 = vst.msk [vmem:[#allocation8 + $0xf8] sm:$0xf] %vm5841_vm7, %v7694_v10  ;;  %v7716_v62 = vor.u32 %v7715_v49, %v7712_v18  ;;  %v7701_v21 = vrot.slane %v7699_v45, 5  ;;  %v7727_v11 = vshll.u32 %v7511_v50, 16  ;;  %v7721_v29 = vrot.slane %v7719_v27, 5  ;;  %v7184_v25 = vpop.permute.xlu1 %7183 }
 0x439   :  { %v7680_v42 = vsel %vm16360_vm10, %v7675_v3, %v7679_v57  ;;  %v7726_v24 = vrot.slane %v7724_v47, 4  ;;  %v7733_v6 = vshll.u32 %v7512_v13, 16  ;;  %7217 = vst.msk [vmem:[#allocation8 + $0xdc] sm:$0xf] %vm7205_vm3, %v7180_v59  ;;  %7477 = vst.msk [vmem:[#allocation8 + $0xf4] sm:$0xf] %vm7205_vm3, %v7442_v63  ;;  %v7446_v22 = vpop.permute.xlu0 %7445 }
 0x43a   :  { %7764 = vst.msk [vmem:[#allocation8 + $0xe4] sm:$0xf] %vm5841_vm7, %v7680_v42  ;;  %v7717_v41 = vrot.slane %v7716_v62, 4  ;;  %v7702_v14 = vor.u32 %v7701_v21, %v7698_v58  ;;  %v7729_v34 = vrot.slane %v7727_v11, 5  ;;  %v7707_v46 = vrot.slane %v7705_v2, 5 }
 0x43b   :  { %v7735_v16 = vrot.slane %v7733_v6, 5  ;;  %7478 = vst.msk [vmem:[#allocation8 + $0x108] sm:$0xf] %vm7205_vm3, %v7444_v12  ;;  %v14593_v32 = vld [vmem:[#allocation8 + $0xcc] ss:$20 sps:$4 sm:$0xff]   ;;  %vm10053_vm4 = vcmask 1040384  }
 0x43c   :  { %v7722_v36 = vsel %vm16360_vm10, %v7717_v41, %v7721_v29  ;;  %v7703_v61 = vrot.slane %v7702_v14, 4  ;;  %v7730_v51 = vor.u32 %v7729_v34, %v7726_v24  ;;  %9107 = vmatprep.mubr.bf16.mxu1 %v14593_v32  ;;  %7218 = vst.msk [vmem:[#allocation8 + $0xf0] sm:$0xf] %vm7205_vm3, %v7182_v30  ;;  %7219 = vst.msk [vmem:[#allocation8 + $0x104] sm:$0xf] %vm7205_vm3, %v7184_v25  ;;  %v7448_v4 = vpop.permute.xlu1 %7447 }
 0x43d   :  { %7767 = vst.msk [vmem:[#allocation8 + $0x120] sm:$0xf] %vm5841_vm7, %v7722_v36  ;;  %v7186_v1 = vpop.permute.xlu0 %7185  ;;  %vm17909_vm6 = vmand %vm10053_vm4, %vm5853_vm5  ;;  %vm10454_vm1 = vsmask.f32 3336  ;;  %vm10456_vm9 = vsmask.f32 5392 }
 0x43e   :  { %v7708_v40 = vsel %vm16360_vm10, %v7703_v61, %v7707_v46  ;;  %v7731_v52 = vrot.slane %v7730_v51, 4  ;;  %7479 = vst.msk [vmem:[#allocation8 + $0x11c] sm:$0xf] %vm7205_vm3, %v7446_v22  ;;  %7480 = vst.msk [vmem:[#allocation8 + $0x130] sm:$0xf] %vm7205_vm3, %v7448_v4 }
 0x43f   :  { %7766 = vst.msk [vmem:[#allocation8 + $0x10c] sm:$0xf] %vm5841_vm7, %v7708_v40 }
 0x440   :  { %v7736_v15 = vsel %vm16360_vm10, %v7731_v52, %v7735_v16  ;;  %v14596_v8 = vld [vmem:[#allocation8 + $0xc8] ss:$20 sps:$4 sm:$0xff]   ;;  %7220 = vst.msk [vmem:[#allocation8 + $0x118] sm:$0xf] %vm7205_vm3, %v7186_v1  ;;  %v7188_v31 = vpop.permute.xlu1 %7187  ;;  %vm10453_vm10 = vsmask.f32 1280 }
 0x441   :  { %7768 = vst.msk [vmem:[#allocation8 + $0x134] sm:$0xf] %vm5841_vm7, %v7736_v15  ;;  %9108 = vmatmul.mubr.bf16.gmra.mrb[20].mxu1 %v14596_v8  ;;  %v7898_v37 = vpop.permute.xlu0 %7897  ;;  %vm10092_vm7 = vsmask.f32 7946  ;;  %vm10455_vm8 = vmor %vm10453_vm10, %vm10454_vm1 }
 0x442   :  { %v14600_v38 = vld [vmem:[#allocation8 + $0xf4] ss:$20 sps:$4 sm:$0xff]   ;;  %7945 = vst.msk [vmem:[#allocation8 + $0x8] sm:$0xf] %vm7205_vm3, %v7898_v37  ;;  %7221 = vst.msk [vmem:[#allocation8 + $0x12c] sm:$0xf] %vm7205_vm3, %v7188_v31 }
 0x443   :  { %v14603_v19 = vld [vmem:[#allocation8 + $0xf0] ss:$20 sps:$4 sm:$0xff]   ;;  %9115 = vmatprep.mubr.bf16.mxu1 %v14600_v38  ;;  %vm17922_vm5 = vmand %vm6491_vm11, %vm10092_vm7  ;;  %vm10458_vm7 = vsmask.f32 7448 }
 0x444   :  { %v7900_v17 = vpop.permute.xlu1 %7899  ;;  %vm10668_vm10 = vmor %vm10053_vm4, %vm6491_vm11 }
 0x445   :  { %v8251_v0 = vpop.permute.xlu0 %8250  ;;  %7946 = vst.msk [vmem:[#allocation8 + $0x1c] sm:$0xf] %vm7205_vm3, %v7900_v17  ;;  %v14607_v33 = vld [vmem:[#allocation8 + $0x11c] ss:$20 sps:$4 sm:$0xff]   ;;  %vm10670_vm1 = vmor %vm10668_vm10, %vm6497_vm13 }
 0x446   :  { %8298 = vst.msk [vmem:[#allocation8 + $0xc] sm:$0xf] %vm7205_vm3, %v8251_v0  ;;  %vm17956_vm4 = vmor %vm10670_vm1, %vm6503_vm15 }
 0x447   :  { %v8516_v5 = vld [vmem:[#allocation8 + $0x118] sm:$0xff] }
 0x448   :  { %v8253_v23 = vpop.permute.xlu1 %8252 }
 0x449   :  { %9116 = vmatmul.mubr.bf16.gmra.mrb[24].mxu1 %v14603_v19  ;;  %v7902_v7 = vpop.permute.xlu0 %7901  ;;  %v8519_v56 = vld [vmem:[#allocation8 + $0x12c] sm:$0xff]  ;;  %8299 = vst.msk [vmem:[#allocation8 + $0x20] sm:$0xf] %vm7205_vm3, %v8253_v23 }
 0x44a   :  { %7947 = vst.msk [vmem:[#allocation8 + $0x30] sm:$0xf] %vm7205_vm3, %v7902_v7  ;;  %v13713_v27 = vcombine.low %v8516_v5, %v8519_v56  ;;  %9123 = vmatprep.mubr.bf16.mxu1 %v14607_v33  ;;  %v17854_v58 = vpop.f32.mrb[68].mxu0 }
 0x44b   :  { %v17856_v45 = vpop.f32.mrb[69].mxu0 }
 0x44c   :  { %v7904_v50 = vpop.permute.xlu1 %7903  ;;  %v14611_v48 = vld [vmem:[#allocation8 + $0x8] ss:$20 sps:$4 sm:$0xff]   ;;  %v17858_v10 = vpop.f32.mrb[70].mxu0 }
 0x44d   :  { %v8255_v28 = vpop.permute.xlu0 %8254  ;;  %7948 = vst.msk [vmem:[#allocation8 + $0x44] sm:$0xf] %vm7205_vm3, %v7904_v50  ;;  %v17861_v62 = vpop.f32.mrb[71].mxu0 }
 0x44e   :  { %8300 = vst.msk [vmem:[#allocation8 + $0x34] sm:$0xf] %vm7205_vm3, %v8255_v28 }
 0x450   :  { %v8257_v60 = vpop.permute.xlu1 %8256  ;;  %v14613_v18 = vld [vmem:[#allocation8 + $0xc] ss:$20 sps:$4 sm:$0xff]  }
 0x451   :  { %9124 = vmatmul.mubr.bf16.gmra.mrb[28].mxu1 %v13713_v27  ;;  %v7906_v53 = vpop.permute.xlu0 %7905  ;;  %8301 = vst.msk [vmem:[#allocation8 + $0x48] sm:$0xf] %vm7205_vm3, %v8257_v60 }
 0x452   :  { %7949 = vst.msk [vmem:[#allocation8 + $0x58] sm:$0xf] %vm7205_vm3, %v7906_v53  ;;  %9164 = vmatprep.mubr.bf16.mxu1 %v14613_v18 }
 0x455   :  { %v8259_v39 = vpop.permute.xlu0 %8258  ;;  %v7908_v49 = vpop.permute.xlu1 %7907  ;;  %v8481_v57 = vld [vmem:[#allocation8 + $0x30] sm:$0xff] }
 0x456   :  { %8302 = vst.msk [vmem:[#allocation8 + $0x5c] sm:$0xf] %vm7205_vm3, %v8259_v39  ;;  %7950 = vst.msk [vmem:[#allocation8 + $0x6c] sm:$0xf] %vm7205_vm3, %v7908_v49 }
 0x458   :  { %v8484_v47 = vld [vmem:[#allocation8 + $0x44] sm:$0xff] }
 0x459   :  { %9165 = vmatmul.mubr.bf16.vlgmr.msra.gmra.mrb[32].mxu1 %v14611_v48  ;;  %v7910_v43 = vpop.permute.xlu0 %7909  ;;  %v14614_v13 = vld [vmem:[#allocation8 + $0x34] ss:$20 sps:$4 sm:$0xff]   ;;  %v13685_v21 = vcombine.low %v8481_v57, %v8484_v47 }
 0x45a   :  { %7951 = vst.msk [vmem:[#allocation8 + $0x80] sm:$0xf] %vm7205_vm3, %v7910_v43  ;;  %9172 = vmatprep.mubr.bf16.mxu1 %v14614_v13 }
 0x45b   :  { %v8261_v3 = vpop.permute.xlu1 %8260 }
 0x45c   :  { %8303 = vst.msk [vmem:[#allocation8 + $0x70] sm:$0xf] %vm7205_vm3, %v8261_v3 }
 0x45d   :  { %v8263_v2 = vpop.permute.xlu0 %8262  ;;  %v8487_v29 = vld [vmem:[#allocation8 + $0x58] sm:$0xff] }
 0x45e   :  { %8304 = vst.msk [vmem:[#allocation8 + $0x84] sm:$0xf] %vm7205_vm3, %v8263_v2 }
 0x45f   :  { %v7912_v11 = vpop.permute.xlu1 %7911 }
 0x460   :  { %7952 = vst.msk [vmem:[#allocation8 + $0x94] sm:$0xf] %vm7205_vm3, %v7912_v11 }
 0x461   :  { %9173 = vmatmul.mubr.bf16.gmra.mrb[36].mxu1 %v13685_v21  ;;  %v7914_v42 = vpop.permute.xlu0 %7913 }
 0x462   :  { %7953 = vst.msk [vmem:[#allocation8 + $0xa8] sm:$0xf] %vm7205_vm3, %v7914_v42 }
 0x463   :  { %v8490_v24 = vld [vmem:[#allocation8 + $0x6c] sm:$0xff] }
 0x464   :  { %v14616_v41 = vld [vmem:[#allocation8 + $0x5c] ss:$20 sps:$4 sm:$0xff]   ;;  %v13690_v14 = vcombine.low %v8487_v29, %v8490_v24  ;;  %v10055_v24 = vld [vmem:[#allocation9] sm:$0x1] }
 0x465   :  { %9180 = vmatprep.mubr.bf16.mxu1 %v14616_v41  ;;  %v8267_v34 = vpop.permute.xlu0 %8266  ;;  %v8493_v46 = vld [vmem:[#allocation8 + $0x80] sm:$0xff] }
 0x466   :  { %8306 = vst.msk [vmem:[#allocation8 + $0xac] sm:$0xf] %vm7205_vm3, %v8267_v34  ;;  %v10058_v41 = vld [vmem:[#allocation9 + $0x4] sm:$0x1]  ;;  %v10070_v34 = vld [vmem:[#allocation9 + $0x14] sm:$0x1] }
 0x469   :  { %9181 = vmatmul.mubr.bf16.gmra.mrb[40].mxu1 %v13690_v14  ;;  %v7918_v59 = vpop.permute.xlu0 %7917  ;;  %v18627_v14 = vmov 0 }
 0x46a   :  { %7955 = vst.msk [vmem:[#allocation8 + $0xd0] sm:$0xf] %vm7205_vm3, %v7918_v59  ;;  %v18628_v14 = vsel %vm17909_vm6, 4294967295, %v18627_v14 }
 0x46b   :  { %18629 = vst [vmem:[#allocation58_spill] sm:$0xff] %v18628_v14 }
 0x46d   :  { %v8271_v36 = vpop.permute.xlu0 %8270  ;;  %v8499_v8 = vld [vmem:[#allocation8 + $0xa8] sm:$0xff] }
 0x46e   :  { %8308 = vst.msk [vmem:[#allocation8 + $0xd4] sm:$0xf] %vm7205_vm3, %v8271_v36  ;;  %v10059_v36 = vsel %vm17909_vm6, 0, %v10058_v41 }
 0x46f   :  { %v8265_v6 = vpop.permute.xlu1 %8264  ;;  %10060 = vst [vmem:[#allocation9 + $0x4] sm:$0x1] %v10059_v36 }
 0x470   :  { %8305 = vst.msk [vmem:[#allocation8 + $0x98] sm:$0xf] %vm7205_vm3, %v8265_v6  ;;  %v10073_v6 = vld [vmem:[#allocation9 + $0x18] sm:$0x1] }
 0x471   :  { %v7922_v52 = vpop.permute.xlu0 %7921 }
 0x472   :  { %7957 = vst.msk [vmem:[#allocation8 + $0xf8] sm:$0xf] %vm7205_vm3, %v7922_v52  ;;  %v10088_v52 = vld [vmem:[#allocation9 + $0x2c] sm:$0x1] }
 0x473   :  { %v7916_v63 = vpop.permute.xlu1 %7915 }
 0x474   :  { %7954 = vst.msk [vmem:[#allocation8 + $0xbc] sm:$0xf] %vm7205_vm3, %v7916_v63  ;;  %v10056_v63 = vsel %vm17909_vm6, 0, %v10055_v24 }
 0x475   :  { %v8275_v15 = vpop.permute.xlu0 %8274  ;;  %10057 = vst [vmem:[#allocation9] sm:$0x1] %v10056_v63 }
 0x476   :  { %8310 = vst.msk [vmem:[#allocation8 + $0xfc] sm:$0xf] %vm7205_vm3, %v8275_v15 }
 0x477   :  { %v8269_v61 = vpop.permute.xlu1 %8268  ;;  %v8496_v51 = vld [vmem:[#allocation8 + $0x94] sm:$0xff] }
 0x478   :  { %v14618_v40 = vld [vmem:[#allocation8 + $0x84] ss:$20 sps:$4 sm:$0xff]   ;;  %8307 = vst.msk [vmem:[#allocation8 + $0xc0] sm:$0xf] %vm7205_vm3, %v8269_v61  ;;  %v13695_v16 = vcombine.low %v8493_v46, %v8496_v51  ;;  %v10071_v61 = vsel %vm17909_vm6, 0, %v10070_v34  ;;  %v10074_v46 = vsel %vm17909_vm6, 0, %v10073_v6 }
 0x479   :  { %9188 = vmatprep.mubr.bf16.mxu1 %v14618_v40  ;;  %v7926_v22 = vpop.permute.xlu0 %7925  ;;  %v18630_v51 = vmov 0  ;;  %10072 = vst [vmem:[#allocation9 + $0x14] sm:$0x1] %v10071_v61  ;;  %10075 = vst [vmem:[#allocation9 + $0x18] sm:$0x1] %v10074_v46 }
 0x47a   :  { %9189 = vmatmul.mubr.bf16.gmra.mrb[44].mxu1 %v13695_v16  ;;  %7959 = vst.msk [vmem:[#allocation8 + $0x120] sm:$0xf] %vm7205_vm3, %v7926_v22  ;;  %v18631_v51 = vsel %vm17922_vm5, 4294967295, %v18630_v51  ;;  %v10094_v16 = vld [vmem:[#allocation9] sm:$0x4] }
 0x47b   :  { %v7920_v12 = vpop.permute.xlu1 %7919  ;;  %18632 = vst [vmem:[#allocation59_spill] sm:$0xff] %v18631_v51 }
 0x47c   :  { %7956 = vst.msk [vmem:[#allocation8 + $0xe4] sm:$0xf] %vm7205_vm3, %v7920_v12 }
 0x47f   :  { %v8273_v32 = vpop.permute.xlu1 %8272  ;;  %v8502_v30 = vld [vmem:[#allocation8 + $0xbc] sm:$0xff] }
 0x480   :  { %v14620_v25 = vld [vmem:[#allocation8 + $0xac] ss:$20 sps:$4 sm:$0xff]   ;;  %8309 = vst.msk [vmem:[#allocation8 + $0xe8] sm:$0xf] %vm7205_vm3, %v8273_v32  ;;  %v13700_v4 = vcombine.low %v8499_v8, %v8502_v30  ;;  %v10089_v32 = vsel %vm17909_vm6, 0, %v10088_v52  ;;  %v10095_v8 = vsel %vm17922_vm5, 0, %v10094_v16 }
 0x481   :  { %9196 = vmatprep.mubr.bf16.mxu1 %v14620_v25  ;;  %v10097_v30 = vld [vmem:[#allocation9 + $0x4] sm:$0x4]  ;;  %10090 = vst [vmem:[#allocation9 + $0x2c] sm:$0x1] %v10089_v32  ;;  %10096 = vst [vmem:[#allocation9] sm:$0x4] %v10095_v8 }
 0x482   :  { %9197 = vmatmul.mubr.bf16.gmra.mrb[48].mxu1 %v13700_v4  ;;  %v10098_v22 = vsel %vm17922_vm5, 0, %v10097_v30  ;;  %v10109_v4 = vld [vmem:[#allocation9 + $0x14] sm:$0x4]  ;;  %v11077_v30 = vld [vmem:[#allocation9 + $0x14] sm:$0x3] }
 0x483   :  { %v7924_v1 = vpop.permute.xlu1 %7923  ;;  %v14624_v31 = vld [vmem:[#allocation8 + $0xd0] ss:$20 sps:$4 sm:$0xff]   ;;  %10099 = vst [vmem:[#allocation9 + $0x4] sm:$0x4] %v10098_v22  ;;  %11085 = vst [vmem:[#allocation10 + $0x42] sm:$0x3] %v11077_v30 }
 0x484   :  { %7958 = vst.msk [vmem:[#allocation8 + $0x10c] sm:$0xf] %vm7205_vm3, %v7924_v1  ;;  %v10112_v1 = vld [vmem:[#allocation9 + $0x18] sm:$0x4] }
 0x485   :  { %v8279_v38 = vpop.permute.xlu0 %8278 }
 0x486   :  { %8312 = vst.msk [vmem:[#allocation8 + $0x124] sm:$0xf] %vm7205_vm3, %v8279_v38 }
 0x487   :  { %v8277_v19 = vpop.permute.xlu1 %8276  ;;  %v14622_v37 = vld [vmem:[#allocation8 + $0xd4] ss:$20 sps:$4 sm:$0xff]  }
 0x488   :  { %8311 = vst.msk [vmem:[#allocation8 + $0x110] sm:$0xf] %vm7205_vm3, %v8277_v19  ;;  %9204 = vmatprep.mubr.bf16.mxu1 %v14622_v37  ;;  %v10110_v19 = vsel %vm17922_vm5, 0, %v10109_v4  ;;  %v10113_v37 = vsel %vm17922_vm5, 0, %v10112_v1 }
 0x489   :  { %10111 = vst [vmem:[#allocation9 + $0x14] sm:$0x4] %v10110_v19  ;;  %10114 = vst [vmem:[#allocation9 + $0x18] sm:$0x4] %v10113_v37 }
 0x48a   :  { %9205 = vmatmul.mubr.bf16.gmra.mrb[52].mxu1 %v14624_v31  ;;  %v10127_v31 = vld [vmem:[#allocation9 + $0x2c] sm:$0x4]  ;;  %v13866_v16 = vld.sshfl [vmem:[#allocation9] sm:$0x12 pattern:$0x76325410] }
 0x48b   :  { %v14627_v5 = vld [vmem:[#allocation8 + $0xf8] ss:$20 sps:$4 sm:$0xff]   ;;  %v10611_v8 = vcombine.high %v13866_v16, %v13866_v16  ;;  %v13874_v1 = vrot.slane %v13866_v16, 9 }
 0x48f   :  { %v7928_v0 = vpop.permute.xlu1 %7927  ;;  %v14625_v7 = vld [vmem:[#allocation8 + $0xfc] ss:$20 sps:$4 sm:$0xff]  }
 0x490   :  { %7960 = vst.msk [vmem:[#allocation8 + $0x134] sm:$0xf] %vm7205_vm3, %v7928_v0  ;;  %9212 = vmatprep.mubr.bf16.mxu1 %v14625_v7  ;;  %v17883_v23 = vpop.f32.mrb[72].mxu0  ;;  %v10128_v0 = vsel %vm17922_vm5, 0, %v10127_v31  ;;  %v10675_v31 = vrot.slane %v10611_v8, 7 }
 0x491   :  { %v17885_v27 = vpop.f32.mrb[73].mxu0  ;;  %10129 = vst [vmem:[#allocation9 + $0x2c] sm:$0x4] %v10128_v0 }
 0x492   :  { %9213 = vmatmul.mubr.bf16.gmra.mrb[56].mxu1 %v14627_v5  ;;  %v17887_v28 = vpop.f32.mrb[74].mxu0  ;;  %v13870_v4 = vld.sshfl [vmem:[#allocation9 + $0x18] sm:$0x12 pattern:$0x76325410] }
 0x493   :  { %v17889_v50 = vpop.f32.mrb[75].mxu0  ;;  %v10643_v37 = vcombine.high %v13870_v4, %v13870_v4  ;;  %v13878_v0 = vrot.slane %v13870_v4, 9 }
 0x494   :  { %v8281_v17 = vpop.permute.xlu1 %8280 }
 0x495   :  { %8313 = vst.msk [vmem:[#allocation8 + $0x138] sm:$0xf] %vm7205_vm3, %v8281_v17  ;;  %v10357_v17 = vld [vmem:[#allocation9] sm:$0x3]  ;;  %vm10457_vm3 = vmor %vm10455_vm8, %vm10456_vm9  ;;  %vm10331_vm8 = vsmask.f32 2306 }
 0x496   :  { %10365 = vst [vmem:[#allocation10] sm:$0x3] %v10357_v17  ;;  %vm17946_vm0 = vmor %vm10457_vm3, %vm10458_vm7  ;;  %v11081_v17 = vld [vmem:[#allocation9 + $0x2c] sm:$0x3] }
 0x497   :  { %v14630_v33 = vld [vmem:[#allocation8 + $0x120] ss:$20 sps:$4 sm:$0xff]   ;;  %11089 = vst [vmem:[#allocation10 + $0x8a] sm:$0x3] %v11081_v17  ;;  %vm18062_vm9 = vmand %vm7286_vm2, %vm10331_vm8 }
 0x498   :  { %v13921_v17 = vld.sshfl [vmem:[#allocation9 + $0x2c] sm:$0x12 pattern:$0x76325410] }
 0x49c   :  { %v14628_v56 = vld [vmem:[#allocation8 + $0x124] ss:$20 sps:$4 sm:$0xff]  }
 0x49d   :  { %9220 = vmatprep.mubr.bf16.mxu1 %v14628_v56 }
 0x49e   :  { %9221 = vmatmul.mubr.bf16.gmra.mrb[60].mxu1 %v14630_v33 }
 0x49f   :  { %v14187_v53 = vpop.f32.mrb[0].mxu1 }
 0x4a0   :  { %v14188_v60 = vpop.f32.mrb[1].mxu1 }
 0x4a1   :  { %v17891_v48 = vadd.f32 %v14188_v60, %v14187_v53  ;;  %v14190_v18 = vpop.f32.mrb[2].mxu1 }
 0x4a2   :  { %v14191_v39 = vpop.f32.mrb[3].mxu1 }
 0x4a3   :  { %v17893_v49 = vadd.f32 %v14191_v39, %v14190_v18  ;;  %v10361_v18 = vld [vmem:[#allocation9 + $0x18] sm:$0x3]  ;;  %v13858_v39 = vld.sshfl [vmem:[#allocation9] sm:$0x13 pattern:$0x76325410] }
 0x4a4   :  { %10369 = vst [vmem:[#allocation10 + $0x48] sm:$0x3] %v10361_v18 }
 0x4b7   :  { %v14193_v43 = vpop.f32.mrb[4].mxu1 }
 0x4b8   :  { %v14194_v57 = vpop.f32.mrb[5].mxu1 }
 0x4b9   :  { %v17895_v3 = vpop.f32.mrb[76].mxu0  ;;  %v17899_v13 = vadd.f32 %v14194_v57, %v14193_v43  ;;  %v14196_v21 = vpop.f32.mrb[6].mxu1  ;;  %v10396_v43 = vcombine.high %v13858_v39, %v13858_v39  ;;  %v10461_v57 = vshrl.u32 %v13858_v39, 16 }
 0x4ba   :  { %v17897_v47 = vpop.f32.mrb[77].mxu0  ;;  %v14197_v11 = vpop.f32.mrb[7].mxu1 }
 0x4bb   :  { %v17901_v2 = vpop.f32.mrb[78].mxu0  ;;  %v17905_v29 = vadd.f32 %v14197_v11, %v14196_v21  ;;  %v13862_v21 = vld.sshfl [vmem:[#allocation9 + $0x18] sm:$0x13 pattern:$0x76325410]  ;;  %v10464_v11 = vshll.u32 %v13858_v39, 16  ;;  %v10676_v39 = vsel %vm17956_vm4, %v13874_v1, %v10675_v31 }
 0x4bc   :  { %v17903_v42 = vpop.f32.mrb[79].mxu0  ;;  %v10470_v24 = vshll.u32 %v10396_v43, 16  ;;  %v10428_v41 = vcombine.high %v13862_v21, %v13862_v21  ;;  %v10463_v34 = vrot.slane %v10461_v57, 6  ;;  %v10517_v61 = vshrl.u32 %v13862_v21, 16  ;;  %10713 = vst [vmem:[#allocation10 + $0x4] sm:$0x3] %v10676_v39 }
 0x4bd   :  { %v10466_v6 = vrot.slane %v10464_v11, 7  ;;  %v10520_v46 = vshll.u32 %v13862_v21, 16  ;;  %v10691_v43 = vrot.slane %v10643_v37, 7  ;;  %v13929_v39 = vrot.slane %v13921_v17, 9 }
 0x4be   :  { %v10472_v63 = vrot.slane %v10470_v24, 7  ;;  %v13913_v57 = vld.sshfl [vmem:[#allocation9 + $0x2c] sm:$0x13 pattern:$0x76325410] }
 0x4bf   :  { %v10522_v32 = vrot.slane %v10520_v46, 7  ;;  %v11169_v11 = vcombine.high %v13913_v57, %v13913_v57  ;;  %v13917_v46 = vld.sshfl [vmem:[#allocation9 + $0x14] sm:$0x12 pattern:$0x76325410] }
 0x4c0   :  { %v11345_v4 = vcombine.high %v13917_v46, %v13917_v46  ;;  %v13925_v1 = vrot.slane %v13917_v46, 9 }
 0x4c9   :  { %v14199_v59 = vpop.f32.mrb[8].mxu1 }
 0x4ca   :  { %v14200_v40 = vpop.f32.mrb[9].mxu1 }
 0x4cb   :  { %v17926_v12 = vadd.f32 %v14200_v40, %v14199_v59  ;;  %v14202_v15 = vpop.f32.mrb[10].mxu1  ;;  %v10467_v59 = vor.u32 %v10466_v6, %v10463_v34  ;;  %v10526_v40 = vshll.u32 %v10428_v41, 16  ;;  %v11269_v34 = vshrl.u32 %v13913_v57, 16 }
 0x4cc   :  { %v14203_v25 = vpop.f32.mrb[11].mxu1 }
 0x4cd   :  { %v17934_v38 = vadd.f32 %v14203_v25, %v14202_v15  ;;  %v10468_v52 = vrot.slane %v10467_v59, 2  ;;  %v10519_v15 = vrot.slane %v10517_v61, 6  ;;  %v10528_v22 = vrot.slane %v10526_v40, 7 }
 0x4ce   :  { %v10692_v59 = vsel %vm17956_vm4, %v13878_v0, %v10691_v43  ;;  %v11272_v61 = vshll.u32 %v13913_v57, 16 }
 0x4cf   :  { %v10473_v25 = vsel %vm17946_vm0, %v10468_v52, %v10472_v63  ;;  %v10523_v19 = vor.u32 %v10522_v32, %v10519_v15  ;;  %10717 = vst [vmem:[#allocation10 + $0x4c] sm:$0x3] %v10692_v59  ;;  %v11271_v15 = vrot.slane %v11269_v34, 6  ;;  %v11278_v32 = vshll.u32 %v11169_v11, 16  ;;  %v10064_v34 = vld [vmem:[#allocation9 + $0xc] sm:$0x1] }
 0x4d0   :  { %10580 = vst [vmem:[#allocation10 + $0x2] sm:$0x3] %v10473_v25  ;;  %v11274_v25 = vrot.slane %v11272_v61, 7 }
 0x4d1   :  { %v10524_v18 = vrot.slane %v10523_v19, 2  ;;  %v10100_v19 = vld [vmem:[#allocation9 + $0x8] sm:$0x4]  ;;  %v11280_v0 = vrot.slane %v11278_v32, 7 }
 0x4d3   :  { %v10529_v6 = vsel %vm17946_vm0, %v10524_v18, %v10528_v22  ;;  %v11392_v18 = vrot.slane %v11345_v4, 7 }
 0x4d4   :  { %10584 = vst [vmem:[#allocation10 + $0x4a] sm:$0x3] %v10529_v6  ;;  %v10103_v6 = vld [vmem:[#allocation9 + $0xc] sm:$0x4] }
 0x4d5   :  { %v10104_v61 = vsel %vm17922_vm5, 0, %v10103_v6 }
 0x4d6   :  { %10105 = vst [vmem:[#allocation9 + $0xc] sm:$0x4] %v10104_v61  ;;  %v10118_v61 = vld [vmem:[#allocation9 + $0x20] sm:$0x4] }
 0x4da   :  { %v14205_v7 = vpop.f32.mrb[12].mxu1 }
 0x4db   :  { %v14206_v5 = vpop.f32.mrb[13].mxu1 }
 0x4dc   :  { %v17942_v56 = vadd.f32 %v14206_v5, %v14205_v7  ;;  %v14208_v33 = vpop.f32.mrb[14].mxu1  ;;  %v10061_v7 = vld [vmem:[#allocation9 + $0x8] sm:$0x1] }
 0x4dd   :  { %v14209_v53 = vpop.f32.mrb[15].mxu1 }
 0x4de   :  { %v17944_v60 = vadd.f32 %v14209_v53, %v14208_v33  ;;  %v13909_v33 = vld.sshfl [vmem:[#allocation9 + $0x14] sm:$0x13 pattern:$0x76325410]  ;;  %v10062_v53 = vsel %vm17909_vm6, 0, %v10061_v7 }
 0x4df   :  { %v11137_v21 = vcombine.high %v13909_v33, %v13909_v33  ;;  %10063 = vst [vmem:[#allocation9 + $0x8] sm:$0x1] %v10062_v53  ;;  %v11213_v24 = vshrl.u32 %v13909_v33, 16  ;;  %v11216_v41 = vshll.u32 %v13909_v33, 16  ;;  %v11275_v33 = vor.u32 %v11274_v25, %v11271_v15 }
 0x4e0   :  { %v11377_v53 = vcombine.high %v13921_v17, %v13921_v17 }
 0x4e1   :  { %v11222_v63 = vshll.u32 %v11137_v21, 16  ;;  %v11215_v52 = vrot.slane %v11213_v24, 6  ;;  %v11218_v16 = vrot.slane %v11216_v41, 7  ;;  %v10101_v21 = vsel %vm17922_vm5, 0, %v10100_v19 }
 0x4e2   :  { %v11276_v11 = vrot.slane %v11275_v33, 2  ;;  %v11393_v24 = vsel %vm17956_vm4, %v13925_v1, %v11392_v18  ;;  %v11408_v41 = vrot.slane %v11377_v53, 7  ;;  %10102 = vst [vmem:[#allocation9 + $0x8] sm:$0x4] %v10101_v21  ;;  %v10115_v33 = vld [vmem:[#allocation9 + $0x1c] sm:$0x4] }
 0x4e3   :  { %v11224_v30 = vrot.slane %v11222_v63, 7  ;;  %v11219_v31 = vor.u32 %v11218_v16, %v11215_v52  ;;  %11421 = vst [vmem:[#allocation10 + $0x46] sm:$0x3] %v11393_v24  ;;  %v10065_v63 = vsel %vm17909_vm6, 0, %v10064_v34  ;;  %v10067_v52 = vld [vmem:[#allocation9 + $0x10] sm:$0x1] }
 0x4e4   :  { %v11281_v46 = vsel %vm17946_vm0, %v11276_v11, %v11280_v0  ;;  %10066 = vst [vmem:[#allocation9 + $0xc] sm:$0x1] %v10065_v63  ;;  %v10106_v16 = vld [vmem:[#allocation9 + $0x10] sm:$0x4]  ;;  %v10068_v15 = vsel %vm17909_vm6, 0, %v10067_v52  ;;  %v10119_v52 = vsel %vm17922_vm5, 0, %v10118_v61 }
 0x4e5   :  { %v11220_v57 = vrot.slane %v11219_v31, 2  ;;  %11297 = vst [vmem:[#allocation10 + $0x8c] sm:$0x3] %v11281_v46  ;;  %v10107_v32 = vsel %vm17922_vm5, 0, %v10106_v16  ;;  %10069 = vst [vmem:[#allocation9 + $0x10] sm:$0x1] %v10068_v15 }
 0x4e6   :  { %10108 = vst [vmem:[#allocation9 + $0x10] sm:$0x4] %v10107_v32  ;;  %v10079_v63 = vld [vmem:[#allocation9 + $0x20] sm:$0x1]  ;;  %10120 = vst [vmem:[#allocation9 + $0x20] sm:$0x4] %v10119_v52 }
 0x4e7   :  { %v11225_v59 = vsel %vm17946_vm0, %v11220_v57, %v11224_v30 }
 0x4e8   :  { %11293 = vst [vmem:[#allocation10 + $0x44] sm:$0x3] %v11225_v59 }
 0x4f7   :  { %v14211_v40 = vpop.f32.mrb[16].mxu1 }
 0x4f8   :  { %v14212_v8 = vpop.f32.mrb[17].mxu1 }
 0x4f9   :  { %v17968_v22 = vadd.f32 %v14212_v8, %v14211_v40  ;;  %v14214_v37 = vpop.f32.mrb[18].mxu1  ;;  %v11409_v40 = vsel %vm17956_vm4, %v13929_v39, %v11408_v41  ;;  %v10116_v39 = vsel %vm17922_vm5, 0, %v10115_v33 }
 0x4fa   :  { %v14215_v7 = vpop.f32.mrb[19].mxu1  ;;  %11425 = vst [vmem:[#allocation10 + $0x8e] sm:$0x3] %v11409_v40  ;;  %10117 = vst [vmem:[#allocation9 + $0x1c] sm:$0x4] %v10116_v39  ;;  %v10080_v40 = vsel %vm17909_vm6, 0, %v10079_v63 }
 0x4fb   :  { %v17970_v43 = vadd.f32 %v14215_v7, %v14214_v37  ;;  %v10076_v7 = vld [vmem:[#allocation9 + $0x1c] sm:$0x1]  ;;  %10081 = vst [vmem:[#allocation9 + $0x20] sm:$0x1] %v10080_v40  ;;  %v10121_v63 = vld [vmem:[#allocation9 + $0x24] sm:$0x4] }
 0x4fc   :  { %v10077_v18 = vsel %vm17909_vm6, 0, %v10076_v7 }
 0x4fd   :  { %10078 = vst [vmem:[#allocation9 + $0x1c] sm:$0x1] %v10077_v18 }
 0x514   :  { %v14217_v8 = vpop.f32.mrb[20].mxu1 }
 0x515   :  { %v14218_v30 = vpop.f32.mrb[21].mxu1 }
 0x516   :  { %v17990_v25 = vadd.f32 %v14218_v30, %v14217_v8  ;;  %v14220_v4 = vpop.f32.mrb[22].mxu1 }
 0x517   :  { %v14221_v1 = vpop.f32.mrb[23].mxu1 }
 0x518   :  { %v17992_v19 = vadd.f32 %v14221_v1, %v14220_v4  ;;  %v18014_v4 = vld [vmem:[%s18574_s7 + $0x2] ss:$0 sm:$0xff] }
 0x51c   :  { %v14223_v37 = vpop.f32.mrb[24].mxu1 }
 0x51d   :  { %v14224_v31 = vpop.f32.mrb[25].mxu1 }
 0x51e   :  { %v17994_v0 = vadd.f32 %v14224_v31, %v14223_v37  ;;  %v14226_v17 = vpop.f32.mrb[26].mxu1  ;;  %v18021_v31 = vld [vmem:[%s18574_s7 + $0x3] ss:$0 sm:$0xff] }
 0x51f   :  { %v14227_v53 = vpop.f32.mrb[27].mxu1 }
 0x520   :  { %v18000_v57 = vadd.f32 %v14227_v53, %v14226_v17 }
 0x524   :  { %v14229_v21 = vpop.f32.mrb[28].mxu1 }
 0x525   :  { %v14230_v11 = vpop.f32.mrb[29].mxu1 }
 0x526   :  { %v18002_v24 = vadd.f32 %v14230_v11, %v14229_v21  ;;  %v14232_v41 = vpop.f32.mrb[30].mxu1 }
 0x527   :  { %v14233_v34 = vpop.f32.mrb[31].mxu1 }
 0x528   :  { %v18004_v6 = vadd.f32 %v14233_v34, %v14232_v41 }
 0x52c   :  { %v14251_v59 = vpop.f32.mrb[32].mxu1 }
 0x52d   :  { %v14252_v46 = vpop.f32.mrb[33].mxu1 }
 0x52e   :  { %v14253_v16 = vadd.f32 %v14252_v46, %v14251_v59  ;;  %v14254_v15 = vpop.f32.mrb[34].mxu1  ;;  %v10082_v59 = vld [vmem:[#allocation9 + $0x24] sm:$0x1] }
 0x52f   :  { %v14255_v32 = vpop.f32.mrb[35].mxu1 }
 0x530   :  { %v9167_v8 = vadd.f32 %v14253_v16, %v17891_v48  ;;  %v14256_v30 = vadd.f32 %v14255_v32, %v14254_v15  ;;  %v10083_v16 = vsel %vm17909_vm6, 0, %v10082_v59  ;;  %v10122_v15 = vsel %vm17922_vm5, 0, %v10121_v63 }
 0x531   :  { %10084 = vst [vmem:[#allocation9 + $0x24] sm:$0x1] %v10083_v16  ;;  %10123 = vst [vmem:[#allocation9 + $0x24] sm:$0x4] %v10122_v15 }
 0x532   :  { %v9264_v1 = vadd.f32 %v17684_v26, %v9167_v8  ;;  %v9170_v37 = vadd.f32 %v14256_v30, %v17893_v49 }
 0x534   :  { %v9328_v17 = vmul.f32 %v18014_v4, %v9264_v1  ;;  %v9267_v7 = vadd.f32 %v17705_v55, %v9170_v37  ;;  %v14257_v48 = vpop.f32.mrb[36].mxu1 }
 0x535   :  { %v14258_v33 = vpop.f32.mrb[37].mxu1 }
 0x536   :  { %v9344_v53 = vadd.f32 %v9328_v17, %v18021_v31  ;;  %v9329_v18 = vmul.f32 %v18014_v4, %v9267_v7  ;;  %v14259_v39 = vadd.f32 %v14258_v33, %v14257_v48  ;;  %v14260_v21 = vpop.f32.mrb[38].mxu1 }
 0x537   :  { %v14261_v26 = vpop.f32.mrb[39].mxu1 }
 0x538   :  { %v9360_v11 = vmax.f32 %v9344_v53, 0.0  ;;  %v9345_v49 = vadd.f32 %v9329_v18, %v18021_v31  ;;  %v9175_v41 = vadd.f32 %v14259_v39, %v17899_v13  ;;  %v14262_v34 = vadd.f32 %v14261_v26, %v14260_v21 }
 0x53a   :  { %v9392_v61 = vcombine.high %v9360_v11, %v9360_v11  ;;  %v9399_v55 = vrot.slane %v9360_v11, %v16385_v20  ;;  %v9361_v46 = vmax.f32 %v9345_v49, 0.0  ;;  %v9272_v40 = vadd.f32 %v17678_v44, %v9175_v41 }
 0x53b   :  { %v9178_v52 = vadd.f32 %v14262_v34, %v17905_v29 }
 0x53c   :  { %v9406_v32 = vrot.slane %v9392_v61, %v16385_v20  ;;  %v9407_v13 = vcombine.high %v9399_v55, %v9399_v55  ;;  %v13762_v8 = vrot.slane %v9399_v55, 9  ;;  %v9409_v30 = vcombine.high %v9361_v46, %v9361_v46  ;;  %v14263_v1 = vpop.f32.mrb[40].mxu1 }
 0x53d   :  { %v9416_v37 = vrot.slane %v9361_v46, %v16385_v20  ;;  %v9330_v44 = vmul.f32 %v18014_v4, %v9272_v40  ;;  %v9275_v29 = vadd.f32 %v17690_v54, %v9178_v52  ;;  %v14264_v17 = vpop.f32.mrb[41].mxu1 }
 0x53e   :  { %v9408_v7 = vcombine.high %v9406_v32, %v9406_v32  ;;  %v13763_v48 = vrot.slane %v9407_v13, 9  ;;  %v13764_v33 = vrot.slane %v9406_v32, 9  ;;  %v9920_v53 = vmax.f32 %v9399_v55, %v13762_v8  ;;  %v18040_v18 = vpop.f32.mrb[42].mxu1 }
 0x53f   :  { %v9423_v39 = vrot.slane %v9409_v30, %v16385_v20  ;;  %v9424_v21 = vcombine.high %v9416_v37, %v9416_v37  ;;  %v13766_v26 = vrot.slane %v9416_v37, 9  ;;  %v9346_v11 = vadd.f32 %v9330_v44, %v18021_v31  ;;  %v18044_v49 = vpop.f32.mrb[43].mxu1 }
 0x540   :  { %v13765_v41 = vrot.slane %v9408_v7, 9  ;;  %v9921_v34 = vmax.f32 %v9407_v13, %v13763_v48  ;;  %v9922_v59 = vmax.f32 %v9406_v32, %v13764_v33  ;;  %v9331_v54 = vmul.f32 %v18014_v4, %v9275_v29 }
 0x541   :  { %v9425_v63 = vcombine.high %v9423_v39, %v9423_v39  ;;  %v13767_v61 = vrot.slane %v9424_v21, 9  ;;  %v13768_v46 = vrot.slane %v9423_v39, 9  ;;  %v9924_v40 = vmax.f32 %v9416_v37, %v13766_v26 }
 0x542   :  { %v9923_v55 = vmax.f32 %v9408_v7, %v13765_v41  ;;  %v9362_v52 = vmax.f32 %v9346_v11, 0.0  ;;  %v9347_v16 = vadd.f32 %v9331_v54, %v18021_v31  ;;  %v14265_v15 = vadd.f32 %v14264_v17, %v14263_v1 }
 0x543   :  { %v13769_v8 = vrot.slane %v9425_v63, 9  ;;  %v9925_v30 = vmax.f32 %v9424_v21, %v13767_v61  ;;  %v9926_v35 = vmax.f32 %v9423_v39, %v13768_v46  ;;  %v9984_v44 = vmax.f32 %v9920_v53, %v9924_v40 }
 0x544   :  { %v9426_v9 = vcombine.high %v9362_v52, %v9362_v52  ;;  %v9433_v13 = vrot.slane %v9362_v52, %v16385_v20  ;;  %v9363_v32 = vmax.f32 %v9347_v16, 0.0  ;;  %v9183_v29 = vadd.f32 %v14265_v15, %v17926_v12 }
 0x545   :  { %v9927_v48 = vmax.f32 %v9425_v63, %v13769_v8  ;;  %v9985_v33 = vmax.f32 %v9921_v34, %v9925_v30  ;;  %v9986_v51 = vmax.f32 %v9922_v59, %v9926_v35  ;;  %v14104_v37 = vpack.c.bf16 %v9984_v44, %v9984_v44 }
 0x546   :  { %v9440_v7 = vrot.slane %v9426_v9, %v16385_v20  ;;  %v9441_v26 = vcombine.high %v9433_v13, %v9433_v13  ;;  %v13770_v11 = vrot.slane %v9433_v13, 9  ;;  %v9443_v1 = vcombine.high %v9363_v32, %v9363_v32 }
 0x547   :  { %v9987_v17 = vmax.f32 %v9923_v55, %v9927_v48  ;;  %v14105_v21 = vpack.c.bf16 %v9985_v33, %v9985_v33  ;;  %v14106_v39 = vpack.c.bf16 %v9986_v51, %v9986_v51  ;;  %v10226_v53 = vunpack.c.l.b16 %v14104_v37 }
 0x548   :  { %v9442_v41 = vcombine.high %v9440_v7, %v9440_v7  ;;  %v13771_v54 = vrot.slane %v9441_v26, 9  ;;  %v13772_v61 = vrot.slane %v9440_v7, 9  ;;  %v9928_v46 = vmax.f32 %v9433_v13, %v13770_v11 }
 0x549   :  { %v14107_v40 = vpack.c.bf16 %v9987_v17, %v9987_v17  ;;  %v10227_v52 = vunpack.c.l.b16 %v14105_v21  ;;  %v10228_v12 = vunpack.c.l.b16 %v14106_v39  ;;  %v10258_v63 = vrot.slane %v10226_v53, 7 }
 0x54a   :  { %v13773_v34 = vrot.slane %v9442_v41, 9  ;;  %v9929_v35 = vmax.f32 %v9441_v26, %v13771_v54  ;;  %v9930_v59 = vmax.f32 %v9440_v7, %v13772_v61  ;;  %v9450_v9 = vrot.slane %v9363_v32, %v16385_v20 }
 0x54b   :  { %v10229_v16 = vunpack.c.l.b16 %v14107_v40  ;;  %v10259_v15 = vrot.slane %v10227_v52, 6  ;;  %v10261_v8 = vrot.slane %v10228_v12, 5  ;;  %v9457_v55 = vrot.slane %v9443_v1, %v16385_v20 }
 0x54c   :  { %v9931_v30 = vmax.f32 %v9442_v41, %v13773_v34  ;;  %v9458_v44 = vcombine.high %v9450_v9, %v9450_v9  ;;  %v13774_v48 = vrot.slane %v9450_v9, 9  ;;  %v9280_v13 = vadd.f32 %v17856_v45, %v9183_v29  ;;  %v10333_v29 = vld [vmem:[#allocation9 + $0x4] sm:$0x7] }
 0x54d   :  { %v14269_v51 = vpop.f32.mrb[44].mxu1  ;;  %v10260_v37 = vsel %vm6491_vm11, %v10259_v15, %v10258_v63  ;;  %v10263_v11 = vrot.slane %v10229_v16, 4  ;;  %v9459_v17 = vcombine.high %v9457_v55, %v9457_v55  ;;  %v13776_v26 = vrot.slane %v9457_v55, 9 }
 0x54e   :  { %v14270_v33 = vpop.f32.mrb[45].mxu1  ;;  %v10262_v32 = vsel %vm6494_vm12, %v10261_v8, %v10260_v37  ;;  %v13775_v21 = vrot.slane %v9458_v44, 9  ;;  %v9932_v39 = vmax.f32 %v9450_v9, %v13774_v48  ;;  %v9332_v1 = vmul.f32 %v18014_v4, %v9280_v13 }
 0x54f   :  { %v18055_v7 = vpop.f32.mrb[46].mxu1  ;;  %v10264_v41 = vsel %vm6497_vm13, %v10263_v11, %v10262_v32  ;;  %v13777_v54 = vrot.slane %v9459_v17, 9  ;;  %v9934_v61 = vmax.f32 %v9457_v55, %v13776_v26  ;;  %v14268_v40 = vadd.f32 %v18044_v49, %v18040_v18 }
 0x550   :  { %v14273_v53 = vpop.f32.mrb[47].mxu1  ;;  %v10314_v52 = vpack.c.b16 %v10264_v41, %v10264_v41  ;;  %v9933_v12 = vmax.f32 %v9458_v44, %v13775_v21  ;;  %v9988_v63 = vmax.f32 %v9928_v46, %v9932_v39  ;;  %v9348_v34 = vadd.f32 %v9332_v1, %v18021_v31 }
 0x551   :  { %v9935_v9 = vmax.f32 %v9459_v17, %v13777_v54  ;;  %v9990_v16 = vmax.f32 %v9930_v59, %v9934_v61  ;;  %v9186_v15 = vadd.f32 %v14268_v40, %v17934_v38  ;;  %v14271_v8 = vadd.f32 %v14270_v33, %v14269_v51 }
 0x552   :  { %v10334_v48 = vsel %vm18062_vm9, %v10314_v52, %v10333_v29  ;;  %v9989_v13 = vmax.f32 %v9929_v35, %v9933_v12  ;;  %v14108_v37 = vpack.c.bf16 %v9988_v63, %v9988_v63  ;;  %v9364_v11 = vmax.f32 %v9348_v34, 0.0 }
 0x553   :  { %10335 = vst [vmem:[#allocation9 + $0x4] sm:$0x7] %v10334_v48  ;;  %v9991_v55 = vmax.f32 %v9931_v30, %v9935_v9  ;;  %v14110_v26 = vpack.c.bf16 %v9990_v16, %v9990_v16  ;;  %v9283_v18 = vadd.f32 %v17861_v62, %v9186_v15  ;;  %v9191_v49 = vadd.f32 %v14271_v8, %v17942_v56 }
 0x554   :  { %v14109_v44 = vpack.c.bf16 %v9989_v13, %v9989_v13  ;;  %v10230_v59 = vunpack.c.l.b16 %v14108_v37  ;;  %v9460_v17 = vcombine.high %v9364_v11, %v9364_v11  ;;  %v9467_v38 = vrot.slane %v9364_v11, %v16385_v20  ;;  %v10336_v37 = vld [vmem:[#allocation9 + $0x8] sm:$0x7] }
 0x555   :  { %v18074_v46 = vpop.f32.mrb[48].mxu1  ;;  %v14111_v33 = vpack.c.bf16 %v9991_v55, %v9991_v55  ;;  %v10232_v35 = vunpack.c.l.b16 %v14110_v26  ;;  %v9333_v32 = vmul.f32 %v18014_v4, %v9283_v18  ;;  %v9288_v30 = vadd.f32 %v17854_v58, %v9191_v49 }
 0x556   :  { %v18077_v51 = vpop.f32.mrb[49].mxu1  ;;  %v10231_v62 = vunpack.c.l.b16 %v14109_v44  ;;  %v10265_v39 = vrot.slane %v10230_v59, 7  ;;  %v9474_v56 = vrot.slane %v9460_v17, %v16385_v20  ;;  %v9475_v1 = vcombine.high %v9467_v38, %v9467_v38 }
 0x557   :  { %v18081_v21 = vpop.f32.mrb[50].mxu1  ;;  %v10233_v29 = vunpack.c.l.b16 %v14111_v33  ;;  %v10268_v54 = vrot.slane %v10232_v35, 5  ;;  %v13778_v61 = vrot.slane %v9467_v38, 9  ;;  %v9349_v40 = vadd.f32 %v9333_v32, %v18021_v31 }
 0x558   :  { %v18084_v41 = vpop.f32.mrb[51].mxu1  ;;  %v10266_v52 = vrot.slane %v10231_v62, 6  ;;  %v9476_v12 = vcombine.high %v9474_v56, %v9474_v56  ;;  %v13779_v63 = vrot.slane %v9475_v1, 9  ;;  %v13780_v34 = vrot.slane %v9474_v56, 9 }
 0x559   :  { %v10270_v9 = vrot.slane %v10233_v29, 4  ;;  %v18087_v58 = vmax.f32 %v9467_v38, %v13778_v61  ;;  %v9365_v16 = vmax.f32 %v9349_v40, 0.0  ;;  %v9334_v15 = vmul.f32 %v18014_v4, %v9288_v30 }
 0x55a   :  { %v10358_v8 = vld [vmem:[#allocation9 + $0x4] sm:$0x3]  ;;  %v10267_v13 = vsel %vm6491_vm11, %v10266_v52, %v10265_v39  ;;  %v18091_v11 = vmax.f32 %v9475_v1, %v13779_v63  ;;  %v18093_v55 = vmax.f32 %v9474_v56, %v13780_v34  ;;  %v14274_v26 = vadd.f32 %v14273_v53, %v18055_v7 }
 0x55b   :  { %v13859_v48 = vld.sshfl [vmem:[#allocation9 + $0x4] sm:$0x13 pattern:$0x76325410]  ;;  %10366 = vst [vmem:[#allocation10 + $0x12] sm:$0x3] %v10358_v8  ;;  %v10269_v17 = vsel %vm6494_vm12, %v10268_v54, %v10267_v13  ;;  %v9477_v40 = vcombine.high %v9365_v16, %v9365_v16  ;;  %v9484_v54 = vrot.slane %v9365_v16, %v16385_v20  ;;  %v9350_v8 = vadd.f32 %v9334_v15, %v18021_v31 }
 0x55c   :  { %v10404_v18 = vcombine.high %v13859_v48, %v13859_v48  ;;  %v10475_v49 = vshrl.u32 %v13859_v48, 16  ;;  %v10478_v44 = vshll.u32 %v13859_v48, 16  ;;  %v13867_v59 = vld.sshfl [vmem:[#allocation9 + $0x4] sm:$0x12 pattern:$0x76325410]  ;;  %v10271_v32 = vsel %vm6497_vm13, %v10270_v9, %v10269_v17 }
 0x55d   :  { %v10619_v38 = vcombine.high %v13867_v59, %v13867_v59  ;;  %v13875_v33 = vrot.slane %v13867_v59, 9  ;;  %v10721_v35 = vld [vmem:[#allocation9 + $0x4] sm:$0x3]  ;;  %v13781_v30 = vrot.slane %v9476_v12, 9  ;;  %v18098_v62 = vpop.f32.mrb[52].mxu1  ;;  %v10315_v7 = vpack.c.b16 %v10271_v32, %v10271_v32 }
 0x55e   :  { %v10477_v39 = vrot.slane %v10475_v49, 6  ;;  %v10480_v56 = vrot.slane %v10478_v44, 7  ;;  %v10484_v1 = vshll.u32 %v10404_v18, 16  ;;  %10729 = vst [vmem:[#allocation10 + $0x6] sm:$0x3] %v10721_v35  ;;  %v18100_v53 = vpop.f32.mrb[53].mxu1  ;;  %v9492_v18 = vcombine.high %v9484_v54, %v9484_v54 }
 0x55f   :  { %v10679_v29 = vrot.slane %v10619_v38, 7  ;;  %v9939_v61 = vmax.f32 %v9476_v12, %v13781_v30  ;;  %v18103_v52 = vpop.f32.mrb[54].mxu1  ;;  %v10337_v9 = vsel %vm18062_vm9, %v10315_v7, %v10336_v37  ;;  %v9491_v12 = vrot.slane %v9477_v40, %v16385_v20 }
 0x560   :  { %v10481_v63 = vor.u32 %v10480_v56, %v10477_v39  ;;  %v10486_v34 = vrot.slane %v10484_v1, 7  ;;  %v18108_v48 = vpop.f32.mrb[55].mxu1  ;;  %10338 = vst [vmem:[#allocation9 + $0x8] sm:$0x7] %v10337_v9  ;;  %v13782_v49 = vrot.slane %v9484_v54, 9  ;;  %v9366_v44 = vmax.f32 %v9350_v8, 0.0 }
 0x561   :  { %v10680_v13 = vsel %vm17956_vm4, %v13875_v33, %v10679_v29  ;;  %v9194_v59 = vadd.f32 %v14274_v26, %v17944_v60  ;;  %v14277_v37 = vadd.f32 %v18077_v51, %v18074_v46  ;;  %v9493_v15 = vcombine.high %v9491_v12, %v9491_v12 }
 0x562   :  { %v10482_v16 = vrot.slane %v10481_v63, 2  ;;  %10714 = vst [vmem:[#allocation10 + $0x16] sm:$0x3] %v10680_v13  ;;  %11065 = vst [vmem:[#allocation10 + $0xa] sm:$0x3] %v10680_v13  ;;  %v13783_v17 = vrot.slane %v9492_v18, 9  ;;  %v9940_v35 = vmax.f32 %v9484_v54, %v13782_v49  ;;  %v9494_v32 = vcombine.high %v9366_v44, %v9366_v44 }
 0x563   :  { %v13784_v38 = vrot.slane %v9491_v12, 9  ;;  %v9501_v30 = vrot.slane %v9366_v44, %v16385_v20  ;;  %v9291_v39 = vadd.f32 %v17858_v10, %v9194_v59  ;;  %v13785_v60 = vrot.slane %v9493_v15, 9 }
 0x564   :  { %v10487_v33 = vsel %vm17946_vm0, %v10482_v16, %v10486_v34  ;;  %v9941_v26 = vmax.f32 %v9492_v18, %v13783_v17  ;;  %v9992_v46 = vmax.f32 %v18087_v58, %v9940_v35  ;;  %v18126_v7 = vrot.slane %v9494_v32, %v16385_v20 }
 0x565   :  { %v18120_v56 = vpop.f32.mrb[56].mxu1  ;;  %10581 = vst [vmem:[#allocation10 + $0x14] sm:$0x3] %v10487_v33  ;;  %10937 = vst [vmem:[#allocation10 + $0x8] sm:$0x3] %v10487_v33  ;;  %v9942_v1 = vmax.f32 %v9491_v12, %v13784_v38  ;;  %v9509_v29 = vcombine.high %v9501_v30, %v9501_v30  ;;  %v13786_v40 = vrot.slane %v9501_v30, 9  ;;  %v9335_v54 = vmul.f32 %v18014_v4, %v9291_v39 }
 0x566   :  { %v18123_v51 = vpop.f32.mrb[57].mxu1  ;;  %v9943_v10 = vmax.f32 %v9493_v15, %v13785_v60  ;;  %v9993_v34 = vmax.f32 %v18091_v11, %v9941_v26  ;;  %v14112_v8 = vpack.c.bf16 %v9992_v46, %v9992_v46  ;;  %v9510_v18 = vcombine.high %v18126_v7, %v18126_v7 }
 0x567   :  { %v18129_v63 = vpop.f32.mrb[58].mxu1  ;;  %v9994_v9 = vmax.f32 %v18093_v55, %v9942_v1  ;;  %v10359_v58 = vld [vmem:[#allocation9 + $0x8] sm:$0x3]  ;;  %v18137_v49 = vmax.f32 %v9501_v30, %v13786_v40  ;;  %v9351_v16 = vadd.f32 %v9335_v54, %v18021_v31  ;;  %v9199_v44 = vadd.f32 %v14277_v37, %v17968_v22 }
 0x568   :  { %v18133_v13 = vpop.f32.mrb[59].mxu1  ;;  %v13860_v12 = vld.sshfl [vmem:[#allocation9 + $0x8] sm:$0x13 pattern:$0x76325410]  ;;  %v9995_v55 = vmax.f32 %v9939_v61, %v9943_v10  ;;  %v14113_v39 = vpack.c.bf16 %v9993_v34, %v9993_v34  ;;  %v10234_v22 = vunpack.c.l.b16 %v14112_v8 }
 0x569   :  { %10367 = vst [vmem:[#allocation10 + $0x24] sm:$0x3] %v10359_v58  ;;  %v10412_v59 = vcombine.high %v13860_v12, %v13860_v12  ;;  %v10489_v15 = vshrl.u32 %v13860_v12, 16  ;;  %v10492_v11 = vshll.u32 %v13860_v12, 16  ;;  %v10722_v33 = vld [vmem:[#allocation9 + $0x8] sm:$0x3]  ;;  %v14114_v60 = vpack.c.bf16 %v9994_v9, %v9994_v9 }
 0x56a   :  { %v13868_v17 = vld.sshfl [vmem:[#allocation9 + $0x8] sm:$0x12 pattern:$0x76325410]  ;;  %10730 = vst [vmem:[#allocation10 + $0x18] sm:$0x3] %v10722_v33  ;;  %v14115_v46 = vpack.c.bf16 %v9995_v55, %v9995_v55  ;;  %v10235_v37 = vunpack.c.l.b16 %v14113_v39 }
 0x56b   :  { %v10627_v38 = vcombine.high %v13868_v17, %v13868_v17  ;;  %v13876_v35 = vrot.slane %v13868_v17, 9  ;;  %v11074_v32 = vld [vmem:[#allocation9 + $0x8] sm:$0x3]  ;;  %v10491_v26 = vrot.slane %v10489_v15, 6  ;;  %v10494_v1 = vrot.slane %v10492_v11, 7 }
 0x56c   :  { %v10498_v30 = vshll.u32 %v10412_v59, 16  ;;  %11082 = vst [vmem:[#allocation10 + $0xc] sm:$0x3] %v11074_v32  ;;  %v10236_v54 = vunpack.c.l.b16 %v14114_v60  ;;  %v10237_v10 = vunpack.c.l.b16 %v14115_v46  ;;  %v13787_v17 = vrot.slane %v9509_v29, 9 }
 0x56d   :  { %v10683_v40 = vrot.slane %v10627_v38, 7  ;;  %v10495_v12 = vor.u32 %v10494_v1, %v10491_v26  ;;  %v10272_v9 = vrot.slane %v10234_v22, 7  ;;  %v10273_v59 = vrot.slane %v10235_v37, 6  ;;  %v10339_v37 = vld [vmem:[#allocation9 + $0xc] sm:$0x7] }
 0x56e   :  { %v10500_v61 = vrot.slane %v10498_v30, 7  ;;  %v10275_v15 = vrot.slane %v10236_v54, 5  ;;  %v10277_v8 = vrot.slane %v10237_v10, 4  ;;  %v13788_v38 = vrot.slane %v18126_v7, 9 }
 0x56f   :  { %v10684_v34 = vsel %vm17956_vm4, %v13876_v35, %v10683_v40  ;;  %v10496_v55 = vrot.slane %v10495_v12, 2  ;;  %v13789_v33 = vrot.slane %v9510_v18, 9  ;;  %v10274_v39 = vsel %vm6491_vm11, %v10273_v59, %v10272_v9 }
 0x570   :  { %10715 = vst [vmem:[#allocation10 + $0x28] sm:$0x3] %v10684_v34  ;;  %11066 = vst [vmem:[#allocation10 + $0x1c] sm:$0x3] %v10684_v34  ;;  %v9945_v60 = vmax.f32 %v9509_v29, %v13787_v17  ;;  %v9367_v26 = vmax.f32 %v9351_v16, 0.0  ;;  %v9296_v35 = vadd.f32 %v17885_v27, %v9199_v44  ;;  %v10276_v30 = vsel %vm6494_vm12, %v10275_v15, %v10274_v39 }
 0x571   :  { %v18141_v58 = vpop.f32.mrb[60].mxu1  ;;  %11418 = vst [vmem:[#allocation10 + $0x10] sm:$0x3] %v10684_v34  ;;  %v10501_v1 = vsel %vm17946_vm0, %v10496_v55, %v10500_v61  ;;  %v9946_v46 = vmax.f32 %v18126_v7, %v13788_v38  ;;  %v9947_v40 = vmax.f32 %v9510_v18, %v13789_v33  ;;  %v10278_v22 = vsel %vm6497_vm13, %v10277_v8, %v10276_v30 }
 0x572   :  { %v18143_v14 = vpop.f32.mrb[61].mxu1  ;;  %10582 = vst [vmem:[#allocation10 + $0x26] sm:$0x3] %v10501_v1  ;;  %10938 = vst [vmem:[#allocation10 + $0x1a] sm:$0x3] %v10501_v1  ;;  %v9511_v54 = vcombine.high %v9367_v26, %v9367_v26  ;;  %v9518_v29 = vrot.slane %v9367_v26, %v16385_v20  ;;  %v9336_v16 = vmul.f32 %v18014_v4, %v9296_v35 }
 0x573   :  { %v18147_v11 = vpop.f32.mrb[62].mxu1  ;;  %11290 = vst [vmem:[#allocation10 + $0xe] sm:$0x3] %v10501_v1  ;;  %v10316_v27 = vpack.c.b16 %v10278_v22, %v10278_v22  ;;  %v14280_v44 = vadd.f32 %v18084_v41, %v18081_v21  ;;  %v14283_v12 = vadd.f32 %v18100_v53, %v18098_v62  ;;  %v14286_v7 = vadd.f32 %v18108_v48, %v18103_v52 }
 0x574   :  { %v18150_v32 = vpop.f32.mrb[63].mxu1  ;;  %v9525_v18 = vrot.slane %v9511_v54, %v16385_v20  ;;  %v9526_v61 = vcombine.high %v9518_v29, %v9518_v29  ;;  %v13790_v10 = vrot.slane %v9518_v29, 9  ;;  %v9352_v17 = vadd.f32 %v9336_v16, %v18021_v31 }
 0x575   :  { %v10340_v34 = vsel %vm18062_vm9, %v10316_v27, %v10339_v37  ;;  %v9202_v9 = vadd.f32 %v14280_v44, %v17970_v43  ;;  %v9207_v59 = vadd.f32 %v14283_v12, %v17990_v25  ;;  %v9210_v21 = vadd.f32 %v14286_v7, %v17992_v19 }
 0x576   :  { %10341 = vst [vmem:[#allocation9 + $0xc] sm:$0x7] %v10340_v34  ;;  %v9527_v41 = vcombine.high %v9525_v18, %v9525_v18  ;;  %v13791_v62 = vrot.slane %v9526_v61, 9  ;;  %v13792_v53 = vrot.slane %v9525_v18, 9  ;;  %v9948_v52 = vmax.f32 %v9518_v29, %v13790_v10 }
 0x577   :  { %v9368_v48 = vmax.f32 %v9352_v17, 0.0  ;;  %v9299_v15 = vadd.f32 %v17889_v50, %v9202_v9  ;;  %v9304_v55 = vadd.f32 %v17883_v23, %v9207_v59  ;;  %v9307_v8 = vadd.f32 %v17887_v28, %v9210_v21 }
 0x578   :  { %v13793_v38 = vrot.slane %v9527_v41, 9  ;;  %v9949_v33 = vmax.f32 %v9526_v61, %v13791_v62  ;;  %v9950_v39 = vmax.f32 %v9525_v18, %v13792_v53  ;;  %v9996_v43 = vmax.f32 %v18137_v49, %v9948_v52 }
 0x579   :  { %v9528_v25 = vcombine.high %v9368_v48, %v9368_v48  ;;  %v9535_v19 = vrot.slane %v9368_v48, %v16385_v20  ;;  %v9337_v26 = vmul.f32 %v18014_v4, %v9299_v15  ;;  %v9338_v35 = vmul.f32 %v18014_v4, %v9304_v55 }
 0x57a   :  { %v9951_v1 = vmax.f32 %v9527_v41, %v13793_v38  ;;  %v9997_v30 = vmax.f32 %v9945_v60, %v9949_v33  ;;  %v9998_v22 = vmax.f32 %v9946_v46, %v9950_v39  ;;  %v14116_v50 = vpack.c.bf16 %v9996_v43, %v9996_v43 }
 0x57b   :  { %v9542_v23 = vrot.slane %v9528_v25, %v16385_v20  ;;  %v9543_v37 = vcombine.high %v9535_v19, %v9535_v19  ;;  %v13794_v28 = vrot.slane %v9535_v19, 9  ;;  %v9353_v54 = vadd.f32 %v9337_v26, %v18021_v31 }
 0x57c   :  { %v9999_v29 = vmax.f32 %v9947_v40, %v9951_v1  ;;  %v14117_v16 = vpack.c.bf16 %v9997_v30, %v9997_v30  ;;  %v14118_v49 = vpack.c.bf16 %v9998_v22, %v9998_v22  ;;  %v10238_v27 = vunpack.c.l.b16 %v14116_v50 }
 0x57d   :  { %v10360_v44 = vld [vmem:[#allocation9 + $0xc] sm:$0x3]  ;;  %v9544_v7 = vcombine.high %v9542_v23, %v9542_v23  ;;  %v18183_v18 = vmax.f32 %v9535_v19, %v13794_v28  ;;  %v9354_v61 = vadd.f32 %v9338_v35, %v18021_v31  ;;  %v9339_v60 = vmul.f32 %v18014_v4, %v9307_v8 }
 0x57e   :  { %v13861_v12 = vld.sshfl [vmem:[#allocation9 + $0xc] sm:$0x13 pattern:$0x76325410]  ;;  %10368 = vst [vmem:[#allocation10 + $0x36] sm:$0x3] %v10360_v44  ;;  %v14119_v9 = vpack.c.bf16 %v9999_v29, %v9999_v29  ;;  %v10239_v62 = vunpack.c.l.b16 %v14117_v16  ;;  %v10240_v53 = vunpack.c.l.b16 %v14118_v49 }
 0x57f   :  { %v10420_v46 = vcombine.high %v13861_v12, %v13861_v12  ;;  %v10503_v10 = vshrl.u32 %v13861_v12, 16  ;;  %v10506_v17 = vshll.u32 %v13861_v12, 16  ;;  %v13869_v34 = vld.sshfl [vmem:[#allocation9 + $0xc] sm:$0x12 pattern:$0x76325410] }
 0x580   :  { %v10635_v59 = vcombine.high %v13869_v34, %v13869_v34  ;;  %v13877_v40 = vrot.slane %v13869_v34, 9  ;;  %v10723_v21 = vld [vmem:[#allocation9 + $0xc] sm:$0x3]  ;;  %v10241_v55 = vunpack.c.l.b16 %v14119_v9  ;;  %v10279_v8 = vrot.slane %v10238_v27, 7  ;;  %v10342_v27 = vld [vmem:[#allocation9 + $0x10] sm:$0x7] }
 0x581   :  { %v11075_v41 = vld [vmem:[#allocation9 + $0xc] sm:$0x3]  ;;  %v10505_v52 = vrot.slane %v10503_v10, 6  ;;  %v10508_v48 = vrot.slane %v10506_v17, 7  ;;  %v10512_v15 = vshll.u32 %v10420_v46, 16  ;;  %v10280_v33 = vrot.slane %v10239_v62, 6 }
 0x582   :  { %10731 = vst [vmem:[#allocation10 + $0x2a] sm:$0x3] %v10723_v21  ;;  %11083 = vst [vmem:[#allocation10 + $0x1e] sm:$0x3] %v11075_v41  ;;  %v10687_v38 = vrot.slane %v10635_v59, 7  ;;  %v10282_v39 = vrot.slane %v10240_v53, 5 }
 0x583   :  { %v10509_v43 = vor.u32 %v10508_v48, %v10505_v52  ;;  %v10514_v25 = vrot.slane %v10512_v15, 7  ;;  %v10284_v19 = vrot.slane %v10241_v55, 4  ;;  %v13795_v26 = vrot.slane %v9543_v37, 9 }
 0x584   :  { %v10688_v35 = vsel %vm17956_vm4, %v13877_v40, %v10687_v38  ;;  %v10281_v1 = vsel %vm6491_vm11, %v10280_v33, %v10279_v8  ;;  %v13796_v30 = vrot.slane %v9542_v23, 9  ;;  %v13797_v22 = vrot.slane %v9544_v7, 9 }
 0x585   :  { %v10510_v50 = vrot.slane %v10509_v43, 2  ;;  %10716 = vst [vmem:[#allocation10 + $0x3a] sm:$0x3] %v10688_v35  ;;  %11067 = vst [vmem:[#allocation10 + $0x2e] sm:$0x3] %v10688_v35  ;;  %v10283_v28 = vsel %vm6494_vm12, %v10282_v39, %v10281_v1  ;;  %v9953_v29 = vmax.f32 %v9543_v37, %v13795_v26  ;;  %v9369_v16 = vmax.f32 %v9353_v54, 0.0 }
 0x586   :  { %11419 = vst [vmem:[#allocation10 + $0x22] sm:$0x3] %v10688_v35  ;;  %v10285_v49 = vsel %vm6497_vm13, %v10284_v19, %v10283_v28  ;;  %v9954_v44 = vmax.f32 %v9542_v23, %v13796_v30  ;;  %v9955_v12 = vmax.f32 %v9544_v7, %v13797_v22  ;;  %v9370_v46 = vmax.f32 %v9354_v61, 0.0 }
 0x587   :  { %v10515_v10 = vsel %vm17946_vm0, %v10510_v50, %v10514_v25  ;;  %v10317_v17 = vpack.c.b16 %v10285_v49, %v10285_v49  ;;  %v9545_v34 = vcombine.high %v9369_v16, %v9369_v16  ;;  %v9552_v9 = vrot.slane %v9369_v16, %v16385_v20 }
 0x588   :  { %10583 = vst [vmem:[#allocation10 + $0x38] sm:$0x3] %v10515_v10  ;;  %10939 = vst [vmem:[#allocation10 + $0x2c] sm:$0x3] %v10515_v10  ;;  %v9562_v59 = vcombine.high %v9370_v46, %v9370_v46  ;;  %v9569_v37 = vrot.slane %v9370_v46, %v16385_v20  ;;  %v9355_v54 = vadd.f32 %v9339_v60, %v18021_v31 }
 0x589   :  { %11291 = vst [vmem:[#allocation10 + $0x20] sm:$0x3] %v10515_v10  ;;  %v14289_v23 = vadd.f32 %v18123_v51, %v18120_v56  ;;  %v10343_v7 = vsel %vm18062_vm9, %v10317_v17, %v10342_v27  ;;  %v9559_v61 = vrot.slane %v9545_v34, %v16385_v20  ;;  %v9560_v40 = vcombine.high %v9552_v9, %v9552_v9 }
 0x58a   :  { %v13798_v21 = vrot.slane %v9552_v9, 9  ;;  %10344 = vst [vmem:[#allocation9 + $0x10] sm:$0x7] %v10343_v7  ;;  %v9576_v41 = vrot.slane %v9562_v59, %v16385_v20  ;;  %v9577_v62 = vcombine.high %v9569_v37, %v9569_v37  ;;  %v13802_v53 = vrot.slane %v9569_v37, 9 }
 0x58b   :  { %v9371_v52 = vmax.f32 %v9355_v54, 0.0  ;;  %v9561_v48 = vcombine.high %v9559_v61, %v9559_v61  ;;  %v13799_v15 = vrot.slane %v9560_v40, 9  ;;  %v13800_v55 = vrot.slane %v9559_v61, 9 }
 0x58c   :  { %v9956_v60 = vmax.f32 %v9552_v9, %v13798_v21  ;;  %v9578_v38 = vcombine.high %v9576_v41, %v9576_v41  ;;  %v13803_v8 = vrot.slane %v9577_v62, 9  ;;  %v13804_v56 = vrot.slane %v9576_v41, 9 }
 0x58d   :  { %v18203_v51 = vmax.f32 %v9569_v37, %v13802_v53  ;;  %v13801_v33 = vrot.slane %v9561_v48, 9  ;;  %v9957_v39 = vmax.f32 %v9560_v40, %v13799_v15  ;;  %v9958_v43 = vmax.f32 %v9559_v61, %v13800_v55 }
 0x58e   :  { %v10000_v25 = vmax.f32 %v18183_v18, %v9956_v60  ;;  %v13805_v19 = vrot.slane %v9578_v38, 9  ;;  %v18206_v26 = vmax.f32 %v9577_v62, %v13803_v8  ;;  %v18208_v35 = vmax.f32 %v9576_v41, %v13804_v56 }
 0x58f   :  { %v9579_v1 = vcombine.high %v9371_v52, %v9371_v52  ;;  %v9959_v30 = vmax.f32 %v9561_v48, %v13801_v33  ;;  %v10001_v22 = vmax.f32 %v9953_v29, %v9957_v39  ;;  %v10002_v50 = vmax.f32 %v9954_v44, %v9958_v43 }
 0x590   :  { %v14120_v28 = vpack.c.bf16 %v10000_v25, %v10000_v25  ;;  %v18210_v16 = vmax.f32 %v9578_v38, %v13805_v19  ;;  %v9586_v49 = vrot.slane %v9371_v52, %v16385_v20  ;;  %v9215_v46 = vadd.f32 %v14289_v23, %v17994_v0 }
 0x591   :  { %v9593_v27 = vrot.slane %v9579_v1, %v16385_v20  ;;  %v10724_v10 = vld [vmem:[#allocation9 + $0x10] sm:$0x3]  ;;  %v10003_v17 = vmax.f32 %v9955_v12, %v9959_v30  ;;  %v14121_v34 = vpack.c.bf16 %v10001_v22, %v10001_v22  ;;  %v14122_v9 = vpack.c.bf16 %v10002_v50, %v10002_v50 }
 0x592   :  { %v13885_v18 = vld.sshfl [vmem:[#allocation9 + $0x10] sm:$0x13 pattern:$0x76325410]  ;;  %v10242_v59 = vunpack.c.l.b16 %v14120_v28  ;;  %10732 = vst [vmem:[#allocation10 + $0x3c] sm:$0x3] %v10724_v10  ;;  %v9594_v7 = vcombine.high %v9586_v49, %v9586_v49 }
 0x593   :  { %v10784_v37 = vcombine.high %v13885_v18, %v13885_v18  ;;  %v10860_v54 = vshrl.u32 %v13885_v18, 16  ;;  %v10863_v29 = vshll.u32 %v13885_v18, 16  ;;  %v13893_v44 = vld.sshfl [vmem:[#allocation9 + $0x10] sm:$0x12 pattern:$0x76325410]  ;;  %v14123_v41 = vpack.c.bf16 %v10003_v17, %v10003_v17 }
 0x594   :  { %v10992_v61 = vcombine.high %v13893_v44, %v13893_v44  ;;  %v13901_v40 = vrot.slane %v13893_v44, 9  ;;  %v11076_v21 = vld [vmem:[#allocation9 + $0x10] sm:$0x3]  ;;  %v10243_v62 = vunpack.c.l.b16 %v14121_v34  ;;  %v10244_v23 = vunpack.c.l.b16 %v14122_v9  ;;  %v10345_v28 = vld [vmem:[#allocation9 + $0x1c] sm:$0x7] }
 0x595   :  { %v10862_v53 = vrot.slane %v10860_v54, 6  ;;  %v10865_v52 = vrot.slane %v10863_v29, 7  ;;  %v10869_v0 = vshll.u32 %v10784_v37, 16  ;;  %11084 = vst [vmem:[#allocation10 + $0x30] sm:$0x3] %v11076_v21  ;;  %v10245_v48 = vunpack.c.l.b16 %v14123_v41 }
 0x596   :  { %v11039_v12 = vrot.slane %v10992_v61, 7  ;;  %v10286_v15 = vrot.slane %v10242_v59, 7  ;;  %v10287_v55 = vrot.slane %v10243_v62, 6  ;;  %v10289_v8 = vrot.slane %v10244_v23, 5 }
 0x597   :  { %v10866_v60 = vor.u32 %v10865_v52, %v10862_v53  ;;  %v10871_v38 = vrot.slane %v10869_v0, 7  ;;  %v9595_v56 = vcombine.high %v9593_v27, %v9593_v27  ;;  %v10291_v43 = vrot.slane %v10245_v48, 4 }
 0x598   :  { %v11040_v33 = vsel %vm17956_vm4, %v13901_v40, %v11039_v12  ;;  %v10288_v39 = vsel %vm6491_vm11, %v10287_v55, %v10286_v15  ;;  %v13806_v25 = vrot.slane %v9586_v49, 9  ;;  %v13807_v30 = vrot.slane %v9594_v7, 9 }
 0x599   :  { %v10867_v19 = vrot.slane %v10866_v60, 2  ;;  %11068 = vst [vmem:[#allocation10 + $0x40] sm:$0x3] %v11040_v33  ;;  %11420 = vst [vmem:[#allocation10 + $0x34] sm:$0x3] %v11040_v33  ;;  %v10290_v1 = vsel %vm6494_vm12, %v10289_v8, %v10288_v39  ;;  %v13808_v22 = vrot.slane %v9593_v27, 9  ;;  %v9312_v17 = vadd.f32 %v17897_v47, %v9215_v46 }
 0x59a   :  { %v10292_v50 = vsel %vm6497_vm13, %v10291_v43, %v10290_v1  ;;  %v13809_v10 = vrot.slane %v9595_v56, 9  ;;  %v9964_v18 = vmax.f32 %v9586_v49, %v13806_v25  ;;  %v9965_v59 = vmax.f32 %v9594_v7, %v13807_v30  ;;  %v10348_v1 = vld [vmem:[#allocation9 + $0x20] sm:$0x7] }
 0x59b   :  { %v10872_v34 = vsel %vm17946_vm0, %v10867_v19, %v10871_v38  ;;  %v10318_v9 = vpack.c.b16 %v10292_v50, %v10292_v50  ;;  %v9966_v37 = vmax.f32 %v9593_v27, %v13808_v22  ;;  %v9340_v44 = vmul.f32 %v18014_v4, %v9312_v17  ;;  %v14638_v22 = vld [vmem:[%s18574_s7 + $0x3] ss:$0 sm:$0xff] }
 0x59c   :  { %10940 = vst [vmem:[#allocation10 + $0x3e] sm:$0x3] %v10872_v34  ;;  %11292 = vst [vmem:[#allocation10 + $0x32] sm:$0x3] %v10872_v34  ;;  %v9967_v54 = vmax.f32 %v9595_v56, %v13809_v10  ;;  %v10004_v29 = vmax.f32 %v18203_v51, %v9964_v18  ;;  %v14292_v61 = vadd.f32 %v18133_v13, %v18129_v63 }
 0x59d   :  { %v10346_v49 = vsel %vm18062_vm9, %v10318_v9, %v10345_v28  ;;  %v10005_v47 = vmax.f32 %v18206_v26, %v9965_v59  ;;  %v10006_v46 = vmax.f32 %v18208_v35, %v9966_v37  ;;  %v14295_v27 = vadd.f32 %v18143_v14, %v18141_v58 }
 0x59e   :  { %10347 = vst [vmem:[#allocation9 + $0x1c] sm:$0x7] %v10346_v49  ;;  %v10007_v7 = vmax.f32 %v18210_v16, %v9967_v54  ;;  %v14124_v40 = vpack.c.bf16 %v10004_v29, %v10004_v29  ;;  %v9356_v51 = vadd.f32 %v9340_v44, %v18021_v31  ;;  %v9218_v4 = vadd.f32 %v14292_v61, %v18000_v57  ;;  %v10085_v29 = vld [vmem:[#allocation9 + $0x28] sm:$0x1]  ;;  %v10124_v44 = vld [vmem:[#allocation9 + $0x28] sm:$0x4] }
 0x59f   :  { %v14125_v21 = vpack.c.bf16 %v10005_v47, %v10005_v47  ;;  %v14126_v63 = vpack.c.bf16 %v10006_v46, %v10006_v46  ;;  %v9223_v13 = vadd.f32 %v14295_v27, %v18002_v24  ;;  %v14298_v26 = vadd.f32 %v18150_v32, %v18147_v11  ;;  %v14637_v11 = vld [vmem:[%s18574_s7 + $0x2] ss:$0 sm:$0xff] }
 0x5a0   :  { %v14127_v41 = vpack.c.bf16 %v10007_v7, %v10007_v7  ;;  %v10246_v35 = vunpack.c.l.b16 %v14124_v40  ;;  %v9372_v62 = vmax.f32 %v9356_v51, 0.0  ;;  %v9315_v14 = vadd.f32 %v17903_v42, %v9218_v4 }
 0x5a1   :  { %v10247_v58 = vunpack.c.l.b16 %v14125_v21  ;;  %v10248_v53 = vunpack.c.l.b16 %v14126_v63  ;;  %v9320_v16 = vadd.f32 %v17895_v3, %v9223_v13  ;;  %v9226_v31 = vadd.f32 %v14298_v26, %v18004_v6 }
 0x5a2   :  { %v10249_v52 = vunpack.c.l.b16 %v14127_v41  ;;  %v10293_v57 = vrot.slane %v10246_v35, 7  ;;  %v9596_v0 = vcombine.high %v9372_v62, %v9372_v62  ;;  %v9603_v24 = vrot.slane %v9372_v62, %v16385_v20 }
 0x5a3   :  { %v10294_v23 = vrot.slane %v10247_v58, 6  ;;  %v10296_v12 = vrot.slane %v10248_v53, 5  ;;  %v9341_v32 = vmul.f32 %v14637_v11, %v9315_v14  ;;  %v9342_v6 = vmul.f32 %v14637_v11, %v9320_v16 }
 0x5a4   :  { %v10298_v48 = vrot.slane %v10249_v52, 4  ;;  %v9610_v3 = vrot.slane %v9596_v0, %v16385_v20  ;;  %v9323_v60 = vadd.f32 %v17901_v2, %v9226_v31  ;;  %v9611_v30 = vcombine.high %v9603_v24, %v9603_v24 }
 0x5a5   :  { %v10362_v42 = vld [vmem:[#allocation9 + $0x1c] sm:$0x3]  ;;  %v10295_v55 = vsel %vm6491_vm11, %v10294_v23, %v10293_v57  ;;  %v9357_v50 = vadd.f32 %v14638_v22, %v9341_v32  ;;  %v9358_v54 = vadd.f32 %v14638_v22, %v9342_v6  ;;  %v13810_v49 = vrot.slane %v9603_v24, 9 }
 0x5a6   :  { %v13863_v15 = vld.sshfl [vmem:[#allocation9 + $0x1c] sm:$0x13 pattern:$0x76325410]  ;;  %10370 = vst [vmem:[#allocation10 + $0x5a] sm:$0x3] %v10362_v42  ;;  %v10297_v39 = vsel %vm6494_vm12, %v10296_v12, %v10295_v55  ;;  %v9612_v9 = vcombine.high %v9610_v3, %v9610_v3  ;;  %v9343_v14 = vmul.f32 %v14637_v11, %v9323_v60 }
 0x5a7   :  { %v10436_v38 = vcombine.high %v13863_v15, %v13863_v15  ;;  %v10531_v8 = vshrl.u32 %v13863_v15, 16  ;;  %v10534_v56 = vshll.u32 %v13863_v15, 16  ;;  %v13871_v33 = vld.sshfl [vmem:[#allocation9 + $0x1c] sm:$0x12 pattern:$0x76325410]  ;;  %v10299_v19 = vsel %vm6497_vm13, %v10298_v48, %v10297_v39 }
 0x5a8   :  { %v10651_v43 = vcombine.high %v13871_v33, %v13871_v33  ;;  %v10725_v25 = vld [vmem:[#allocation9 + $0x1c] sm:$0x3]  ;;  %v10319_v18 = vpack.c.b16 %v10299_v19, %v10299_v19  ;;  %v13879_v17 = vrot.slane %v13871_v33, 9  ;;  %v13811_v27 = vrot.slane %v9611_v30, 9 }
 0x5a9   :  { %v10533_v28 = vrot.slane %v10531_v8, 6  ;;  %v10536_v2 = vrot.slane %v10534_v56, 7  ;;  %v10540_v10 = vshll.u32 %v10436_v38, 16  ;;  %10733 = vst [vmem:[#allocation10 + $0x4e] sm:$0x3] %v10725_v25  ;;  %v9373_v7 = vmax.f32 %v9357_v50, 0.0 }
 0x5aa   :  { %v10695_v34 = vrot.slane %v10651_v43, 7  ;;  %v10349_v37 = vsel %vm18062_vm9, %v10319_v18, %v10348_v1  ;;  %v13812_v40 = vrot.slane %v9610_v3, 9  ;;  %v13813_v51 = vrot.slane %v9612_v9, 9 }
 0x5ab   :  { %v10537_v59 = vor.u32 %v10536_v2, %v10533_v28  ;;  %10350 = vst [vmem:[#allocation9 + $0x20] sm:$0x7] %v10349_v37  ;;  %v10542_v46 = vrot.slane %v10540_v10, 7  ;;  %v10086_v21 = vsel %vm17909_vm6, 0, %v10085_v29  ;;  %v10125_v13 = vsel %vm17922_vm5, 0, %v10124_v44 }
 0x5ac   :  { %v10696_v61 = vsel %vm17956_vm4, %v13879_v17, %v10695_v34  ;;  %v9613_v41 = vcombine.high %v9373_v7, %v9373_v7  ;;  %v9620_v35 = vrot.slane %v9373_v7, %v16385_v20  ;;  %v9374_v62 = vmax.f32 %v9358_v54, 0.0  ;;  %10087 = vst [vmem:[#allocation9 + $0x28] sm:$0x1] %v10086_v21  ;;  %10126 = vst [vmem:[#allocation9 + $0x28] sm:$0x4] %v10125_v13 }
 0x5ad   :  { %v10538_v47 = vrot.slane %v10537_v59, 2  ;;  %10718 = vst [vmem:[#allocation10 + $0x5e] sm:$0x3] %v10696_v61  ;;  %11069 = vst [vmem:[#allocation10 + $0x52] sm:$0x3] %v10696_v61  ;;  %v9968_v31 = vmax.f32 %v9603_v24, %v13810_v49  ;;  %v9969_v52 = vmax.f32 %v9611_v30, %v13811_v27  ;;  %v9970_v57 = vmax.f32 %v9610_v3, %v13812_v40 }
 0x5ae   :  { %v9627_v58 = vrot.slane %v9613_v41, %v16385_v20  ;;  %v9628_v53 = vcombine.high %v9620_v35, %v9620_v35  ;;  %v13814_v16 = vrot.slane %v9620_v35, 9  ;;  %v9971_v0 = vmax.f32 %v9612_v9, %v13813_v51 }
 0x5af   :  { %v10543_v26 = vsel %vm17946_vm0, %v10538_v47, %v10542_v46  ;;  %v9630_v42 = vcombine.high %v9374_v62, %v9374_v62  ;;  %v18267_v15 = vrot.slane %v9374_v62, %v16385_v20  ;;  %v9359_v38 = vadd.f32 %v14638_v22, %v9343_v14 }
 0x5b0   :  { %10585 = vst [vmem:[#allocation10 + $0x5c] sm:$0x3] %v10543_v26  ;;  %10941 = vst [vmem:[#allocation10 + $0x50] sm:$0x3] %v10543_v26  ;;  %v9629_v32 = vcombine.high %v9627_v58, %v9627_v58  ;;  %v9972_v48 = vmax.f32 %v9620_v35, %v13814_v16  ;;  %v13815_v3 = vrot.slane %v9628_v53, 9  ;;  %v13816_v1 = vrot.slane %v9627_v58, 9 }
 0x5b1   :  { %v9644_v22 = vrot.slane %v9630_v42, %v16385_v20  ;;  %v9645_v17 = vcombine.high %v18267_v15, %v18267_v15  ;;  %v9375_v37 = vmax.f32 %v9359_v38, 0.0  ;;  %v13818_v26 = vrot.slane %v18267_v15, 9 }
 0x5b2   :  { %v10363_v23 = vld [vmem:[#allocation9 + $0x20] sm:$0x3]  ;;  %v10008_v39 = vmax.f32 %v9968_v31, %v9972_v48  ;;  %v13817_v50 = vrot.slane %v9629_v32, 9  ;;  %v9973_v28 = vmax.f32 %v9628_v53, %v13815_v3  ;;  %v9974_v18 = vmax.f32 %v9627_v58, %v13816_v1 }
 0x5b3   :  { %v13864_v12 = vld.sshfl [vmem:[#allocation9 + $0x20] sm:$0x13 pattern:$0x76325410]  ;;  %10371 = vst [vmem:[#allocation10 + $0x6c] sm:$0x3] %v10363_v23  ;;  %v9646_v7 = vcombine.high %v9644_v22, %v9644_v22  ;;  %v9647_v4 = vcombine.high %v9375_v37, %v9375_v37  ;;  %v9654_v21 = vrot.slane %v9375_v37, %v16385_v20  ;;  %v9976_v48 = vmax.f32 %v18267_v15, %v13818_v26 }
 0x5b4   :  { %v10444_v55 = vcombine.high %v13864_v12, %v13864_v12  ;;  %v10545_v6 = vshrl.u32 %v13864_v12, 16  ;;  %v10548_v11 = vshll.u32 %v13864_v12, 16  ;;  %v13872_v60 = vld.sshfl [vmem:[#allocation9 + $0x20] sm:$0x12 pattern:$0x76325410]  ;;  %v14128_v2 = vpack.c.bf16 %v10008_v39, %v10008_v39 }
 0x5b5   :  { %v10659_v8 = vcombine.high %v13872_v60, %v13872_v60  ;;  %v13880_v56 = vrot.slane %v13872_v60, 9  ;;  %v10726_v24 = vld [vmem:[#allocation9 + $0x20] sm:$0x3]  ;;  %v9975_v9 = vmax.f32 %v9629_v32, %v13817_v50  ;;  %v10009_v59 = vmax.f32 %v9969_v52, %v9973_v28 }
 0x5b6   :  { %v11078_v33 = vld [vmem:[#allocation9 + $0x20] sm:$0x3]  ;;  %v10547_v43 = vrot.slane %v10545_v6, 6  ;;  %v10550_v25 = vrot.slane %v10548_v11, 7  ;;  %v10554_v19 = vshll.u32 %v10444_v55, 16  ;;  %v10010_v44 = vmax.f32 %v9970_v57, %v9974_v18 }
 0x5b7   :  { %10734 = vst [vmem:[#allocation10 + $0x60] sm:$0x3] %v10726_v24  ;;  %11086 = vst [vmem:[#allocation10 + $0x54] sm:$0x3] %v11078_v33  ;;  %v10699_v30 = vrot.slane %v10659_v8, 7  ;;  %v10250_v61 = vunpack.c.l.b16 %v14128_v2  ;;  %v10011_v49 = vmax.f32 %v9971_v0, %v9975_v9  ;;  %v14129_v47 = vpack.c.bf16 %v10009_v59, %v10009_v59 }
 0x5b8   :  { %v10551_v10 = vor.u32 %v10550_v25, %v10547_v43  ;;  %v10556_v29 = vrot.slane %v10554_v19, 7  ;;  %v14130_v27 = vpack.c.bf16 %v10010_v44, %v10010_v44  ;;  %v13819_v41 = vrot.slane %v9645_v17, 9  ;;  %v10351_v11 = vld [vmem:[#allocation9 + $0x24] sm:$0x7] }
 0x5b9   :  { %v10700_v34 = vsel %vm17956_vm4, %v13880_v56, %v10699_v30  ;;  %v14131_v40 = vpack.c.bf16 %v10011_v49, %v10011_v49  ;;  %v10251_v51 = vunpack.c.l.b16 %v14129_v47  ;;  %v10300_v13 = vrot.slane %v10250_v61, 7 }
 0x5ba   :  { %v10552_v54 = vrot.slane %v10551_v10, 2  ;;  %10719 = vst [vmem:[#allocation10 + $0x70] sm:$0x3] %v10700_v34  ;;  %11070 = vst [vmem:[#allocation10 + $0x64] sm:$0x3] %v10700_v34  ;;  %v10252_v63 = vunpack.c.l.b16 %v14130_v27  ;;  %v9661_v14 = vrot.slane %v9647_v4, %v16385_v20  ;;  %v9662_v58 = vcombine.high %v9654_v21, %v9654_v21 }
 0x5bb   :  { %11422 = vst [vmem:[#allocation10 + $0x58] sm:$0x3] %v10700_v34  ;;  %v10253_v35 = vunpack.c.l.b16 %v14131_v40  ;;  %v10301_v62 = vrot.slane %v10251_v51, 6  ;;  %v13820_v16 = vrot.slane %v9644_v22, 9  ;;  %v13821_v31 = vrot.slane %v9646_v7, 9 }
 0x5bc   :  { %v10557_v46 = vsel %vm17946_vm0, %v10552_v54, %v10556_v29  ;;  %v10303_v53 = vrot.slane %v10252_v63, 5  ;;  %v13822_v52 = vrot.slane %v9654_v21, 9  ;;  %v9663_v23 = vcombine.high %v9661_v14, %v9661_v14  ;;  %v10354_v29 = vld [vmem:[#allocation9 + $0x28] sm:$0x7] }
 0x5bd   :  { %10586 = vst [vmem:[#allocation10 + $0x6e] sm:$0x3] %v10557_v46  ;;  %10942 = vst [vmem:[#allocation10 + $0x62] sm:$0x3] %v10557_v46  ;;  %v10302_v57 = vsel %vm6491_vm11, %v10301_v62, %v10300_v13  ;;  %v10305_v0 = vrot.slane %v10253_v35, 4  ;;  %v13823_v12 = vrot.slane %v9662_v58, 9  ;;  %v9977_v60 = vmax.f32 %v9645_v17, %v13819_v41 }
 0x5be   :  { %11294 = vst [vmem:[#allocation10 + $0x56] sm:$0x3] %v10557_v46  ;;  %v10304_v32 = vsel %vm6494_vm12, %v10303_v53, %v10302_v57  ;;  %v13824_v42 = vrot.slane %v9661_v14, 9  ;;  %v9980_v55 = vmax.f32 %v9654_v21, %v13822_v52  ;;  %v13825_v38 = vrot.slane %v9663_v23, 9 }
 0x5bf   :  { %v10306_v6 = vsel %vm6497_vm13, %v10305_v0, %v10304_v32  ;;  %v9981_v8 = vmax.f32 %v9662_v58, %v13823_v12  ;;  %v9978_v24 = vmax.f32 %v9644_v22, %v13820_v16  ;;  %v9979_v39 = vmax.f32 %v9646_v7, %v13821_v31 }
 0x5c0   :  { %v10320_v56 = vpack.c.b16 %v10306_v6, %v10306_v6  ;;  %v9982_v33 = vmax.f32 %v9661_v14, %v13824_v42  ;;  %v10012_v3 = vmax.f32 %v9976_v48, %v9980_v55  ;;  %v9983_v43 = vmax.f32 %v9663_v23, %v13825_v38 }
 0x5c1   :  { %v10013_v25 = vmax.f32 %v9977_v60, %v9981_v8 }
 0x5c2   :  { %v10352_v19 = vsel %vm18062_vm9, %v10320_v56, %v10351_v11  ;;  %v10014_v1 = vmax.f32 %v9978_v24, %v9982_v33  ;;  %v14132_v15 = vpack.c.bf16 %v10012_v3, %v10012_v3  ;;  %v10015_v30 = vmax.f32 %v9979_v39, %v9983_v43 }
 0x5c3   :  { %10353 = vst [vmem:[#allocation9 + $0x24] sm:$0x7] %v10352_v19  ;;  %v14133_v50 = vpack.c.bf16 %v10013_v25, %v10013_v25 }
 0x5c4   :  { %v14134_v28 = vpack.c.bf16 %v10014_v1, %v10014_v1  ;;  %v10254_v2 = vunpack.c.l.b16 %v14132_v15  ;;  %v14135_v10 = vpack.c.bf16 %v10015_v30, %v10015_v30 }
 0x5c5   :  { %v10255_v18 = vunpack.c.l.b16 %v14133_v50 }
 0x5c6   :  { %v10256_v17 = vunpack.c.l.b16 %v14134_v28  ;;  %v10257_v34 = vunpack.c.l.b16 %v14135_v10  ;;  %v10307_v22 = vrot.slane %v10254_v2, 7 }
 0x5c7   :  { %v10308_v9 = vrot.slane %v10255_v18, 6 }
 0x5c8   :  { %v10310_v59 = vrot.slane %v10256_v17, 5  ;;  %v10312_v54 = vrot.slane %v10257_v34, 4 }
 0x5c9   :  { %v10309_v37 = vsel %vm6491_vm11, %v10308_v9, %v10307_v22 }
 0x5ca   :  { %v10364_v44 = vld [vmem:[#allocation9 + $0x24] sm:$0x3]  ;;  %v10311_v49 = vsel %vm6494_vm12, %v10310_v59, %v10309_v37 }
 0x5cb   :  { %v13865_v61 = vld.sshfl [vmem:[#allocation9 + $0x24] sm:$0x13 pattern:$0x76325410]  ;;  %10372 = vst [vmem:[#allocation10 + $0x7e] sm:$0x3] %v10364_v44  ;;  %v10313_v40 = vsel %vm6497_vm13, %v10312_v54, %v10311_v49 }
 0x5cc   :  { %v10452_v47 = vcombine.high %v13865_v61, %v13865_v61  ;;  %v10559_v46 = vshrl.u32 %v13865_v61, 16  ;;  %v10562_v27 = vshll.u32 %v13865_v61, 16  ;;  %v13873_v7 = vld.sshfl [vmem:[#allocation9 + $0x24] sm:$0x12 pattern:$0x76325410]  ;;  %v10321_v63 = vpack.c.b16 %v10313_v40, %v10313_v40 }
 0x5cd   :  { %v10667_v51 = vcombine.high %v13873_v7, %v13873_v7  ;;  %v10727_v4 = vld [vmem:[#allocation9 + $0x24] sm:$0x3]  ;;  %v13881_v35 = vrot.slane %v13873_v7, 9 }
 0x5ce   :  { %v11079_v21 = vld [vmem:[#allocation9 + $0x24] sm:$0x3]  ;;  %v10561_v13 = vrot.slane %v10559_v46, 6  ;;  %v10564_v26 = vrot.slane %v10562_v27, 7  ;;  %v10568_v41 = vshll.u32 %v10452_v47, 16  ;;  %v10355_v14 = vsel %vm18062_vm9, %v10321_v63, %v10354_v29 }
 0x5cf   :  { %10735 = vst [vmem:[#allocation10 + $0x72] sm:$0x3] %v10727_v4  ;;  %11087 = vst [vmem:[#allocation10 + $0x66] sm:$0x3] %v11079_v21  ;;  %v10703_v62 = vrot.slane %v10667_v51, 7 }
 0x5d0   :  { %v10565_v58 = vor.u32 %v10564_v26, %v10561_v13  ;;  %10356 = vst [vmem:[#allocation9 + $0x28] sm:$0x7] %v10355_v14  ;;  %v10570_v31 = vrot.slane %v10568_v41, 7 }
 0x5d1   :  { %v10704_v53 = vsel %vm17956_vm4, %v13881_v35, %v10703_v62 }
 0x5d2   :  { %v10566_v16 = vrot.slane %v10565_v58, 2  ;;  %10720 = vst [vmem:[#allocation10 + $0x82] sm:$0x3] %v10704_v53  ;;  %11071 = vst [vmem:[#allocation10 + $0x76] sm:$0x3] %v10704_v53 }
 0x5d3   :  { %11423 = vst [vmem:[#allocation10 + $0x6a] sm:$0x3] %v10704_v53 }
 0x5d4   :  { %v10571_v52 = vsel %vm17946_vm0, %v10566_v16, %v10570_v31 }
 0x5d5   :  { %10587 = vst [vmem:[#allocation10 + $0x80] sm:$0x3] %v10571_v52  ;;  %10943 = vst [vmem:[#allocation10 + $0x74] sm:$0x3] %v10571_v52 }
 0x5d6   :  { %11295 = vst [vmem:[#allocation10 + $0x68] sm:$0x3] %v10571_v52 }
 0x5d7   :  { %v10728_v57 = vld [vmem:[#allocation9 + $0x28] sm:$0x3] }
 0x5d8   :  { %v13889_v0 = vld.sshfl [vmem:[#allocation9 + $0x28] sm:$0x13 pattern:$0x76325410]  ;;  %10736 = vst [vmem:[#allocation10 + $0x84] sm:$0x3] %v10728_v57 }
 0x5d9   :  { %v10816_v45 = vcombine.high %v13889_v0, %v13889_v0  ;;  %v10916_v23 = vshrl.u32 %v13889_v0, 16  ;;  %v10919_v12 = vshll.u32 %v13889_v0, 16  ;;  %v13897_v32 = vld.sshfl [vmem:[#allocation9 + $0x28] sm:$0x12 pattern:$0x76325410] }
 0x5da   :  { %v11024_v48 = vcombine.high %v13897_v32, %v13897_v32  ;;  %v11080_v42 = vld [vmem:[#allocation9 + $0x28] sm:$0x3]  ;;  %v13905_v60 = vrot.slane %v13897_v32, 9 }
 0x5db   :  { %v10918_v55 = vrot.slane %v10916_v23, 6  ;;  %v10921_v6 = vrot.slane %v10919_v12, 7  ;;  %v10925_v11 = vshll.u32 %v10816_v45, 16  ;;  %11088 = vst [vmem:[#allocation10 + $0x78] sm:$0x3] %v11080_v42 }
 0x5dc   :  { %v11055_v38 = vrot.slane %v11024_v48, 7 }
 0x5dd   :  { %v10922_v8 = vor.u32 %v10921_v6, %v10918_v55  ;;  %v10927_v33 = vrot.slane %v10925_v11, 7 }
 0x5de   :  { %v11056_v56 = vsel %vm17956_vm4, %v13905_v60, %v11055_v38 }
 0x5df   :  { %v10923_v24 = vrot.slane %v10922_v8, 2  ;;  %11072 = vst [vmem:[#allocation10 + $0x88] sm:$0x3] %v11056_v56  ;;  %11424 = vst [vmem:[#allocation10 + $0x7c] sm:$0x3] %v11056_v56 }
 0x5e1   :  { %v10928_v3 = vsel %vm17946_vm0, %v10923_v24, %v10927_v33 }
 0x5e2   :  { %10944 = vst [vmem:[#allocation10 + $0x86] sm:$0x3] %v10928_v3  ;;  %11296 = vst [vmem:[#allocation10 + $0x7a] sm:$0x3] %v10928_v3 }
 0x5e3   :  { %14711 = dma.done.wait [#allocation6], 18432 }
 0x5e4   :  { %14712 = vsyncadd [#allocation6], 4294948864  ;;  %v11455_v39 = vld [vmem:[#allocation2 + $0x8] sm:$0xff]  ;;  %v11454_v43 = vld [vmem:[#allocation2] sm:$0xff] }
 0x5e5   :  { %v11457_v25 = vld [vmem:[#allocation2 + $0x18] sm:$0xff]  ;;  %11818 = vmatprep.subr.bf16.mxu1 %v11455_v39  ;;  %v11456_v19 = vld [vmem:[#allocation2 + $0x10] sm:$0xff]  ;;  %v11459_v5 = vld [vmem:[#allocation2 + $0x28] sm:$0xff] }
 0x5e6   :  { %11819 = vmatpush1.bf16.msra.mxu1 %v11454_v43  ;;  %v11458_v1 = vld [vmem:[#allocation2 + $0x20] sm:$0xff]  ;;  %v11461_v15 = vld [vmem:[#allocation2 + $0x38] sm:$0xff]  ;;  %v11460_v30 = vld [vmem:[#allocation2 + $0x30] sm:$0xff] }
 0x5e7   :  { %11820 = vmatprep.subr.bf16.mxu1 %v11457_v25  ;;  %v11463_v36 = vld [vmem:[#allocation2 + $0x48] sm:$0xff]  ;;  %v14639_v50 = vld [vmem:[#allocation10] ss:$18 sps:$4 sm:$0xff]   ;;  %v11465_v17 = vld [vmem:[#allocation2 + $0x58] sm:$0xff] }
 0x5e8   :  { %v14642_v28 = vld [vmem:[#allocation10 + $0x24] ss:$18 sps:$4 sm:$0xff]   ;;  %v18299_v2 = vrot.slane %v14639_v50, %v16385_v20  ;;  %v11469_v37 = vld [vmem:[#allocation2 + $0x78] sm:$0xff] }
 0x5e9   :  { %v11646_v10 = vrot.slane %v14642_v28, %v16385_v20  ;;  %v11462_v18 = vld [vmem:[#allocation2 + $0x40] sm:$0xff]  ;;  %v11464_v22 = vld [vmem:[#allocation2 + $0x50] sm:$0xff]  ;;  %v11467_v9 = vld [vmem:[#allocation2 + $0x68] sm:$0xff] }
 0x5ea   :  { %11821 = vmatpush1.bf16.msra.mxu1 %v11456_v19  ;;  %v11466_v59 = vld [vmem:[#allocation2 + $0x60] sm:$0xff]  ;;  %v11468_v54 = vld [vmem:[#allocation2 + $0x70] sm:$0xff]  ;;  %v11471_v29 = vld [vmem:[#allocation2 + $0x88] sm:$0xff] }
 0x5eb   :  { %11822 = vmatprep.subr.bf16.mxu1 %v11459_v5  ;;  %v11655_v34 = vcombine.high %v18299_v2, %v11646_v10  ;;  %v11470_v44 = vld [vmem:[#allocation2 + $0x80] sm:$0xff]  ;;  %v11473_v61 = vld [vmem:[#allocation2 + $0x98] sm:$0xff]  ;;  %v11472_v49 = vld [vmem:[#allocation2 + $0x90] sm:$0xff]  ;;  %v11654_v16 = vcombine.low %v18299_v2, %v11646_v10 }
 0x5ec   :  { %v11475_v47 = vld [vmem:[#allocation2 + $0xa8] sm:$0xff]  ;;  %v11474_v46 = vld [vmem:[#allocation2 + $0xa0] sm:$0xff]  ;;  %v11477_v27 = vld [vmem:[#allocation2 + $0xb8] sm:$0xff] }
 0x5ed   :  { %11850 = vmatprep.mubr.bf16.mxu1 %v11655_v34  ;;  %v11476_v7 = vld [vmem:[#allocation2 + $0xb0] sm:$0xff]  ;;  %v11479_v40 = vld [vmem:[#allocation2 + $0xc8] sm:$0xff]  ;;  %v11478_v51 = vld [vmem:[#allocation2 + $0xc0] sm:$0xff] }
 0x5ee   :  { %11823 = vmatpush1.bf16.msra.mxu1 %v11458_v1  ;;  %v11481_v4 = vld [vmem:[#allocation2 + $0xd8] sm:$0xff]  ;;  %v11480_v21 = vld [vmem:[#allocation2 + $0xd0] sm:$0xff]  ;;  %v11483_v63 = vld [vmem:[#allocation2 + $0xe8] sm:$0xff] }
 0x5ef   :  { %11824 = vmatprep.subr.bf16.mxu1 %v11461_v15  ;;  %v14645_v13 = vld [vmem:[#allocation10 + $0x48] ss:$18 sps:$4 sm:$0xff]   ;;  %v14647_v26 = vld [vmem:[#allocation10 + $0x6c] ss:$18 sps:$4 sm:$0xff]   ;;  %v11482_v41 = vld [vmem:[#allocation2 + $0xe0] sm:$0xff] }
 0x5f0   :  { %v11485_v35 = vld [vmem:[#allocation2 + $0xf8] sm:$0xff]  ;;  %v11721_v62 = vrot.slane %v14645_v13, %v16385_v20  ;;  %v11735_v14 = vrot.slane %v14647_v26, %v16385_v20  ;;  %v11484_v58 = vld [vmem:[#allocation2 + $0xf0] sm:$0xff]  ;;  %v11487_v53 = vld [vmem:[#allocation2 + $0x108] sm:$0xff] }
 0x5f1   :  { %v14641_v31 = vld [vmem:[#allocation10 + $0x4] ss:$18 sps:$4 sm:$0xff]   ;;  %v14644_v52 = vld [vmem:[#allocation10 + $0x28] ss:$18 sps:$4 sm:$0xff]   ;;  %v14649_v34 = vld [vmem:[#allocation10 + $0x4c] ss:$18 sps:$4 sm:$0xff]  }
 0x5f2   :  { %11825 = vmatpush1.bf16.msra.mxu1 %v11460_v30  ;;  %v11744_v57 = vcombine.high %v11721_v62, %v11735_v14  ;;  %v11486_v0 = vld [vmem:[#allocation2 + $0x100] sm:$0xff]  ;;  %v11489_v45 = vld [vmem:[#allocation2 + $0x118] sm:$0xff]  ;;  %v18307_v23 = vrot.slane %v14641_v31, %v16385_v20  ;;  %v18310_v12 = vrot.slane %v14644_v52, %v16385_v20  ;;  %v11488_v32 = vld [vmem:[#allocation2 + $0x110] sm:$0xff]  ;;  %v11743_v42 = vcombine.low %v11721_v62, %v11735_v14 }
 0x5f3   :  { %11826 = vmatprep.subr.bf16.mxu1 %v11463_v36  ;;  %v11491_v48 = vld [vmem:[#allocation2 + $0x128] sm:$0xff]  ;;  %v11490_v6 = vld [vmem:[#allocation2 + $0x120] sm:$0xff]  ;;  %v11493_v11 = vld [vmem:[#allocation2 + $0x138] sm:$0xff] }
 0x5f4   :  { %v11657_v55 = vcombine.high %v18307_v23, %v18310_v12  ;;  %v11492_v60 = vld [vmem:[#allocation2 + $0x130] sm:$0xff]  ;;  %v11495_v38 = vld [vmem:[#allocation2 + $0x148] sm:$0xff]  ;;  %v11494_v8 = vld [vmem:[#allocation2 + $0x140] sm:$0xff] }
 0x5f5   :  { %v11497_v56 = vld [vmem:[#allocation2 + $0x158] sm:$0xff]  ;;  %v11496_v24 = vld [vmem:[#allocation2 + $0x150] sm:$0xff]  ;;  %v11499_v33 = vld [vmem:[#allocation2 + $0x168] sm:$0xff] }
 0x5f6   :  { %11827 = vmatpush1.bf16.msra.mxu1 %v11462_v18  ;;  %v11498_v3 = vld [vmem:[#allocation2 + $0x160] sm:$0xff]  ;;  %v11501_v39 = vld [vmem:[#allocation2 + $0x178] sm:$0xff]  ;;  %v11500_v43 = vld [vmem:[#allocation2 + $0x170] sm:$0xff] }
 0x5f7   :  { %11828 = vmatprep.subr.bf16.mxu1 %v11465_v17  ;;  %v11503_v25 = vld [vmem:[#allocation2 + $0x188] sm:$0xff]  ;;  %v11502_v19 = vld [vmem:[#allocation2 + $0x180] sm:$0xff]  ;;  %v11505_v5 = vld [vmem:[#allocation2 + $0x198] sm:$0xff] }
 0x5f8   :  { %v11504_v1 = vld [vmem:[#allocation2 + $0x190] sm:$0xff]  ;;  %v11507_v15 = vld [vmem:[#allocation2 + $0x1a8] sm:$0xff]  ;;  %v11506_v30 = vld [vmem:[#allocation2 + $0x1a0] sm:$0xff] }
 0x5f9   :  { %v11509_v36 = vld [vmem:[#allocation2 + $0x1b8] sm:$0xff]  ;;  %v11508_v50 = vld [vmem:[#allocation2 + $0x1b0] sm:$0xff]  ;;  %v11511_v28 = vld [vmem:[#allocation2 + $0x1c8] sm:$0xff] }
 0x5fa   :  { %11829 = vmatpush1.bf16.msra.mxu1 %v11464_v22  ;;  %v11510_v2 = vld [vmem:[#allocation2 + $0x1c0] sm:$0xff]  ;;  %v11513_v10 = vld [vmem:[#allocation2 + $0x1d8] sm:$0xff]  ;;  %v11512_v18 = vld [vmem:[#allocation2 + $0x1d0] sm:$0xff] }
 0x5fb   :  { %11830 = vmatprep.subr.bf16.mxu1 %v11467_v9  ;;  %v11515_v17 = vld [vmem:[#allocation2 + $0x1e8] sm:$0xff]  ;;  %v14650_v22 = vld [vmem:[#allocation10 + $0x70] ss:$18 sps:$4 sm:$0xff]   ;;  %v11533_v52 = vld [vmem:[#allocation2 + $0x278] sm:$0xff] }
 0x5fc   :  { %v11514_v9 = vld [vmem:[#allocation2 + $0x1e0] sm:$0xff]  ;;  %v11527_v62 = vld [vmem:[#allocation2 + $0x248] sm:$0xff] }
 0x5fd   :  { %v11522_v26 = vld [vmem:[#allocation2 + $0x220] sm:$0xff] }
 0x5fe   :  { %11831 = vmatpush1.bf16.msra.mxu1 %v11466_v59  ;;  %v11517_v59 = vld [vmem:[#allocation2 + $0x1f8] sm:$0xff]  ;;  %v11526_v14 = vld [vmem:[#allocation2 + $0x240] sm:$0xff] }
 0x5ff   :  { %11832 = vmatprep.subr.bf16.mxu1 %v11469_v37  ;;  %v11728_v37 = vrot.slane %v14649_v34, %v16385_v20  ;;  %v11530_v31 = vld [vmem:[#allocation2 + $0x260] sm:$0xff] }
 0x602   :  { %11833 = vmatpush1.bf16.msra.mxu1 %v11468_v54  ;;  %v11742_v54 = vrot.slane %v14650_v22, %v16385_v20  ;;  %v11554_v22 = vld [vmem:[#allocation2 + $0x320] sm:$0xff] }
 0x603   :  { %11834 = vmatprep.subr.bf16.mxu1 %v11471_v29  ;;  %v11516_v29 = vld [vmem:[#allocation2 + $0x1f0] sm:$0xff] }
 0x606   :  { %11835 = vmatpush1.bf16.msra.mxu1 %v11470_v44  ;;  %v11519_v44 = vld [vmem:[#allocation2 + $0x208] sm:$0xff] }
 0x607   :  { %11836 = vmatprep.subr.bf16.mxu1 %v11473_v61  ;;  %v11656_v61 = vcombine.low %v18307_v23, %v18310_v12  ;;  %v11537_v23 = vld [vmem:[#allocation2 + $0x298] sm:$0xff]  ;;  %v11536_v12 = vld [vmem:[#allocation2 + $0x290] sm:$0xff] }
 0x60a   :  { %11837 = vmatpush1.bf16.msra.mxu1 %v11472_v49  ;;  %v11746_v49 = vcombine.high %v11728_v37, %v11742_v54 }
 0x60b   :  { %11838 = vmatprep.subr.bf16.mxu1 %v11475_v47  ;;  %v14651_v47 = vld [vmem:[#allocation10 + $0x8] ss:$18 sps:$4 sm:$0xff]  }
 0x60e   :  { %11839 = vmatpush1.bf16.msra.mxu1 %v11474_v46  ;;  %v14653_v46 = vld [vmem:[#allocation10 + $0x2c] ss:$18 sps:$4 sm:$0xff]  }
 0x60f   :  { %11840 = vmatprep.subr.bf16.mxu1 %v11477_v27  ;;  %v11518_v27 = vld [vmem:[#allocation2 + $0x200] sm:$0xff] }
 0x612   :  { %11841 = vmatpush1.bf16.msra.mxu1 %v11476_v7  ;;  %v11521_v7 = vld [vmem:[#allocation2 + $0x218] sm:$0xff] }
 0x613   :  { %11842 = vmatprep.subr.bf16.mxu1 %v11479_v40  ;;  %v18319_v40 = vrot.slane %v14651_v47, %v16385_v20  ;;  %v11565_v47 = vld [vmem:[#allocation2 + $0x378] sm:$0xff] }
 0x616   :  { %11843 = vmatpush1.bf16.msra.mxu1 %v11478_v51  ;;  %v18322_v51 = vrot.slane %v14653_v46, %v16385_v20  ;;  %v11564_v46 = vld [vmem:[#allocation2 + $0x370] sm:$0xff] }
 0x617   :  { %11844 = vmatprep.subr.bf16.mxu1 %v11481_v4  ;;  %v11520_v4 = vld [vmem:[#allocation2 + $0x210] sm:$0xff] }
 0x618   :  { %v11691_v13 = vcombine.high %v18319_v40, %v18322_v51 }
 0x61a   :  { %11845 = vmatpush1.bf16.msra.mxu1 %v11480_v21  ;;  %v11523_v21 = vld [vmem:[#allocation2 + $0x228] sm:$0xff] }
 0x61b   :  { %11846 = vmatprep.subr.bf16.mxu1 %v11483_v63  ;;  %v11745_v63 = vcombine.low %v11728_v37, %v11742_v54  ;;  %v11559_v37 = vld [vmem:[#allocation2 + $0x348] sm:$0xff]  ;;  %v11558_v54 = vld [vmem:[#allocation2 + $0x340] sm:$0xff] }
 0x61e   :  { %11847 = vmatpush1.bf16.msra.mxu1 %v11482_v41  ;;  %v11525_v41 = vld [vmem:[#allocation2 + $0x238] sm:$0xff] }
 0x61f   :  { %11848 = vmatprep.subr.bf16.mxu1 %v11485_v35  ;;  %v11524_v35 = vld [vmem:[#allocation2 + $0x230] sm:$0xff] }
 0x622   :  { %11849 = vmatpush1.bf16.msra.mxu1 %v11484_v58  ;;  %v11529_v58 = vld [vmem:[#allocation2 + $0x258] sm:$0xff] }
 0x623   :  { %11871 = vmatprep.subr.bf16.mxu1 %v11487_v53  ;;  %v11528_v53 = vld [vmem:[#allocation2 + $0x250] sm:$0xff] }
 0x625   :  { %11851 = vmatmul.mubr.bf16.vlgmr.msra.gmra.mrb[64].mxu1 %v11654_v16  ;;  %v11531_v16 = vld [vmem:[#allocation2 + $0x268] sm:$0xff] }
 0x626   :  { %11872 = vmatpush1.bf16.msra.mxu1 %v11486_v0  ;;  %11860 = vmatprep.mubr.bf16.mxu1 %v11744_v57  ;;  %v11532_v57 = vld [vmem:[#allocation2 + $0x270] sm:$0xff]  ;;  %v11535_v0 = vld [vmem:[#allocation2 + $0x288] sm:$0xff] }
 0x627   :  { %11873 = vmatprep.subr.bf16.mxu1 %v11489_v45  ;;  %v11534_v45 = vld [vmem:[#allocation2 + $0x280] sm:$0xff] }
 0x62a   :  { %11874 = vmatpush1.bf16.msra.mxu1 %v11488_v32  ;;  %v11539_v32 = vld [vmem:[#allocation2 + $0x2a8] sm:$0xff] }
 0x62b   :  { %11875 = vmatprep.subr.bf16.mxu1 %v11491_v48  ;;  %v11538_v48 = vld [vmem:[#allocation2 + $0x2a0] sm:$0xff] }
 0x62d   :  { %11861 = vmatmul.mubr.bf16.gmra.mrb[68].mxu1 %v11743_v42  ;;  %v11541_v42 = vld [vmem:[#allocation2 + $0x2b8] sm:$0xff] }
 0x62e   :  { %11876 = vmatpush1.bf16.msra.mxu1 %v11490_v6  ;;  %11903 = vmatprep.mubr.bf16.mxu1 %v11657_v55  ;;  %v11540_v55 = vld [vmem:[#allocation2 + $0x2b0] sm:$0xff]  ;;  %v11543_v6 = vld [vmem:[#allocation2 + $0x2c8] sm:$0xff] }
 0x62f   :  { %11877 = vmatprep.subr.bf16.mxu1 %v11493_v11  ;;  %v11542_v11 = vld [vmem:[#allocation2 + $0x2c0] sm:$0xff] }
 0x632   :  { %11878 = vmatpush1.bf16.msra.mxu1 %v11492_v60  ;;  %v11545_v60 = vld [vmem:[#allocation2 + $0x2d8] sm:$0xff] }
 0x633   :  { %11879 = vmatprep.subr.bf16.mxu1 %v11495_v38  ;;  %v11544_v38 = vld [vmem:[#allocation2 + $0x2d0] sm:$0xff] }
 0x636   :  { %11880 = vmatpush1.bf16.msra.mxu1 %v11494_v8  ;;  %v11547_v8 = vld [vmem:[#allocation2 + $0x2e8] sm:$0xff] }
 0x637   :  { %11881 = vmatprep.subr.bf16.mxu1 %v11497_v56  ;;  %v14655_v56 = vld [vmem:[#allocation10 + $0x50] ss:$18 sps:$4 sm:$0xff]  }
 0x63a   :  { %11882 = vmatpush1.bf16.msra.mxu1 %v11496_v24  ;;  %v14657_v24 = vld [vmem:[#allocation10 + $0x74] ss:$18 sps:$4 sm:$0xff]  }
 0x63b   :  { %11883 = vmatprep.subr.bf16.mxu1 %v11499_v33  ;;  %v11546_v33 = vld [vmem:[#allocation2 + $0x2e0] sm:$0xff] }
 0x63e   :  { %11884 = vmatpush1.bf16.msra.mxu1 %v11498_v3  ;;  %v11549_v3 = vld [vmem:[#allocation2 + $0x2f8] sm:$0xff] }
 0x63f   :  { %11885 = vmatprep.subr.bf16.mxu1 %v11501_v39  ;;  %v11757_v39 = vrot.slane %v14655_v56, %v16385_v20  ;;  %v11591_v56 = vld [vmem:[#allocation2 + $0x448] sm:$0xff] }
 0x642   :  { %11886 = vmatpush1.bf16.msra.mxu1 %v11500_v43  ;;  %v11771_v43 = vrot.slane %v14657_v24, %v16385_v20  ;;  %v11590_v24 = vld [vmem:[#allocation2 + $0x440] sm:$0xff] }
 0x643   :  { %11887 = vmatprep.subr.bf16.mxu1 %v11503_v25  ;;  %v11548_v25 = vld [vmem:[#allocation2 + $0x2f0] sm:$0xff] }
 0x646   :  { %11888 = vmatpush1.bf16.msra.mxu1 %v11502_v19  ;;  %v11551_v19 = vld [vmem:[#allocation2 + $0x308] sm:$0xff] }
 0x647   :  { %11889 = vmatprep.subr.bf16.mxu1 %v11505_v5  ;;  %v11690_v5 = vcombine.low %v18319_v40, %v18322_v51  ;;  %v11569_v40 = vld [vmem:[#allocation2 + $0x398] sm:$0xff]  ;;  %v11568_v51 = vld [vmem:[#allocation2 + $0x390] sm:$0xff] }
 0x64a   :  { %11890 = vmatpush1.bf16.msra.mxu1 %v11504_v1  ;;  %v11780_v1 = vcombine.high %v11757_v39, %v11771_v43 }
 0x64b   :  { %11891 = vmatprep.subr.bf16.mxu1 %v11507_v15  ;;  %v14659_v15 = vld [vmem:[#allocation10 + $0xc] ss:$18 sps:$4 sm:$0xff]  }
 0x64e   :  { %11892 = vmatpush1.bf16.msra.mxu1 %v11506_v30  ;;  %v14660_v30 = vld [vmem:[#allocation10 + $0x30] ss:$18 sps:$4 sm:$0xff]  }
 0x64f   :  { %11893 = vmatprep.subr.bf16.mxu1 %v11509_v36  ;;  %v11550_v36 = vld [vmem:[#allocation2 + $0x300] sm:$0xff] }
 0x652   :  { %11894 = vmatpush1.bf16.msra.mxu1 %v11508_v50  ;;  %v11553_v50 = vld [vmem:[#allocation2 + $0x318] sm:$0xff] }
 0x653   :  { %11895 = vmatprep.subr.bf16.mxu1 %v11511_v28  ;;  %v18331_v28 = vrot.slane %v14659_v15, %v16385_v20 }
 0x656   :  { %11896 = vmatpush1.bf16.msra.mxu1 %v11510_v2  ;;  %v18334_v2 = vrot.slane %v14660_v30, %v16385_v20  ;;  %v11596_v30 = vld [vmem:[#allocation2 + $0x470] sm:$0xff] }
 0x657   :  { %11897 = vmatprep.subr.bf16.mxu1 %v11513_v10  ;;  %v11552_v10 = vld [vmem:[#allocation2 + $0x310] sm:$0xff] }
 0x658   :  { %v11693_v34 = vcombine.high %v18331_v28, %v18334_v2 }
 0x65a   :  { %11898 = vmatpush1.bf16.msra.mxu1 %v11512_v18  ;;  %v11555_v18 = vld [vmem:[#allocation2 + $0x328] sm:$0xff] }
 0x65b   :  { %11899 = vmatprep.subr.bf16.mxu1 %v11515_v17  ;;  %v11779_v17 = vcombine.low %v11757_v39, %v11771_v43  ;;  %v11595_v39 = vld [vmem:[#allocation2 + $0x468] sm:$0xff]  ;;  %v14663_v43 = vld [vmem:[#allocation10 + $0x10] ss:$18 sps:$4 sm:$0x33]  }
 0x65e   :  { %11900 = vmatpush1.bf16.msra.mxu1 %v11514_v9  ;;  %v11557_v9 = vld [vmem:[#allocation2 + $0x338] sm:$0xff] }
 0x65f   :  { %11901 = vmatprep.subr.bf16.mxu1 %v11517_v59  ;;  %v11556_v59 = vld [vmem:[#allocation2 + $0x330] sm:$0xff] }
 0x662   :  { %11902 = vmatpush1.bf16.msra.mxu1 %v11516_v29  ;;  %v11561_v29 = vld [vmem:[#allocation2 + $0x358] sm:$0xff] }
 0x663   :  { %11924 = vmatprep.subr.bf16.mxu1 %v11519_v44  ;;  %v11560_v44 = vld [vmem:[#allocation2 + $0x350] sm:$0xff] }
 0x665   :  { %11904 = vmatmul.mubr.bf16.vlgmr.msra.gmra.mrb[64].mxu1 %v11656_v61  ;;  %v11563_v61 = vld [vmem:[#allocation2 + $0x368] sm:$0xff] }
 0x666   :  { %11925 = vmatpush1.bf16.msra.mxu1 %v11518_v27  ;;  %11913 = vmatprep.mubr.bf16.mxu1 %v11746_v49  ;;  %v11562_v49 = vld [vmem:[#allocation2 + $0x360] sm:$0xff]  ;;  %v11567_v27 = vld [vmem:[#allocation2 + $0x388] sm:$0xff] }
 0x667   :  { %11926 = vmatprep.subr.bf16.mxu1 %v11521_v7  ;;  %v11566_v7 = vld [vmem:[#allocation2 + $0x380] sm:$0xff] }
 0x66a   :  { %11927 = vmatpush1.bf16.msra.mxu1 %v11520_v4  ;;  %v11571_v4 = vld [vmem:[#allocation2 + $0x3a8] sm:$0xff] }
 0x66b   :  { %11928 = vmatprep.subr.bf16.mxu1 %v11523_v21  ;;  %v11570_v21 = vld [vmem:[#allocation2 + $0x3a0] sm:$0xff] }
 0x66d   :  { %11914 = vmatmul.mubr.bf16.gmra.mrb[68].mxu1 %v11745_v63  ;;  %v11573_v63 = vld [vmem:[#allocation2 + $0x3b8] sm:$0xff] }
 0x66e   :  { %11929 = vmatpush1.bf16.msra.mxu1 %v11522_v26  ;;  %11956 = vmatprep.mubr.bf16.mxu1 %v11691_v13  ;;  %v11572_v13 = vld [vmem:[#allocation2 + $0x3b0] sm:$0xff]  ;;  %v11575_v26 = vld [vmem:[#allocation2 + $0x3c8] sm:$0xff] }
 0x66f   :  { %11930 = vmatprep.subr.bf16.mxu1 %v11525_v41  ;;  %v11574_v41 = vld [vmem:[#allocation2 + $0x3c0] sm:$0xff] }
 0x672   :  { %11931 = vmatpush1.bf16.msra.mxu1 %v11524_v35  ;;  %v11577_v35 = vld [vmem:[#allocation2 + $0x3d8] sm:$0xff] }
 0x673   :  { %11932 = vmatprep.subr.bf16.mxu1 %v11527_v62  ;;  %v11576_v62 = vld [vmem:[#allocation2 + $0x3d0] sm:$0xff] }
 0x676   :  { %11933 = vmatpush1.bf16.msra.mxu1 %v11526_v14  ;;  %v11579_v14 = vld [vmem:[#allocation2 + $0x3e8] sm:$0xff] }
 0x677   :  { %11934 = vmatprep.subr.bf16.mxu1 %v11529_v58  ;;  %v14661_v58 = vld [vmem:[#allocation10 + $0x54] ss:$18 sps:$4 sm:$0xff]  }
 0x67a   :  { %11935 = vmatpush1.bf16.msra.mxu1 %v11528_v53  ;;  %v14662_v53 = vld [vmem:[#allocation10 + $0x78] ss:$18 sps:$4 sm:$0xff]  }
 0x67b   :  { %11936 = vmatprep.subr.bf16.mxu1 %v11531_v16  ;;  %v11578_v16 = vld [vmem:[#allocation2 + $0x3e0] sm:$0xff] }
 0x67e   :  { %11937 = vmatpush1.bf16.msra.mxu1 %v11530_v31  ;;  %v11581_v31 = vld [vmem:[#allocation2 + $0x3f8] sm:$0xff] }
 0x67f   :  { %11938 = vmatprep.subr.bf16.mxu1 %v11533_v52  ;;  %v11764_v52 = vrot.slane %v14661_v58, %v16385_v20 }
 0x682   :  { %11939 = vmatpush1.bf16.msra.mxu1 %v11532_v57  ;;  %v11778_v57 = vrot.slane %v14662_v53, %v16385_v20 }
 0x683   :  { %11940 = vmatprep.subr.bf16.mxu1 %v11535_v0  ;;  %v11580_v0 = vld [vmem:[#allocation2 + $0x3f0] sm:$0xff] }
 0x686   :  { %11941 = vmatpush1.bf16.msra.mxu1 %v11534_v45  ;;  %v11583_v45 = vld [vmem:[#allocation2 + $0x408] sm:$0xff] }
 0x687   :  { %11942 = vmatprep.subr.bf16.mxu1 %v11537_v23  ;;  %v11692_v23 = vcombine.low %v18331_v28, %v18334_v2  ;;  %v14666_v28 = vld [vmem:[#allocation10 + $0x7c] ss:$18 sps:$4 sm:$0x33]  }
 0x68a   :  { %11943 = vmatpush1.bf16.msra.mxu1 %v11536_v12  ;;  %v11782_v12 = vcombine.high %v11764_v52, %v11778_v57 }
 0x68b   :  { %11944 = vmatprep.subr.bf16.mxu1 %v11539_v32  ;;  %v11582_v32 = vld [vmem:[#allocation2 + $0x400] sm:$0xff] }
 0x68e   :  { %11945 = vmatpush1.bf16.msra.mxu1 %v11538_v48  ;;  %v11585_v48 = vld [vmem:[#allocation2 + $0x418] sm:$0xff] }
 0x68f   :  { %11946 = vmatprep.subr.bf16.mxu1 %v11541_v42  ;;  %v11584_v42 = vld [vmem:[#allocation2 + $0x410] sm:$0xff] }
 0x692   :  { %11947 = vmatpush1.bf16.msra.mxu1 %v11540_v55  ;;  %v11587_v55 = vld [vmem:[#allocation2 + $0x428] sm:$0xff] }
 0x693   :  { %11948 = vmatprep.subr.bf16.mxu1 %v11543_v6  ;;  %v11781_v6 = vcombine.low %v11764_v52, %v11778_v57 }
 0x696   :  { %11949 = vmatpush1.bf16.msra.mxu1 %v11542_v11  ;;  %v11586_v11 = vld [vmem:[#allocation2 + $0x420] sm:$0xff] }
 0x697   :  { %11950 = vmatprep.subr.bf16.mxu1 %v11545_v60  ;;  %v11589_v60 = vld [vmem:[#allocation2 + $0x438] sm:$0xff] }
 0x69a   :  { %11951 = vmatpush1.bf16.msra.mxu1 %v11544_v38  ;;  %v18641_v38 = vmov 0  }
 0x69b   :  { %11952 = vmatprep.subr.bf16.mxu1 %v11547_v8  ;;  %v11588_v8 = vld [vmem:[#allocation2 + $0x430] sm:$0xff] }
 0x69e   :  { %11953 = vmatpush1.bf16.msra.mxu1 %v11546_v33  ;;  %v11593_v33 = vld [vmem:[#allocation2 + $0x458] sm:$0xff] }
 0x69f   :  { %11954 = vmatprep.subr.bf16.mxu1 %v11549_v3  ;;  %v11592_v3 = vld [vmem:[#allocation2 + $0x450] sm:$0xff] }
 0x6a2   :  { %11955 = vmatpush1.bf16.msra.mxu1 %v11548_v25  ;;  %v14664_v25 = vld [vmem:[#allocation10 + $0x34] ss:$18 sps:$4 sm:$0x33]  }
 0x6a3   :  { %11977 = vmatprep.subr.bf16.mxu1 %v11551_v19  ;;  %v11594_v19 = vld [vmem:[#allocation2 + $0x460] sm:$0xff]  ;;  %v11709_v15 = vrot.slane %v14664_v25, %v16385_v20 }
 0x6a5   :  { %11957 = vmatmul.mubr.bf16.vlgmr.msra.gmra.mrb[64].mxu1 %v11690_v5  ;;  %v11597_v5 = vld [vmem:[#allocation2 + $0x478] sm:$0xff] }
 0x6a6   :  { %11978 = vmatpush1.bf16.msra.mxu1 %v11550_v36  ;;  %11966 = vmatprep.mubr.bf16.mxu1 %v11780_v1  ;;  %v11702_v1 = vrot.slane %v14663_v43, %v16385_v20 }
 0x6a7   :  { %11979 = vmatprep.subr.bf16.mxu1 %v11553_v50  ;;  %v14665_v50 = vld [vmem:[#allocation10 + $0x58] ss:$18 sps:$4 sm:$0x33]  }
 0x6a8   :  { %v11710_v36 = vcombine.low %v11702_v1, %v11709_v15  ;;  %v11791_v2 = vrot.slane %v14665_v50, %v16385_v20 }
 0x6aa   :  { %11980 = vmatpush1.bf16.msra.mxu1 %v11552_v10  ;;  %v11798_v10 = vrot.slane %v14666_v28, %v16385_v20 }
 0x6ab   :  { %11981 = vmatprep.subr.bf16.mxu1 %v11555_v18 }
 0x6ac   :  { %v11799_v18 = vcombine.low %v11791_v2, %v11798_v10 }
 0x6ad   :  { %11967 = vmatmul.mubr.bf16.gmra.mrb[68].mxu1 %v11779_v17  ;;  %v18642_v17 = vld [vmem:[#allocation57_spill] sm:$0xff] }
 0x6ae   :  { %11982 = vmatpush1.bf16.msra.mxu1 %v11554_v22  ;;  %12009 = vmatprep.mubr.bf16.mxu1 %v11693_v34  ;;  %v18349_v34 = vsub.s32 0, %v18642_v17  ;;  %v13930_v22 = vld [vmem:[%s18574_s7 + $0x4] ss:$8 sm:$0x3] }
 0x6af   :  { %11983 = vmatprep.subr.bf16.mxu1 %v11557_v9  ;;  %v18355_v9 = vsub.s32 1, %v18642_v17 }
 0x6b2   :  { %11984 = vmatpush1.bf16.msra.mxu1 %v11556_v59  ;;  %v13931_v59 = vld [vmem:[%s18574_s7 + $0x5] ss:$8 sm:$0x3] }
 0x6b3   :  { %11985 = vmatprep.subr.bf16.mxu1 %v11559_v37  ;;  %v12091_v37 = vrot.slane %v13930_v22, %v18349_v34 }
 0x6b6   :  { %11986 = vmatpush1.bf16.msra.mxu1 %v11558_v54  ;;  %v18362_v54 = vrot.slane %v13930_v22, %v18355_v9 }
 0x6b7   :  { %11987 = vmatprep.subr.bf16.mxu1 %v11561_v29  ;;  %v12110_v29 = vrot.slane %v13931_v59, %v18349_v34 }
 0x6ba   :  { %11988 = vmatpush1.bf16.msra.mxu1 %v11560_v44 }
 0x6bb   :  { %11989 = vmatprep.subr.bf16.mxu1 %v11563_v61  ;;  %v18366_v61 = vrot.slane %v13931_v59, %v18355_v9 }
 0x6be   :  { %11990 = vmatpush1.bf16.msra.mxu1 %v11562_v49 }
 0x6bf   :  { %11991 = vmatprep.subr.bf16.mxu1 %v11565_v47 }
 0x6c2   :  { %11992 = vmatpush1.bf16.msra.mxu1 %v11564_v46 }
 0x6c3   :  { %11993 = vmatprep.subr.bf16.mxu1 %v11567_v27 }
 0x6c6   :  { %11994 = vmatpush1.bf16.msra.mxu1 %v11566_v7 }
 0x6c7   :  { %11995 = vmatprep.subr.bf16.mxu1 %v11569_v40 }
 0x6ca   :  { %11996 = vmatpush1.bf16.msra.mxu1 %v11568_v51 }
 0x6cb   :  { %11997 = vmatprep.subr.bf16.mxu1 %v11571_v4 }
 0x6ce   :  { %11998 = vmatpush1.bf16.msra.mxu1 %v11570_v21 }
 0x6cf   :  { %11999 = vmatprep.subr.bf16.mxu1 %v11573_v63 }
 0x6d2   :  { %12000 = vmatpush1.bf16.msra.mxu1 %v11572_v13 }
 0x6d3   :  { %12001 = vmatprep.subr.bf16.mxu1 %v11575_v26 }
 0x6d6   :  { %12002 = vmatpush1.bf16.msra.mxu1 %v11574_v41 }
 0x6d7   :  { %12003 = vmatprep.subr.bf16.mxu1 %v11577_v35 }
 0x6da   :  { %12004 = vmatpush1.bf16.msra.mxu1 %v11576_v62 }
 0x6db   :  { %12005 = vmatprep.subr.bf16.mxu1 %v11579_v14 }
 0x6de   :  { %12006 = vmatpush1.bf16.msra.mxu1 %v11578_v16 }
 0x6df   :  { %12007 = vmatprep.subr.bf16.mxu1 %v11581_v31 }
 0x6e2   :  { %12008 = vmatpush1.bf16.msra.mxu1 %v11580_v0 }
 0x6e3   :  { %12030 = vmatprep.subr.bf16.mxu1 %v11583_v45 }
 0x6e5   :  { %12010 = vmatmul.mubr.bf16.vlgmr.msra.gmra.mrb[64].mxu1 %v11692_v23 }
 0x6e6   :  { %12031 = vmatpush1.bf16.msra.mxu1 %v11582_v32  ;;  %12019 = vmatprep.mubr.bf16.mxu1 %v11782_v12 }
 0x6e7   :  { %12032 = vmatprep.subr.bf16.mxu1 %v11585_v48 }
 0x6ea   :  { %12033 = vmatpush1.bf16.msra.mxu1 %v11584_v42 }
 0x6eb   :  { %12034 = vmatprep.subr.bf16.mxu1 %v11587_v55 }
 0x6ed   :  { %12020 = vmatmul.mubr.bf16.gmra.mrb[68].mxu1 %v11781_v6 }
 0x6ee   :  { %12035 = vmatpush1.bf16.msra.mxu1 %v11586_v11  ;;  %12062 = vmatprep.mubr.bf16.mxu1 %v18641_v38 }
 0x6ef   :  { %12036 = vmatprep.subr.bf16.mxu1 %v11589_v60 }
 0x6f2   :  { %12037 = vmatpush1.bf16.msra.mxu1 %v11588_v8 }
 0x6f3   :  { %12038 = vmatprep.subr.bf16.mxu1 %v11591_v56 }
 0x6f6   :  { %12039 = vmatpush1.bf16.msra.mxu1 %v11590_v24 }
 0x6f7   :  { %12040 = vmatprep.subr.bf16.mxu1 %v11593_v33 }
 0x6fa   :  { %12041 = vmatpush1.bf16.msra.mxu1 %v11592_v3 }
 0x6fb   :  { %12042 = vmatprep.subr.bf16.mxu1 %v11595_v39 }
 0x6fe   :  { %12043 = vmatpush1.bf16.msra.mxu1 %v11594_v19 }
 0x6ff   :  { %12044 = vmatprep.subr.bf16.mxu1 %v11597_v5 }
 0x702   :  { %12045 = vmatpush1.bf16.msra.mxu1 %v11596_v30 }
 0x705   :  { %12063 = vmatmul.mubr.bf16.vlgmr.msra.gmra.mrb[64].mxu1 %v11710_v36 }
 0x706   :  { %12072 = vmatprep.mubr.bf16.mxu1 %v18641_v38 }
 0x70d   :  { %12073 = vmatmul.mubr.bf16.gmra.mrb[68].mxu1 %v11799_v18 }
 0x7d8   :  { %v12064_v44 = vpop.f32.mrb[64].mxu1 }
 0x7d9   :  { %v12098_v49 = vmul.f32 %v12091_v37, %v12064_v44  ;;  %v12066_v47 = vpop.f32.mrb[65].mxu1 }
 0x7da   :  { %v12099_v46 = vmul.f32 %v18362_v54, %v12066_v47  ;;  %v12068_v27 = vpop.f32.mrb[66].mxu1 }
 0x7db   :  { %v12117_v7 = vadd.f32 %v12110_v29, %v12098_v49  ;;  %v12100_v40 = vmul.f32 %v12091_v37, %v12068_v27  ;;  %v12070_v51 = vpop.f32.mrb[67].mxu1 }
 0x7dc   :  { %v12118_v4 = vadd.f32 %v18366_v61, %v12099_v46  ;;  %v12101_v21 = vmul.f32 %v18362_v54, %v12070_v51 }
 0x7dd   :  { %v12125_v63 = vmax.f32 %v12117_v7, 0.0  ;;  %v12119_v13 = vadd.f32 %v12110_v29, %v12100_v40 }
 0x7de   :  { %v12126_v26 = vmax.f32 %v12118_v4, 0.0  ;;  %v12120_v41 = vadd.f32 %v18366_v61, %v12101_v21 }
 0x7df   :  { %v12127_v35 = vmax.f32 %v12119_v13, 0.0 }
 0x7e0   :  { %v12141_v62 = vcombine.low %v12125_v63, %v12126_v26  ;;  %v12142_v14 = vcombine.high %v12125_v63, %v12126_v26  ;;  %v12128_v58 = vmax.f32 %v12120_v41, 0.0  ;;  %v12074_v53 = vpop.f32.mrb[68].mxu1 }
 0x7e1   :  { %v12102_v16 = vmul.f32 %v12091_v37, %v12074_v53  ;;  %v12076_v31 = vpop.f32.mrb[69].mxu1 }
 0x7e2   :  { %v12149_v52 = vrot.slane %v12141_v62, %v16385_v20  ;;  %v12156_v57 = vrot.slane %v12142_v14, %v16385_v20  ;;  %v12159_v0 = vcombine.low %v12127_v35, %v12128_v58  ;;  %v12160_v45 = vcombine.high %v12127_v35, %v12128_v58  ;;  %v12078_v23 = vpop.f32.mrb[70].mxu1 }
 0x7e3   :  { %v12121_v12 = vadd.f32 %v12110_v29, %v12102_v16  ;;  %v12103_v32 = vmul.f32 %v18362_v54, %v12076_v31  ;;  %v12104_v48 = vmul.f32 %v12091_v37, %v12078_v23  ;;  %v12080_v42 = vpop.f32.mrb[71].mxu1 }
 0x7e4   :  { %v12157_v55 = vcombine.high %v12149_v52, %v12149_v52  ;;  %v12158_v6 = vcombine.high %v12156_v57, %v12156_v57  ;;  %v13932_v11 = vrot.slane %v12149_v52, 9  ;;  %v13934_v60 = vrot.slane %v12156_v57, 9 }
 0x7e5   :  { %v12167_v38 = vrot.slane %v12159_v0, %v16385_v20  ;;  %v12174_v8 = vrot.slane %v12160_v45, %v16385_v20  ;;  %v12129_v56 = vmax.f32 %v12121_v12, 0.0  ;;  %v12122_v24 = vadd.f32 %v18366_v61, %v12103_v32 }
 0x7e6   :  { %v13933_v33 = vrot.slane %v12157_v55, 9  ;;  %v13935_v3 = vrot.slane %v12158_v6, 9  ;;  %v12277_v39 = vmax.f32 %v12149_v52, %v13932_v11  ;;  %v12279_v43 = vmax.f32 %v12156_v57, %v13934_v60 }
 0x7e7   :  { %v12175_v25 = vcombine.high %v12167_v38, %v12167_v38  ;;  %v12176_v19 = vcombine.high %v12174_v8, %v12174_v8  ;;  %v13936_v5 = vrot.slane %v12167_v38, 9  ;;  %v13938_v1 = vrot.slane %v12174_v8, 9 }
 0x7e8   :  { %v12278_v15 = vmax.f32 %v12157_v55, %v13933_v33  ;;  %v12280_v30 = vmax.f32 %v12158_v6, %v13935_v3  ;;  %v18378_v36 = vmax.f32 %v12277_v39, %v12279_v43  ;;  %v12130_v50 = vmax.f32 %v12122_v24, 0.0 }
 0x7e9   :  { %v13937_v28 = vrot.slane %v12175_v25, 9  ;;  %v13939_v2 = vrot.slane %v12176_v19, 9  ;;  %v12281_v10 = vmax.f32 %v12167_v38, %v13936_v5  ;;  %v12283_v18 = vmax.f32 %v12174_v8, %v13938_v1 }
 0x7ea   :  { %v18380_v22 = vmax.f32 %v12278_v15, %v12280_v30  ;;  %v12177_v59 = vcombine.low %v12129_v56, %v12130_v50  ;;  %v12178_v37 = vcombine.high %v12129_v56, %v12130_v50  ;;  %v12123_v44 = vadd.f32 %v12110_v29, %v12104_v48 }
 0x7eb   :  { %v12282_v49 = vmax.f32 %v12175_v25, %v13937_v28  ;;  %v12284_v47 = vmax.f32 %v12176_v19, %v13939_v2  ;;  %v18382_v46 = vmax.f32 %v12281_v10, %v12283_v18  ;;  %v12105_v27 = vmul.f32 %v18362_v54, %v12080_v42 }
 0x7ec   :  { %v12185_v7 = vrot.slane %v12177_v59, %v16385_v20  ;;  %v12192_v40 = vrot.slane %v12178_v37, %v16385_v20  ;;  %v12131_v4 = vmax.f32 %v12123_v44, 0.0 }
 0x7ed   :  { %v18387_v51 = vmax.f32 %v12282_v49, %v12284_v47  ;;  %v12124_v21 = vadd.f32 %v18366_v61, %v12105_v27 }
 0x7ee   :  { %v12193_v63 = vcombine.high %v12185_v7, %v12185_v7  ;;  %v12194_v13 = vcombine.high %v12192_v40, %v12192_v40  ;;  %v13940_v26 = vrot.slane %v12185_v7, 9  ;;  %v13942_v41 = vrot.slane %v12192_v40, 9 }
 0x7ef   :  { %v12132_v29 = vmax.f32 %v12124_v21, 0.0 }
 0x7f0   :  { %v13941_v35 = vrot.slane %v12193_v63, 9  ;;  %v13943_v62 = vrot.slane %v12194_v13, 9  ;;  %v12285_v14 = vmax.f32 %v12185_v7, %v13940_v26  ;;  %v12287_v58 = vmax.f32 %v12192_v40, %v13942_v41 }
 0x7f1   :  { %v12195_v53 = vcombine.low %v12131_v4, %v12132_v29  ;;  %v12196_v54 = vcombine.high %v12131_v4, %v12132_v29 }
 0x7f2   :  { %v12286_v16 = vmax.f32 %v12193_v63, %v13941_v35  ;;  %v12288_v31 = vmax.f32 %v12194_v13, %v13943_v62  ;;  %v18390_v52 = vmax.f32 %v12285_v14, %v12287_v58 }
 0x7f3   :  { %v12203_v57 = vrot.slane %v12195_v53, %v16385_v20  ;;  %v12210_v0 = vrot.slane %v12196_v54, %v16385_v20 }
 0x7f4   :  { %v18394_v61 = vmax.f32 %v12286_v16, %v12288_v31 }
 0x7f5   :  { %v12211_v45 = vcombine.high %v12203_v57, %v12203_v57  ;;  %v12212_v23 = vcombine.high %v12210_v0, %v12210_v0  ;;  %v13944_v12 = vrot.slane %v12203_v57, 9  ;;  %v13946_v32 = vrot.slane %v12210_v0, 9 }
 0x7f7   :  { %v13945_v48 = vrot.slane %v12211_v45, 9  ;;  %v13947_v42 = vrot.slane %v12212_v23, 9  ;;  %v12289_v55 = vmax.f32 %v12203_v57, %v13944_v12  ;;  %v12291_v6 = vmax.f32 %v12210_v0, %v13946_v32 }
 0x7f9   :  { %v12290_v11 = vmax.f32 %v12211_v45, %v13945_v48  ;;  %v12292_v60 = vmax.f32 %v12212_v23, %v13947_v42  ;;  %v18396_v38 = vmax.f32 %v12289_v55, %v12291_v6 }
 0x7fb   :  { %v18398_v8 = vmax.f32 %v12290_v11, %v12292_v60 }
 0x7fc   :  { %14713 = dma.done.wait [#allocation6 + $0x1], 4096 }
 0x7fd   :  { %14714 = vsyncadd [#allocation6 + $0x1], 4294963200  ;;  %v18401_v20 = vsub.s32 2, %v18642_v17  ;;  %v12410_v49 = vld [vmem:[#allocation3 + $0x8] sm:$0xff]  ;;  %v12409_v47 = vld [vmem:[#allocation3] sm:$0xff]  ;;  %vm12474_vm0 = vcmask 1041409  }
 0x7fe   :  { %v12412_v27 = vld [vmem:[#allocation3 + $0x18] sm:$0xff]  ;;  %12506 = vmatprep.subr.bf16.mxu0 %v12410_v49  ;;  %v12411_v29 = vld [vmem:[#allocation3 + $0x10] sm:$0xff]  ;;  %v12414_v14 = vld [vmem:[#allocation3 + $0x28] sm:$0xff]  ;;  %vm18643_vm2 = vcmask 1047559  }
 0x7ff   :  { %v12320_v56 = vrot.slane %v18378_v36, %v18401_v20  ;;  %v12328_v24 = vrot.slane %v18380_v22, %v18401_v20  ;;  %v12336_v33 = vrot.slane %v18382_v46, %v18401_v20  ;;  %v12344_v3 = vrot.slane %v18387_v51, %v18401_v20  ;;  %12507 = vmatpush1.bf16.msra.mxu0 %v12409_v47  ;;  %v12413_v57 = vld [vmem:[#allocation3 + $0x20] sm:$0xff]  ;;  %v12416_v45 = vld [vmem:[#allocation3 + $0x38] sm:$0xff]  ;;  %v12415_v48 = vld [vmem:[#allocation3 + $0x30] sm:$0xff] }
 0x800   :  { %v12352_v39 = vrot.slane %v18390_v52, %v18401_v20  ;;  %v12360_v43 = vrot.slane %v18394_v61, %v18401_v20  ;;  %v12368_v25 = vrot.slane %v18396_v38, %v18401_v20  ;;  %v12376_v19 = vrot.slane %v18398_v8, %v18401_v20  ;;  %12508 = vmatprep.subr.bf16.mxu0 %v12412_v27  ;;  %v12418_v42 = vld [vmem:[#allocation3 + $0x48] sm:$0xff]  ;;  %v12417_v55 = vld [vmem:[#allocation3 + $0x40] sm:$0xff]  ;;  %v12420_v6 = vld [vmem:[#allocation3 + $0x58] sm:$0xff] }
 0x801   :  { %v12394_v5 = vpack.c.bf16 %v12320_v56, %v12320_v56  ;;  %v12396_v1 = vpack.c.bf16 %v12328_v24, %v12328_v24  ;;  %v12398_v15 = vpack.c.bf16 %v12336_v33, %v12336_v33  ;;  %v12400_v30 = vpack.c.bf16 %v12344_v3, %v12344_v3  ;;  %v12419_v11 = vld [vmem:[#allocation3 + $0x50] sm:$0xff]  ;;  %v12422_v60 = vld [vmem:[#allocation3 + $0x68] sm:$0xff]  ;;  %v12421_v56 = vld [vmem:[#allocation3 + $0x60] sm:$0xff] }
 0x802   :  { %v12402_v50 = vpack.c.bf16 %v12352_v39, %v12352_v39  ;;  %v12404_v28 = vpack.c.bf16 %v12360_v43, %v12360_v43  ;;  %v12406_v2 = vpack.c.bf16 %v12368_v25, %v12368_v25  ;;  %v12408_v10 = vpack.c.bf16 %v12376_v19, %v12376_v19  ;;  %v12424_v24 = vld [vmem:[#allocation3 + $0x78] sm:$0xff]  ;;  %v12423_v3 = vld [vmem:[#allocation3 + $0x70] sm:$0xff]  ;;  %v12426_v43 = vld [vmem:[#allocation3 + $0x88] sm:$0xff] }
 0x803   :  { %v12458_v18 = vunpack.c.l.b16 %v12394_v5  ;;  %v12460_v59 = vunpack.c.l.b16 %v12396_v1  ;;  %v12462_v37 = vunpack.c.l.b16 %v12398_v15  ;;  %v12464_v44 = vunpack.c.l.b16 %v12400_v30  ;;  %12509 = vmatpush1.bf16.msra.mxu0 %v12411_v29  ;;  %v12425_v1 = vld [vmem:[#allocation3 + $0x80] sm:$0xff]  ;;  %v12428_v30 = vld [vmem:[#allocation3 + $0x98] sm:$0xff] }
 0x804   :  { %v12466_v7 = vunpack.c.l.b16 %v12402_v50  ;;  %v12468_v40 = vunpack.c.l.b16 %v12404_v28  ;;  %v12470_v4 = vunpack.c.l.b16 %v12406_v2  ;;  %v12472_v21 = vunpack.c.l.b16 %v12408_v10  ;;  %12510 = vmatprep.subr.bf16.mxu0 %v12414_v14  ;;  %v12427_v2 = vld [vmem:[#allocation3 + $0x90] sm:$0xff]  ;;  %v12429_v49 = vld [vmem:[#allocation3 + $0xa0] sm:$0xff]  ;;  %v12432_v27 = vld [vmem:[#allocation3 + $0xb8] sm:$0xff] }
 0x805   :  { %v12488_v63 = vrot.slane %v12460_v59, 7  ;;  %v12490_v13 = vrot.slane %v12462_v37, 6  ;;  %v12492_v26 = vrot.slane %v12464_v44, 5  ;;  %v12324_v33 = vrot.slane %v18380_v22, %v18349_v34  ;;  %v12433_v14 = vld [vmem:[#allocation3 + $0xc0] sm:$0xff] }
 0x806   :  { %v12494_v41 = vrot.slane %v12466_v7, 4  ;;  %v12496_v62 = vrot.slane %v12468_v40, 3  ;;  %v12498_v53 = vrot.slane %v12470_v4, 2  ;;  %v12500_v16 = vrot.slane %v12472_v21, 1 }
 0x807   :  { %v12489_v35 = vsel %vm12474_vm0, %v12488_v63, %v12458_v18  ;;  %12511 = vmatpush1.bf16.msra.mxu0 %v12413_v57  ;;  %v12332_v39 = vrot.slane %v18382_v46, %v18349_v34  ;;  %v12316_v25 = vrot.slane %v18378_v36, %v18349_v34  ;;  %v12395_v19 = vpack.c.bf16 %v12324_v33, %v12324_v33  ;;  %v12430_v36 = vld [vmem:[#allocation3 + $0xa8] sm:$0xff]  ;;  %v12431_v63 = vld [vmem:[#allocation3 + $0xb0] sm:$0xff] }
 0x808   :  { %v12491_v58 = vsel %vm6491_vm11, %v12490_v13, %v12489_v35  ;;  %12512 = vmatprep.subr.bf16.mxu0 %v12416_v45  ;;  %v12340_v5 = vrot.slane %v18387_v51, %v18349_v34  ;;  %v12348_v28 = vrot.slane %v18390_v52, %v18349_v34  ;;  %v12356_v18 = vrot.slane %v18394_v61, %v18349_v34 }
 0x809   :  { %v12493_v54 = vsel %vm6494_vm12, %v12492_v26, %v12491_v58  ;;  %v12397_v15 = vpack.c.bf16 %v12332_v39, %v12332_v39  ;;  %v12393_v22 = vpack.c.bf16 %v12316_v25, %v12316_v25  ;;  %v12459_v50 = vunpack.c.l.b16 %v12395_v19 }
 0x80a   :  { %v12495_v31 = vsel %vm6497_vm13, %v12494_v41, %v12493_v54  ;;  %v12399_v46 = vpack.c.bf16 %v12340_v5, %v12340_v5  ;;  %v12401_v37 = vpack.c.bf16 %v12348_v28, %v12348_v28  ;;  %v12364_v47 = vrot.slane %v18396_v38, %v18349_v34  ;;  %v12434_v41 = vld [vmem:[#allocation3 + $0xc8] sm:$0xff] }
 0x80b   :  { %v12497_v0 = vsel %vm6500_vm14, %v12496_v62, %v12495_v31  ;;  %12513 = vmatpush1.bf16.msra.mxu0 %v12415_v48  ;;  %v12461_v10 = vunpack.c.l.b16 %v12397_v15  ;;  %v12457_v59 = vunpack.c.l.b16 %v12393_v22  ;;  %v12473_v51 = vrot.slane %v12459_v50, 7  ;;  %v12435_v31 = vld [vmem:[#allocation3 + $0xd0] sm:$0xff]  ;;  %v12440_v48 = vld [vmem:[#allocation3 + $0xf8] sm:$0xff] }
 0x80c   :  { %v12499_v23 = vsel %vm6503_vm15, %v12498_v53, %v12497_v0  ;;  %12514 = vmatprep.subr.bf16.mxu0 %v12418_v42  ;;  %v12463_v44 = vunpack.c.l.b16 %v12399_v46  ;;  %v12403_v7 = vpack.c.bf16 %v12356_v18, %v12356_v18  ;;  %v12465_v4 = vunpack.c.l.b16 %v12401_v37  ;;  %v12436_v53 = vld [vmem:[#allocation3 + $0xd8] sm:$0xff]  ;;  %v12438_v0 = vld [vmem:[#allocation3 + $0xe8] sm:$0xff] }
 0x80d   :  { %v12501_v12 = vsel %vm18643_vm2, %v12500_v16, %v12499_v23  ;;  %v12476_v52 = vrot.slane %v12461_v10, 6  ;;  %v12475_v40 = vsel %vm12474_vm0, %v12473_v51, %v12457_v59  ;;  %v12372_v61 = vrot.slane %v18398_v8, %v18349_v34 }
 0x80e   :  { %v12503_v32 = vpack.c.b16 %v12501_v12, %v12501_v12  ;;  %v12478_v21 = vrot.slane %v12463_v44, 5  ;;  %v12405_v13 = vpack.c.bf16 %v12364_v47, %v12364_v47  ;;  %v12467_v29 = vunpack.c.l.b16 %v12403_v7  ;;  %v12437_v12 = vld [vmem:[#allocation3 + $0xe0] sm:$0xff] }
 0x80f   :  { %12515 = vmatpush1.bf16.msra.mxu0 %v12417_v55  ;;  %v12477_v26 = vsel %vm6491_vm11, %v12476_v52, %v12475_v40  ;;  %v12480_v35 = vrot.slane %v12465_v4, 4  ;;  %v12407_v38 = vpack.c.bf16 %v12372_v61, %v12372_v61  ;;  %vm18644_vm11 = vmmov %vm18643_vm2  ;;  %v12439_v55 = vld [vmem:[#allocation3 + $0xf0] sm:$0xff] }
 0x810   :  { %12538 = vmatprep.mubr.bf16.mxu0 %v12503_v32  ;;  %12516 = vmatprep.subr.bf16.mxu0 %v12420_v6  ;;  %v12479_v62 = vsel %vm6494_vm12, %v12478_v21, %v12477_v26  ;;  %v12469_v58 = vunpack.c.l.b16 %v12405_v13  ;;  %v12482_v54 = vrot.slane %v12467_v29, 3  ;;  %vm12589_vm12 = vcmask 1043456  }
 0x811   :  { %v12481_v8 = vsel %vm6497_vm13, %v12480_v35, %v12479_v62  ;;  %v12471_v16 = vunpack.c.l.b16 %v12407_v38 }
 0x812   :  { %v12484_v57 = vrot.slane %v12469_v58, 2  ;;  %v12483_v45 = vsel %vm6500_vm14, %v12482_v54, %v12481_v8 }
 0x813   :  { %12517 = vmatpush1.bf16.msra.mxu0 %v12419_v11  ;;  %v12486_v23 = vrot.slane %v12471_v16, 1  ;;  %v13948_v11 = vld [vmem:[%s18574_s7 + $0x6] ss:$8 sm:$0x3] }
 0x814   :  { %12518 = vmatprep.subr.bf16.mxu0 %v12422_v60  ;;  %v12485_v32 = vsel %vm6503_vm15, %v12484_v57, %v12483_v45  ;;  %v13949_v60 = vld [vmem:[%s18574_s7 + $0x7] ss:$8 sm:$0x3] }
 0x815   :  { %v12487_v42 = vsel %vm18644_vm11, %v12486_v23, %v12485_v32  ;;  %v12568_v33 = vrot.slane %v13949_v60, %v18349_v34  ;;  %v12572_v39 = vrot.slane %v13949_v60, %v18355_v9 }
 0x816   :  { %v12502_v6 = vpack.c.b16 %v12487_v42, %v12487_v42 }
 0x817   :  { %12519 = vmatpush1.bf16.msra.mxu0 %v12421_v56  ;;  %v12553_v56 = vrot.slane %v13948_v11, %v18349_v34 }
 0x818   :  { %12520 = vmatprep.subr.bf16.mxu0 %v12424_v24  ;;  %v12557_v24 = vrot.slane %v13948_v11, %v18355_v9 }
 0x81b   :  { %12521 = vmatpush1.bf16.msra.mxu0 %v12423_v3 }
 0x81c   :  { %12522 = vmatprep.subr.bf16.mxu0 %v12426_v43 }
 0x81f   :  { %12523 = vmatpush1.bf16.msra.mxu0 %v12425_v1 }
 0x820   :  { %12524 = vmatprep.subr.bf16.mxu0 %v12428_v30 }
 0x823   :  { %12525 = vmatpush1.bf16.msra.mxu0 %v12427_v2 }
 0x824   :  { %12526 = vmatprep.subr.bf16.mxu0 %v12430_v36 }
 0x827   :  { %12527 = vmatpush1.bf16.msra.mxu0 %v12429_v49 }
 0x828   :  { %12528 = vmatprep.subr.bf16.mxu0 %v12432_v27 }
 0x82b   :  { %12529 = vmatpush1.bf16.msra.mxu0 %v12431_v63 }
 0x82c   :  { %12530 = vmatprep.subr.bf16.mxu0 %v12434_v41 }
 0x82f   :  { %12531 = vmatpush1.bf16.msra.mxu0 %v12433_v14 }
 0x830   :  { %12532 = vmatprep.subr.bf16.mxu0 %v12436_v53 }
 0x833   :  { %12533 = vmatpush1.bf16.msra.mxu0 %v12435_v31 }
 0x834   :  { %12534 = vmatprep.subr.bf16.mxu0 %v12438_v0 }
 0x837   :  { %12535 = vmatpush1.bf16.msra.mxu0 %v12437_v12 }
 0x838   :  { %12536 = vmatprep.subr.bf16.mxu0 %v12440_v48 }
 0x83b   :  { %12537 = vmatpush1.bf16.msra.mxu0 %v12439_v55 }
 0x83e   :  { %12539 = vmatmul.mubr.bf16.vlgmr.msra.gmra.mrb[80].mxu0 %v12502_v6 }
 0x911   :  { %v12540_v3 = vpop.f32.mrb[80].mxu0 }
 0x912   :  { %v12560_v43 = vmul.f32 %v12553_v56, %v12540_v3  ;;  %v12542_v25 = vpop.f32.mrb[81].mxu0 }
 0x913   :  { %v12561_v19 = vmul.f32 %v12557_v24, %v12542_v25  ;;  %v12544_v5 = vpop.f32.mrb[82].mxu0 }
 0x914   :  { %v12575_v1 = vadd.f32 %v12568_v33, %v12560_v43  ;;  %v12545_v15 = vpop.f32.mrb[83].mxu0 }
 0x915   :  { %v12576_v30 = vadd.f32 %v12572_v39, %v12561_v19 }
 0x916   :  { %v12577_v22 = vmax.f32 %v12575_v1, 0.0 }
 0x917   :  { %v12578_v50 = vmax.f32 %v12576_v30, 0.0 }
 0x919   :  { %v12581_v28 = vcombine.low %v12577_v22, %v12578_v50  ;;  %v12582_v46 = vcombine.high %v12577_v22, %v12578_v50  ;;  %v13950_v2 = vcombine.low %v12578_v50, %v12578_v50  ;;  %v13951_v10 = vcombine.high %v12578_v50, %v12578_v50 }
 0x91b   :  { %v12590_v36 = vsel %vm12589_vm12, %v12581_v28, 0.0  ;;  %v12597_v18 = vsel %vm12589_vm12, %v13950_v2, 0.0  ;;  %v12604_v59 = vsel %vm12589_vm12, %v12582_v46, 0.0  ;;  %v12611_v51 = vsel %vm12589_vm12, %v13951_v10, 0.0 }
 0x91c   :  { %v12591_v37 = vrot.slane %v12590_v36, 4  ;;  %v12598_v44 = vrot.slane %v12597_v18, 4  ;;  %v12605_v49 = vrot.slane %v12604_v59, 4  ;;  %v12612_v47 = vrot.slane %v12611_v51, 4 }
 0x91e   :  { %v12592_v52 = vadd.f32 %v12591_v37, %v12590_v36  ;;  %v12599_v27 = vadd.f32 %v12598_v44, %v12597_v18  ;;  %v12606_v7 = vadd.f32 %v12605_v49, %v12604_v59  ;;  %v12613_v40 = vadd.f32 %v12612_v47, %v12611_v51 }
 0x920   :  { %v12593_v4 = vrot.slane %v12592_v52, 2  ;;  %v12600_v61 = vrot.slane %v12599_v27, 2  ;;  %v12607_v21 = vrot.slane %v12606_v7, 2  ;;  %v12614_v63 = vrot.slane %v12613_v40, 2 }
 0x922   :  { %v12594_v13 = vadd.f32 %v12593_v4, %v12592_v52  ;;  %v12601_v26 = vadd.f32 %v12600_v61, %v12599_v27  ;;  %v12608_v41 = vadd.f32 %v12607_v21, %v12606_v7  ;;  %v12615_v29 = vadd.f32 %v12614_v63, %v12613_v40 }
 0x924   :  { %v12595_v35 = vrot.slane %v12594_v13, 1  ;;  %v12602_v38 = vrot.slane %v12601_v26, 1  ;;  %v12609_v62 = vrot.slane %v12608_v41, 1  ;;  %v12616_v14 = vrot.slane %v12615_v29, 1 }
 0x926   :  { %v12596_v58 = vadd.f32 %v12595_v35, %v12594_v13  ;;  %v12603_v53 = vadd.f32 %v12602_v38, %v12601_v26  ;;  %v12610_v54 = vadd.f32 %v12609_v62, %v12608_v41  ;;  %v12617_v8 = vadd.f32 %v12616_v14, %v12615_v29 }
 0x928   :  { %v18459_v16 = vmul.f32 0.25, %v12596_v58  ;;  %v12620_v31 = vmul.f32 0.25, %v12603_v53  ;;  %v18461_v57 = vmul.f32 0.25, %v12610_v54  ;;  %v12622_v0 = vmul.f32 0.25, %v12617_v8 }
 0x929   :  { %14715 = dma.done.wait [#allocation6 + $0x2], 10240 }
 0x92a   :  { %14716 = vsyncadd [#allocation6 + $0x2], 4294957056  ;;  %v12627_v45 = vpack.c.bf16 %v12620_v31, %v12620_v31  ;;  %v12629_v23 = vpack.c.bf16 %v12622_v0, %v12622_v0  ;;  %v12631_v55 = vld [vmem:[#allocation4 + $0x8] sm:$0xff]  ;;  %v12630_v6 = vld [vmem:[#allocation4] sm:$0xff]  ;;  %v12626_v44 = vpack.c.bf16 %v18459_v16, %v18459_v16  ;;  %v12628_v49 = vpack.c.bf16 %v18461_v57, %v18461_v57 }
 0x92b   :  { %v12636_v11 = vld [vmem:[#allocation4 + $0x30] sm:$0xff]  ;;  %12754 = vmatprep.subr.bf16.mxu0 %v12631_v55  ;;  %v12635_v60 = vld [vmem:[#allocation4 + $0x28] sm:$0xff]  ;;  %v12641_v56 = vld [vmem:[#allocation4 + $0x58] sm:$0xff]  ;;  %vm12876_vm13 = vcmask 74752  }
 0x92c   :  { %v12745_v12 = vunpack.c.l.b16 %v12627_v45  ;;  %v12747_v32 = vunpack.c.l.b16 %v12629_v23  ;;  %12755 = vmatpush1.bf16.msra.mxu0 %v12630_v6  ;;  %v12640_v24 = vld [vmem:[#allocation4 + $0x50] sm:$0xff]  ;;  %v12646_v33 = vld [vmem:[#allocation4 + $0x80] sm:$0xff]  ;;  %v12645_v3 = vld [vmem:[#allocation4 + $0x78] sm:$0xff]  ;;  %v12744_v27 = vunpack.c.l.b16 %v12626_v44  ;;  %v12746_v7 = vunpack.c.l.b16 %v12628_v49 }
 0x92d   :  { %12756 = vmatprep.subr.bf16.mxu0 %v12636_v11  ;;  %v12651_v39 = vld [vmem:[#allocation4 + $0xa8] sm:$0xff]  ;;  %v12650_v43 = vld [vmem:[#allocation4 + $0xa0] sm:$0xff]  ;;  %v12656_v25 = vld [vmem:[#allocation4 + $0xd0] sm:$0xff] }
 0x92e   :  { %v12749_v48 = vsel %vm12474_vm0, %v12747_v32, %v12745_v12  ;;  %v12655_v19 = vld [vmem:[#allocation4 + $0xc8] sm:$0xff]  ;;  %v12661_v5 = vld [vmem:[#allocation4 + $0xf8] sm:$0xff]  ;;  %v12660_v1 = vld [vmem:[#allocation4 + $0xf0] sm:$0xff]  ;;  %v12748_v61 = vsel %vm12474_vm0, %v12746_v7, %v12744_v27 }
 0x92f   :  { %v18464_v42 = vpack.c.b16 %v12749_v48, %v12749_v48  ;;  %v12666_v15 = vld [vmem:[#allocation4 + $0x120] sm:$0xff]  ;;  %v12665_v30 = vld [vmem:[#allocation4 + $0x118] sm:$0xff]  ;;  %v12671_v22 = vld [vmem:[#allocation4 + $0x148] sm:$0xff]  ;;  %v18472_v13 = vpack.c.b16 %v12748_v61, %v12748_v61 }
 0x930   :  { %12757 = vmatpush1.bf16.msra.mxu0 %v12635_v60  ;;  %v12670_v50 = vld [vmem:[#allocation4 + $0x140] sm:$0xff]  ;;  %v12676_v28 = vld [vmem:[#allocation4 + $0x170] sm:$0xff]  ;;  %v12675_v46 = vld [vmem:[#allocation4 + $0x168] sm:$0xff] }
 0x931   :  { %12786 = vmatprep.mubr.bf16.mxu0 %v18464_v42  ;;  %12758 = vmatprep.subr.bf16.mxu0 %v12641_v56  ;;  %v12681_v2 = vld [vmem:[#allocation4 + $0x198] sm:$0xff]  ;;  %v12680_v10 = vld [vmem:[#allocation4 + $0x190] sm:$0xff]  ;;  %v12686_v36 = vld [vmem:[#allocation4 + $0x1c0] sm:$0xff] }
 0x932   :  { %v12685_v18 = vld [vmem:[#allocation4 + $0x1b8] sm:$0xff]  ;;  %v12691_v59 = vld [vmem:[#allocation4 + $0x1e8] sm:$0xff]  ;;  %v12690_v51 = vld [vmem:[#allocation4 + $0x1e0] sm:$0xff] }
 0x933   :  { %v12696_v37 = vld [vmem:[#allocation4 + $0x210] sm:$0xff]  ;;  %v12695_v47 = vld [vmem:[#allocation4 + $0x208] sm:$0xff]  ;;  %v12701_v52 = vld [vmem:[#allocation4 + $0x238] sm:$0xff] }
 0x934   :  { %12759 = vmatpush1.bf16.msra.mxu0 %v12640_v24  ;;  %v12700_v40 = vld [vmem:[#allocation4 + $0x230] sm:$0xff]  ;;  %v12706_v4 = vld [vmem:[#allocation4 + $0x260] sm:$0xff]  ;;  %v12705_v21 = vld [vmem:[#allocation4 + $0x258] sm:$0xff] }
 0x935   :  { %12760 = vmatprep.subr.bf16.mxu0 %v12646_v33  ;;  %v12633_v63 = vld [vmem:[#allocation4 + $0x18] sm:$0xff]  ;;  %v12632_v26 = vld [vmem:[#allocation4 + $0x10] sm:$0xff]  ;;  %v12638_v41 = vld [vmem:[#allocation4 + $0x40] sm:$0xff] }
 0x936   :  { %v12637_v29 = vld [vmem:[#allocation4 + $0x38] sm:$0xff]  ;;  %v12643_v35 = vld [vmem:[#allocation4 + $0x68] sm:$0xff]  ;;  %v12642_v38 = vld [vmem:[#allocation4 + $0x60] sm:$0xff] }
 0x937   :  { %v12648_v62 = vld [vmem:[#allocation4 + $0x90] sm:$0xff]  ;;  %v12647_v14 = vld [vmem:[#allocation4 + $0x88] sm:$0xff]  ;;  %v12653_v58 = vld [vmem:[#allocation4 + $0xb8] sm:$0xff] }
 0x938   :  { %12761 = vmatpush1.bf16.msra.mxu0 %v12645_v3  ;;  %v12652_v53 = vld [vmem:[#allocation4 + $0xb0] sm:$0xff]  ;;  %v12658_v54 = vld [vmem:[#allocation4 + $0xe0] sm:$0xff]  ;;  %v12657_v8 = vld [vmem:[#allocation4 + $0xd8] sm:$0xff] }
 0x939   :  { %12762 = vmatprep.subr.bf16.mxu0 %v12651_v39  ;;  %v12663_v16 = vld [vmem:[#allocation4 + $0x108] sm:$0xff]  ;;  %v12662_v31 = vld [vmem:[#allocation4 + $0x100] sm:$0xff]  ;;  %v12668_v57 = vld [vmem:[#allocation4 + $0x130] sm:$0xff] }
 0x93a   :  { %v12667_v0 = vld [vmem:[#allocation4 + $0x128] sm:$0xff]  ;;  %v12673_v45 = vld [vmem:[#allocation4 + $0x158] sm:$0xff]  ;;  %v12672_v23 = vld [vmem:[#allocation4 + $0x150] sm:$0xff] }
 0x93b   :  { %v12678_v12 = vld [vmem:[#allocation4 + $0x180] sm:$0xff]  ;;  %v12677_v32 = vld [vmem:[#allocation4 + $0x178] sm:$0xff]  ;;  %v12683_v48 = vld [vmem:[#allocation4 + $0x1a8] sm:$0xff] }
 0x93c   :  { %12763 = vmatpush1.bf16.msra.mxu0 %v12650_v43  ;;  %v12682_v55 = vld [vmem:[#allocation4 + $0x1a0] sm:$0xff]  ;;  %v12688_v6 = vld [vmem:[#allocation4 + $0x1d0] sm:$0xff]  ;;  %v12687_v11 = vld [vmem:[#allocation4 + $0x1c8] sm:$0xff] }
 0x93d   :  { %12764 = vmatprep.subr.bf16.mxu0 %v12656_v25  ;;  %v12693_v60 = vld [vmem:[#allocation4 + $0x1f8] sm:$0xff]  ;;  %v12692_v56 = vld [vmem:[#allocation4 + $0x1f0] sm:$0xff]  ;;  %v12698_v24 = vld [vmem:[#allocation4 + $0x220] sm:$0xff] }
 0x93e   :  { %v12697_v33 = vld [vmem:[#allocation4 + $0x218] sm:$0xff]  ;;  %v12703_v3 = vld [vmem:[#allocation4 + $0x248] sm:$0xff]  ;;  %v12702_v39 = vld [vmem:[#allocation4 + $0x240] sm:$0xff] }
 0x93f   :  { %v12708_v43 = vld [vmem:[#allocation4 + $0x270] sm:$0xff]  ;;  %v12707_v25 = vld [vmem:[#allocation4 + $0x268] sm:$0xff] }
 0x940   :  { %12765 = vmatpush1.bf16.msra.mxu0 %v12655_v19  ;;  %v12674_v19 = vld [vmem:[#allocation4 + $0x160] sm:$0xff]  ;;  %v13953_v44 = vld [vmem:[%s18574_s7 + $0x2a] ss:$8 sm:$0x10] }
 0x941   :  { %12766 = vmatprep.subr.bf16.mxu0 %v12661_v5  ;;  %v12634_v5 = vld [vmem:[#allocation4 + $0x20] sm:$0xff] }
 0x944   :  { %12767 = vmatpush1.bf16.msra.mxu0 %v12660_v1  ;;  %v12679_v1 = vld [vmem:[#allocation4 + $0x188] sm:$0xff] }
 0x945   :  { %12768 = vmatprep.subr.bf16.mxu0 %v12666_v15  ;;  %v12639_v15 = vld [vmem:[#allocation4 + $0x48] sm:$0xff] }
 0x948   :  { %12769 = vmatpush1.bf16.msra.mxu0 %v12665_v30  ;;  %v12684_v30 = vld [vmem:[#allocation4 + $0x1b0] sm:$0xff] }
 0x949   :  { %12770 = vmatprep.subr.bf16.mxu0 %v12671_v22  ;;  %v12644_v22 = vld [vmem:[#allocation4 + $0x70] sm:$0xff] }
 0x94c   :  { %12771 = vmatpush1.bf16.msra.mxu0 %v12670_v50  ;;  %v12689_v50 = vld [vmem:[#allocation4 + $0x1d8] sm:$0xff] }
 0x94d   :  { %12772 = vmatprep.subr.bf16.mxu0 %v12676_v28  ;;  %v12649_v28 = vld [vmem:[#allocation4 + $0x98] sm:$0xff] }
 0x950   :  { %12773 = vmatpush1.bf16.msra.mxu0 %v12675_v46  ;;  %v12694_v46 = vld [vmem:[#allocation4 + $0x200] sm:$0xff] }
 0x951   :  { %12774 = vmatprep.subr.bf16.mxu0 %v12681_v2  ;;  %v12654_v2 = vld [vmem:[#allocation4 + $0xc0] sm:$0xff] }
 0x954   :  { %12775 = vmatpush1.bf16.msra.mxu0 %v12680_v10  ;;  %v12699_v10 = vld [vmem:[#allocation4 + $0x228] sm:$0xff] }
 0x955   :  { %12776 = vmatprep.subr.bf16.mxu0 %v12686_v36  ;;  %v12659_v36 = vld [vmem:[#allocation4 + $0xe8] sm:$0xff] }
 0x958   :  { %12777 = vmatpush1.bf16.msra.mxu0 %v12685_v18  ;;  %v12704_v18 = vld [vmem:[#allocation4 + $0x250] sm:$0xff] }
 0x959   :  { %12778 = vmatprep.subr.bf16.mxu0 %v12691_v59  ;;  %v12709_v59 = vld [vmem:[#allocation4 + $0x278] sm:$0xff] }
 0x95c   :  { %12779 = vmatpush1.bf16.msra.mxu0 %v12690_v51  ;;  %v12669_v51 = vld [vmem:[#allocation4 + $0x138] sm:$0xff] }
 0x95d   :  { %12780 = vmatprep.subr.bf16.mxu0 %v12696_v37  ;;  %v13952_v37 = vld [vmem:[%s18574_s7 + $0x2a] ss:$8 sm:$0xf] }
 0x95e   :  { %v12713_v49 = vor.u32 %v13953_v44, %v13952_v37 }
 0x960   :  { %12781 = vmatpush1.bf16.msra.mxu0 %v12695_v47  ;;  %v12718_v47 = vrot.slane %v12713_v49, %v18349_v34  ;;  %v12722_v27 = vrot.slane %v12713_v49, %v18355_v9 }
 0x961   :  { %12782 = vmatprep.subr.bf16.mxu0 %v12701_v52  ;;  %v13954_v52 = vld [vmem:[%s18574_s7 + $0x28] ss:$8 sm:$0xf] }
 0x962   :  { %v12888_v61 = vrot.slane %v13954_v52, %v18349_v34 }
 0x964   :  { %12783 = vmatpush1.bf16.msra.mxu0 %v12700_v40  ;;  %v13955_v40 = vld [vmem:[%s18574_s7 + $0x29] ss:$8 sm:$0xf] }
 0x965   :  { %12784 = vmatprep.subr.bf16.mxu0 %v12706_v4 }
 0x968   :  { %12785 = vmatpush1.bf16.msra.mxu0 %v12705_v21 }
 0x969   :  { %12795 = vmatprep.subr.bf16.mxu0 %v12633_v63 }
 0x96b   :  { %12787 = vmatmul.mubr.bf16.vlgmr.msra.gmra.mrb[84].mxu0 %v18472_v13 }
 0x96c   :  { %12796 = vmatpush1.bf16.msra.mxu0 %v12632_v26  ;;  %12827 = vmatprep.mubr.bf16.mxu0 %v18464_v42 }
 0x96d   :  { %12797 = vmatprep.subr.bf16.mxu0 %v12638_v41 }
 0x970   :  { %12798 = vmatpush1.bf16.msra.mxu0 %v12637_v29  ;;  %v12915_v29 = vrot.slane %v13955_v40, %v18349_v34 }
 0x971   :  { %12799 = vmatprep.subr.bf16.mxu0 %v12643_v35 }
 0x974   :  { %12800 = vmatpush1.bf16.msra.mxu0 %v12642_v38 }
 0x975   :  { %12801 = vmatprep.subr.bf16.mxu0 %v12648_v62  ;;  %v12919_v62 = vrot.slane %v13955_v40, %v18355_v9 }
 0x978   :  { %12802 = vmatpush1.bf16.msra.mxu0 %v12647_v14 }
 0x979   :  { %12803 = vmatprep.subr.bf16.mxu0 %v12653_v58 }
 0x97c   :  { %12804 = vmatpush1.bf16.msra.mxu0 %v12652_v53 }
 0x97d   :  { %12805 = vmatprep.subr.bf16.mxu0 %v12658_v54 }
 0x980   :  { %12806 = vmatpush1.bf16.msra.mxu0 %v12657_v8  ;;  %v12729_v8 = vsub.s32 3, %v18642_v17 }
 0x981   :  { %12807 = vmatprep.subr.bf16.mxu0 %v12663_v16  ;;  %v12726_v16 = vrot.slane %v12713_v49, %v18401_v20 }
 0x984   :  { %12808 = vmatpush1.bf16.msra.mxu0 %v12662_v31  ;;  %v12730_v31 = vrot.slane %v12713_v49, %v12729_v8 }
 0x985   :  { %12809 = vmatprep.subr.bf16.mxu0 %v12668_v57 }
 0x988   :  { %12810 = vmatpush1.bf16.msra.mxu0 %v12667_v0 }
 0x989   :  { %12811 = vmatprep.subr.bf16.mxu0 %v12673_v45  ;;  %v12896_v45 = vrot.slane %v13954_v52, %v18401_v20 }
 0x98c   :  { %12812 = vmatpush1.bf16.msra.mxu0 %v12672_v23 }
 0x98d   :  { %12813 = vmatprep.subr.bf16.mxu0 %v12678_v12  ;;  %v12900_v12 = vrot.slane %v13954_v52, %v12729_v8 }
 0x990   :  { %12814 = vmatpush1.bf16.msra.mxu0 %v12677_v32 }
 0x991   :  { %12815 = vmatprep.subr.bf16.mxu0 %v12683_v48 }
 0x994   :  { %12816 = vmatpush1.bf16.msra.mxu0 %v12682_v55 }
 0x995   :  { %12817 = vmatprep.subr.bf16.mxu0 %v12688_v6 }
 0x998   :  { %12818 = vmatpush1.bf16.msra.mxu0 %v12687_v11  ;;  %v12927_v11 = vrot.slane %v13955_v40, %v12729_v8 }
 0x999   :  { %12819 = vmatprep.subr.bf16.mxu0 %v12693_v60 }
 0x99c   :  { %12820 = vmatpush1.bf16.msra.mxu0 %v12692_v56 }
 0x99d   :  { %12821 = vmatprep.subr.bf16.mxu0 %v12698_v24 }
 0x9a0   :  { %12822 = vmatpush1.bf16.msra.mxu0 %v12697_v33 }
 0x9a1   :  { %12823 = vmatprep.subr.bf16.mxu0 %v12703_v3  ;;  %v12733_v3 = vsub.s32 4, %v18642_v17 }
 0x9a4   :  { %12824 = vmatpush1.bf16.msra.mxu0 %v12702_v39 }
 0x9a5   :  { %12825 = vmatprep.subr.bf16.mxu0 %v12708_v43  ;;  %v12734_v43 = vrot.slane %v12713_v49, %v12733_v3 }
 0x9a8   :  { %12826 = vmatpush1.bf16.msra.mxu0 %v12707_v25 }
 0x9a9   :  { %14311 = vmatprep.subr.bf16.mxu0 %v12674_v19 }
 0x9ab   :  { %12828 = vmatmul.mubr.bf16.vlgmr.msra.gmra.mrb[88].mxu0 %v18472_v13 }
 0x9ac   :  { %14312 = vmatpush3.bf16.msra.mxu0 %v12634_v5  ;;  %12868 = vmatprep.mubr.bf16.mxu0 %v18464_v42  ;;  %v12664_v42 = vld [vmem:[#allocation4 + $0x110] sm:$0xff] }
 0x9ad   :  { %14313 = vmatprep.subr.bf16.mxu0 %v12679_v1 }
 0x9b0   :  { %14314 = vmatpush3.bf16.msra.mxu0 %v12639_v15 }
 0x9b1   :  { %14315 = vmatprep.subr.bf16.mxu0 %v12684_v30  ;;  %v18646_v30 = vld [vmem:[#allocation49_spill] sm:$0xff] }
 0x9b2   :  { %14355 = vmatprep.subr.bf16.mxu1 %v18646_v30 }
 0x9b4   :  { %14316 = vmatpush3.bf16.msra.mxu0 %v12644_v22 }
 0x9b5   :  { %14317 = vmatprep.subr.bf16.mxu0 %v12689_v50 }
 0x9b8   :  { %14318 = vmatpush3.bf16.msra.mxu0 %v12649_v28 }
 0x9b9   :  { %14319 = vmatprep.subr.bf16.mxu0 %v12694_v46 }
 0x9bc   :  { %14320 = vmatpush3.bf16.msra.mxu0 %v12654_v2 }
 0x9bd   :  { %14321 = vmatprep.subr.bf16.mxu0 %v12699_v10 }
 0x9c0   :  { %14322 = vmatpush3.bf16.msra.mxu0 %v12659_v36 }
 0x9c1   :  { %14323 = vmatprep.subr.bf16.mxu0 %v12704_v18 }
 0x9c4   :  { %14324 = vmatpush3.bf16.msra.mxu0 %v12664_v42 }
 0x9c5   :  { %14325 = vmatprep.subr.bf16.mxu0 %v12709_v59 }
 0x9c8   :  { %14326 = vmatpush3.bf16.msra.mxu0 %v12669_v51 }
 0x9cb   :  { %12869 = vmatmul.mubr.bf16.vlgmr.msra.gmra.mrb[92].mxu0 %v18472_v13  ;;  %v12892_v13 = vrot.slane %v13954_v52, %v18355_v9  ;;  %v12923_v9 = vrot.slane %v13955_v40, %v18401_v20  ;;  %v18645_v20 = vld [vmem:[#allocation33_spill] sm:$0xff] }
 0x9cc   :  { %14333 = vmatprep.subr.bf16.mxu0 %v18645_v20 }
 0xa3e   :  { %v12788_v7 = vpop.f32.mrb[84].mxu0 }
 0xa3f   :  { %v12789_v4 = vadd.f32 %v12788_v7, %v12718_v47  ;;  %v12790_v21 = vpop.f32.mrb[85].mxu0 }
 0xa40   :  { %v12791_v63 = vadd.f32 %v12790_v21, %v12722_v27  ;;  %v12792_v26 = vpop.f32.mrb[86].mxu0 }
 0xa41   :  { %v12878_v41 = vmax.f32 %v12789_v4, 0.0  ;;  %v12793_v35 = vpop.f32.mrb[87].mxu0 }
 0xa42   :  { %v12879_v38 = vmax.f32 %v12791_v63, 0.0 }
 0xa43   :  { %v12905_v14 = vmul.f32 %v12888_v61, %v12878_v41 }
 0xa44   :  { %v12906_v58 = vmul.f32 %v12892_v13, %v12879_v38 }
 0xa45   :  { %v18497_v53 = vadd.f32 %v12915_v29, %v12905_v14 }
 0xa46   :  { %v12933_v54 = vadd.f32 %v12919_v62, %v12906_v58 }
 0xa48   :  { %v12941_v22 = vpack.c.bf16 %v12933_v54, %v12933_v54 }
 0xa7e   :  { %v12829_v57 = vpop.f32.mrb[88].mxu0 }
 0xa7f   :  { %v12830_v0 = vadd.f32 %v12829_v57, %v12726_v16  ;;  %v12831_v23 = vpop.f32.mrb[89].mxu0 }
 0xa80   :  { %v12832_v34 = vadd.f32 %v12831_v23, %v12730_v31  ;;  %v12833_v32 = vpop.f32.mrb[90].mxu0 }
 0xa81   :  { %v12880_v48 = vmax.f32 %v12830_v0, 0.0  ;;  %v12834_v55 = vpop.f32.mrb[91].mxu0 }
 0xa82   :  { %v12881_v6 = vmax.f32 %v12832_v34, 0.0 }
 0xa83   :  { %v12907_v60 = vmul.f32 %v12896_v45, %v12880_v48 }
 0xa84   :  { %v12908_v56 = vmul.f32 %v12900_v12, %v12881_v6 }
 0xa85   :  { %v12934_v24 = vadd.f32 %v12923_v9, %v12907_v60 }
 0xa86   :  { %v12935_v33 = vadd.f32 %v12927_v11, %v12908_v56 }
 0xa88   :  { %v12943_v50 = vpack.c.bf16 %v12935_v33, %v12935_v33 }
 0xa9e   :  { %v14327_v39 = vpop.f32.mrb[92].mxu0 }
 0xa9f   :  { %v14328_v25 = vpop.f32.mrb[93].mxu0 }
 0xaa0   :  { %v14329_v19 = vadd.f32 %v14328_v25, %v14327_v39  ;;  %v14330_v5 = vpop.f32.mrb[94].mxu0 }
 0xaa1   :  { %v14331_v1 = vpop.f32.mrb[95].mxu0 }
 0xaa2   :  { %v12871_v15 = vadd.f32 %v14329_v19, %v12734_v43 }
 0xaa4   :  { %12877 = vst.msk [vmem:[#allocation11] sm:$0x3] %vm12876_vm13, %v12871_v15 }
 0xaa5   :  { %14717 = dma.done.wait [#allocation6 + $0x3], 4096 }
 0xaa6   :  { %14718 = vsyncadd [#allocation6 + $0x3], 4294963200  ;;  %v18647_v28 = vld [vmem:[#allocation25_spill] sm:$0xff]  ;;  %v18649_v46 = vld [vmem:[#allocation34_spill] sm:$0xff]  ;;  %13009 = vmatprep.mubr.bf16.mxu0 %v12941_v22  ;;  %13049 = vmatprep.mubr.bf16.mxu1 %v12943_v50  ;;  %v12940_v62 = vpack.c.bf16 %v18497_v53, %v18497_v53  ;;  %v12942_v14 = vpack.c.bf16 %v12934_v24, %v12934_v24  ;;  %s14726_s15 = smov [#allocation11]  }
 0xaa7   :  { %14334 = vmatpush3.bf16.msra.mxu0 %v18647_v28  ;;  %v18648_v17 = vld [vmem:[#allocation41_spill] sm:$0xff]  ;;  %v18650_v2 = vld [vmem:[#allocation50_spill] sm:$0xff]  ;;  %v18653_v18 = vld [vmem:[#allocation35_spill] sm:$0xff]  ;;  %s13064_s16 = sshll.u32 %s14726_s15, 4  ;;  %s13065_s16 = int_to_ptr.vmem [resolvable:$true] %s13064_s16 }
 0xaa8   :  { %14356 = vmatpush3.bf16.msra.mxu1 %v18648_v17  ;;  %14335 = vmatprep.subr.bf16.mxu0 %v18649_v46  ;;  %v18651_v10 = vld [vmem:[#allocation26_spill] sm:$0xff]  ;;  %v18654_v42 = vld [vmem:[#allocation51_spill] sm:$0xff]  ;;  %v18657_v37 = vld [vmem:[#allocation36_spill] sm:$0xff]  ;;  %s14667_s17 = scalar_lea.vmem %s13065_s16, 32  ;;  %p14672_p1 = scmp.lt.s32.totalorder %s13065_s16, %s13065_s16 }
 0xaa9   :  { %14357 = vmatprep.subr.bf16.mxu1 %v18650_v2  ;;  %v18652_v36 = vld [vmem:[#allocation42_spill] sm:$0xff]  ;;  %v18655_v59 = vld [vmem:[#allocation27_spill] sm:$0xff]  ;;  %v18658_v44 = vld [vmem:[#allocation52_spill] sm:$0xff]  ;;  %p14668_p0 = scmp.ne.s32.totalorder %s13065_s16, %s14667_s17  ;;  %p14673_p2 = scmp.lt.s32.totalorder %s14667_s17, %s14667_s17 }
 0xaaa   :  { %v18656_v51 = vld [vmem:[#allocation43_spill] sm:$0xff]  ;;  %v18659_v49 = vld [vmem:[#allocation28_spill] sm:$0xff]  ;;  %v18661_v52 = vld [vmem:[#allocation37_spill] sm:$0xff] }
 0xaab   :  { %14336 = vmatpush3.bf16.msra.mxu0 %v18651_v10  ;;  %v18660_v47 = vld [vmem:[#allocation44_spill] sm:$0xff]  ;;  %v18662_v27 = vld [vmem:[#allocation53_spill] sm:$0xff]  ;;  %v18665_v4 = vld [vmem:[#allocation38_spill] sm:$0xff]  ;;  %p14674_p3 = por %p14673_p2, %p14672_p1 }
 0xaac   :  { %14358 = vmatpush3.bf16.msra.mxu1 %v18652_v36  ;;  %14337 = vmatprep.subr.bf16.mxu0 %v18653_v18  ;;  %v18663_v7 = vld [vmem:[#allocation29_spill] sm:$0xff]  ;;  %v18666_v61 = vld [vmem:[#allocation54_spill] sm:$0xff]  ;;  %v18669_v13 = vld [vmem:[#allocation39_spill] sm:$0xff] }
 0xaad   :  { %14359 = vmatprep.subr.bf16.mxu1 %v18654_v42  ;;  %v18664_v40 = vld [vmem:[#allocation45_spill] sm:$0xff]  ;;  %v18667_v21 = vld [vmem:[#allocation30_spill] sm:$0xff]  ;;  %v18670_v26 = vld [vmem:[#allocation55_spill] sm:$0xff]  ;;  %p14675_p4 = pnand %p14674_p3, %p14668_p0 }
 0xaae   :  { %v18668_v63 = vld [vmem:[#allocation46_spill] sm:$0xff]  ;;  %v18671_v41 = vld [vmem:[#allocation31_spill] sm:$0xff]  ;;  %v18673_v35 = vld [vmem:[#allocation40_spill] sm:$0xff] }
 0xaaf   :  { %14338 = vmatpush3.bf16.msra.mxu0 %v18655_v59  ;;  %v18672_v29 = vld [vmem:[#allocation47_spill] sm:$0xff]  ;;  %v18674_v38 = vld [vmem:[#allocation56_spill] sm:$0xff] }
 0xab0   :  { %14360 = vmatpush3.bf16.msra.mxu1 %v18656_v51  ;;  %14339 = vmatprep.subr.bf16.mxu0 %v18657_v37  ;;  %v18675_v58 = vld [vmem:[#allocation32_spill] sm:$0xff] }
 0xab1   :  { %14361 = vmatprep.subr.bf16.mxu1 %v18658_v44  ;;  %v18676_v54 = vld [vmem:[#allocation48_spill] sm:$0xff] }
 0xab3   :  { %14340 = vmatpush3.bf16.msra.mxu0 %v18659_v49 }
 0xab4   :  { %14362 = vmatpush3.bf16.msra.mxu1 %v18660_v47  ;;  %14341 = vmatprep.subr.bf16.mxu0 %v18661_v52 }
 0xab5   :  { %14363 = vmatprep.subr.bf16.mxu1 %v18662_v27 }
 0xab7   :  { %14342 = vmatpush3.bf16.msra.mxu0 %v18663_v7 }
 0xab8   :  { %14364 = vmatpush3.bf16.msra.mxu1 %v18664_v40  ;;  %14343 = vmatprep.subr.bf16.mxu0 %v18665_v4 }
 0xab9   :  { %14365 = vmatprep.subr.bf16.mxu1 %v18666_v61 }
 0xabb   :  { %14344 = vmatpush3.bf16.msra.mxu0 %v18667_v21 }
 0xabc   :  { %14366 = vmatpush3.bf16.msra.mxu1 %v18668_v63  ;;  %14345 = vmatprep.subr.bf16.mxu0 %v18669_v13 }
 0xabd   :  { %14367 = vmatprep.subr.bf16.mxu1 %v18670_v26 }
 0xabf   :  { %14346 = vmatpush3.bf16.msra.mxu0 %v18671_v41 }
 0xac0   :  { %14368 = vmatpush3.bf16.msra.mxu1 %v18672_v29  ;;  %14347 = vmatprep.subr.bf16.mxu0 %v18673_v35 }
 0xac1   :  { %14369 = vmatprep.subr.bf16.mxu1 %v18674_v38 }
 0xac3   :  { %14348 = vmatpush3.bf16.msra.mxu0 %v18675_v58 }
 0xac4   :  { %14370 = vmatpush3.bf16.msra.mxu1 %v18676_v54 }
 0xac6   :  { %13010 = vmatmul.mubr.bf16.vlgmr.msra.gmra.mrb[96].mxu0 %v12940_v62 }
 0xac7   :  { %13050 = vmatmul.mubr.bf16.vlgmr.msra.gmra.mrb[72].mxu1 %v12942_v14 }
 0xac8   :  { %14678 = shalt.err (!%p14675_p4)
}
 0xac9   :  { %s14679_s0 = scalar_lea.hbm %s18575_s8, 32 }
 0xaca   :  { %p14680_p5 = scmp.ne.s32.totalorder %s18575_s8, %s14679_s0  ;;  %p14683_p6 = scmp.lt.u32.totalorder %s14679_s0, %s18575_s8 }
 0xacc   :  { %p14685_p7 = pnand %p14683_p6, %p14680_p5 }
 0xace   :  { %14688 = shalt.err (!%p14685_p7)
}
 0xacf   :  { %13067 = dma.vmem_to_hbm [thread:$0]  %s13065_s16, 32, %s18575_s8, [#allocation12]   ;;  %v12976_v16 = vld [vmem:[%s18574_s7 + $0x2b] ss:$0 sm:$0xff] }
 0xad0   :  { %s14727_s25 = smov [#allocation13]  }
 0xad1   :  { %s13074_s1 = sshll.u32 %s14727_s25, 4  ;;  %s13075_s1 = int_to_ptr.vmem [resolvable:$true] %s13074_s1 }
 0xad2   :  { %s14689_s8 = scalar_lea.vmem %s13075_s1, 32  ;;  %p14694_p9 = scmp.lt.s32.totalorder %s13075_s1, %s13075_s1 }
 0xad3   :  { %p14690_p8 = scmp.ne.s32.totalorder %s13075_s1, %s14689_s8  ;;  %p14695_p10 = scmp.lt.s32.totalorder %s14689_s8, %s14689_s8 }
 0xad5   :  { %p14696_p11 = por %p14695_p10, %p14694_p9 }
 0xad7   :  { %p14697_p12 = pnand %p14696_p11, %p14690_p8 }
 0xb99   :  { %v14349_v53 = vpop.f32.mrb[96].mxu0 }
 0xb9a   :  { %v14371_v8 = vpop.f32.mrb[72].mxu1  ;;  %v14350_v31 = vpop.f32.mrb[97].mxu0 }
 0xb9b   :  { %v14372_v57 = vpop.f32.mrb[73].mxu1  ;;  %v14351_v0 = vadd.f32 %v14350_v31, %v14349_v53  ;;  %v14352_v23 = vpop.f32.mrb[98].mxu0 }
 0xb9c   :  { %v14373_v45 = vadd.f32 %v14372_v57, %v14371_v8  ;;  %v14374_v34 = vpop.f32.mrb[74].mxu1  ;;  %v14353_v12 = vpop.f32.mrb[99].mxu0 }
 0xb9d   :  { %v14375_v32 = vpop.f32.mrb[75].mxu1  ;;  %v13012_v48 = vadd.f32 %v14351_v0, %v12976_v16 }
 0xb9f   :  { %v13052_v9 = vadd.f32 %v14373_v45, %v13012_v48 }
 0xba1   :  { %13057 = vst.msk [vmem:[#allocation13] sm:$0x3] %vm12876_vm13, %v13052_v9 }
 0xba2   :  { %14700 = shalt.err (!%p14697_p12)
}
 0xba3   :  { %s14701_s27 = scalar_lea.hbm %s18576_s9, 32 }
 0xba4   :  { %p14702_p13 = scmp.ne.s32.totalorder %s18576_s9, %s14701_s27  ;;  %p14705_p0 = scmp.lt.u32.totalorder %s14701_s27, %s18576_s9 }
 0xba6   :  { %p14707_p1 = pnand %p14705_p0, %p14702_p13 }
 0xba8   :  { %14710 = shalt.err (!%p14707_p1)
}
 0xba9   :  { %13077 = dma.vmem_to_hbm [thread:$0]  %s13075_s1, 32, %s18576_s9, [#allocation14]  }
 0xbaa   :  { %14719 = dma.done.wait [#allocation12], 32  }
 0xbab   :  { %14720 = vsyncadd [#allocation12], 4294967264 }
 0xbac   :  { %14721 = dma.done.wait [#allocation14], 32  }
 0xbad   :  { %14722 = vsyncadd [#allocation14], 4294967264 }
 0xbae   :  { %13084 = vsyncpa [#allocation12], 1 }
 0xbaf   :  { %13085 = vsyncpa [#allocation14], 1 }
 0xbb0   :  { %13086 = vsyncmov [#allocation6] }
 0xbb3   :  { %s13087_s11 = vpop.sfrf %13086 }
 0xbb4   :  { %p13956_p2 = scmp.ne.s32.totalorder %s13087_s11, 0 }
 0xbb6   :  { %13091 = shalt.err (%p13956_p2)  }
 0xbb7   :  { %13093 = vsyncmov [#allocation6 + $0x1] }
 0xbba   :  { %s13094_s12 = vpop.sfrf %13093 }
 0xbbb   :  { %p13957_p3 = scmp.ne.s32.totalorder %s13094_s12, 0 }
 0xbbd   :  { %13098 = shalt.err (%p13957_p3)  }
 0xbbe   :  { %13100 = vsyncmov [#allocation6 + $0x2] }
 0xbc1   :  { %s13101_s13 = vpop.sfrf %13100 }
 0xbc2   :  { %p13958_p4 = scmp.ne.s32.totalorder %s13101_s13, 0 }
 0xbc4   :  { %13105 = shalt.err (%p13958_p4)  }
 0xbc5   :  { %13107 = vsyncmov [#allocation6 + $0x3] }
 0xbc8   :  { %s13108_s9 = vpop.sfrf %13107 }
 0xbc9   :  { %p13959_p5 = scmp.ne.s32.totalorder %s13108_s9, 0 }
 0xbcb   :  { %13112 = shalt.err (%p13959_p5)  }

</bundles_post_ra>
